<compile_context>
chip_gen: v6e
topology: v6e:2x2x1
jax: 0.10.0
libtpu: 0.0.40
codegen_flags: <defaults>
</compile_context>

<pallas_src>
import functools

import jax
import jax.numpy as jnp
from jax.experimental import pallas as pl
from jax.experimental.pallas import tpu as pltpu

BN_EPS = 1e-5
TM_DEFAULT = 1024                 # rows (N*H*W) per tile


def round_up(x, m):
    return (x + m - 1) // m * m


def pad_to(a, shape):
    pads = [(0, s - d) for d, s in zip(a.shape, shape)]
    return jnp.pad(a, pads)


# ----------------------------------------------------------------------------
# Pass A: per-tile partial BN statistics of the two projections.
#   yg = g @ Wg, yx = x @ Wx   (bf16 MXU operands, f32 accumulation)
#   stats tile rows: [sum_g, sumsq_g, sum_x, sumsq_x, 0, 0, 0, 0]
# Padded rows of g/x are zero and there is no conv bias, so they contribute
# exactly zero to every sum -> no masking needed.
# ----------------------------------------------------------------------------
def _proj_stats_kernel(g_ref, x_ref, wg_ref, wx_ref, stats_ref):
    yg = jnp.dot(g_ref[...], wg_ref[...], preferred_element_type=jnp.float32)
    yx = jnp.dot(x_ref[...], wx_ref[...], preferred_element_type=jnp.float32)
    stats_ref[0:1, :] = jnp.sum(yg, axis=0, keepdims=True)
    stats_ref[1:2, :] = jnp.sum(yg * yg, axis=0, keepdims=True)
    stats_ref[2:3, :] = jnp.sum(yx, axis=0, keepdims=True)
    stats_ref[3:4, :] = jnp.sum(yx * yx, axis=0, keepdims=True)
    stats_ref[4:8, :] = jnp.zeros((4, yg.shape[1]), jnp.float32)


# ----------------------------------------------------------------------------
# Pass B: recompute the projections, apply the folded BN affine, relu, and the
# 1-output-channel psi projection as a lane reduction (not a 127/128-wasted
# MXU matmul).  coef rows: [scale_g, shift_g, scale_x, shift_x, w_psi, 0,0,0].
# ----------------------------------------------------------------------------
def _psi_kernel(g_ref, x_ref, wg_ref, wx_ref, coef_ref, p_ref):
    yg = jnp.dot(g_ref[...], wg_ref[...], preferred_element_type=jnp.float32)
    yx = jnp.dot(x_ref[...], wx_ref[...], preferred_element_type=jnp.float32)
    s = yg * coef_ref[0:1, :] + coef_ref[1:2, :]
    s = s + yx * coef_ref[2:3, :] + coef_ref[3:4, :]
    s = jnp.maximum(s, 0.0)
    p_ref[...] = jnp.sum(s * coef_ref[4:5, :], axis=-1, keepdims=True)


# ----------------------------------------------------------------------------
# Pass C (pure streaming): out = x * sigmoid(a * p + b), (a, b) from SMEM.
# ----------------------------------------------------------------------------
def _gate_kernel(x_ref, p_ref, ab_ref, o_ref):
    a = ab_ref[0]
    b = ab_ref[1]
    psi = jax.nn.sigmoid(p_ref[...] * a + b)          # (tm, 1)
    o_ref[...] = x_ref[...] * psi                     # lane-broadcast multiply


def _vmem_limit(tile_bytes):
    # double-buffered tiles + headroom, capped so it also fits v7x (64 MiB phys)
    return int(min(max(2 * tile_bytes + (4 << 20), 16 << 20), 48 << 20))


# ----------------------------------------------------------------------------
# wrapper
# ----------------------------------------------------------------------------
def attention_gate_nhwc(x, g, params, *, tm=TM_DEFAULT, eps=BN_EPS):
    """x: [N,H,W,F_l], g: [N,H,W,F_g] (same N,H,W).  Returns x * psi(x, g)."""
    n, h, w, f_l = x.shape
    ng, hg, wg_sz, f_g = g.shape
    assert (n, h, w) == (ng, hg, wg_sz)
    f_int = params["wg"].shape[1]

    m = n * h * w
    tm = min(round_up(tm, 256), round_up(m, 256))
    mp = round_up(m, tm)
    nm = mp // tm

    fgp = round_up(f_g, 128)
    flp = round_up(f_l, 128)
    fip = round_up(f_int, 128)

    # bf16 matmul operands (cast *before* padding: no padded f32 copies), plus
    # an unpadded-lane f32 view of x for the final gating pass.
    g2_bf = pad_to(g.reshape(m, f_g).astype(jnp.bfloat16), (mp, fgp))
    x2_bf = pad_to(x.reshape(m, f_l).astype(jnp.bfloat16), (mp, flp))
    x_rows = pad_to(x.reshape(m, f_l).astype(jnp.float32), (mp, f_l))

    wg_mat = pad_to(params["wg"].astype(jnp.float32),
                    (fgp, fip)).astype(jnp.bfloat16)
    wx_mat = pad_to(params["wx"].astype(jnp.float32),
                    (flp, fip)).astype(jnp.bfloat16)

    def pad_vec(v):
        return pad_to(v.astype(jnp.float32).reshape(-1), (fip,))

    gg = pad_vec(params["gg"])
    tg = pad_vec(params["tg"])
    gx = pad_vec(params["gx"])
    tx = pad_vec(params["tx"])
    wpsi = pad_vec(params["wpsi"].reshape(-1))

    bytes_ab = ((tm * fgp + tm * flp + fgp * fip + flp * fip) * 2
                + 8 * fip * 4 + tm * 4)
    bytes_c = tm * f_l * 4 * 2 + tm * 4

    # ---- pass A: per-tile partial sums of the projections (parallel over M) --
    stats = pl.pallas_call(
        _proj_stats_kernel,
        out_shape=jax.ShapeDtypeStruct((nm * 8, fip), jnp.float32),
        grid_spec=pltpu.PrefetchScalarGridSpec(
            num_scalar_prefetch=0,
            grid=(nm,),
            in_specs=[
                pl.BlockSpec((tm, fgp), lambda i: (i, 0)),      # g  (bf16)
                pl.BlockSpec((tm, flp), lambda i: (i, 0)),      # x  (bf16)
                pl.BlockSpec((fgp, fip), lambda i: (0, 0)),     # Wg (bf16)
                pl.BlockSpec((flp, fip), lambda i: (0, 0)),     # Wx (bf16)
            ],
            out_specs=pl.BlockSpec((8, fip), lambda i: (i, 0)),
        ),
        compiler_params=pltpu.CompilerParams(
            dimension_semantics=("parallel",),
            vmem_limit_bytes=_vmem_limit(bytes_ab)),
    )(g2_bf, x2_bf, wg_mat, wx_mat)

    # ---- tiny JAX epilogue: fold BN stats + gamma/beta into scale / shift ----
    st = stats.reshape(nm, 8, fip).sum(axis=0)
    inv_m = 1.0 / float(m)
    mean_g = st[0] * inv_m
    var_g = jnp.maximum(st[1] * inv_m - mean_g * mean_g, 0.0)
    mean_x = st[2] * inv_m
    var_x = jnp.maximum(st[3] * inv_m - mean_x * mean_x, 0.0)
    scale_g = jax.lax.rsqrt(var_g + eps) * gg
    shift_g = tg - mean_g * scale_g
    scale_x = jax.lax.rsqrt(var_x + eps) * gx
    shift_x = tx - mean_x * scale_x
    zero = jnp.zeros_like(wpsi)
    coef = jnp.stack([scale_g, shift_g, scale_x, shift_x, wpsi,
                      zero, zero, zero], axis=0)                 # (8, fip)

    # ---- pass B: recompute projections + folded BN + relu + psi pre-act ------
    p = pl.pallas_call(
        _psi_kernel,
        out_shape=jax.ShapeDtypeStruct((mp, 1), jnp.float32),
        grid_spec=pltpu.PrefetchScalarGridSpec(
            num_scalar_prefetch=0,
            grid=(nm,),
            in_specs=[
                pl.BlockSpec((tm, fgp), lambda i: (i, 0)),      # g  (bf16)
                pl.BlockSpec((tm, flp), lambda i: (i, 0)),      # x  (bf16)
                pl.BlockSpec((fgp, fip), lambda i: (0, 0)),     # Wg (bf16)
                pl.BlockSpec((flp, fip), lambda i: (0, 0)),     # Wx (bf16)
                pl.BlockSpec((8, fip), lambda i: (0, 0)),       # coef (f32)
            ],
            out_specs=pl.BlockSpec((tm, 1), lambda i: (i, 0)),
        ),
        compiler_params=pltpu.CompilerParams(
            dimension_semantics=("parallel",),
            vmem_limit_bytes=_vmem_limit(bytes_ab)),
    )(g2_bf, x2_bf, wg_mat, wx_mat, coef)

    # ---- tiny JAX epilogue: psi-BN affine (two-pass mean/var, valid rows only)
    pv = p[:m, 0]
    mean_p = jnp.mean(pv)
    var_p = jnp.mean(jnp.square(pv - mean_p))
    a = jax.lax.rsqrt(var_p + eps) * params["gp"].astype(jnp.float32)[0]
    b = params["tp"].astype(jnp.float32)[0] - mean_p * a
    ab = jnp.stack([a, b])                                       # (2,) f32

    # ---- pass C: gate (pure streaming, parallel over M) ----------------------
    out = pl.pallas_call(
        _gate_kernel,
        out_shape=jax.ShapeDtypeStruct((mp, f_l), jnp.float32),
        grid_spec=pltpu.PrefetchScalarGridSpec(
            num_scalar_prefetch=0,
            grid=(nm,),
            in_specs=[
                pl.BlockSpec((tm, f_l), lambda i: (i, 0)),      # x (f32)
                pl.BlockSpec((tm, 1), lambda i: (i, 0)),        # p
                pl.BlockSpec(memory_space=pltpu.MemorySpace.SMEM),  # [a, b]
            ],
            out_specs=pl.BlockSpec((tm, f_l), lambda i: (i, 0)),
        ),
        compiler_params=pltpu.CompilerParams(
            dimension_semantics=("parallel",),
            vmem_limit_bytes=_vmem_limit(bytes_c)),
    )(x_rows, p, ab)

    return out[:m].reshape(n, h, w, f_l)


def attention_gate_forward(x_nchw, g_nchw, params, *, tm=TM_DEFAULT):
    """PyTorch-layout entry point: x [N,F_l,H,W], g [N,F_g,H,W] -> [N,F_l,H,W]."""
    x = jnp.transpose(x_nchw, (0, 2, 3, 1)).astype(jnp.float32)
    g = jnp.transpose(g_nchw, (0, 2, 3, 1)).astype(jnp.float32)
    y = attention_gate_nhwc(x, g, params, tm=tm)
    return jnp.transpose(y, (0, 3, 1, 2))


# ----------------------------------------------------------------------------
# pure-JAX reference (train-mode BatchNorm, biases included), used for a
# self-check; it also validates that dropping the conv biases in the kernel
# (exactly cancelled by train-mode BN) is correct.
# ----------------------------------------------------------------------------
def attention_gate_reference(x, g, p, eps=BN_EPS):
    def conv1x1(t, w, b):
        return jnp.einsum("nchw,cd->ndhw", t, w) + b[None, :, None, None]

    def bn(t, gamma, beta):
        mean = jnp.mean(t, axis=(0, 2, 3), keepdims=True)
        var = jnp.mean(jnp.square(t - mean), axis=(0, 2, 3), keepdims=True)
        return ((t - mean) * jax.lax.rsqrt(var + eps)
                * gamma[None, :, None, None] + beta[None, :, None, None])

    g1 = bn(conv1x1(g, p["wg"], p["bg"]), p["gg"], p["tg"])
    x1 = bn(conv1x1(x, p["wx"], p["bx"]), p["gx"], p["tx"])
    s = jnp.maximum(g1 + x1, 0.0)
    psi = jax.nn.sigmoid(bn(conv1x1(s, p["wpsi"], p["bp"]), p["gp"], p["tp"]))
    return x * psi


# ----------------------------------------------------------------------------
# deterministic synthetic parameters
#   wg/wx: [F_g|F_l, F_int]  (PyTorch conv weight [F_int, F_in, 1, 1] transposed)
#   wpsi:  [F_int, 1]
#   bg/bx/bp: conv biases; gg/gx/gp: BN gamma; tg/tx/tp: BN beta
# ----------------------------------------------------------------------------
def build_attention_gate_params(key, f_g, f_l, f_int):
    ks = jax.random.split(key, 12)

    def nrm(k, shape, scale):
        return scale * jax.random.normal(k, shape, dtype=jnp.float32)

    return dict(
        wg=nrm(ks[0], (f_g, f_int), (1.0 / f_g) ** 0.5),
        bg=nrm(ks[1], (f_int,), 0.05),
        gg=1.0 + nrm(ks[2], (f_int,), 0.05),
        tg=nrm(ks[3], (f_int,), 0.05),
        wx=nrm(ks[4], (f_l, f_int), (1.0 / f_l) ** 0.5),
        bx=nrm(ks[5], (f_int,), 0.05),
        gx=1.0 + nrm(ks[6], (f_int,), 0.05),
        tx=nrm(ks[7], (f_int,), 0.05),
        wpsi=nrm(ks[8], (f_int, 1), (1.0 / f_int) ** 0.5),
        bp=nrm(ks[9], (1,), 0.05),
        gp=1.0 + nrm(ks[10], (1,), 0.05),
        tp=nrm(ks[11], (1,), 0.05),
    )


if __name__ == "__main__":
    key = jax.random.PRNGKey(0)
    kp, kx, kg = jax.random.split(key, 3)
    N, H, W = 2, 20, 20              # M = 800: exercises padded rows
    F_g, F_l, F_int = 32, 32, 16

    params = build_attention_gate_params(kp, F_g, F_l, F_int)
    x = jax.random.normal(kx, (N, F_l, H, W), dtype=jnp.float32)
    g = jax.random.normal(kg, (N, F_g, H, W), dtype=jnp.float32)

    ref = attention_gate_reference(x, g, params)

    # single-tile config (tm clamps to 1024) and multi-tile config (4 row tiles)
    for tile_m in (TM_DEFAULT, 256):
        fwd = jax.jit(functools.partial(attention_gate_forward, tm=tile_m))
        out = jax.block_until_ready(fwd(x, g, params))
        assert out.shape == (N, F_l, H, W), out.shape
        assert out.dtype == jnp.float32
        assert bool(jnp.all(jnp.isfinite(out)))
        # loose tolerance: projections use bf16 MXU operands (f32 accumulation)
        max_err = float(jnp.max(jnp.abs(out - ref)))
        assert max_err < 0.1, (tile_m, max_err)

    print("KERNEL_OK")
</pallas_src>

<mosaic_0001>
module attributes {stable_mosaic.version = 11 : i64} {
  func.func @_proj_stats_kernel(%arg0: i32, %arg1: memref<1024x128xbf16, #tpu.memory_space<vmem>>, %arg2: memref<1024x128xbf16, #tpu.memory_space<vmem>>, %arg3: memref<128x128xbf16, #tpu.memory_space<vmem>>, %arg4: memref<128x128xbf16, #tpu.memory_space<vmem>>, %arg5: memref<8x128xf32, #tpu.memory_space<vmem>>) attributes {dimension_semantics = [#tpu.dimension_semantics<parallel>], iteration_bounds = array<i64: 1>, scalar_prefetch = 0 : i64, scratch_operands = 0 : i64, tpu.core_type = #tpu.core_type<tc>, window_params = [{transform_indices = @transform_0, window_bounds = array<i64: 1024, 128>}, {transform_indices = @transform_1, window_bounds = array<i64: 1024, 128>}, {pipeline_mode = #tpu.pipeline_mode<synchronous>, transform_indices = @transform_2, window_bounds = array<i64: 128, 128>}, {pipeline_mode = #tpu.pipeline_mode<synchronous>, transform_indices = @transform_3, window_bounds = array<i64: 128, 128>}, {transform_indices = @transform_4, window_bounds = array<i64: 8, 128>}]} {
    %c0 = arith.constant 0 : index
    %c0_0 = arith.constant 0 : index
    %0 = vector.load %arg1[%c0, %c0_0] : memref<1024x128xbf16, #tpu.memory_space<vmem>>, vector<1024x128xbf16>
    %c0_1 = arith.constant 0 : index
    %c0_2 = arith.constant 0 : index
    %1 = vector.load %arg3[%c0_1, %c0_2] : memref<128x128xbf16, #tpu.memory_space<vmem>>, vector<128x128xbf16>
    %cst = arith.constant dense<0.000000e+00> : vector<1024x128xf32>
    %2 = tpu.matmul %0, %1, %cst {dimension_numbers = #tpu.dot_dimension_numbers<[1], [0], [0], [1], [0, 0, 1, 1], [], []>} : vector<1024x128xbf16>, vector<128x128xbf16>, vector<1024x128xf32> -> vector<1024x128xf32>
    %c0_3 = arith.constant 0 : index
    %c0_4 = arith.constant 0 : index
    %3 = vector.load %arg2[%c0_3, %c0_4] : memref<1024x128xbf16, #tpu.memory_space<vmem>>, vector<1024x128xbf16>
    %c0_5 = arith.constant 0 : index
    %c0_6 = arith.constant 0 : index
    %4 = vector.load %arg4[%c0_5, %c0_6] : memref<128x128xbf16, #tpu.memory_space<vmem>>, vector<128x128xbf16>
    %cst_7 = arith.constant dense<0.000000e+00> : vector<1024x128xf32>
    %5 = tpu.matmul %3, %4, %cst_7 {dimension_numbers = #tpu.dot_dimension_numbers<[1], [0], [0], [1], [0, 0, 1, 1], [], []>} : vector<1024x128xbf16>, vector<128x128xbf16>, vector<1024x128xf32> -> vector<1024x128xf32>
    %cst_8 = arith.constant dense<0.000000e+00> : vector<128xf32>
    %6 = vector.multi_reduction <add>, %2, %cst_8 [0] : vector<1024x128xf32> to vector<128xf32>
    %7 = vector.shape_cast %6 : vector<128xf32> to vector<1x128xf32>
    %c0_9 = arith.constant 0 : index
    %c0_10 = arith.constant 0 : index
    %8 = vector.load %arg5[%c0_9, %c0_10] : memref<8x128xf32, #tpu.memory_space<vmem>>, vector<1x128xf32>
    tpu.vector_store %arg5[%c0_9, %c0_10], %7 {strides = array<i32>} : memref<8x128xf32, #tpu.memory_space<vmem>>, vector<1x128xf32>,
    %9 = arith.mulf %2, %2 : vector<1024x128xf32>
    %cst_11 = arith.constant dense<0.000000e+00> : vector<128xf32>
    %10 = vector.multi_reduction <add>, %9, %cst_11 [0] : vector<1024x128xf32> to vector<128xf32>
    %11 = vector.shape_cast %10 : vector<128xf32> to vector<1x128xf32>
    %c1 = arith.constant 1 : index
    %c0_12 = arith.constant 0 : index
    %12 = vector.load %arg5[%c1, %c0_12] : memref<8x128xf32, #tpu.memory_space<vmem>>, vector<1x128xf32>
    tpu.vector_store %arg5[%c1, %c0_12], %11 {strides = array<i32>} : memref<8x128xf32, #tpu.memory_space<vmem>>, vector<1x128xf32>,
    %cst_13 = arith.constant dense<0.000000e+00> : vector<128xf32>
    %13 = vector.multi_reduction <add>, %5, %cst_13 [0] : vector<1024x128xf32> to vector<128xf32>
    %14 = vector.shape_cast %13 : vector<128xf32> to vector<1x128xf32>
    %c2 = arith.constant 2 : index
    %c0_14 = arith.constant 0 : index
    %15 = vector.load %arg5[%c2, %c0_14] : memref<8x128xf32, #tpu.memory_space<vmem>>, vector<1x128xf32>
    tpu.vector_store %arg5[%c2, %c0_14], %14 {strides = array<i32>} : memref<8x128xf32, #tpu.memory_space<vmem>>, vector<1x128xf32>,
    %16 = arith.mulf %5, %5 : vector<1024x128xf32>
    %cst_15 = arith.constant dense<0.000000e+00> : vector<128xf32>
    %17 = vector.multi_reduction <add>, %16, %cst_15 [0] : vector<1024x128xf32> to vector<128xf32>
    %18 = vector.shape_cast %17 : vector<128xf32> to vector<1x128xf32>
    %c3 = arith.constant 3 : index
    %c0_16 = arith.constant 0 : index
    %19 = vector.load %arg5[%c3, %c0_16] : memref<8x128xf32, #tpu.memory_space<vmem>>, vector<1x128xf32>
    tpu.vector_store %arg5[%c3, %c0_16], %18 {strides = array<i32>} : memref<8x128xf32, #tpu.memory_space<vmem>>, vector<1x128xf32>,
    %cst_17 = arith.constant 0.000000e+00 : f32
    %20 = vector.broadcast %cst_17 : f32 to vector<4x128xf32>
    %c4 = arith.constant 4 : index
    %c0_18 = arith.constant 0 : index
    %21 = vector.load %arg5[%c4, %c0_18] : memref<8x128xf32, #tpu.memory_space<vmem>>, vector<4x128xf32>
    tpu.vector_store %arg5[%c4, %c0_18], %20 {strides = array<i32>} : memref<8x128xf32, #tpu.memory_space<vmem>>, vector<4x128xf32>,
    return
  }
  func.func @transform_0(%arg0: i32) -> (i32, i32) {
    %c0_i32 = arith.constant 0 : i32
    %c0_i32_0 = arith.constant 0 : i32
    return %arg0, %c0_i32 : i32, i32
  }
  func.func @transform_1(%arg0: i32) -> (i32, i32) {
    %c0_i32 = arith.constant 0 : i32
    %c0_i32_0 = arith.constant 0 : i32
    return %arg0, %c0_i32 : i32, i32
  }
  func.func @transform_2(%arg0: i32) -> (i32, i32) {
    %c0_i32 = arith.constant 0 : i32
    %c0_i32_0 = arith.constant 0 : i32
    %c0_i32_1 = arith.constant 0 : i32
    return %c0_i32, %c0_i32_0 : i32, i32
  }
  func.func @transform_3(%arg0: i32) -> (i32, i32) {
    %c0_i32 = arith.constant 0 : i32
    %c0_i32_0 = arith.constant 0 : i32
    %c0_i32_1 = arith.constant 0 : i32
    return %c0_i32, %c0_i32_0 : i32, i32
  }
  func.func @transform_4(%arg0: i32) -> (i32, i32) {
    %c0_i32 = arith.constant 0 : i32
    %c0_i32_0 = arith.constant 0 : i32
    return %arg0, %c0_i32 : i32, i32
  }
}

module attributes {stable_mosaic.version = 11 : i64} {
  func.func @_psi_kernel(%arg0: i32, %arg1: memref<1024x128xbf16, #tpu.memory_space<vmem>>, %arg2: memref<1024x128xbf16, #tpu.memory_space<vmem>>, %arg3: memref<128x128xbf16, #tpu.memory_space<vmem>>, %arg4: memref<128x128xbf16, #tpu.memory_space<vmem>>, %arg5: memref<8x128xf32, #tpu.memory_space<vmem>>, %arg6: memref<1024x1xf32, #tpu.memory_space<vmem>>) attributes {dimension_semantics = [#tpu.dimension_semantics<parallel>], iteration_bounds = array<i64: 1>, scalar_prefetch = 0 : i64, scratch_operands = 0 : i64, tpu.core_type = #tpu.core_type<tc>, window_params = [{transform_indices = @transform_0, window_bounds = array<i64: 1024, 128>}, {transform_indices = @transform_1, window_bounds = array<i64: 1024, 128>}, {pipeline_mode = #tpu.pipeline_mode<synchronous>, transform_indices = @transform_2, window_bounds = array<i64: 128, 128>}, {pipeline_mode = #tpu.pipeline_mode<synchronous>, transform_indices = @transform_3, window_bounds = array<i64: 128, 128>}, {pipeline_mode = #tpu.pipeline_mode<synchronous>, transform_indices = @transform_4, window_bounds = array<i64: 8, 128>}, {transform_indices = @transform_5, window_bounds = array<i64: 1024, 1>}]} {
    %c0 = arith.constant 0 : index
    %c0_0 = arith.constant 0 : index
    %0 = vector.load %arg1[%c0, %c0_0] : memref<1024x128xbf16, #tpu.memory_space<vmem>>, vector<1024x128xbf16>
    %c0_1 = arith.constant 0 : index
    %c0_2 = arith.constant 0 : index
    %1 = vector.load %arg3[%c0_1, %c0_2] : memref<128x128xbf16, #tpu.memory_space<vmem>>, vector<128x128xbf16>
    %cst = arith.constant dense<0.000000e+00> : vector<1024x128xf32>
    %2 = tpu.matmul %0, %1, %cst {dimension_numbers = #tpu.dot_dimension_numbers<[1], [0], [0], [1], [0, 0, 1, 1], [], []>} : vector<1024x128xbf16>, vector<128x128xbf16>, vector<1024x128xf32> -> vector<1024x128xf32>
    %c0_3 = arith.constant 0 : index
    %c0_4 = arith.constant 0 : index
    %3 = vector.load %arg2[%c0_3, %c0_4] : memref<1024x128xbf16, #tpu.memory_space<vmem>>, vector<1024x128xbf16>
    %c0_5 = arith.constant 0 : index
    %c0_6 = arith.constant 0 : index
    %4 = vector.load %arg4[%c0_5, %c0_6] : memref<128x128xbf16, #tpu.memory_space<vmem>>, vector<128x128xbf16>
    %cst_7 = arith.constant dense<0.000000e+00> : vector<1024x128xf32>
    %5 = tpu.matmul %3, %4, %cst_7 {dimension_numbers = #tpu.dot_dimension_numbers<[1], [0], [0], [1], [0, 0, 1, 1], [], []>} : vector<1024x128xbf16>, vector<128x128xbf16>, vector<1024x128xf32> -> vector<1024x128xf32>
    %c0_8 = arith.constant 0 : index
    %c0_9 = arith.constant 0 : index
    %6 = vector.load %arg5[%c0_8, %c0_9] : memref<8x128xf32, #tpu.memory_space<vmem>>, vector<1x128xf32>
    %7 = vector.broadcast %6 : vector<1x128xf32> to vector<1024x128xf32>
    %8 = arith.mulf %2, %7 : vector<1024x128xf32>
    %c1 = arith.constant 1 : index
    %c0_10 = arith.constant 0 : index
    %9 = vector.load %arg5[%c1, %c0_10] : memref<8x128xf32, #tpu.memory_space<vmem>>, vector<1x128xf32>
    %10 = vector.broadcast %9 : vector<1x128xf32> to vector<1024x128xf32>
    %11 = arith.addf %8, %10 : vector<1024x128xf32>
    %c2 = arith.constant 2 : index
    %c0_11 = arith.constant 0 : index
    %12 = vector.load %arg5[%c2, %c0_11] : memref<8x128xf32, #tpu.memory_space<vmem>>, vector<1x128xf32>
    %13 = vector.broadcast %12 : vector<1x128xf32> to vector<1024x128xf32>
    %14 = arith.mulf %5, %13 : vector<1024x128xf32>
    %15 = arith.addf %11, %14 : vector<1024x128xf32>
    %c3 = arith.constant 3 : index
    %c0_12 = arith.constant 0 : index
    %16 = vector.load %arg5[%c3, %c0_12] : memref<8x128xf32, #tpu.memory_space<vmem>>, vector<1x128xf32>
    %17 = vector.broadcast %16 : vector<1x128xf32> to vector<1024x128xf32>
    %18 = arith.addf %15, %17 : vector<1024x128xf32>
    %cst_13 = arith.constant 0.000000e+00 : f32
    %19 = vector.broadcast %cst_13 : f32 to vector<1024x128xf32>
    %20 = arith.maximumf %18, %19 : vector<1024x128xf32>
    %c4 = arith.constant 4 : index
    %c0_14 = arith.constant 0 : index
    %21 = vector.load %arg5[%c4, %c0_14] : memref<8x128xf32, #tpu.memory_space<vmem>>, vector<1x128xf32>
    %22 = vector.broadcast %21 : vector<1x128xf32> to vector<1024x128xf32>
    %23 = arith.mulf %20, %22 : vector<1024x128xf32>
    %cst_15 = arith.constant dense<0.000000e+00> : vector<1024xf32>
    %24 = vector.multi_reduction <add>, %23, %cst_15 [1] : vector<1024x128xf32> to vector<1024xf32>
    %25 = vector.shape_cast %24 : vector<1024xf32> to vector<1024x1xf32>
    %c0_16 = arith.constant 0 : index
    %c0_17 = arith.constant 0 : index
    %26 = vector.load %arg6[%c0_16, %c0_17] : memref<1024x1xf32, #tpu.memory_space<vmem>>, vector<1024x1xf32>
    tpu.vector_store %arg6[%c0_16, %c0_17], %25 {strides = array<i32>} : memref<1024x1xf32, #tpu.memory_space<vmem>>, vector<1024x1xf32>,
    return
  }
  func.func @transform_0(%arg0: i32) -> (i32, i32) {
    %c0_i32 = arith.constant 0 : i32
    %c0_i32_0 = arith.constant 0 : i32
    return %arg0, %c0_i32 : i32, i32
  }
  func.func @transform_1(%arg0: i32) -> (i32, i32) {
    %c0_i32 = arith.constant 0 : i32
    %c0_i32_0 = arith.constant 0 : i32
    return %arg0, %c0_i32 : i32, i32
  }
  func.func @transform_2(%arg0: i32) -> (i32, i32) {
    %c0_i32 = arith.constant 0 : i32
    %c0_i32_0 = arith.constant 0 : i32
    %c0_i32_1 = arith.constant 0 : i32
    return %c0_i32, %c0_i32_0 : i32, i32
  }
  func.func @transform_3(%arg0: i32) -> (i32, i32) {
    %c0_i32 = arith.constant 0 : i32
    %c0_i32_0 = arith.constant 0 : i32
    %c0_i32_1 = arith.constant 0 : i32
    return %c0_i32, %c0_i32_0 : i32, i32
  }
  func.func @transform_4(%arg0: i32) -> (i32, i32) {
    %c0_i32 = arith.constant 0 : i32
    %c0_i32_0 = arith.constant 0 : i32
    %c0_i32_1 = arith.constant 0 : i32
    return %c0_i32, %c0_i32_0 : i32, i32
  }
  func.func @transform_5(%arg0: i32) -> (i32, i32) {
    %c0_i32 = arith.constant 0 : i32
    %c0_i32_0 = arith.constant 0 : i32
    return %arg0, %c0_i32 : i32, i32
  }
}

module attributes {stable_mosaic.version = 11 : i64} {
  func.func @_gate_kernel(%arg0: i32, %arg1: memref<1024x32xf32, #tpu.memory_space<vmem>>, %arg2: memref<1024x1xf32, #tpu.memory_space<vmem>>, %arg3: memref<2xf32, #tpu.memory_space<smem>>, %arg4: memref<1024x32xf32, #tpu.memory_space<vmem>>) attributes {dimension_semantics = [#tpu.dimension_semantics<parallel>], iteration_bounds = array<i64: 1>, scalar_prefetch = 0 : i64, scratch_operands = 0 : i64, tpu.core_type = #tpu.core_type<tc>, window_params = [{transform_indices = @transform_0, window_bounds = array<i64: 1024, 32>}, {transform_indices = @transform_1, window_bounds = array<i64: 1024, 1>}, {transform_indices = @transform_2, window_bounds = array<i64: 2>}, {transform_indices = @transform_3, window_bounds = array<i64: 1024, 32>}]} {
    %c0 = arith.constant 0 : index
    %0 = memref.load %arg3[%c0] : memref<2xf32, #tpu.memory_space<smem>>
    %c1 = arith.constant 1 : index
    %1 = memref.load %arg3[%c1] : memref<2xf32, #tpu.memory_space<smem>>
    %c0_0 = arith.constant 0 : index
    %c0_1 = arith.constant 0 : index
    %2 = vector.load %arg2[%c0_0, %c0_1] : memref<1024x1xf32, #tpu.memory_space<vmem>>, vector<1024x1xf32>
    %3 = vector.broadcast %0 : f32 to vector<1024x1xf32>
    %4 = arith.mulf %2, %3 : vector<1024x1xf32>
    %5 = vector.broadcast %1 : f32 to vector<1024x1xf32>
    %6 = arith.addf %4, %5 : vector<1024x1xf32>
    %7 = arith.negf %6 : vector<1024x1xf32>
    %8 = math.exp %7 : vector<1024x1xf32>
    %cst = arith.constant 1.000000e+00 : f32
    %9 = vector.broadcast %cst : f32 to vector<1024x1xf32>
    %10 = arith.addf %9, %8 : vector<1024x1xf32>
    %11 = arith.divf %9, %10 : vector<1024x1xf32>
    %c0_2 = arith.constant 0 : index
    %c0_3 = arith.constant 0 : index
    %12 = vector.load %arg1[%c0_2, %c0_3] : memref<1024x32xf32, #tpu.memory_space<vmem>>, vector<1024x32xf32>
    %13 = vector.broadcast %11 : vector<1024x1xf32> to vector<1024x32xf32>
    %14 = arith.mulf %12, %13 : vector<1024x32xf32>
    %c0_4 = arith.constant 0 : index
    %c0_5 = arith.constant 0 : index
    %15 = vector.load %arg4[%c0_4, %c0_5] : memref<1024x32xf32, #tpu.memory_space<vmem>>, vector<1024x32xf32>
    tpu.vector_store %arg4[%c0_4, %c0_5], %14 {strides = array<i32>} : memref<1024x32xf32, #tpu.memory_space<vmem>>, vector<1024x32xf32>,
    return
  }
  func.func @transform_0(%arg0: i32) -> (i32, i32) {
    %c0_i32 = arith.constant 0 : i32
    %c0_i32_0 = arith.constant 0 : i32
    return %arg0, %c0_i32 : i32, i32
  }
  func.func @transform_1(%arg0: i32) -> (i32, i32) {
    %c0_i32 = arith.constant 0 : i32
    %c0_i32_0 = arith.constant 0 : i32
    return %arg0, %c0_i32 : i32, i32
  }
  func.func @transform_2(%arg0: i32) -> i32 {
    %c0_i32 = arith.constant 0 : i32
    %c0_i32_0 = arith.constant 0 : i32
    return %c0_i32 : i32
  }
  func.func @transform_3(%arg0: i32) -> (i32, i32) {
    %c0_i32 = arith.constant 0 : i32
    %c0_i32_0 = arith.constant 0 : i32
    return %arg0, %c0_i32 : i32, i32
  }
}

</mosaic_0001>

<bundles_post_ra>
// kernel: attention_gate_forward.5
= control target key start
LH: loop header
LB: loop body
LE: loop exit
PB: predicated region body
PF: predicated region fallthrough
CT: control target
= control target key end

     0   :  { %8 = vsyncpa [#allocation3], 0  ;;  %s4515_s0 = inlined_call_operand.vmem [shape: f32[1024,32], index: 0, kind: input, shape index: {}]   ;;  %s4516_s1 = inlined_call_operand.vmem [shape: f32[1024,1], index: 1, kind: input, shape index: {}]   ;;  %s4517_s2 = inlined_call_operand.vmem [shape: f32[2], index: 2, kind: input, shape index: {}]   ;;  %s4518_s3 = inlined_call_operand.vmem [shape: f32[1024,32], index: 3, kind: output, shape index: {}]  }
   0x1   :  { %s19_s14 = sshll.u32 %s4517_s2, 4  ;;  %s20_s14 = int_to_ptr.vmem [resolvable:$true] %s19_s14 }
   0x2   :  { %s2858_s15 = scalar_lea.vmem %s20_s14, 16  ;;  %p2863_p1 = scmp.lt.s32.totalorder %s20_s14, %s20_s14 }
   0x3   :  { %p2859_p0 = scmp.ne.s32.totalorder %s20_s14, %s2858_s15  ;;  %p2864_p2 = scmp.lt.s32.totalorder %s2858_s15, %s2858_s15 }
   0x5   :  { %p2865_p3 = por %p2864_p2, %p2863_p1 }
   0x7   :  { %p2866_p4 = pnand %p2865_p3, %p2859_p0 }
   0x9   :  { %2869 = shalt.err (!%p2866_p4)
}
   0xa   :  { %s2872_s16 = smov [#allocation2]  }
   0xb   :  { %22 = dma.vmem_to_smem %s20_s14, 16, %s2872_s16, [#allocation3]  }
   0xc   :  { %2870 = dma.done.wait [#allocation3], 16  }
   0xd   :  { %2871 = vsyncadd [#allocation3], 4294967280 }
   0xe   :  { %26 = sfence }
   0xf   :  { %s27_s17 = sld [smem:[#allocation2]]  ;;  %v2873_v0 = vmov 0   ;;  %v31_v1 = vld [vmem:[%s4516_s1 + $0x10] sm:$0xff]  ;;  %v29_v2 = vld [vmem:[%s4516_s1] sm:$0xff]  ;;  %v32_v3 = vld [vmem:[%s4516_s1 + $0x18] sm:$0xff]  ;;  %vm2079_vm0 = vcmask 261120  }
  0x10   :  { %2345 = vset.pattern.permute.xlu1 %v2873_v0  ;;  %2344 = vset.pattern.permute.xlu0 %v2873_v0  ;;  %s2213_s18 = sld [smem:[#allocation2 + $0x1]]  ;;  %v30_v4 = vld [vmem:[%s4516_s1 + $0x8] sm:$0xff]  ;;  %v33_v6 = vld [vmem:[%s4516_s1 + $0x20] sm:$0xff]  ;;  %v36_v7 = vld [vmem:[%s4516_s1 + $0x38] sm:$0xff] }
  0x11   :  { %v34_v5 = vld [vmem:[%s4516_s1 + $0x28] sm:$0xff]  ;;  %v35_v9 = vld [vmem:[%s4516_s1 + $0x30] sm:$0xff]  ;;  %v37_v27 = vld [vmem:[%s4516_s1 + $0x40] sm:$0xff] }
  0x12   :  { %v38_v22 = vld [vmem:[%s4516_s1 + $0x48] sm:$0xff]  ;;  %v40_v28 = vld [vmem:[%s4516_s1 + $0x58] sm:$0xff]  ;;  %v39_v29 = vld [vmem:[%s4516_s1 + $0x50] sm:$0xff] }
  0x13   :  { %v42_v37 = vld [vmem:[%s4516_s1 + $0x68] sm:$0xff]  ;;  %v41_v38 = vld [vmem:[%s4516_s1 + $0x60] sm:$0xff]  ;;  %v44_v48 = vld [vmem:[%s4516_s1 + $0x78] sm:$0xff] }
  0x14   :  { %v43_v52 = vld [vmem:[%s4516_s1 + $0x70] sm:$0xff] }
  0x15   :  { %v2918_v8 = vstv %s27_s17 }
  0x16   :  { %v160_v10 = vmul.f32 %v2918_v8, %v31_v1  ;;  %v2924_v11 = vstv %s2213_s18  ;;  %v158_v12 = vmul.f32 %v2918_v8, %v29_v2  ;;  %v161_v13 = vmul.f32 %v2918_v8, %v32_v3 }
  0x17   :  { %v159_v14 = vmul.f32 %v2918_v8, %v30_v4  ;;  %v163_v15 = vmul.f32 %v2918_v8, %v34_v5  ;;  %v162_v16 = vmul.f32 %v2918_v8, %v33_v6  ;;  %v165_v17 = vmul.f32 %v2918_v8, %v36_v7 }
  0x18   :  { %v289_v18 = vadd.f32 %v2924_v11, %v160_v10  ;;  %v287_v19 = vadd.f32 %v2924_v11, %v158_v12  ;;  %v290_v20 = vadd.f32 %v2924_v11, %v161_v13  ;;  %v164_v21 = vmul.f32 %v2918_v8, %v35_v9  ;;  %v46_v9 = vld [vmem:[%s4516_s1 + $0x88] sm:$0xff]  ;;  %v45_v13 = vld [vmem:[%s4516_s1 + $0x80] sm:$0xff] }
  0x19   :  { %v288_v23 = vadd.f32 %v2924_v11, %v159_v14  ;;  %v292_v24 = vadd.f32 %v2924_v11, %v163_v15  ;;  %v291_v25 = vadd.f32 %v2924_v11, %v162_v16  ;;  %v294_v26 = vadd.f32 %v2924_v11, %v165_v17  ;;  %v48_v16 = vld [vmem:[%s4516_s1 + $0x98] sm:$0xff] }
  0x1a   :  { %v2216_v30 = vmul.f32 -1.442695, %v289_v18  ;;  %v2214_v31 = vmul.f32 -1.442695, %v287_v19  ;;  %v2217_v32 = vmul.f32 -1.442695, %v290_v20  ;;  %v293_v35 = vadd.f32 %v2924_v11, %v164_v21 }
  0x1b   :  { %v2215_v33 = vmul.f32 -1.442695, %v288_v23  ;;  %v2219_v34 = vmul.f32 -1.442695, %v292_v24  ;;  %v167_v36 = vmul.f32 %v2918_v8, %v38_v22  ;;  %v2218_v39 = vmul.f32 -1.442695, %v291_v25 }
  0x1c   :  { %2346 = vpow2.f32 %v2216_v30  ;;  %v2221_v40 = vmul.f32 -1.442695, %v294_v26  ;;  %v166_v41 = vmul.f32 %v2918_v8, %v37_v27  ;;  %v169_v43 = vmul.f32 %v2918_v8, %v40_v28  ;;  %v47_v20 = vld [vmem:[%s4516_s1 + $0x90] sm:$0xff]  ;;  %v50_v30 = vld [vmem:[%s4516_s1 + $0xa8] sm:$0xff] }
  0x1d   :  { %2348 = vpow2.f32 %v2214_v31  ;;  %v296_v42 = vadd.f32 %v2924_v11, %v167_v36  ;;  %v168_v44 = vmul.f32 %v2918_v8, %v39_v29  ;;  %v171_v46 = vmul.f32 %v2918_v8, %v42_v37 }
  0x1e   :  { %2350 = vpow2.f32 %v2217_v32  ;;  %v295_v45 = vadd.f32 %v2924_v11, %v166_v41  ;;  %v170_v47 = vmul.f32 %v2918_v8, %v41_v38  ;;  %v2220_v49 = vmul.f32 -1.442695, %v293_v35  ;;  %v52_v38 = vld [vmem:[%s4516_s1 + $0xb8] sm:$0xff] }
  0x1f   :  { %2352 = vpow2.f32 %v2215_v33  ;;  %v298_v50 = vadd.f32 %v2924_v11, %v169_v43  ;;  %v297_v51 = vadd.f32 %v2924_v11, %v168_v44  ;;  %v2223_v53 = vmul.f32 -1.442695, %v296_v42  ;;  %v51_v43 = vld [vmem:[%s4516_s1 + $0xb0] sm:$0xff] }
  0x20   :  { %2354 = vpow2.f32 %v2219_v34  ;;  %v300_v54 = vadd.f32 %v2924_v11, %v171_v46  ;;  %v2222_v55 = vmul.f32 -1.442695, %v295_v45  ;;  %v299_v56 = vadd.f32 %v2924_v11, %v170_v47  ;;  %v49_v34 = vld [vmem:[%s4516_s1 + $0xa0] sm:$0xff] }
  0x21   :  { %2356 = vpow2.f32 %v2218_v39  ;;  %v173_v57 = vmul.f32 %v2918_v8, %v44_v48  ;;  %v2225_v58 = vmul.f32 -1.442695, %v298_v50  ;;  %v172_v59 = vmul.f32 %v2918_v8, %v43_v52  ;;  %v54_v48 = vld [vmem:[%s4516_s1 + $0xc8] sm:$0xff] }
  0x22   :  { %2358 = vpow2.f32 %v2221_v40  ;;  %v2224_v60 = vmul.f32 -1.442695, %v297_v51  ;;  %v2227_v62 = vmul.f32 -1.442695, %v300_v54  ;;  %v2226_v0 = vmul.f32 -1.442695, %v299_v56 }
  0x23   :  { %2360 = vpow2.f32 %v2220_v49  ;;  %v302_v61 = vadd.f32 %v2924_v11, %v173_v57  ;;  %v301_v63 = vadd.f32 %v2924_v11, %v172_v59  ;;  %v175_v19 = vmul.f32 %v2918_v8, %v46_v9 }
  0x24   :  { %2362 = vpow2.f32 %v2223_v53  ;;  %v174_v23 = vmul.f32 %v2918_v8, %v45_v13  ;;  %v177_v26 = vmul.f32 %v2918_v8, %v48_v16  ;;  %v176_v29 = vmul.f32 %v2918_v8, %v47_v20  ;;  %v53_v53 = vld [vmem:[%s4516_s1 + $0xc0] sm:$0xff]  ;;  %v60_v16 = vld [vmem:[%s4516_s1 + $0xf8] sm:$0xff] }
  0x25   :  { %2364 = vpow2.f32 %v2222_v55  ;;  %v2229_v1 = vmul.f32 -1.442695, %v302_v61  ;;  %v2228_v2 = vmul.f32 -1.442695, %v301_v63  ;;  %v304_v33 = vadd.f32 %v2924_v11, %v175_v19  ;;  %v55_v63 = vld [vmem:[%s4516_s1 + $0xd0] sm:$0xff] }
  0x26   :  { %2366 = vpow2.f32 %v2225_v58  ;;  %v303_v37 = vadd.f32 %v2924_v11, %v174_v23  ;;  %v306_v41 = vadd.f32 %v2924_v11, %v177_v26  ;;  %v179_v42 = vmul.f32 %v2918_v8, %v50_v30  ;;  %v56_v58 = vld [vmem:[%s4516_s1 + $0xd8] sm:$0xff] }
  0x27   :  { %2368 = vpow2.f32 %v2224_v60  ;;  %v305_v46 = vadd.f32 %v2924_v11, %v176_v29  ;;  %v178_v47 = vmul.f32 %v2918_v8, %v49_v34  ;;  %v2231_v51 = vmul.f32 -1.442695, %v304_v33 }
  0x28   :  { %2370 = vpow2.f32 %v2227_v62  ;;  %v181_v52 = vmul.f32 %v2918_v8, %v52_v38  ;;  %v2230_v56 = vmul.f32 -1.442695, %v303_v37  ;;  %v180_v57 = vmul.f32 %v2918_v8, %v51_v43 }
  0x29   :  { %v2347_v3 = vpop.eup %2346  ;;  %2372 = vpow2.f32 %v2226_v0  ;;  %v308_v61 = vadd.f32 %v2924_v11, %v179_v42  ;;  %v183_v62 = vmul.f32 %v2918_v8, %v54_v48  ;;  %v185_v9 = vmul.f32 %v2918_v8, %v56_v58 }
  0x2a   :  { %v2349_v4 = vpop.eup %2348  ;;  %v801_v5 = vadd.f32 1.0, %v2347_v3  ;;  %2374 = vpow2.f32 %v2229_v1  ;;  %v182_v3 = vmul.f32 %v2918_v8, %v53_v53  ;;  %v2232_v13 = vmul.f32 -1.442695, %v305_v46 }
  0x2b   :  { %v2351_v6 = vpop.eup %2350  ;;  %v799_v7 = vadd.f32 1.0, %v2349_v4  ;;  %2376 = vpow2.f32 %v2228_v2  ;;  %v307_v2 = vadd.f32 %v2924_v11, %v178_v47  ;;  %v58_v4 = vld [vmem:[%s4516_s1 + $0xe8] sm:$0xff]  ;;  %v312_v19 = vadd.f32 %v2924_v11, %v183_v62 }
  0x2c   :  { %v2353_v10 = vpop.eup %2352  ;;  %2378 = vrcp.f32 %v801_v5  ;;  %v802_v12 = vadd.f32 1.0, %v2351_v6  ;;  %v2233_v6 = vmul.f32 -1.442695, %v306_v41  ;;  %v187_v20 = vmul.f32 %v2918_v8, %v58_v4 }
  0x2d   :  { %v2355_v14 = vpop.eup %2354  ;;  %2380 = vrcp.f32 %v799_v7  ;;  %v800_v15 = vadd.f32 1.0, %v2353_v10  ;;  %v310_v7 = vadd.f32 %v2924_v11, %v181_v52  ;;  %v57_v10 = vld [vmem:[%s4516_s1 + $0xe0] sm:$0xff]  ;;  %v2234_v23 = vmul.f32 -1.442695, %v307_v2 }
  0x2e   :  { %v2357_v17 = vpop.eup %2356  ;;  %2382 = vrcp.f32 %v802_v12  ;;  %v804_v18 = vadd.f32 1.0, %v2355_v14  ;;  %v309_v14 = vadd.f32 %v2924_v11, %v180_v57  ;;  %v189_v29 = vmul.f32 %v2918_v8, %v60_v16  ;;  %v61_v2 = vld [vmem:[%s4516_s1 + $0x100] sm:$0xff] }
  0x2f   :  { %v2359_v21 = vpop.eup %2358  ;;  %2384 = vrcp.f32 %v800_v15  ;;  %v803_v22 = vadd.f32 1.0, %v2357_v17  ;;  %v184_v15 = vmul.f32 %v2918_v8, %v55_v63 }
  0x30   :  { %v2361_v24 = vpop.eup %2360  ;;  %2386 = vrcp.f32 %v804_v18  ;;  %v806_v25 = vadd.f32 1.0, %v2359_v21  ;;  %v2235_v18 = vmul.f32 -1.442695, %v308_v61  ;;  %v59_v21 = vld [vmem:[%s4516_s1 + $0xf0] sm:$0xff]  ;;  %v318_v42 = vadd.f32 %v2924_v11, %v189_v29 }
  0x31   :  { %v2363_v27 = vpop.eup %2362  ;;  %2388 = vrcp.f32 %v803_v22  ;;  %v805_v28 = vadd.f32 1.0, %v2361_v24  ;;  %v311_v24 = vadd.f32 %v2924_v11, %v182_v3  ;;  %v188_v33 = vmul.f32 %v2918_v8, %v59_v21 }
  0x32   :  { %v2365_v31 = vpop.eup %2364  ;;  %2390 = vrcp.f32 %v806_v25  ;;  %v808_v32 = vadd.f32 1.0, %v2363_v27  ;;  %v186_v25 = vmul.f32 %v2918_v8, %v57_v10  ;;  %v2237_v27 = vmul.f32 -1.442695, %v310_v7 }
  0x33   :  { %v2367_v35 = vpop.eup %2366  ;;  %2392 = vrcp.f32 %v805_v28  ;;  %v807_v36 = vadd.f32 1.0, %v2365_v31  ;;  %v314_v28 = vadd.f32 %v2924_v11, %v185_v9  ;;  %v2236_v31 = vmul.f32 -1.442695, %v309_v14  ;;  %v63_v9 = vld [vmem:[%s4516_s1 + $0x110] sm:$0xff] }
  0x34   :  { %v2369_v39 = vpop.eup %2368  ;;  %2394 = vrcp.f32 %v808_v32  ;;  %v810_v40 = vadd.f32 1.0, %v2367_v35  ;;  %v313_v32 = vadd.f32 %v2924_v11, %v184_v15  ;;  %v2239_v35 = vmul.f32 -1.442695, %v312_v19  ;;  %v66_v15 = vld [vmem:[%s4516_s1 + $0x128] sm:$0xff] }
  0x35   :  { %v2371_v44 = vpop.eup %2370  ;;  %2396 = vrcp.f32 %v807_v36  ;;  %v809_v45 = vadd.f32 1.0, %v2369_v39  ;;  %v316_v36 = vadd.f32 %v2924_v11, %v187_v20  ;;  %v2238_v38 = vmul.f32 -1.442695, %v311_v24 }
  0x36   :  { %v2373_v49 = vpop.eup %2372  ;;  %2398 = vrcp.f32 %v810_v40  ;;  %v812_v50 = vadd.f32 1.0, %v2371_v44  ;;  %v315_v39 = vadd.f32 %v2924_v11, %v186_v25  ;;  %v2241_v41 = vmul.f32 -1.442695, %v314_v28 }
  0x37   :  { %v2375_v54 = vpop.eup %2374  ;;  %2400 = vrcp.f32 %v809_v45  ;;  %v811_v55 = vadd.f32 1.0, %v2373_v49  ;;  %v2240_v44 = vmul.f32 -1.442695, %v313_v32  ;;  %v317_v45 = vadd.f32 %v2924_v11, %v188_v33 }
  0x38   :  { %v2377_v59 = vpop.eup %2376  ;;  %2402 = vrcp.f32 %v812_v50  ;;  %v814_v60 = vadd.f32 1.0, %v2375_v54  ;;  %v2243_v47 = vmul.f32 -1.442695, %v316_v36  ;;  %v2242_v49 = vmul.f32 -1.442695, %v315_v39  ;;  %v70_v36 = vld [vmem:[%s4516_s1 + $0x148] sm:$0xff] }
  0x39   :  { %v2379_v0 = vpop.eup %2378  ;;  %2404 = vrcp.f32 %v811_v55  ;;  %v813_v1 = vadd.f32 1.0, %v2377_v59  ;;  %v2244_v53 = vmul.f32 -1.442695, %v317_v45  ;;  %v190_v14 = vmul.f32 %v2918_v8, %v61_v2  ;;  %v76_v2 = vld [vmem:[%s4516_s1 + $0x178] sm:$0xff] }
  0x3a   :  { %v2381_v5 = vpop.eup %2380  ;;  %1323 = vperm.xlu1 %2345, %v2379_v0   ;;  %2406 = vrcp.f32 %v814_v60  ;;  %v192_v21 = vmul.f32 %v2918_v8, %v63_v9  ;;  %v195_v25 = vmul.f32 %v2918_v8, %v66_v15 }
  0x3b   :  { %v2383_v12 = vpop.eup %2382  ;;  %1313 = vperm.xlu0 %2344, %v2381_v5   ;;  %2408 = vrcp.f32 %v813_v1  ;;  %v64_v5 = vld [vmem:[%s4516_s1 + $0x118] sm:$0xff] }
  0x3c   :  { %v2385_v17 = vpop.eup %2384  ;;  %2410 = vpow2.f32 %v2231_v51  ;;  %v2245_v51 = vmul.f32 -1.442695, %v318_v42  ;;  %v321_v39 = vadd.f32 %v2924_v11, %v192_v21 }
  0x3d   :  { %v2387_v22 = vpop.eup %2386  ;;  %2412 = vpow2.f32 %v2230_v56  ;;  %v62_v56 = vld [vmem:[%s4516_s1 + $0x108] sm:$0xff] }
  0x3e   :  { %v2389_v26 = vpop.eup %2388  ;;  %1328 = vperm.xlu1 %2345, %v2383_v12   ;;  %2414 = vpow2.f32 %v2233_v6  ;;  %v191_v63 = vmul.f32 %v2918_v8, %v62_v56  ;;  %v74_v56 = vld [vmem:[%s4516_s1 + $0x168] sm:$0xff] }
  0x3f   :  { %v2391_v30 = vpop.eup %2390  ;;  %1318 = vperm.xlu0 %2344, %v2385_v17   ;;  %2416 = vpow2.f32 %v2232_v13 }
  0x40   :  { %v2393_v34 = vpop.eup %2392  ;;  %2418 = vpow2.f32 %v2235_v18  ;;  %v320_v13 = vadd.f32 %v2924_v11, %v191_v63  ;;  %v193_v18 = vmul.f32 %v2918_v8, %v64_v5  ;;  %v2248_v63 = vmul.f32 -1.442695, %v321_v39 }
  0x41   :  { %v2395_v37 = vpop.eup %2394  ;;  %2420 = vpow2.f32 %v2234_v23 }
  0x42   :  { %v2397_v40 = vpop.eup %2396  ;;  %1338 = vperm.xlu1 %2345, %v2387_v22   ;;  %2422 = vpow2.f32 %v2237_v27  ;;  %v65_v22 = vld [vmem:[%s4516_s1 + $0x120] sm:$0xff]  ;;  %v2247_v29 = vmul.f32 -1.442695, %v320_v13 }
  0x43   :  { %v2399_v43 = vpop.eup %2398  ;;  %1333 = vperm.xlu0 %2344, %v2389_v26   ;;  %2424 = vpow2.f32 %v2236_v31  ;;  %v68_v26 = vld [vmem:[%s4516_s1 + $0x138] sm:$0xff]  ;;  %v67_v31 = vld [vmem:[%s4516_s1 + $0x130] sm:$0xff] }
  0x44   :  { %v2401_v46 = vpop.eup %2400  ;;  %2426 = vpow2.f32 %v2239_v35  ;;  %v194_v35 = vmul.f32 %v2918_v8, %v65_v22  ;;  %v196_v45 = vmul.f32 %v2918_v8, %v67_v31 }
  0x45   :  { %v2403_v48 = vpop.eup %2402  ;;  %2428 = vpow2.f32 %v2238_v38 }
  0x46   :  { %v2405_v50 = vpop.eup %2404  ;;  %1348 = vperm.xlu1 %2345, %v2391_v30   ;;  %2430 = vpow2.f32 %v2241_v41  ;;  %v319_v30 = vadd.f32 %v2924_v11, %v190_v14  ;;  %v69_v41 = vld [vmem:[%s4516_s1 + $0x140] sm:$0xff] }
  0x47   :  { %v3061_v52 = vpop.eup %2406  ;;  %1343 = vperm.xlu0 %2344, %v2393_v34   ;;  %2432 = vpow2.f32 %v2240_v44  ;;  %v322_v34 = vadd.f32 %v2924_v11, %v193_v18  ;;  %v324_v44 = vadd.f32 %v2924_v11, %v195_v25 }
  0x48   :  { %v3063_v54 = vpop.eup %2408  ;;  %2434 = vpow2.f32 %v2243_v47 }
  0x49   :  { %v2411_v55 = vpop.eup %2410  ;;  %2436 = vpow2.f32 %v2242_v49  ;;  %v2246_v49 = vmul.f32 -1.442695, %v319_v30 }
  0x4a   :  { %v2413_v57 = vpop.eup %2412  ;;  %1358 = vperm.xlu1 %2345, %v2395_v37   ;;  %v816_v58 = vadd.f32 1.0, %v2411_v55  ;;  %2438 = vpow2.f32 %v2245_v51  ;;  %v71_v51 = vld [vmem:[%s4516_s1 + $0x150] sm:$0xff]  ;;  %v198_v55 = vmul.f32 %v2918_v8, %v69_v41 }
  0x4b   :  { %v2415_v59 = vpop.eup %2414  ;;  %1353 = vperm.xlu0 %2344, %v2397_v40   ;;  %v815_v60 = vadd.f32 1.0, %v2413_v57  ;;  %2440 = vpow2.f32 %v2244_v53  ;;  %v197_v40 = vmul.f32 %v2918_v8, %v68_v26 }
  0x4c   :  { %v2417_v61 = vpop.eup %2416  ;;  %2442 = vrcp.f32 %v816_v58  ;;  %v818_v62 = vadd.f32 1.0, %v2415_v59  ;;  %v2249_v58 = vmul.f32 -1.442695, %v322_v34 }
  0x4d   :  { %v2419_v0 = vpop.eup %2418  ;;  %2444 = vrcp.f32 %v815_v60  ;;  %v817_v1 = vadd.f32 1.0, %v2417_v61  ;;  %v326_v59 = vadd.f32 %v2924_v11, %v197_v40  ;;  %v73_v61 = vld [vmem:[%s4516_s1 + $0x160] sm:$0xff] }
  0x4e   :  { %v2421_v3 = vpop.eup %2420  ;;  %1368 = vperm.xlu1 %2345, %v2399_v43   ;;  %2446 = vrcp.f32 %v818_v62  ;;  %v820_v4 = vadd.f32 1.0, %v2419_v0  ;;  %v325_v0 = vadd.f32 %v2924_v11, %v196_v45  ;;  %v202_v13 = vmul.f32 %v2918_v8, %v73_v61 }
  0x4f   :  { %v2423_v6 = vpop.eup %2422  ;;  %1363 = vperm.xlu0 %2344, %v2401_v46   ;;  %2448 = vrcp.f32 %v817_v1  ;;  %v819_v7 = vadd.f32 1.0, %v2421_v3  ;;  %v72_v46 = vld [vmem:[%s4516_s1 + $0x158] sm:$0xff]  ;;  %v200_v1 = vmul.f32 %v2918_v8, %v71_v51  ;;  %v2253_v15 = vmul.f32 -1.442695, %v326_v59 }
  0x50   :  { %v2425_v10 = vpop.eup %2424  ;;  %2450 = vrcp.f32 %v820_v4  ;;  %v822_v12 = vadd.f32 1.0, %v2423_v6  ;;  %v201_v60 = vmul.f32 %v2918_v8, %v72_v46  ;;  %v2251_v4 = vmul.f32 -1.442695, %v324_v44  ;;  %v78_v44 = vld [vmem:[%s4516_s1 + $0x188] sm:$0xff] }
  0x51   :  { %v2427_v16 = vpop.eup %2426  ;;  %2452 = vrcp.f32 %v819_v7  ;;  %v821_v17 = vadd.f32 1.0, %v2425_v10  ;;  %v203_v6 = vmul.f32 %v2918_v8, %v74_v56  ;;  %v75_v7 = vld [vmem:[%s4516_s1 + $0x170] sm:$0xff] }
  0x52   :  { %v2429_v19 = vpop.eup %2428  ;;  %1378 = vperm.xlu1 %2345, %v2403_v48   ;;  %2454 = vrcp.f32 %v822_v12  ;;  %v824_v20 = vadd.f32 1.0, %v2427_v16  ;;  %v327_v12 = vadd.f32 %v2924_v11, %v198_v55  ;;  %v330_v16 = vadd.f32 %v2924_v11, %v201_v60 }
  0x53   :  { %v2431_v23 = vpop.eup %2430  ;;  %1373 = vperm.xlu0 %2344, %v2405_v50   ;;  %2456 = vrcp.f32 %v821_v17  ;;  %v823_v24 = vadd.f32 1.0, %v2429_v19  ;;  %v199_v50 = vmul.f32 %v2918_v8, %v70_v36  ;;  %v205_v17 = vmul.f32 %v2918_v8, %v76_v2 }
  0x54   :  { %v2433_v27 = vpop.eup %2432  ;;  %2458 = vrcp.f32 %v824_v20  ;;  %v826_v28 = vadd.f32 1.0, %v2431_v23  ;;  %v2252_v19 = vmul.f32 -1.442695, %v325_v0  ;;  %v329_v20 = vadd.f32 %v2924_v11, %v200_v1  ;;  %v79_v0 = vld [vmem:[%s4516_s1 + $0x190] sm:$0xff] }
  0x55   :  { %v2435_v32 = vpop.eup %2434  ;;  %2460 = vrcp.f32 %v823_v24  ;;  %v825_v33 = vadd.f32 1.0, %v2433_v27  ;;  %v328_v5 = vadd.f32 %v2924_v11, %v199_v50  ;;  %v204_v21 = vmul.f32 %v2918_v8, %v75_v7 }
  0x56   :  { %v2437_v37 = vpop.eup %2436  ;;  %1388 = vperm.xlu1 %2345, %v3061_v52   ;;  %2462 = vrcp.f32 %v826_v28  ;;  %v828_v38 = vadd.f32 1.0, %v2435_v32  ;;  %v332_v24 = vadd.f32 %v2924_v11, %v203_v6  ;;  %v2254_v26 = vmul.f32 -1.442695, %v327_v12 }
  0x57   :  { %v2439_v42 = vpop.eup %2438  ;;  %1383 = vperm.xlu0 %2344, %v3063_v54   ;;  %2464 = vrcp.f32 %v825_v33  ;;  %v827_v43 = vadd.f32 1.0, %v2437_v37  ;;  %v323_v54 = vadd.f32 %v2924_v11, %v194_v35  ;;  %v2255_v23 = vmul.f32 -1.442695, %v328_v5 }
  0x58   :  { %v2441_v47 = vpop.eup %2440  ;;  %2466 = vrcp.f32 %v828_v38  ;;  %v830_v48 = vadd.f32 1.0, %v2439_v42  ;;  %v331_v27 = vadd.f32 %v2924_v11, %v202_v13  ;;  %v334_v30 = vadd.f32 %v2924_v11, %v205_v17 }
  0x59   :  { %v2443_v52 = vpop.eup %2442  ;;  %2468 = vrcp.f32 %v827_v43  ;;  %v829_v53 = vadd.f32 1.0, %v2441_v47  ;;  %v2250_v10 = vmul.f32 -1.442695, %v323_v54  ;;  %v2256_v32 = vmul.f32 -1.442695, %v329_v20 }
  0x5a   :  { %v2445_v57 = vpop.eup %2444  ;;  %1398 = vperm.xlu1 %2345, %v2443_v52   ;;  %2470 = vrcp.f32 %v830_v48  ;;  %v333_v33 = vadd.f32 %v2924_v11, %v204_v21  ;;  %v2259_v35 = vmul.f32 -1.442695, %v332_v24  ;;  %v2258_v37 = vmul.f32 -1.442695, %v331_v27  ;;  %v86_v24 = vld [vmem:[%s4516_s1 + $0x1c8] sm:$0xff] }
  0x5b   :  { %v2447_v62 = vpop.eup %2446  ;;  %1393 = vperm.xlu0 %2344, %v2445_v57   ;;  %2472 = vrcp.f32 %v829_v53  ;;  %v2261_v39 = vmul.f32 -1.442695, %v334_v30  ;;  %v207_v52 = vmul.f32 %v2918_v8, %v78_v44  ;;  %v208_v13 = vmul.f32 %v2918_v8, %v79_v0  ;;  %v90_v44 = vld [vmem:[%s4516_s1 + $0x1e8] sm:$0xff] }
  0x5c   :  { %v2449_v3 = vpop.eup %2448  ;;  %2474 = vpow2.f32 %v2247_v29  ;;  %v2257_v29 = vmul.f32 -1.442695, %v330_v16  ;;  %v2260_v41 = vmul.f32 -1.442695, %v333_v33 }
  0x5d   :  { %v2451_v9 = vpop.eup %2450  ;;  %2476 = vpow2.f32 %v2246_v49  ;;  %v77_v49 = vld [vmem:[%s4516_s1 + $0x180] sm:$0xff] }
  0x5e   :  { %v2453_v14 = vpop.eup %2452  ;;  %1408 = vperm.xlu1 %2345, %v2447_v62   ;;  %2478 = vpow2.f32 %v2249_v58  ;;  %v206_v57 = vmul.f32 %v2918_v8, %v77_v49  ;;  %v80_v58 = vld [vmem:[%s4516_s1 + $0x198] sm:$0xff]  ;;  %v89_v49 = vld [vmem:[%s4516_s1 + $0x1e0] sm:$0xff] }
  0x5f   :  { %v2455_v18 = vpop.eup %2454  ;;  %1403 = vperm.xlu0 %2344, %v2449_v3   ;;  %2480 = vpow2.f32 %v2248_v63  ;;  %v336_v63 = vadd.f32 %v2924_v11, %v207_v52  ;;  %v209_v3 = vmul.f32 %v2918_v8, %v80_v58  ;;  %v219_v58 = vmul.f32 %v2918_v8, %v90_v44 }
  0x60   :  { %v2457_v22 = vpop.eup %2456  ;;  %2482 = vpow2.f32 %v2251_v4  ;;  %v82_v4 = vld [vmem:[%s4516_s1 + $0x1a8] sm:$0xff]  ;;  %v335_v7 = vadd.f32 %v2924_v11, %v206_v57 }
  0x61   :  { %v2459_v25 = vpop.eup %2458  ;;  %2484 = vpow2.f32 %v2250_v10  ;;  %v2263_v17 = vmul.f32 -1.442695, %v336_v63  ;;  %v218_v63 = vmul.f32 %v2918_v8, %v89_v49  ;;  %v95_v49 = vld [vmem:[%s4516_s1 + $0x210] sm:$0xff] }
  0x62   :  { %v2461_v28 = vpop.eup %2460  ;;  %1418 = vperm.xlu1 %2345, %v2451_v9   ;;  %2486 = vpow2.f32 %v2253_v15  ;;  %v81_v9 = vld [vmem:[%s4516_s1 + $0x1a0] sm:$0xff]  ;;  %v2262_v27 = vmul.f32 -1.442695, %v335_v7 }
  0x63   :  { %v2463_v31 = vpop.eup %2462  ;;  %1413 = vperm.xlu0 %2344, %v2453_v14   ;;  %2488 = vpow2.f32 %v2252_v19  ;;  %v84_v14 = vld [vmem:[%s4516_s1 + $0x1b8] sm:$0xff]  ;;  %v83_v19 = vld [vmem:[%s4516_s1 + $0x1b0] sm:$0xff] }
  0x64   :  { %v2465_v34 = vpop.eup %2464  ;;  %2490 = vpow2.f32 %v2255_v23  ;;  %v210_v23 = vmul.f32 %v2918_v8, %v81_v9  ;;  %v212_v33 = vmul.f32 %v2918_v8, %v83_v19 }
  0x65   :  { %v2467_v36 = vpop.eup %2466  ;;  %2492 = vpow2.f32 %v2254_v26 }
  0x66   :  { %v2469_v38 = vpop.eup %2468  ;;  %1428 = vperm.xlu1 %2345, %v2455_v18   ;;  %2494 = vpow2.f32 %v2257_v29  ;;  %v211_v18 = vmul.f32 %v2918_v8, %v82_v4  ;;  %v85_v29 = vld [vmem:[%s4516_s1 + $0x1c0] sm:$0xff]  ;;  %v341_v52 = vadd.f32 %v2924_v11, %v212_v33 }
  0x67   :  { %v3147_v40 = vpop.eup %2470  ;;  %1423 = vperm.xlu0 %2344, %v2457_v22   ;;  %2496 = vpow2.f32 %v2256_v32  ;;  %v338_v22 = vadd.f32 %v2924_v11, %v209_v3  ;;  %v337_v32 = vadd.f32 %v2924_v11, %v208_v13 }
  0x68   :  { %v3149_v42 = vpop.eup %2472  ;;  %2498 = vpow2.f32 %v2259_v35 }
  0x69   :  { %v2475_v43 = vpop.eup %2474  ;;  %2500 = vpow2.f32 %v2258_v37  ;;  %v340_v37 = vadd.f32 %v2924_v11, %v211_v18 }
  0x6a   :  { %v2477_v45 = vpop.eup %2476  ;;  %1438 = vperm.xlu1 %2345, %v2459_v25   ;;  %v832_v46 = vadd.f32 1.0, %v2475_v43  ;;  %2502 = vpow2.f32 %v2261_v39  ;;  %v87_v39 = vld [vmem:[%s4516_s1 + $0x1d0] sm:$0xff]  ;;  %v214_v43 = vmul.f32 %v2918_v8, %v85_v29 }
  0x6b   :  { %v2479_v47 = vpop.eup %2478  ;;  %1433 = vperm.xlu0 %2344, %v2461_v28   ;;  %v831_v48 = vadd.f32 1.0, %v2477_v45  ;;  %2504 = vpow2.f32 %v2260_v41  ;;  %v213_v28 = vmul.f32 %v2918_v8, %v84_v14 }
  0x6c   :  { %v2481_v50 = vpop.eup %2480  ;;  %2506 = vrcp.f32 %v832_v46  ;;  %v834_v51 = vadd.f32 1.0, %v2479_v47  ;;  %v2265_v46 = vmul.f32 -1.442695, %v338_v22 }
  0x6d   :  { %v2483_v53 = vpop.eup %2482  ;;  %2508 = vrcp.f32 %v831_v48  ;;  %v833_v54 = vadd.f32 1.0, %v2481_v50  ;;  %v342_v47 = vadd.f32 %v2924_v11, %v213_v28 }
  0x6e   :  { %v2485_v55 = vpop.eup %2484  ;;  %1448 = vperm.xlu1 %2345, %v2463_v31   ;;  %2510 = vrcp.f32 %v834_v51  ;;  %v836_v56 = vadd.f32 1.0, %v2483_v53  ;;  %v2264_v51 = vmul.f32 -1.442695, %v337_v32  ;;  %v216_v53 = vmul.f32 %v2918_v8, %v87_v39  ;;  %v94_v32 = vld [vmem:[%s4516_s1 + $0x208] sm:$0xff] }
  0x6f   :  { %v2487_v59 = vpop.eup %2486  ;;  %1443 = vperm.xlu0 %2344, %v2465_v34   ;;  %2512 = vrcp.f32 %v833_v54  ;;  %v835_v60 = vadd.f32 1.0, %v2485_v55  ;;  %v88_v34 = vld [vmem:[%s4516_s1 + $0x1d8] sm:$0xff]  ;;  %v223_v39 = vmul.f32 %v2918_v8, %v94_v32  ;;  %v106_v32 = vld [vmem:[%s4516_s1 + $0x268] sm:$0xff] }
  0x70   :  { %v2489_v61 = vpop.eup %2488  ;;  %2514 = vrcp.f32 %v836_v56  ;;  %v838_v62 = vadd.f32 1.0, %v2487_v59  ;;  %v217_v48 = vmul.f32 %v2918_v8, %v88_v34  ;;  %v92_v54 = vld [vmem:[%s4516_s1 + $0x1f8] sm:$0xff]  ;;  %v2267_v56 = vmul.f32 -1.442695, %v340_v37  ;;  %v91_v59 = vld [vmem:[%s4516_s1 + $0x1f0] sm:$0xff] }
  0x71   :  { %v2491_v1 = vpop.eup %2490  ;;  %2516 = vrcp.f32 %v835_v60  ;;  %v837_v2 = vadd.f32 1.0, %v2489_v61  ;;  %v221_v3 = vmul.f32 %v2918_v8, %v92_v54  ;;  %v220_v7 = vmul.f32 %v2918_v8, %v91_v59 }
  0x72   :  { %v2493_v5 = vpop.eup %2492  ;;  %1458 = vperm.xlu1 %2345, %v2467_v36   ;;  %2518 = vrcp.f32 %v838_v62  ;;  %v840_v6 = vadd.f32 1.0, %v2491_v1  ;;  %v343_v62 = vadd.f32 %v2924_v11, %v214_v43  ;;  %v2269_v1 = vmul.f32 -1.442695, %v342_v47 }
  0x73   :  { %v2495_v10 = vpop.eup %2494  ;;  %1453 = vperm.xlu0 %2344, %v2469_v38   ;;  %2520 = vrcp.f32 %v837_v2  ;;  %v839_v12 = vadd.f32 1.0, %v2493_v5  ;;  %v215_v38 = vmul.f32 %v2918_v8, %v86_v24  ;;  %v346_v2 = vadd.f32 %v2924_v11, %v217_v48 }
  0x74   :  { %v2497_v15 = vpop.eup %2496  ;;  %2522 = vrcp.f32 %v840_v6  ;;  %v842_v16 = vadd.f32 1.0, %v2495_v10  ;;  %v2268_v5 = vmul.f32 -1.442695, %v341_v52  ;;  %v345_v6 = vadd.f32 %v2924_v11, %v216_v53 }
  0x75   :  { %v2499_v20 = vpop.eup %2498  ;;  %2524 = vrcp.f32 %v839_v12  ;;  %v841_v21 = vadd.f32 1.0, %v2497_v15  ;;  %v344_v57 = vadd.f32 %v2924_v11, %v215_v38  ;;  %v348_v12 = vadd.f32 %v2924_v11, %v219_v58 }
  0x76   :  { %v2501_v25 = vpop.eup %2500  ;;  %1468 = vperm.xlu1 %2345, %v3147_v40   ;;  %2526 = vrcp.f32 %v842_v16  ;;  %v844_v26 = vadd.f32 1.0, %v2499_v20  ;;  %v2270_v14 = vmul.f32 -1.442695, %v343_v62  ;;  %v347_v15 = vadd.f32 %v2924_v11, %v218_v63 }
  0x77   :  { %v2503_v30 = vpop.eup %2502  ;;  %1463 = vperm.xlu0 %2344, %v3149_v42   ;;  %2528 = vrcp.f32 %v841_v21  ;;  %v843_v31 = vadd.f32 1.0, %v2501_v25  ;;  %v339_v42 = vadd.f32 %v2924_v11, %v210_v23  ;;  %v2271_v10 = vmul.f32 -1.442695, %v344_v57 }
  0x78   :  { %v2505_v35 = vpop.eup %2504  ;;  %2530 = vrcp.f32 %v844_v26  ;;  %v846_v36 = vadd.f32 1.0, %v2503_v30  ;;  %v350_v18 = vadd.f32 %v2924_v11, %v221_v3  ;;  %v2272_v20 = vmul.f32 -1.442695, %v345_v6 }
  0x79   :  { %v2507_v40 = vpop.eup %2506  ;;  %2532 = vrcp.f32 %v843_v31  ;;  %v845_v41 = vadd.f32 1.0, %v2505_v35  ;;  %v2266_v61 = vmul.f32 -1.442695, %v339_v42  ;;  %v349_v21 = vadd.f32 %v2924_v11, %v220_v7 }
  0x7a   :  { %v2509_v45 = vpop.eup %2508  ;;  %1478 = vperm.xlu1 %2345, %v2507_v40   ;;  %2534 = vrcp.f32 %v846_v36  ;;  %v2275_v23 = vmul.f32 -1.442695, %v348_v12  ;;  %v2274_v25 = vmul.f32 -1.442695, %v347_v15  ;;  %v93_v40 = vld [vmem:[%s4516_s1 + $0x200] sm:$0xff]  ;;  %v352_v52 = vadd.f32 %v2924_v11, %v223_v39  ;;  %v102_v12 = vld [vmem:[%s4516_s1 + $0x248] sm:$0xff] }
  0x7b   :  { %v2511_v50 = vpop.eup %2510  ;;  %1473 = vperm.xlu0 %2344, %v2509_v45   ;;  %2536 = vrcp.f32 %v845_v41  ;;  %v2276_v29 = vmul.f32 -1.442695, %v349_v21  ;;  %v96_v45 = vld [vmem:[%s4516_s1 + $0x218] sm:$0xff]  ;;  %v222_v48 = vmul.f32 %v2918_v8, %v93_v40  ;;  %v224_v59 = vmul.f32 %v2918_v8, %v95_v49 }
  0x7c   :  { %v2513_v55 = vpop.eup %2512  ;;  %2538 = vpow2.f32 %v2263_v17  ;;  %v2273_v17 = vmul.f32 -1.442695, %v346_v2  ;;  %v2279_v3 = vmul.f32 -1.442695, %v352_v52 }
  0x7d   :  { %v2515_v60 = vpop.eup %2514  ;;  %2540 = vpow2.f32 %v2262_v27  ;;  %v2277_v27 = vmul.f32 -1.442695, %v350_v18  ;;  %v351_v63 = vadd.f32 %v2924_v11, %v222_v48  ;;  %v353_v15 = vadd.f32 %v2924_v11, %v224_v59 }
  0x7e   :  { %v2517_v0 = vpop.eup %2516  ;;  %1488 = vperm.xlu1 %2345, %v2511_v50   ;;  %2542 = vpow2.f32 %v2265_v46 }
  0x7f   :  { %v2519_v4 = vpop.eup %2518  ;;  %1483 = vperm.xlu0 %2344, %v2513_v55   ;;  %2544 = vpow2.f32 %v2264_v51  ;;  %v225_v55 = vmul.f32 %v2918_v8, %v96_v45  ;;  %v2280_v39 = vmul.f32 -1.442695, %v353_v15 }
  0x80   :  { %v2521_v9 = vpop.eup %2520  ;;  %2546 = vpow2.f32 %v2267_v56  ;;  %v98_v56 = vld [vmem:[%s4516_s1 + $0x228] sm:$0xff] }
  0x81   :  { %v2523_v13 = vpop.eup %2522  ;;  %2548 = vpow2.f32 %v2266_v61 }
  0x82   :  { %v2525_v16 = vpop.eup %2524  ;;  %1498 = vperm.xlu1 %2345, %v2515_v60   ;;  %2550 = vpow2.f32 %v2269_v1  ;;  %v97_v60 = vld [vmem:[%s4516_s1 + $0x220] sm:$0xff] }
  0x83   :  { %v2527_v19 = vpop.eup %2526  ;;  %1493 = vperm.xlu0 %2344, %v2517_v0   ;;  %2552 = vpow2.f32 %v2268_v5  ;;  %v100_v0 = vld [vmem:[%s4516_s1 + $0x238] sm:$0xff]  ;;  %v99_v5 = vld [vmem:[%s4516_s1 + $0x230] sm:$0xff] }
  0x84   :  { %v2529_v22 = vpop.eup %2528  ;;  %2554 = vpow2.f32 %v2271_v10  ;;  %v226_v10 = vmul.f32 %v2918_v8, %v97_v60  ;;  %v228_v21 = vmul.f32 %v2918_v8, %v99_v5 }
  0x85   :  { %v2531_v24 = vpop.eup %2530  ;;  %2556 = vpow2.f32 %v2270_v14 }
  0x86   :  { %v2533_v26 = vpop.eup %2532  ;;  %1508 = vperm.xlu1 %2345, %v2519_v4   ;;  %2558 = vpow2.f32 %v2273_v17  ;;  %v227_v4 = vmul.f32 %v2918_v8, %v98_v56  ;;  %v101_v17 = vld [vmem:[%s4516_s1 + $0x240] sm:$0xff]  ;;  %v357_v40 = vadd.f32 %v2924_v11, %v228_v21 }
  0x87   :  { %v3233_v28 = vpop.eup %2534  ;;  %1503 = vperm.xlu0 %2344, %v2521_v9   ;;  %2560 = vpow2.f32 %v2272_v20  ;;  %v354_v9 = vadd.f32 %v2924_v11, %v225_v55  ;;  %v2278_v20 = vmul.f32 -1.442695, %v351_v63 }
  0x88   :  { %v3235_v30 = vpop.eup %2536  ;;  %2562 = vpow2.f32 %v2275_v23 }
  0x89   :  { %v2539_v31 = vpop.eup %2538  ;;  %2564 = vpow2.f32 %v2274_v25  ;;  %v356_v25 = vadd.f32 %v2924_v11, %v227_v4 }
  0x8a   :  { %v2541_v33 = vpop.eup %2540  ;;  %1518 = vperm.xlu1 %2345, %v2523_v13   ;;  %v848_v34 = vadd.f32 1.0, %v2539_v31  ;;  %2566 = vpow2.f32 %v2277_v27  ;;  %v103_v27 = vld [vmem:[%s4516_s1 + $0x250] sm:$0xff]  ;;  %v230_v31 = vmul.f32 %v2918_v8, %v101_v17 }
  0x8b   :  { %v2543_v35 = vpop.eup %2542  ;;  %1513 = vperm.xlu0 %2344, %v2525_v16   ;;  %v847_v36 = vadd.f32 1.0, %v2541_v33  ;;  %2568 = vpow2.f32 %v2276_v29  ;;  %v229_v16 = vmul.f32 %v2918_v8, %v100_v0 }
  0x8c   :  { %v2545_v37 = vpop.eup %2544  ;;  %2570 = vrcp.f32 %v848_v34  ;;  %v850_v38 = vadd.f32 1.0, %v2543_v35  ;;  %v2281_v34 = vmul.f32 -1.442695, %v354_v9 }
  0x8d   :  { %v2547_v41 = vpop.eup %2546  ;;  %2572 = vrcp.f32 %v847_v36  ;;  %v849_v42 = vadd.f32 1.0, %v2545_v37  ;;  %v358_v35 = vadd.f32 %v2924_v11, %v229_v16  ;;  %v105_v37 = vld [vmem:[%s4516_s1 + $0x260] sm:$0xff] }
  0x8e   :  { %v2549_v43 = vpop.eup %2548  ;;  %1528 = vperm.xlu1 %2345, %v2527_v19   ;;  %2574 = vrcp.f32 %v850_v38  ;;  %v852_v44 = vadd.f32 1.0, %v2547_v41  ;;  %v232_v41 = vmul.f32 %v2918_v8, %v103_v27 }
  0x8f   :  { %v2551_v46 = vpop.eup %2550  ;;  %1523 = vperm.xlu0 %2344, %v2529_v22   ;;  %2576 = vrcp.f32 %v849_v42  ;;  %v851_v47 = vadd.f32 1.0, %v2549_v43  ;;  %v104_v22 = vld [vmem:[%s4516_s1 + $0x258] sm:$0xff] }
  0x90   :  { %v2553_v50 = vpop.eup %2552  ;;  %2578 = vrcp.f32 %v852_v44  ;;  %v854_v51 = vadd.f32 1.0, %v2551_v46  ;;  %v233_v36 = vmul.f32 %v2918_v8, %v104_v22  ;;  %v108_v42 = vld [vmem:[%s4516_s1 + $0x278] sm:$0xff]  ;;  %v2283_v44 = vmul.f32 -1.442695, %v356_v25 }
  0x91   :  { %v2555_v53 = vpop.eup %2554  ;;  %2580 = vrcp.f32 %v851_v47  ;;  %v853_v54 = vadd.f32 1.0, %v2553_v50  ;;  %v235_v46 = vmul.f32 %v2918_v8, %v106_v32  ;;  %v107_v47 = vld [vmem:[%s4516_s1 + $0x270] sm:$0xff]  ;;  %v359_v50 = vadd.f32 %v2924_v11, %v230_v31  ;;  %v112_v22 = vld [vmem:[%s4516_s1 + $0x298] sm:$0xff] }
  0x92   :  { %v2557_v57 = vpop.eup %2556  ;;  %1538 = vperm.xlu1 %2345, %v2531_v24   ;;  %2582 = vrcp.f32 %v854_v51  ;;  %v856_v58 = vadd.f32 1.0, %v2555_v53  ;;  %v234_v51 = vmul.f32 %v2918_v8, %v105_v37  ;;  %v2285_v53 = vmul.f32 -1.442695, %v358_v35 }
  0x93   :  { %v2559_v61 = vpop.eup %2558  ;;  %1533 = vperm.xlu0 %2344, %v2533_v26   ;;  %2584 = vrcp.f32 %v853_v54  ;;  %v855_v62 = vadd.f32 1.0, %v2557_v57  ;;  %v231_v26 = vmul.f32 %v2918_v8, %v102_v12  ;;  %v362_v54 = vadd.f32 %v2924_v11, %v233_v36  ;;  %v114_v36 = vld [vmem:[%s4516_s1 + $0x2a8] sm:$0xff] }
  0x94   :  { %v2561_v1 = vpop.eup %2560  ;;  %2586 = vrcp.f32 %v856_v58  ;;  %v858_v2 = vadd.f32 1.0, %v2559_v61  ;;  %v237_v55 = vmul.f32 %v2918_v8, %v108_v42  ;;  %v2284_v57 = vmul.f32 -1.442695, %v357_v40 }
  0x95   :  { %v2563_v6 = vpop.eup %2562  ;;  %2588 = vrcp.f32 %v855_v62  ;;  %v857_v7 = vadd.f32 1.0, %v2561_v1  ;;  %v360_v45 = vadd.f32 %v2924_v11, %v231_v26  ;;  %v361_v58 = vadd.f32 %v2924_v11, %v232_v41  ;;  %v111_v26 = vld [vmem:[%s4516_s1 + $0x290] sm:$0xff] }
  0x96   :  { %v2565_v13 = vpop.eup %2564  ;;  %1548 = vperm.xlu1 %2345, %v3233_v28   ;;  %2590 = vrcp.f32 %v858_v2  ;;  %v860_v14 = vadd.f32 1.0, %v2563_v6  ;;  %v236_v59 = vmul.f32 %v2918_v8, %v107_v47  ;;  %v364_v62 = vadd.f32 %v2924_v11, %v235_v46  ;;  %v113_v47 = vld [vmem:[%s4516_s1 + $0x2a0] sm:$0xff] }
  0x97   :  { %v2567_v18 = vpop.eup %2566  ;;  %1543 = vperm.xlu0 %2344, %v3235_v30   ;;  %2592 = vrcp.f32 %v857_v7  ;;  %v859_v19 = vadd.f32 1.0, %v2565_v13  ;;  %v355_v30 = vadd.f32 %v2924_v11, %v226_v10  ;;  %v2287_v61 = vmul.f32 -1.442695, %v360_v45 }
  0x98   :  { %v2569_v23 = vpop.eup %2568  ;;  %2594 = vrcp.f32 %v860_v14  ;;  %v862_v24 = vadd.f32 1.0, %v2567_v18  ;;  %v2286_v0 = vmul.f32 -1.442695, %v359_v50  ;;  %v363_v1 = vadd.f32 %v2924_v11, %v234_v51  ;;  %v110_v18 = vld [vmem:[%s4516_s1 + $0x288] sm:$0xff] }
  0x99   :  { %v2571_v28 = vpop.eup %2570  ;;  %2596 = vrcp.f32 %v859_v19  ;;  %v861_v29 = vadd.f32 1.0, %v2569_v23  ;;  %v2282_v49 = vmul.f32 -1.442695, %v355_v30  ;;  %v366_v4 = vadd.f32 %v2924_v11, %v237_v55 }
  0x9a   :  { %v2573_v33 = vpop.eup %2572  ;;  %1558 = vperm.xlu1 %2345, %v2571_v28   ;;  %2598 = vrcp.f32 %v862_v24  ;;  %v2288_v6 = vmul.f32 -1.442695, %v361_v58  ;;  %v365_v7 = vadd.f32 %v2924_v11, %v236_v59  ;;  %v2291_v10 = vmul.f32 -1.442695, %v364_v62  ;;  %v1183_v62 = vld [vmem:[%s4515_s0] sm:$0xff] }
  0x9b   :  { %v2575_v38 = vpop.eup %2574  ;;  %1553 = vperm.xlu0 %2344, %v2573_v33   ;;  %2600 = vrcp.f32 %v861_v29  ;;  %v2290_v13 = vmul.f32 -1.442695, %v363_v1  ;;  %v2293_v15 = vmul.f32 -1.442695, %v366_v4  ;;  %v239_v25 = vmul.f32 %v2918_v8, %v110_v18 }
  0x9c   :  { %v2577_v43 = vpop.eup %2576  ;;  %2602 = vpow2.f32 %v2279_v3  ;;  %v2289_v3 = vmul.f32 -1.442695, %v362_v54  ;;  %v2292_v17 = vmul.f32 -1.442695, %v365_v7  ;;  %v241_v32 = vmul.f32 %v2918_v8, %v112_v22  ;;  %v116_v54 = vld [vmem:[%s4516_s1 + $0x2b8] sm:$0xff]  ;;  %v118_v7 = vld [vmem:[%s4516_s1 + $0x2c8] sm:$0xff] }
  0x9d   :  { %v2579_v48 = vpop.eup %2578  ;;  %2604 = vpow2.f32 %v2278_v20  ;;  %v109_v20 = vld [vmem:[%s4516_s1 + $0x280] sm:$0xff]  ;;  %v240_v35 = vmul.f32 %v2918_v8, %v111_v26  ;;  %v243_v46 = vmul.f32 %v2918_v8, %v114_v36  ;;  %v242_v59 = vmul.f32 %v2918_v8, %v113_v47 }
  0x9e   :  { %v2581_v52 = vpop.eup %2580  ;;  %1568 = vperm.xlu1 %2345, %v2575_v38   ;;  %2606 = vpow2.f32 %v2281_v34  ;;  %v238_v29 = vmul.f32 %v2918_v8, %v109_v20  ;;  %v370_v45 = vadd.f32 %v2924_v11, %v241_v32  ;;  %v1187_v47 = vld [vmem:[%s4515_s0 + $0x20] sm:$0xff] }
  0x9f   :  { %v2583_v56 = vpop.eup %2582  ;;  %1563 = vperm.xlu0 %2344, %v2577_v43   ;;  %2608 = vpow2.f32 %v2280_v39  ;;  %v368_v39 = vadd.f32 %v2924_v11, %v239_v25  ;;  %v369_v50 = vadd.f32 %v2924_v11, %v240_v35  ;;  %v372_v1 = vadd.f32 %v2924_v11, %v243_v46 }
  0xa0   :  { %v2585_v60 = vpop.eup %2584  ;;  %2610 = vpow2.f32 %v2283_v44  ;;  %v367_v42 = vadd.f32 %v2924_v11, %v238_v29  ;;  %v247_v25 = vmul.f32 %v2918_v8, %v118_v7 }
  0xa1   :  { %v2587_v63 = vpop.eup %2586  ;;  %2612 = vpow2.f32 %v2282_v49 }
  0xa2   :  { %v2589_v2 = vpop.eup %2588  ;;  %1578 = vperm.xlu1 %2345, %v2579_v48   ;;  %2614 = vpow2.f32 %v2285_v53  ;;  %v3350_v53 = vmul.f32 -1.442695, %v368_v39  ;;  %v3358_v58 = vmul.f32 -1.442695, %v367_v42  ;;  %v121_v39 = vld [vmem:[%s4516_s1 + $0x2e0] sm:$0xff]  ;;  %v1188_v42 = vld [vmem:[%s4515_s0 + $0x28] sm:$0xff] }
  0xa3   :  { %v2591_v5 = vpop.eup %2590  ;;  %1573 = vperm.xlu0 %2344, %v2581_v52   ;;  %2616 = vpow2.f32 %v2284_v57 }
  0xa4   :  { %v2593_v9 = vpop.eup %2592  ;;  %2618 = vpow2.f32 %v2287_v61 }
  0xa5   :  { %v2595_v12 = vpop.eup %2594  ;;  %2620 = vpow2.f32 %v2286_v0  ;;  %v3367_v0 = vmul.f32 -1.442695, %v370_v45  ;;  %v124_v45 = vld [vmem:[%s4516_s1 + $0x2f8] sm:$0xff] }
  0xa6   :  { %v2597_v14 = vpop.eup %2596  ;;  %1588 = vperm.xlu1 %2345, %v2583_v56   ;;  %2622 = vpow2.f32 %v2289_v3  ;;  %v1185_v56 = vld [vmem:[%s4515_s0 + $0x10] sm:$0xff] }
  0xa7   :  { %v3319_v16 = vpop.eup %2598  ;;  %1583 = vperm.xlu0 %2344, %v2585_v60   ;;  %2624 = vpow2.f32 %v2288_v6  ;;  %v115_v60 = vld [vmem:[%s4516_s1 + $0x2b0] sm:$0xff]  ;;  %v245_v6 = vmul.f32 %v2918_v8, %v116_v54 }
  0xa8   :  { %v3324_v19 = vpop.eup %2600  ;;  %2626 = vpow2.f32 %v2291_v10 }
  0xa9   :  { %v2603_v21 = vpop.eup %2602  ;;  %2628 = vpow2.f32 %v2290_v13 }
  0xaa   :  { %v2605_v23 = vpop.eup %2604  ;;  %1598 = vperm.xlu1 %2345, %v2587_v63   ;;  %v864_v24 = vadd.f32 1.0, %v2603_v21  ;;  %2630 = vpow2.f32 %v2293_v15  ;;  %v244_v15 = vmul.f32 %v2918_v8, %v115_v60  ;;  %v1186_v21 = vld [vmem:[%s4515_s0 + $0x18] sm:$0xff] }
  0xab   :  { %v2607_v27 = vpop.eup %2606  ;;  %1593 = vperm.xlu0 %2344, %v2589_v2   ;;  %v863_v28 = vadd.f32 1.0, %v2605_v23  ;;  %2632 = vpow2.f32 %v2292_v17  ;;  %v120_v17 = vld [vmem:[%s4516_s1 + $0x2d8] sm:$0xff] }
  0xac   :  { %v2609_v30 = vpop.eup %2608  ;;  %2634 = vrcp.f32 %v864_v24  ;;  %v866_v31 = vadd.f32 1.0, %v2607_v27  ;;  %v1184_v24 = vld [vmem:[%s4515_s0 + $0x8] sm:$0xff]  ;;  %v119_v27 = vld [vmem:[%s4516_s1 + $0x2d0] sm:$0xff]  ;;  %v249_v32 = vmul.f32 %v2918_v8, %v120_v17 }
  0xad   :  { %v2611_v33 = vpop.eup %2610  ;;  %2636 = vrcp.f32 %v863_v28  ;;  %v865_v34 = vadd.f32 1.0, %v2609_v30 }
  0xae   :  { %v2613_v37 = vpop.eup %2612  ;;  %1608 = vperm.xlu1 %2345, %v2591_v5   ;;  %2638 = vrcp.f32 %v866_v31  ;;  %v868_v38 = vadd.f32 1.0, %v2611_v33  ;;  %v3370_v5 = vmul.f32 -1.442695, %v369_v50  ;;  %v374_v31 = vadd.f32 %v2924_v11, %v245_v6  ;;  %v122_v33 = vld [vmem:[%s4516_s1 + $0x2e8] sm:$0xff] }
  0xaf   :  { %v2615_v40 = vpop.eup %2614  ;;  %1603 = vperm.xlu0 %2344, %v2593_v9   ;;  %2640 = vrcp.f32 %v865_v34  ;;  %v867_v41 = vadd.f32 1.0, %v2613_v37  ;;  %v117_v9 = vld [vmem:[%s4516_s1 + $0x2c0] sm:$0xff]  ;;  %v2299_v37 = vmul.f32 -1.442695, %v372_v1  ;;  %v251_v50 = vmul.f32 %v2918_v8, %v122_v33 }
  0xb0   :  { %v2617_v43 = vpop.eup %2616  ;;  %2642 = vrcp.f32 %v868_v38  ;;  %v870_v44 = vadd.f32 1.0, %v2615_v40  ;;  %v246_v26 = vmul.f32 %v2918_v8, %v117_v9  ;;  %v373_v38 = vadd.f32 %v2924_v11, %v244_v15 }
  0xb1   :  { %v2619_v48 = vpop.eup %2618  ;;  %2644 = vrcp.f32 %v867_v41  ;;  %v869_v49 = vadd.f32 1.0, %v2617_v43  ;;  %v380_v7 = vadd.f32 %v2924_v11, %v251_v50  ;;  %v1196_v50 = vld [vmem:[%s4515_s0 + $0x68] sm:$0xff] }
  0xb2   :  { %v2621_v51 = vpop.eup %2620  ;;  %1618 = vperm.xlu1 %2345, %v2595_v12   ;;  %2646 = vrcp.f32 %v870_v44  ;;  %v872_v52 = vadd.f32 1.0, %v2619_v48  ;;  %v248_v44 = vmul.f32 %v2918_v8, %v119_v27  ;;  %v376_v48 = vadd.f32 %v2924_v11, %v247_v25 }
  0xb3   :  { %v2623_v55 = vpop.eup %2622  ;;  %1613 = vperm.xlu0 %2344, %v2597_v14   ;;  %2648 = vrcp.f32 %v869_v49  ;;  %v871_v57 = vadd.f32 1.0, %v2621_v51  ;;  %v375_v49 = vadd.f32 %v2924_v11, %v246_v26  ;;  %v123_v51 = vld [vmem:[%s4516_s1 + $0x2f0] sm:$0xff]  ;;  %v2307_v25 = vmul.f32 -1.442695, %v380_v7  ;;  %v126_v26 = vld [vmem:[%s4516_s1 + $0x308] sm:$0xff] }
  0xb4   :  { %v2625_v61 = vpop.eup %2624  ;;  %2650 = vrcp.f32 %v872_v52  ;;  %v874_v63 = vadd.f32 1.0, %v2623_v55  ;;  %v378_v55 = vadd.f32 %v2924_v11, %v249_v32  ;;  %v2303_v6 = vmul.f32 -1.442695, %v376_v48 }
  0xb5   :  { %v2627_v2 = vpop.eup %2626  ;;  %v1324_v3 = vpop.permute.xlu1 %1323  ;;  %2652 = vrcp.f32 %v871_v57  ;;  %v873_v4 = vadd.f32 1.0, %v2625_v61  ;;  %v2300_v61 = vmul.f32 -1.442695, %v373_v38  ;;  %v255_v38 = vmul.f32 %v2918_v8, %v126_v26 }
  0xb6   :  { %v2629_v10 = vpop.eup %2628  ;;  %v1953_v12 = vmul.f32 %v1324_v3, %v1185_v56  ;;  %v1314_v13 = vpop.permute.xlu0 %1313  ;;  %1628 = vperm.xlu1 %2345, %v3319_v16   ;;  %2654 = vrcp.f32 %v874_v63  ;;  %v876_v14 = vadd.f32 1.0, %v2627_v2  ;;  %v371_v16 = vadd.f32 %v2924_v11, %v242_v59 }
  0xb7   :  { %v2631_v18 = vpop.eup %2630  ;;  %v1951_v20 = vmul.f32 %v1314_v13, %v1183_v62  ;;  %1623 = vperm.xlu0 %2344, %v3324_v19   ;;  %2656 = vrcp.f32 %v873_v4  ;;  %v875_v22 = vadd.f32 1.0, %v2629_v10  ;;  %v250_v56 = vmul.f32 %v2918_v8, %v121_v39 }
  0xb8   :  { %v2633_v23 = vpop.eup %2632  ;;  %2082 = vst.msk [vmem:[%s4518_s3 + $0x10] sm:$0xff] %vm2079_vm0, %v1953_v12  ;;  %2658 = vrcp.f32 %v876_v14  ;;  %v878_v19 = vadd.f32 1.0, %v2631_v18  ;;  %v2298_v43 = vmul.f32 -1.442695, %v371_v16  ;;  %v253_v62 = vmul.f32 %v2918_v8, %v124_v45 }
  0xb9   :  { %v2635_v28 = vpop.eup %2634  ;;  %2080 = vst.msk [vmem:[%s4518_s3] sm:$0xff] %vm2079_vm0, %v1951_v20  ;;  %v1329_v29 = vpop.permute.xlu1 %1328  ;;  %2660 = vrcp.f32 %v875_v22  ;;  %v877_v30 = vadd.f32 1.0, %v2633_v23  ;;  %v377_v2 = vadd.f32 %v2924_v11, %v248_v44  ;;  %v252_v3 = vmul.f32 %v2918_v8, %v123_v51  ;;  %v1192_v22 = vld [vmem:[%s4515_s0 + $0x48] sm:$0xff] }
  0xba   :  { %v2637_v34 = vpop.eup %2636  ;;  %v1954_v35 = vmul.f32 %v1329_v29, %v1186_v21  ;;  %v1319_v36 = vpop.permute.xlu0 %1318  ;;  %1638 = vperm.xlu1 %2345, %v2635_v28   ;;  %2662 = vrcp.f32 %v878_v19  ;;  %v2302_v10 = vmul.f32 -1.442695, %v375_v49  ;;  %v379_v12 = vadd.f32 %v2924_v11, %v250_v56  ;;  %v1191_v19 = vld [vmem:[%s4515_s0 + $0x40] sm:$0xff] }
  0xbb   :  { %v2639_v40 = vpop.eup %2638  ;;  %v1952_v41 = vmul.f32 %v1319_v36, %v1184_v24  ;;  %1633 = vperm.xlu0 %2344, %v2637_v34   ;;  %2664 = vrcp.f32 %v877_v30  ;;  %v2305_v17 = vmul.f32 -1.442695, %v378_v55  ;;  %v382_v18 = vadd.f32 %v2924_v11, %v253_v62  ;;  %v1194_v36 = vld [vmem:[%s4515_s0 + $0x58] sm:$0xff] }
  0xbc   :  { %v2641_v46 = vpop.eup %2640  ;;  %2083 = vst.msk [vmem:[%s4518_s3 + $0x18] sm:$0xff] %vm2079_vm0, %v1954_v35  ;;  %2666 = vpow2.f32 %v3350_v53  ;;  %v2301_v53 = vmul.f32 -1.442695, %v374_v31  ;;  %v2304_v16 = vmul.f32 -1.442695, %v377_v2  ;;  %v381_v23 = vadd.f32 %v2924_v11, %v252_v3  ;;  %v127_v2 = vld [vmem:[%s4516_s1 + $0x310] sm:$0xff] }
  0xbd   :  { %v2643_v52 = vpop.eup %2642  ;;  %2081 = vst.msk [vmem:[%s4518_s3 + $0x8] sm:$0xff] %vm2079_vm0, %v1952_v41  ;;  %v1339_v54 = vpop.permute.xlu1 %1338  ;;  %2668 = vpow2.f32 %v3358_v58  ;;  %v1190_v58 = vld [vmem:[%s4515_s0 + $0x38] sm:$0xff]  ;;  %v2306_v29 = vmul.f32 -1.442695, %v379_v12  ;;  %v2309_v33 = vmul.f32 -1.442695, %v382_v18 }
  0xbe   :  { %v2645_v57 = vpop.eup %2644  ;;  %v1956_v59 = vmul.f32 %v1339_v54, %v1188_v42  ;;  %v1334_v60 = vpop.permute.xlu0 %1333  ;;  %1648 = vperm.xlu1 %2345, %v2639_v40   ;;  %2670 = vpow2.f32 %v3367_v0  ;;  %v1189_v0 = vld [vmem:[%s4515_s0 + $0x30] sm:$0xff]  ;;  %v130_v3 = vld [vmem:[%s4516_s1 + $0x328] sm:$0xff] }
  0xbf   :  { %v2647_v63 = vpop.eup %2646  ;;  %v1955_v1 = vmul.f32 %v1334_v60, %v1187_v47  ;;  %1643 = vperm.xlu0 %2344, %v2641_v46   ;;  %2672 = vpow2.f32 %v3370_v5  ;;  %v1193_v40 = vld [vmem:[%s4515_s0 + $0x50] sm:$0xff] }
  0xc0   :  { %v2649_v4 = vpop.eup %2648  ;;  %2085 = vst.msk [vmem:[%s4518_s3 + $0x28] sm:$0xff] %vm2079_vm0, %v1956_v59  ;;  %2674 = vpow2.f32 %v2299_v37  ;;  %v2308_v37 = vmul.f32 -1.442695, %v381_v23  ;;  %v1197_v12 = vld [vmem:[%s4515_s0 + $0x70] sm:$0xff] }
  0xc1   :  { %v2651_v9 = vpop.eup %2650  ;;  %2084 = vst.msk [vmem:[%s4518_s3 + $0x20] sm:$0xff] %vm2079_vm0, %v1955_v1  ;;  %v1349_v5 = vpop.permute.xlu1 %1348  ;;  %2676 = vpow2.f32 %v2298_v43  ;;  %v125_v43 = vld [vmem:[%s4516_s1 + $0x300] sm:$0xff] }
  0xc2   :  { %v2653_v13 = vpop.eup %2652  ;;  %v1958_v14 = vmul.f32 %v1349_v5, %v1190_v58  ;;  %v1344_v15 = vpop.permute.xlu0 %1343  ;;  %1658 = vperm.xlu1 %2345, %v2643_v52   ;;  %2678 = vpow2.f32 %v2301_v53  ;;  %v384_v52 = vadd.f32 %v2924_v11, %v255_v38  ;;  %v1195_v53 = vld [vmem:[%s4515_s0 + $0x60] sm:$0xff]  ;;  %v254_v56 = vmul.f32 %v2918_v8, %v125_v43  ;;  %v131_v38 = vld [vmem:[%s4516_s1 + $0x330] sm:$0xff] }
  0xc3   :  { %v3464_v20 = vpop.eup %2654  ;;  %v1957_v21 = vmul.f32 %v1344_v15, %v1189_v0  ;;  %1653 = vperm.xlu0 %2344, %v2645_v57   ;;  %2680 = vpow2.f32 %v2300_v61  ;;  %v128_v61 = vld [vmem:[%s4516_s1 + $0x318] sm:$0xff]  ;;  %v129_v5 = vld [vmem:[%s4516_s1 + $0x320] sm:$0xff] }
  0xc4   :  { %v3470_v24 = vpop.eup %2656  ;;  %2087 = vst.msk [vmem:[%s4518_s3 + $0x38] sm:$0xff] %vm2079_vm0, %v1958_v14  ;;  %2682 = vpow2.f32 %v2303_v6  ;;  %v1198_v6 = vld [vmem:[%s4515_s0 + $0x78] sm:$0xff]  ;;  %v383_v14 = vadd.f32 %v2924_v11, %v254_v56  ;;  %v257_v15 = vmul.f32 %v2918_v8, %v128_v61  ;;  %v258_v26 = vmul.f32 %v2918_v8, %v129_v5 }
  0xc5   :  { %v3482_v27 = vpop.eup %2658  ;;  %2086 = vst.msk [vmem:[%s4518_s3 + $0x30] sm:$0xff] %vm2079_vm0, %v1957_v21  ;;  %v1359_v28 = vpop.permute.xlu1 %1358  ;;  %2684 = vpow2.f32 %v2302_v10  ;;  %v136_v56 = vld [vmem:[%s4516_s1 + $0x358] sm:$0xff] }
  0xc6   :  { %v3488_v30 = vpop.eup %2660  ;;  %v1960_v31 = vmul.f32 %v1359_v28, %v1192_v22  ;;  %v1354_v32 = vpop.permute.xlu0 %1353  ;;  %1668 = vperm.xlu1 %2345, %v2647_v63   ;;  %2686 = vpow2.f32 %v2305_v17  ;;  %v132_v17 = vld [vmem:[%s4516_s1 + $0x338] sm:$0xff]  ;;  %v256_v22 = vmul.f32 %v2918_v8, %v127_v2 }
  0xc7   :  { %v3490_v34 = vpop.eup %2662  ;;  %v1959_v35 = vmul.f32 %v1354_v32, %v1191_v19  ;;  %1663 = vperm.xlu0 %2344, %v2649_v4   ;;  %2688 = vpow2.f32 %v2304_v16  ;;  %v259_v16 = vmul.f32 %v2918_v8, %v130_v3 }
  0xc8   :  { %v3496_v39 = vpop.eup %2664  ;;  %2089 = vst.msk [vmem:[%s4518_s3 + $0x48] sm:$0xff] %vm2079_vm0, %v1960_v31  ;;  %2690 = vpow2.f32 %v2307_v25  ;;  %v1200_v31 = vld [vmem:[%s4515_s0 + $0x88] sm:$0xff]  ;;  %v385_v43 = vadd.f32 %v2924_v11, %v256_v22 }
  0xc9   :  { %v2667_v41 = vpop.eup %2666  ;;  %2088 = vst.msk [vmem:[%s4518_s3 + $0x40] sm:$0xff] %vm2079_vm0, %v1959_v35  ;;  %v1369_v42 = vpop.permute.xlu1 %1368  ;;  %2692 = vpow2.f32 %v2306_v29 }
  0xca   :  { %v2669_v44 = vpop.eup %2668  ;;  %v1962_v45 = vmul.f32 %v1369_v42, %v1194_v36  ;;  %v1364_v46 = vpop.permute.xlu0 %1363  ;;  %1678 = vperm.xlu1 %2345, %v2651_v9   ;;  %v880_v47 = vadd.f32 1.0, %v2667_v41  ;;  %2694 = vpow2.f32 %v2309_v33  ;;  %v3542_v9 = vmul.f32 -1.442695, %v384_v52 }
  0xcb   :  { %v2671_v48 = vpop.eup %2670  ;;  %v1961_v49 = vmul.f32 %v1364_v46, %v1193_v40  ;;  %1673 = vperm.xlu0 %2344, %v2653_v13   ;;  %v879_v51 = vadd.f32 1.0, %v2669_v44  ;;  %2696 = vpow2.f32 %v2308_v37  ;;  %v261_v33 = vmul.f32 %v2918_v8, %v132_v17 }
  0xcc   :  { %v2673_v54 = vpop.eup %2672  ;;  %2091 = vst.msk [vmem:[%s4518_s3 + $0x58] sm:$0xff] %vm2079_vm0, %v1962_v45  ;;  %2698 = vrcp.f32 %v880_v47  ;;  %v882_v55 = vadd.f32 1.0, %v2671_v48  ;;  %v3579_v36 = vmul.f32 -1.442695, %v383_v14  ;;  %v386_v37 = vadd.f32 %v2924_v11, %v257_v15  ;;  %v134_v45 = vld [vmem:[%s4516_s1 + $0x348] sm:$0xff] }
  0xcd   :  { %v2675_v57 = vpop.eup %2674  ;;  %2090 = vst.msk [vmem:[%s4518_s3 + $0x50] sm:$0xff] %vm2079_vm0, %v1961_v49  ;;  %v1379_v59 = vpop.permute.xlu1 %1378  ;;  %2700 = vrcp.f32 %v879_v51  ;;  %v881_v60 = vadd.f32 1.0, %v2673_v54  ;;  %v388_v44 = vadd.f32 %v2924_v11, %v259_v16  ;;  %v133_v51 = vld [vmem:[%s4516_s1 + $0x340] sm:$0xff]  ;;  %v263_v61 = vmul.f32 %v2918_v8, %v134_v45  ;;  %v1204_v15 = vld [vmem:[%s4515_s0 + $0xa8] sm:$0xff] }
  0xce   :  { %v2677_v62 = vpop.eup %2676  ;;  %v1964_v63 = vmul.f32 %v1379_v59, %v1196_v50  ;;  %v1374_v1 = vpop.permute.xlu0 %1373  ;;  %1688 = vperm.xlu1 %2345, %v3464_v20   ;;  %2702 = vrcp.f32 %v882_v55  ;;  %v884_v58 = vadd.f32 1.0, %v2675_v57  ;;  %v387_v50 = vadd.f32 %v2924_v11, %v258_v26 }
  0xcf   :  { %v2679_v4 = vpop.eup %2678  ;;  %v1963_v0 = vmul.f32 %v1374_v1, %v1195_v53  ;;  %1683 = vperm.xlu0 %2344, %v3470_v24   ;;  %2704 = vrcp.f32 %v881_v60  ;;  %v883_v7 = vadd.f32 1.0, %v2677_v62  ;;  %v1202_v53 = vld [vmem:[%s4515_s0 + $0x98] sm:$0xff]  ;;  %v390_v60 = vadd.f32 %v2924_v11, %v261_v33  ;;  %v135_v62 = vld [vmem:[%s4516_s1 + $0x350] sm:$0xff] }
  0xd0   :  { %v2681_v10 = vpop.eup %2680  ;;  %2093 = vst.msk [vmem:[%s4518_s3 + $0x68] sm:$0xff] %vm2079_vm0, %v1964_v63  ;;  %2706 = vrcp.f32 %v884_v58  ;;  %v886_v13 = vadd.f32 1.0, %v2679_v4  ;;  %v2313_v2 = vmul.f32 -1.442695, %v386_v37  ;;  %v262_v3 = vmul.f32 %v2918_v8, %v133_v51  ;;  %v138_v4 = vld [vmem:[%s4516_s1 + $0x368] sm:$0xff] }
  0xd1   :  { %v2683_v18 = vpop.eup %2682  ;;  %2092 = vst.msk [vmem:[%s4518_s3 + $0x60] sm:$0xff] %vm2079_vm0, %v1963_v0  ;;  %v1389_v20 = vpop.permute.xlu1 %1388  ;;  %2708 = vrcp.f32 %v883_v7  ;;  %v885_v21 = vadd.f32 1.0, %v2681_v10  ;;  %v2312_v5 = vmul.f32 -1.442695, %v385_v43  ;;  %v265_v10 = vmul.f32 %v2918_v8, %v136_v56 }
  0xd2   :  { %v2685_v23 = vpop.eup %2684  ;;  %v1966_v24 = vmul.f32 %v1389_v20, %v1198_v6  ;;  %v1384_v19 = vpop.permute.xlu0 %1383  ;;  %1698 = vperm.xlu1 %2345, %v3482_v27   ;;  %2710 = vrcp.f32 %v886_v13  ;;  %v888_v25 = vadd.f32 1.0, %v2683_v18  ;;  %v1199_v27 = vld [vmem:[%s4515_s0 + $0x80] sm:$0xff]  ;;  %v264_v18 = vmul.f32 %v2918_v8, %v135_v62 }
  0xd3   :  { %v2687_v28 = vpop.eup %2686  ;;  %v1965_v29 = vmul.f32 %v1384_v19, %v1197_v12  ;;  %1693 = vperm.xlu0 %2344, %v3488_v30   ;;  %2712 = vrcp.f32 %v885_v21  ;;  %v887_v32 = vadd.f32 1.0, %v2685_v23  ;;  %v137_v12 = vld [vmem:[%s4516_s1 + $0x360] sm:$0xff]  ;;  %v2315_v22 = vmul.f32 -1.442695, %v388_v44 }
  0xd4   :  { %v2689_v35 = vpop.eup %2688  ;;  %2095 = vst.msk [vmem:[%s4518_s3 + $0x78] sm:$0xff] %vm2079_vm0, %v1966_v24  ;;  %2714 = vrcp.f32 %v888_v25  ;;  %v890_v30 = vadd.f32 1.0, %v2687_v28  ;;  %v1203_v21 = vld [vmem:[%s4515_s0 + $0xa0] sm:$0xff]  ;;  %v392_v16 = vadd.f32 %v2924_v11, %v263_v61  ;;  %v267_v23 = vmul.f32 %v2918_v8, %v138_v4 }
  0xd5   :  { %v2691_v40 = vpop.eup %2690  ;;  %2094 = vst.msk [vmem:[%s4518_s3 + $0x70] sm:$0xff] %vm2079_vm0, %v1965_v29  ;;  %v1399_v41 = vpop.permute.xlu1 %1398  ;;  %2716 = vrcp.f32 %v887_v32  ;;  %v889_v42 = vadd.f32 1.0, %v2689_v35  ;;  %v2314_v25 = vmul.f32 -1.442695, %v387_v50  ;;  %v391_v26 = vadd.f32 %v2924_v11, %v262_v3 }
  0xd6   :  { %v2693_v46 = vpop.eup %2692  ;;  %v1968_v47 = vmul.f32 %v1399_v41, %v1200_v31  ;;  %v1394_v48 = vpop.permute.xlu0 %1393  ;;  %1708 = vperm.xlu1 %2345, %v3490_v34   ;;  %2718 = vrcp.f32 %v890_v30  ;;  %v892_v49 = vadd.f32 1.0, %v2691_v40  ;;  %v260_v34 = vmul.f32 %v2918_v8, %v131_v38  ;;  %v1206_v30 = vld [vmem:[%s4515_s0 + $0xb8] sm:$0xff]  ;;  %v1205_v40 = vld [vmem:[%s4515_s0 + $0xb0] sm:$0xff] }
  0xd7   :  { %v2695_v52 = vpop.eup %2694  ;;  %v1967_v54 = vmul.f32 %v1394_v48, %v1199_v27  ;;  %1703 = vperm.xlu0 %2344, %v3496_v39   ;;  %2720 = vrcp.f32 %v889_v42  ;;  %v891_v55 = vadd.f32 1.0, %v2693_v46  ;;  %v1201_v39 = vld [vmem:[%s4515_s0 + $0x90] sm:$0xff]  ;;  %v266_v28 = vmul.f32 %v2918_v8, %v137_v12 }
  0xd8   :  { %v2697_v57 = vpop.eup %2696  ;;  %2097 = vst.msk [vmem:[%s4518_s3 + $0x88] sm:$0xff] %vm2079_vm0, %v1968_v47  ;;  %2722 = vrcp.f32 %v892_v49  ;;  %v894_v59 = vadd.f32 1.0, %v2695_v52  ;;  %v389_v17 = vadd.f32 %v2924_v11, %v260_v34  ;;  %v2317_v32 = vmul.f32 -1.442695, %v390_v60  ;;  %v140_v47 = vld [vmem:[%s4516_s1 + $0x378] sm:$0xff]  ;;  %v139_v52 = vld [vmem:[%s4516_s1 + $0x370] sm:$0xff] }
  0xd9   :  { %v2699_v63 = vpop.eup %2698  ;;  %2096 = vst.msk [vmem:[%s4518_s3 + $0x80] sm:$0xff] %vm2079_vm0, %v1967_v54  ;;  %v1409_v1 = vpop.permute.xlu1 %1408  ;;  %2724 = vrcp.f32 %v891_v55  ;;  %v893_v58 = vadd.f32 1.0, %v2697_v57  ;;  %v394_v33 = vadd.f32 %v2924_v11, %v265_v10  ;;  %v393_v37 = vadd.f32 %v2924_v11, %v264_v18  ;;  %v1208_v55 = vld [vmem:[%s4515_s0 + $0xc8] sm:$0xff]  ;;  %v1207_v57 = vld [vmem:[%s4515_s0 + $0xc0] sm:$0xff] }
  0xda   :  { %v2701_v0 = vpop.eup %2700  ;;  %v1970_v6 = vmul.f32 %v1409_v1, %v1202_v53  ;;  %v1404_v7 = vpop.permute.xlu0 %1403  ;;  %1718 = vperm.xlu1 %2345, %v2699_v63   ;;  %2726 = vrcp.f32 %v894_v59  ;;  %v2319_v41 = vmul.f32 -1.442695, %v392_v16  ;;  %v396_v42 = vadd.f32 %v2924_v11, %v267_v23  ;;  %v142_v23 = vld [vmem:[%s4516_s1 + $0x388] sm:$0xff] }
  0xdb   :  { %v2703_v13 = vpop.eup %2702  ;;  %v1969_v14 = vmul.f32 %v1404_v7, %v1201_v39  ;;  %1713 = vperm.xlu0 %2344, %v2701_v0   ;;  %2728 = vrcp.f32 %v893_v58  ;;  %v2318_v45 = vmul.f32 -1.442695, %v391_v26  ;;  %v395_v46 = vadd.f32 %v2924_v11, %v266_v28  ;;  %v1210_v0 = vld [vmem:[%s4515_s0 + $0xd8] sm:$0xff]  ;;  %v1209_v7 = vld [vmem:[%s4515_s0 + $0xd0] sm:$0xff]  ;;  %v141_v28 = vld [vmem:[%s4516_s1 + $0x380] sm:$0xff] }
  0xdc   :  { %v2705_v20 = vpop.eup %2704  ;;  %2099 = vst.msk [vmem:[%s4518_s3 + $0x98] sm:$0xff] %vm2079_vm0, %v1970_v6  ;;  %2730 = vpow2.f32 %v3542_v9  ;;  %v2321_v51 = vmul.f32 -1.442695, %v394_v33  ;;  %v2320_v34 = vmul.f32 -1.442695, %v393_v37  ;;  %v269_v59 = vmul.f32 %v2918_v8, %v140_v47  ;;  %v144_v37 = vld [vmem:[%s4516_s1 + $0x398] sm:$0xff] }
  0xdd   :  { %v2707_v24 = vpop.eup %2706  ;;  %2098 = vst.msk [vmem:[%s4518_s3 + $0x90] sm:$0xff] %vm2079_vm0, %v1969_v14  ;;  %v1419_v19 = vpop.permute.xlu1 %1418  ;;  %2732 = vpow2.f32 %v3579_v36  ;;  %v2316_v36 = vmul.f32 -1.442695, %v389_v17  ;;  %v2323_v39 = vmul.f32 -1.442695, %v396_v42  ;;  %v268_v63 = vmul.f32 %v2918_v8, %v139_v52  ;;  %v1214_v42 = vld [vmem:[%s4515_s0 + $0xf8] sm:$0xff] }
  0xde   :  { %v2709_v9 = vpop.eup %2708  ;;  %v1972_v29 = vmul.f32 %v1419_v19, %v1204_v15  ;;  %v1414_v31 = vpop.permute.xlu0 %1413  ;;  %1728 = vperm.xlu1 %2345, %v2703_v13   ;;  %2734 = vpow2.f32 %v2313_v2  ;;  %v2322_v62 = vmul.f32 -1.442695, %v395_v46  ;;  %v1211_v19 = vld [vmem:[%s4515_s0 + $0xe0] sm:$0xff]  ;;  %v1213_v46 = vld [vmem:[%s4515_s0 + $0xf0] sm:$0xff] }
  0xdf   :  { %v2711_v35 = vpop.eup %2710  ;;  %v1971_v27 = vmul.f32 %v1414_v31, %v1203_v21  ;;  %1723 = vperm.xlu0 %2344, %v2705_v20   ;;  %2736 = vpow2.f32 %v2312_v5  ;;  %v398_v5 = vadd.f32 %v2924_v11, %v269_v59  ;;  %v397_v13 = vadd.f32 %v2924_v11, %v268_v63 }
  0xe0   :  { %v2713_v38 = vpop.eup %2712  ;;  %2101 = vst.msk [vmem:[%s4518_s3 + $0xa8] sm:$0xff] %vm2079_vm0, %v1972_v29  ;;  %2738 = vpow2.f32 %v2315_v22  ;;  %v1212_v22 = vld [vmem:[%s4515_s0 + $0xe8] sm:$0xff] }
  0xe1   :  { %v2715_v43 = vpop.eup %2714  ;;  %2100 = vst.msk [vmem:[%s4518_s3 + $0xa0] sm:$0xff] %vm2079_vm0, %v1971_v27  ;;  %v1429_v44 = vpop.permute.xlu1 %1428  ;;  %2740 = vpow2.f32 %v2314_v25  ;;  %v2325_v26 = vmul.f32 -1.442695, %v398_v5  ;;  %v147_v5 = vld [vmem:[%s4516_s1 + $0x3b0] sm:$0xff] }
  0xe2   :  { %v2717_v48 = vpop.eup %2716  ;;  %v1974_v49 = vmul.f32 %v1429_v44, %v1206_v30  ;;  %v1424_v50 = vpop.permute.xlu0 %1423  ;;  %1738 = vperm.xlu1 %2345, %v2707_v24   ;;  %2742 = vpow2.f32 %v2317_v32  ;;  %v2324_v32 = vmul.f32 -1.442695, %v397_v13  ;;  %v270_v44 = vmul.f32 %v2918_v8, %v141_v28 }
  0xe3   :  { %v3677_v54 = vpop.eup %2718  ;;  %v1973_v53 = vmul.f32 %v1424_v50, %v1205_v40  ;;  %1733 = vperm.xlu0 %2344, %v2709_v9   ;;  %2744 = vpow2.f32 %v2316_v36  ;;  %v271_v36 = vmul.f32 %v2918_v8, %v142_v23  ;;  %v149_v23 = vld [vmem:[%s4516_s1 + $0x3c0] sm:$0xff] }
  0xe4   :  { %v3682_v56 = vpop.eup %2720  ;;  %2103 = vst.msk [vmem:[%s4518_s3 + $0xb8] sm:$0xff] %vm2079_vm0, %v1974_v49  ;;  %2746 = vpow2.f32 %v2319_v41 }
  0xe5   :  { %v3692_v60 = vpop.eup %2722  ;;  %2102 = vst.msk [vmem:[%s4518_s3 + $0xb0] sm:$0xff] %vm2079_vm0, %v1973_v53  ;;  %v1439_v61 = vpop.permute.xlu1 %1438  ;;  %2748 = vpow2.f32 %v2318_v45  ;;  %v145_v53 = vld [vmem:[%s4516_s1 + $0x3a0] sm:$0xff] }
  0xe6   :  { %v3699_v1 = vpop.eup %2724  ;;  %v1976_v58 = vmul.f32 %v1439_v61, %v1208_v55  ;;  %v1434_v2 = vpop.permute.xlu0 %1433  ;;  %1748 = vperm.xlu1 %2345, %v2711_v35   ;;  %2750 = vpow2.f32 %v2321_v51  ;;  %v273_v51 = vmul.f32 %v2918_v8, %v144_v37 }
  0xe7   :  { %v3701_v3 = vpop.eup %2726  ;;  %v1975_v4 = vmul.f32 %v1434_v2, %v1207_v57  ;;  %1743 = vperm.xlu0 %2344, %v2713_v38   ;;  %2752 = vpow2.f32 %v2320_v34  ;;  %v143_v38 = vld [vmem:[%s4516_s1 + $0x390] sm:$0xff] }
  0xe8   :  { %v3706_v6 = vpop.eup %2728  ;;  %2105 = vst.msk [vmem:[%s4518_s3 + $0xc8] sm:$0xff] %vm2079_vm0, %v1976_v58  ;;  %2754 = vpow2.f32 %v2323_v39  ;;  %v272_v52 = vmul.f32 %v2918_v8, %v143_v38  ;;  %v400_v39 = vadd.f32 %v2924_v11, %v271_v36  ;;  %v399_v58 = vadd.f32 %v2924_v11, %v270_v44  ;;  %v1220_v44 = vld [vmem:[%s4515_s0 + $0x128] sm:$0xff] }
  0xe9   :  { %v2731_v10 = vpop.eup %2730  ;;  %2104 = vst.msk [vmem:[%s4518_s3 + $0xc0] sm:$0xff] %vm2079_vm0, %v1975_v4  ;;  %v1449_v12 = vpop.permute.xlu1 %1448  ;;  %2756 = vpow2.f32 %v2322_v62  ;;  %v1216_v62 = vld [vmem:[%s4515_s0 + $0x108] sm:$0xff] }
  0xea   :  { %v2733_v14 = vpop.eup %2732  ;;  %v1978_v15 = vmul.f32 %v1449_v12, %v1210_v0  ;;  %v1444_v17 = vpop.permute.xlu0 %1443  ;;  %1758 = vperm.xlu1 %2345, %v2715_v43   ;;  %v896_v18 = vadd.f32 1.0, %v2731_v10  ;;  %v2327_v28 = vmul.f32 -1.442695, %v400_v39 }
  0xeb   :  { %v2735_v20 = vpop.eup %2734  ;;  %v1977_v21 = vmul.f32 %v1444_v17, %v1209_v7  ;;  %1753 = vperm.xlu0 %2344, %v2717_v48   ;;  %v895_v16 = vadd.f32 1.0, %v2733_v14  ;;  %v274_v7 = vmul.f32 %v2918_v8, %v145_v53  ;;  %v402_v14 = vadd.f32 %v2924_v11, %v273_v51 }
  0xec   :  { %v2737_v24 = vpop.eup %2736  ;;  %2107 = vst.msk [vmem:[%s4518_s3 + $0xd8] sm:$0xff] %vm2079_vm0, %v1978_v15  ;;  %2758 = vrcp.f32 %v896_v18  ;;  %v898_v25 = vadd.f32 1.0, %v2735_v20  ;;  %v401_v15 = vadd.f32 %v2924_v11, %v272_v52 }
  0xed   :  { %v2739_v9 = vpop.eup %2738  ;;  %2106 = vst.msk [vmem:[%s4518_s3 + $0xd0] sm:$0xff] %vm2079_vm0, %v1977_v21  ;;  %v1459_v29 = vpop.permute.xlu1 %1458  ;;  %2760 = vrcp.f32 %v895_v16  ;;  %v897_v31 = vadd.f32 1.0, %v2737_v24  ;;  %v150_v16 = vld [vmem:[%s4516_s1 + $0x3c8] sm:$0xff]  ;;  %v2329_v38 = vmul.f32 -1.442695, %v402_v14 }
  0xee   :  { %v2741_v33 = vpop.eup %2740  ;;  %v1980_v35 = vmul.f32 %v1459_v29, %v1212_v22  ;;  %v1454_v27 = vpop.permute.xlu0 %1453  ;;  %1768 = vperm.xlu1 %2345, %v3677_v54   ;;  %2762 = vrcp.f32 %v898_v25  ;;  %v900_v30 = vadd.f32 1.0, %v2739_v9  ;;  %v146_v54 = vld [vmem:[%s4516_s1 + $0x3a8] sm:$0xff]  ;;  %v276_v25 = vmul.f32 %v2918_v8, %v147_v5 }
  0xef   :  { %v2743_v40 = vpop.eup %2742  ;;  %v1979_v41 = vmul.f32 %v1454_v27, %v1211_v19  ;;  %1763 = vperm.xlu0 %2344, %v3682_v56   ;;  %2764 = vrcp.f32 %v897_v31  ;;  %v899_v43 = vadd.f32 1.0, %v2741_v33  ;;  %v275_v0 = vmul.f32 %v2918_v8, %v146_v54  ;;  %v1218_v19 = vld [vmem:[%s4515_s0 + $0x118] sm:$0xff]  ;;  %v153_v54 = vld [vmem:[%s4516_s1 + $0x3e0] sm:$0xff] }
  0xf0   :  { %v2745_v45 = vpop.eup %2744  ;;  %2109 = vst.msk [vmem:[%s4518_s3 + $0xe8] sm:$0xff] %vm2079_vm0, %v1980_v35  ;;  %v902_v47 = vadd.f32 1.0, %v2743_v40  ;;  %2766 = vpow2.f32 %v2325_v26  ;;  %v1217_v26 = vld [vmem:[%s4515_s0 + $0x110] sm:$0xff]  ;;  %v403_v9 = vadd.f32 %v2924_v11, %v274_v7  ;;  %v279_v33 = vmul.f32 %v2918_v8, %v150_v16  ;;  %v152_v27 = vld [vmem:[%s4516_s1 + $0x3d8] sm:$0xff] }
  0xf1   :  { %v2747_v48 = vpop.eup %2746  ;;  %2108 = vst.msk [vmem:[%s4518_s3 + $0xe0] sm:$0xff] %vm2079_vm0, %v1979_v41  ;;  %v1469_v49 = vpop.permute.xlu1 %1468  ;;  %v901_v50 = vadd.f32 1.0, %v2745_v45  ;;  %2768 = vpow2.f32 %v2324_v32  ;;  %v2326_v32 = vmul.f32 -1.442695, %v399_v58  ;;  %v278_v35 = vmul.f32 %v2918_v8, %v149_v23  ;;  %v151_v41 = vld [vmem:[%s4516_s1 + $0x3d0] sm:$0xff] }
  0xf2   :  { %v2749_v55 = vpop.eup %2748  ;;  %v1982_v34 = vmul.f32 %v1469_v49, %v1214_v42  ;;  %v1464_v56 = vpop.permute.xlu0 %1463  ;;  %1778 = vperm.xlu1 %2345, %v3692_v60   ;;  %2770 = vrcp.f32 %v900_v30  ;;  %v904_v57 = vadd.f32 1.0, %v2747_v48  ;;  %v148_v60 = vld [vmem:[%s4516_s1 + $0x3b8] sm:$0xff]  ;;  %v2328_v45 = vmul.f32 -1.442695, %v401_v15  ;;  %v1219_v49 = vld [vmem:[%s4515_s0 + $0x120] sm:$0xff]  ;;  %v1221_v7 = vld [vmem:[%s4515_s0 + $0x130] sm:$0xff] }
  0xf3   :  { %v2751_v59 = vpop.eup %2750  ;;  %v1981_v61 = vmul.f32 %v1464_v56, %v1213_v46  ;;  %1773 = vperm.xlu0 %2344, %v3699_v1   ;;  %2772 = vrcp.f32 %v899_v43  ;;  %v903_v63 = vadd.f32 1.0, %v2749_v55  ;;  %v1215_v1 = vld [vmem:[%s4515_s0 + $0x100] sm:$0xff]  ;;  %v277_v22 = vmul.f32 %v2918_v8, %v148_v60  ;;  %v155_v23 = vld [vmem:[%s4516_s1 + $0x3f0] sm:$0xff] }
  0xf4   :  { %v2753_v2 = vpop.eup %2752  ;;  %2111 = vst.msk [vmem:[%s4518_s3 + $0xf8] sm:$0xff] %vm2079_vm0, %v1982_v34  ;;  %2774 = vrcp.f32 %v902_v47  ;;  %v906_v4 = vadd.f32 1.0, %v2751_v59  ;;  %v405_v46 = vadd.f32 %v2924_v11, %v276_v25  ;;  %v154_v47 = vld [vmem:[%s4516_s1 + $0x3e8] sm:$0xff]  ;;  %v2330_v51 = vmul.f32 -1.442695, %v403_v9 }
  0xf5   :  { %v2755_v10 = vpop.eup %2754  ;;  %2110 = vst.msk [vmem:[%s4518_s3 + $0xf0] sm:$0xff] %vm2079_vm0, %v1981_v61  ;;  %v1479_v12 = vpop.permute.xlu1 %1478  ;;  %2776 = vrcp.f32 %v901_v50  ;;  %v905_v13 = vadd.f32 1.0, %v2753_v2  ;;  %v406_v40 = vadd.f32 %v2924_v11, %v277_v22  ;;  %v281_v52 = vmul.f32 %v2918_v8, %v152_v27  ;;  %v1222_v2 = vld [vmem:[%s4515_s0 + $0x138] sm:$0xff] }
  0xf6   :  { %v2757_v17 = vpop.eup %2756  ;;  %v1984_v18 = vmul.f32 %v1479_v12, %v1216_v62  ;;  %v1474_v20 = vpop.permute.xlu0 %1473  ;;  %1788 = vperm.xlu1 %2345, %v3701_v3   ;;  %2778 = vrcp.f32 %v904_v57  ;;  %v908_v21 = vadd.f32 1.0, %v2755_v10  ;;  %v408_v34 = vadd.f32 %v2924_v11, %v279_v33 }
  0xf7   :  { %v1983_v24 = vmul.f32 %v1474_v20, %v1215_v1  ;;  %1783 = vperm.xlu0 %2344, %v3706_v6   ;;  %2780 = vrcp.f32 %v903_v63  ;;  %v907_v3 = vadd.f32 1.0, %v2757_v17  ;;  %v404_v6 = vadd.f32 %v2924_v11, %v275_v0  ;;  %v156_v17 = vld [vmem:[%s4516_s1 + $0x3f8] sm:$0xff] }
  0xf8   :  { %2113 = vst.msk [vmem:[%s4518_s3 + $0x108] sm:$0xff] %vm2079_vm0, %v1984_v18  ;;  %2782 = vrcp.f32 %v906_v4  ;;  %v407_v56 = vadd.f32 %v2924_v11, %v278_v35  ;;  %v280_v57 = vmul.f32 %v2918_v8, %v151_v41  ;;  %v2333_v62 = vmul.f32 -1.442695, %v406_v40  ;;  %v1226_v41 = vld [vmem:[%s4515_s0 + $0x158] sm:$0xff] }
  0xf9   :  { %v2759_v29 = vpop.eup %2758  ;;  %2112 = vst.msk [vmem:[%s4518_s3 + $0x100] sm:$0xff] %vm2079_vm0, %v1983_v24  ;;  %v1489_v31 = vpop.permute.xlu1 %1488  ;;  %2784 = vrcp.f32 %v905_v13  ;;  %v2331_v50 = vmul.f32 -1.442695, %v404_v6  ;;  %v283_v63 = vmul.f32 %v2918_v8, %v154_v47  ;;  %v2332_v1 = vmul.f32 -1.442695, %v405_v46  ;;  %v1223_v6 = vld [vmem:[%s4515_s0 + $0x140] sm:$0xff] }
  0xfa   :  { %v2761_v30 = vpop.eup %2760  ;;  %v1986_v36 = vmul.f32 %v1489_v31, %v1218_v19  ;;  %v1484_v37 = vpop.permute.xlu0 %1483  ;;  %1798 = vperm.xlu1 %2345, %v2759_v29   ;;  %2786 = vrcp.f32 %v908_v21  ;;  %v282_v4 = vmul.f32 %v2918_v8, %v153_v54  ;;  %v410_v10 = vadd.f32 %v2924_v11, %v281_v52 }
  0xfb   :  { %v2763_v42 = vpop.eup %2762  ;;  %v1985_v43 = vmul.f32 %v1484_v37, %v1217_v26  ;;  %1793 = vperm.xlu0 %2344, %v2761_v30   ;;  %2788 = vrcp.f32 %v907_v3  ;;  %v409_v15 = vadd.f32 %v2924_v11, %v280_v57  ;;  %v2335_v22 = vmul.f32 -1.442695, %v408_v34  ;;  %v1224_v3 = vld [vmem:[%s4515_s0 + $0x148] sm:$0xff] }
  0xfc   :  { %v2765_v48 = vpop.eup %2764  ;;  %2115 = vst.msk [vmem:[%s4518_s3 + $0x118] sm:$0xff] %vm2079_vm0, %v1986_v36  ;;  %2790 = vpow2.f32 %v2327_v28  ;;  %v412_v16 = vadd.f32 %v2924_v11, %v283_v63  ;;  %v2334_v25 = vmul.f32 -1.442695, %v407_v56  ;;  %v411_v26 = vadd.f32 %v2924_v11, %v282_v4 }
  0xfd   :  { %v2767_v53 = vpop.eup %2766  ;;  %2114 = vst.msk [vmem:[%s4518_s3 + $0x110] sm:$0xff] %vm2079_vm0, %v1985_v43  ;;  %v1499_v55 = vpop.permute.xlu1 %1498  ;;  %2792 = vpow2.f32 %v2326_v32  ;;  %v2337_v9 = vmul.f32 -1.442695, %v410_v10  ;;  %v285_v29 = vmul.f32 %v2918_v8, %v156_v17  ;;  %v2336_v33 = vmul.f32 -1.442695, %v409_v15  ;;  %v1229_v10 = vld [vmem:[%s4515_s0 + $0x170] sm:$0xff] }
  0xfe   :  { %v2769_v39 = vpop.eup %2768  ;;  %v1988_v59 = vmul.f32 %v1499_v55, %v1220_v44  ;;  %v1494_v61 = vpop.permute.xlu0 %1493  ;;  %1808 = vperm.xlu1 %2345, %v2763_v42   ;;  %2794 = vpow2.f32 %v2329_v38  ;;  %v910_v5 = vadd.f32 1.0, %v2767_v53  ;;  %v284_v35 = vmul.f32 %v2918_v8, %v155_v23  ;;  %v1225_v8 = vld [vmem:[%s4515_s0 + $0x150] sm:$0xff]  ;;  %v1228_v53 = vld [vmem:[%s4515_s0 + $0x168] sm:$0xff] }
  0xff   :  { %v2771_v58 = vpop.eup %2770  ;;  %v1987_v60 = vmul.f32 %v1494_v61, %v1219_v49  ;;  %1803 = vperm.xlu0 %2344, %v2765_v48   ;;  %2796 = vpow2.f32 %v2328_v45  ;;  %v909_v14 = vadd.f32 1.0, %v2769_v39  ;;  %v2339_v37 = vmul.f32 -1.442695, %v412_v16 }
 0x100   :  { %v2773_v0 = vpop.eup %2772  ;;  %2117 = vst.msk [vmem:[%s4518_s3 + $0x128] sm:$0xff] %vm2079_vm0, %v1988_v59  ;;  %2798 = vpow2.f32 %v2331_v50  ;;  %v2338_v42 = vmul.f32 -1.442695, %v411_v26  ;;  %v414_v44 = vadd.f32 %v2924_v11, %v285_v29  ;;  %v413_v47 = vadd.f32 %v2924_v11, %v284_v35  ;;  %v1227_v11 = vld [vmem:[%s4515_s0 + $0x160] sm:$0xff]  ;;  %v1233_v35 = vld [vmem:[%s4515_s0 + $0x190] sm:$0xff] }
 0x101   :  { %v2775_v12 = vpop.eup %2774  ;;  %2116 = vst.msk [vmem:[%s4518_s3 + $0x120] sm:$0xff] %vm2079_vm0, %v1987_v60  ;;  %v1509_v13 = vpop.permute.xlu1 %1508  ;;  %2800 = vpow2.f32 %v2330_v51 }
 0x102   :  { %v2777_v18 = vpop.eup %2776  ;;  %v1990_v20 = vmul.f32 %v1509_v13, %v1222_v2  ;;  %v1504_v21 = vpop.permute.xlu0 %1503  ;;  %1818 = vperm.xlu1 %2345, %v2771_v58   ;;  %2802 = vpow2.f32 %v2333_v62  ;;  %v2341_v57 = vmul.f32 -1.442695, %v414_v44  ;;  %v2340_v62 = vmul.f32 -1.442695, %v413_v47 }
 0x103   :  { %v2779_v24 = vpop.eup %2778  ;;  %v1989_v19 = vmul.f32 %v1504_v21, %v1221_v7  ;;  %1813 = vperm.xlu0 %2344, %v2773_v0   ;;  %2804 = vpow2.f32 %v2332_v1  ;;  %v1230_v0 = vld [vmem:[%s4515_s0 + $0x178] sm:$0xff] }
 0x104   :  { %v2781_v28 = vpop.eup %2780  ;;  %2119 = vst.msk [vmem:[%s4518_s3 + $0x138] sm:$0xff] %vm2079_vm0, %v1990_v20  ;;  %2806 = vrcp.f32 %v910_v5 }
 0x105   :  { %v2783_v31 = vpop.eup %2782  ;;  %2118 = vst.msk [vmem:[%s4518_s3 + $0x130] sm:$0xff] %vm2079_vm0, %v1989_v19  ;;  %v1519_v32 = vpop.permute.xlu1 %1518  ;;  %2808 = vrcp.f32 %v909_v14 }
 0x106   :  { %v2785_v27 = vpop.eup %2784  ;;  %v1992_v30 = vmul.f32 %v1519_v32, %v1224_v3  ;;  %v1514_v36 = vpop.permute.xlu0 %1513  ;;  %1828 = vperm.xlu1 %2345, %v2775_v12   ;;  %2810 = vpow2.f32 %v2335_v22  ;;  %v1232_v22 = vld [vmem:[%s4515_s0 + $0x188] sm:$0xff] }
 0x107   :  { %v2787_v38 = vpop.eup %2786  ;;  %v1991_v40 = vmul.f32 %v1514_v36, %v1223_v6  ;;  %1823 = vperm.xlu0 %2344, %v2777_v18   ;;  %2812 = vpow2.f32 %v2334_v25 }
 0x108   :  { %v2789_v43 = vpop.eup %2788  ;;  %2121 = vst.msk [vmem:[%s4518_s3 + $0x148] sm:$0xff] %vm2079_vm0, %v1992_v30  ;;  %2814 = vpow2.f32 %v2337_v9 }
 0x109   :  { %v2791_v45 = vpop.eup %2790  ;;  %2120 = vst.msk [vmem:[%s4518_s3 + $0x140] sm:$0xff] %vm2079_vm0, %v1991_v40  ;;  %v1529_v46 = vpop.permute.xlu1 %1528  ;;  %2816 = vpow2.f32 %v2336_v33 }
 0x10a   :  { %v2793_v48 = vpop.eup %2792  ;;  %v1994_v49 = vmul.f32 %v1529_v46, %v1226_v41  ;;  %v1524_v50 = vpop.permute.xlu0 %1523  ;;  %1838 = vperm.xlu1 %2345, %v2779_v24   ;;  %v912_v51 = vadd.f32 1.0, %v2791_v45  ;;  %2818 = vpow2.f32 %v2339_v37  ;;  %v1231_v24 = vld [vmem:[%s4515_s0 + $0x180] sm:$0xff] }
 0x10b   :  { %v2795_v52 = vpop.eup %2794  ;;  %v1993_v54 = vmul.f32 %v1524_v50, %v1225_v8  ;;  %1833 = vperm.xlu0 %2344, %v2781_v28   ;;  %v911_v55 = vadd.f32 1.0, %v2793_v48  ;;  %2820 = vpow2.f32 %v2338_v42  ;;  %v1235_v45 = vld [vmem:[%s4515_s0 + $0x1a0] sm:$0xff] }
 0x10c   :  { %v2797_v34 = vpop.eup %2796  ;;  %2123 = vst.msk [vmem:[%s4518_s3 + $0x158] sm:$0xff] %vm2079_vm0, %v1994_v49  ;;  %2822 = vrcp.f32 %v912_v51  ;;  %v914_v56 = vadd.f32 1.0, %v2795_v52 }
 0x10d   :  { %v2799_v39 = vpop.eup %2798  ;;  %2122 = vst.msk [vmem:[%s4518_s3 + $0x150] sm:$0xff] %vm2079_vm0, %v1993_v54  ;;  %v1539_v59 = vpop.permute.xlu1 %1538  ;;  %2824 = vrcp.f32 %v911_v55  ;;  %v913_v61 = vadd.f32 1.0, %v2797_v34 }
 0x10e   :  { %v2801_v63 = vpop.eup %2800  ;;  %v1996_v58 = vmul.f32 %v1539_v59, %v1228_v53  ;;  %v1534_v60 = vpop.permute.xlu0 %1533  ;;  %1848 = vperm.xlu1 %2345, %v2783_v31   ;;  %2826 = vrcp.f32 %v914_v56  ;;  %v916_v2 = vadd.f32 1.0, %v2799_v39  ;;  %v1234_v31 = vld [vmem:[%s4515_s0 + $0x198] sm:$0xff] }
 0x10f   :  { %v2803_v1 = vpop.eup %2802  ;;  %v1995_v4 = vmul.f32 %v1534_v60, %v1227_v11  ;;  %1843 = vperm.xlu0 %2344, %v2785_v27   ;;  %2828 = vrcp.f32 %v913_v61  ;;  %v915_v7 = vadd.f32 1.0, %v2801_v63  ;;  %v1238_v53 = vld [vmem:[%s4515_s0 + $0x1b8] sm:$0xff]  ;;  %v1237_v11 = vld [vmem:[%s4515_s0 + $0x1b0] sm:$0xff]  ;;  %v1240_v63 = vld [vmem:[%s4515_s0 + $0x1c8] sm:$0xff] }
 0x110   :  { %v2805_v5 = vpop.eup %2804  ;;  %2125 = vst.msk [vmem:[%s4518_s3 + $0x168] sm:$0xff] %vm2079_vm0, %v1996_v58  ;;  %2830 = vpow2.f32 %v2341_v57  ;;  %v918_v18 = vadd.f32 1.0, %v2803_v1 }
 0x111   :  { %v2807_v12 = vpop.eup %2806  ;;  %2124 = vst.msk [vmem:[%s4518_s3 + $0x160] sm:$0xff] %vm2079_vm0, %v1995_v4  ;;  %v1549_v13 = vpop.permute.xlu1 %1548  ;;  %2832 = vpow2.f32 %v2340_v62  ;;  %v917_v16 = vadd.f32 1.0, %v2805_v5 }
 0x112   :  { %v2809_v14 = vpop.eup %2808  ;;  %v1998_v15 = vmul.f32 %v1549_v13, %v1230_v0  ;;  %v1544_v17 = vpop.permute.xlu0 %1543  ;;  %1858 = vperm.xlu1 %2345, %v2787_v38   ;;  %2834 = vrcp.f32 %v916_v2  ;;  %v1239_v2 = vld [vmem:[%s4515_s0 + $0x1c0] sm:$0xff]  ;;  %v1241_v13 = vld [vmem:[%s4515_s0 + $0x1d0] sm:$0xff] }
 0x113   :  { %v2811_v20 = vpop.eup %2810  ;;  %v1997_v21 = vmul.f32 %v1544_v17, %v1229_v10  ;;  %1853 = vperm.xlu0 %2344, %v2789_v43   ;;  %2836 = vrcp.f32 %v915_v7  ;;  %v1236_v43 = vld [vmem:[%s4515_s0 + $0x1a8] sm:$0xff]  ;;  %v1242_v10 = vld [vmem:[%s4515_s0 + $0x1d8] sm:$0xff] }
 0x114   :  { %v2813_v23 = vpop.eup %2812  ;;  %2127 = vst.msk [vmem:[%s4518_s3 + $0x178] sm:$0xff] %vm2079_vm0, %v1998_v15  ;;  %2838 = vrcp.f32 %v918_v18  ;;  %v920_v6 = vadd.f32 1.0, %v2811_v20 }
 0x115   :  { %v2815_v19 = vpop.eup %2814  ;;  %2126 = vst.msk [vmem:[%s4518_s3 + $0x170] sm:$0xff] %vm2079_vm0, %v1997_v21  ;;  %v1559_v3 = vpop.permute.xlu1 %1558  ;;  %2840 = vrcp.f32 %v917_v16  ;;  %v919_v32 = vadd.f32 1.0, %v2813_v23  ;;  %v1244_v21 = vld [vmem:[%s4515_s0 + $0x1e8] sm:$0xff]  ;;  %v1243_v16 = vld [vmem:[%s4515_s0 + $0x1e0] sm:$0xff] }
 0x116   :  { %v2817_v25 = vpop.eup %2816  ;;  %v2000_v26 = vmul.f32 %v1559_v3, %v1232_v22  ;;  %v1554_v28 = vpop.permute.xlu0 %1553  ;;  %1868 = vperm.xlu1 %2345, %v2807_v12   ;;  %2842 = vrcp.f32 %v920_v6  ;;  %v922_v40 = vadd.f32 1.0, %v2815_v19  ;;  %v1245_v6 = vld [vmem:[%s4515_s0 + $0x1f0] sm:$0xff] }
 0x117   :  { %v2819_v9 = vpop.eup %2818  ;;  %v1999_v29 = vmul.f32 %v1554_v28, %v1231_v24  ;;  %1863 = vperm.xlu0 %2344, %v2809_v14   ;;  %2844 = vrcp.f32 %v919_v32  ;;  %v921_v8 = vadd.f32 1.0, %v2817_v25 }
 0x118   :  { %v2821_v33 = vpop.eup %2820  ;;  %2129 = vst.msk [vmem:[%s4518_s3 + $0x188] sm:$0xff] %vm2079_vm0, %v2000_v26  ;;  %2846 = vrcp.f32 %v922_v40  ;;  %v924_v51 = vadd.f32 1.0, %v2819_v9  ;;  %v1246_v26 = vld [vmem:[%s4515_s0 + $0x1f8] sm:$0xff] }
 0x119   :  { %v2823_v27 = vpop.eup %2822  ;;  %2128 = vst.msk [vmem:[%s4518_s3 + $0x180] sm:$0xff] %vm2079_vm0, %v1999_v29  ;;  %v1569_v30 = vpop.permute.xlu1 %1568  ;;  %2848 = vrcp.f32 %v921_v8  ;;  %v923_v55 = vadd.f32 1.0, %v2821_v33 }
 0x11a   :  { %v2825_v36 = vpop.eup %2824  ;;  %v2002_v37 = vmul.f32 %v1569_v30, %v1234_v31  ;;  %v1564_v38 = vpop.permute.xlu0 %1563  ;;  %1878 = vperm.xlu1 %2345, %v2823_v27   ;;  %2850 = vrcp.f32 %v924_v51  ;;  %v1247_v30 = vld [vmem:[%s4515_s0 + $0x200] sm:$0xff] }
 0x11b   :  { %v2827_v41 = vpop.eup %2826  ;;  %v2001_v42 = vmul.f32 %v1564_v38, %v1233_v35  ;;  %1873 = vperm.xlu0 %2344, %v2825_v36   ;;  %2852 = vrcp.f32 %v923_v55  ;;  %v1248_v35 = vld [vmem:[%s4515_s0 + $0x208] sm:$0xff] }
 0x11c   :  { %v2829_v44 = vpop.eup %2828  ;;  %2131 = vst.msk [vmem:[%s4518_s3 + $0x198] sm:$0xff] %vm2079_vm0, %v2002_v37 }
 0x11d   :  { %v2831_v46 = vpop.eup %2830  ;;  %2130 = vst.msk [vmem:[%s4518_s3 + $0x190] sm:$0xff] %vm2079_vm0, %v2001_v42  ;;  %v1579_v47 = vpop.permute.xlu1 %1578  ;;  %v1249_v42 = vld [vmem:[%s4515_s0 + $0x210] sm:$0xff] }
 0x11e   :  { %v2833_v48 = vpop.eup %2832  ;;  %v2004_v49 = vmul.f32 %v1579_v47, %v1236_v43  ;;  %v1574_v50 = vpop.permute.xlu0 %1573  ;;  %1888 = vperm.xlu1 %2345, %v2827_v41   ;;  %v926_v59 = vadd.f32 1.0, %v2831_v46  ;;  %v1250_v41 = vld [vmem:[%s4515_s0 + $0x218] sm:$0xff]  ;;  %v1252_v46 = vld [vmem:[%s4515_s0 + $0x228] sm:$0xff]  ;;  %v1251_v47 = vld [vmem:[%s4515_s0 + $0x220] sm:$0xff] }
 0x11f   :  { %v2835_v52 = vpop.eup %2834  ;;  %v2003_v54 = vmul.f32 %v1574_v50, %v1235_v45  ;;  %1883 = vperm.xlu0 %2344, %v2829_v44   ;;  %v925_v58 = vadd.f32 1.0, %v2833_v48 }
 0x120   :  { %v2837_v34 = vpop.eup %2836  ;;  %2133 = vst.msk [vmem:[%s4518_s3 + $0x1a8] sm:$0xff] %vm2079_vm0, %v2004_v49  ;;  %2854 = vrcp.f32 %v926_v59 }
 0x121   :  { %2132 = vst.msk [vmem:[%s4518_s3 + $0x1a0] sm:$0xff] %vm2079_vm0, %v2003_v54  ;;  %v1589_v56 = vpop.permute.xlu1 %1588  ;;  %v2839_v61 = vpop.eup %2838  ;;  %2856 = vrcp.f32 %v925_v58  ;;  %v1253_v54 = vld [vmem:[%s4515_s0 + $0x230] sm:$0xff] }
 0x122   :  { %v2006_v57 = vmul.f32 %v1589_v56, %v1238_v53  ;;  %v1584_v39 = vpop.permute.xlu0 %1583  ;;  %1898 = vperm.xlu1 %2345, %v2835_v52   ;;  %v2841_v60 = vpop.eup %2840  ;;  %v1254_v52 = vld [vmem:[%s4515_s0 + $0x238] sm:$0xff]  ;;  %v1256_v56 = vld [vmem:[%s4515_s0 + $0x248] sm:$0xff]  ;;  %v1257_v58 = vld [vmem:[%s4515_s0 + $0x250] sm:$0xff] }
 0x123   :  { %v2005_v62 = vmul.f32 %v1584_v39, %v1237_v11  ;;  %1893 = vperm.xlu0 %2344, %v2837_v34   ;;  %v2843_v7 = vpop.eup %2842 }
 0x124   :  { %2135 = vst.msk [vmem:[%s4518_s3 + $0x1b8] sm:$0xff] %vm2079_vm0, %v2006_v57  ;;  %v2845_v12 = vpop.eup %2844  ;;  %v1255_v57 = vld [vmem:[%s4515_s0 + $0x240] sm:$0xff] }
 0x125   :  { %2134 = vst.msk [vmem:[%s4518_s3 + $0x1b0] sm:$0xff] %vm2079_vm0, %v2005_v62  ;;  %v1599_v1 = vpop.permute.xlu1 %1598  ;;  %v2847_v18 = vpop.eup %2846 }
 0x126   :  { %v2008_v4 = vmul.f32 %v1599_v1, %v1240_v63  ;;  %v1594_v0 = vpop.permute.xlu0 %1593  ;;  %1908 = vperm.xlu1 %2345, %v2839_v61   ;;  %v2849_v22 = vpop.eup %2848  ;;  %v1258_v63 = vld [vmem:[%s4515_s0 + $0x258] sm:$0xff] }
 0x127   :  { %v2007_v5 = vmul.f32 %v1594_v0, %v1239_v2  ;;  %1903 = vperm.xlu0 %2344, %v2841_v60   ;;  %v2851_v3 = vpop.eup %2850  ;;  %v1260_v0 = vld [vmem:[%s4515_s0 + $0x268] sm:$0xff] }
 0x128   :  { %2137 = vst.msk [vmem:[%s4518_s3 + $0x1c8] sm:$0xff] %vm2079_vm0, %v2008_v4  ;;  %v2853_v28 = vpop.eup %2852 }
 0x129   :  { %2136 = vst.msk [vmem:[%s4518_s3 + $0x1c0] sm:$0xff] %vm2079_vm0, %v2007_v5  ;;  %v1609_v14 = vpop.permute.xlu1 %1608 }
 0x12a   :  { %v2010_v15 = vmul.f32 %v1609_v14, %v1242_v10  ;;  %v1604_v17 = vpop.permute.xlu0 %1603  ;;  %1918 = vperm.xlu1 %2345, %v2843_v7   ;;  %v1259_v7 = vld [vmem:[%s4515_s0 + $0x260] sm:$0xff]  ;;  %v1262_v14 = vld [vmem:[%s4515_s0 + $0x278] sm:$0xff] }
 0x12b   :  { %v2009_v20 = vmul.f32 %v1604_v17, %v1241_v13  ;;  %1913 = vperm.xlu0 %2344, %v2845_v12  }
 0x12c   :  { %2139 = vst.msk [vmem:[%s4518_s3 + $0x1d8] sm:$0xff] %vm2079_vm0, %v2010_v15  ;;  %v1261_v15 = vld [vmem:[%s4515_s0 + $0x270] sm:$0xff] }
 0x12d   :  { %2138 = vst.msk [vmem:[%s4518_s3 + $0x1d0] sm:$0xff] %vm2079_vm0, %v2009_v20  ;;  %v1619_v23 = vpop.permute.xlu1 %1618  ;;  %v2855_v32 = vpop.eup %2854 }
 0x12e   :  { %v2012_v24 = vmul.f32 %v1619_v23, %v1244_v21  ;;  %v1614_v19 = vpop.permute.xlu0 %1613  ;;  %1928 = vperm.xlu1 %2345, %v2847_v18   ;;  %v2857_v27 = vpop.eup %2856 }
 0x12f   :  { %v2011_v25 = vmul.f32 %v1614_v19, %v1243_v16  ;;  %1923 = vperm.xlu0 %2344, %v2849_v22   ;;  %v1264_v22 = vld [vmem:[%s4515_s0 + $0x288] sm:$0xff]  ;;  %v1263_v16 = vld [vmem:[%s4515_s0 + $0x280] sm:$0xff] }
 0x130   :  { %2141 = vst.msk [vmem:[%s4518_s3 + $0x1e8] sm:$0xff] %vm2079_vm0, %v2012_v24 }
 0x131   :  { %2140 = vst.msk [vmem:[%s4518_s3 + $0x1e0] sm:$0xff] %vm2079_vm0, %v2011_v25  ;;  %v1629_v9 = vpop.permute.xlu1 %1628  ;;  %v1266_v25 = vld [vmem:[%s4515_s0 + $0x298] sm:$0xff] }
 0x132   :  { %v2014_v29 = vmul.f32 %v1629_v9, %v1246_v26  ;;  %v1624_v31 = vpop.permute.xlu0 %1623  ;;  %1938 = vperm.xlu1 %2345, %v2851_v3   ;;  %v1265_v26 = vld [vmem:[%s4515_s0 + $0x290] sm:$0xff] }
 0x133   :  { %v2013_v33 = vmul.f32 %v1624_v31, %v1245_v6  ;;  %1933 = vperm.xlu0 %2344, %v2853_v28   ;;  %v1268_v31 = vld [vmem:[%s4515_s0 + $0x2a8] sm:$0xff] }
 0x134   :  { %2143 = vst.msk [vmem:[%s4518_s3 + $0x1f8] sm:$0xff] %vm2079_vm0, %v2014_v29 }
 0x135   :  { %2142 = vst.msk [vmem:[%s4518_s3 + $0x1f0] sm:$0xff] %vm2079_vm0, %v2013_v33  ;;  %v1639_v36 = vpop.permute.xlu1 %1638 }
 0x136   :  { %v2016_v37 = vmul.f32 %v1639_v36, %v1248_v35  ;;  %v1634_v38 = vpop.permute.xlu0 %1633  ;;  %1948 = vperm.xlu1 %2345, %v2855_v32   ;;  %v1267_v32 = vld [vmem:[%s4515_s0 + $0x2a0] sm:$0xff]  ;;  %v1270_v36 = vld [vmem:[%s4515_s0 + $0x2b8] sm:$0xff] }
 0x137   :  { %v2015_v40 = vmul.f32 %v1634_v38, %v1247_v30  ;;  %1943 = vperm.xlu0 %2344, %v2857_v27  }
 0x138   :  { %2145 = vst.msk [vmem:[%s4518_s3 + $0x208] sm:$0xff] %vm2079_vm0, %v2016_v37  ;;  %v1269_v37 = vld [vmem:[%s4515_s0 + $0x2b0] sm:$0xff] }
 0x139   :  { %2144 = vst.msk [vmem:[%s4518_s3 + $0x200] sm:$0xff] %vm2079_vm0, %v2015_v40  ;;  %v1649_v43 = vpop.permute.xlu1 %1648 }
 0x13a   :  { %v2018_v8 = vmul.f32 %v1649_v43, %v1250_v41  ;;  %v1644_v44 = vpop.permute.xlu0 %1643  ;;  %v1272_v43 = vld [vmem:[%s4515_s0 + $0x2c8] sm:$0xff] }
 0x13b   :  { %v2017_v45 = vmul.f32 %v1644_v44, %v1249_v42 }
 0x13c   :  { %2147 = vst.msk [vmem:[%s4518_s3 + $0x218] sm:$0xff] %vm2079_vm0, %v2018_v8  ;;  %v1271_v8 = vld [vmem:[%s4515_s0 + $0x2c0] sm:$0xff] }
 0x13d   :  { %2146 = vst.msk [vmem:[%s4518_s3 + $0x210] sm:$0xff] %vm2079_vm0, %v2017_v45  ;;  %v1659_v48 = vpop.permute.xlu1 %1658 }
 0x13e   :  { %v2020_v49 = vmul.f32 %v1659_v48, %v1252_v46  ;;  %v1654_v50 = vpop.permute.xlu0 %1653  ;;  %v1274_v48 = vld [vmem:[%s4515_s0 + $0x2d8] sm:$0xff] }
 0x13f   :  { %v2019_v51 = vmul.f32 %v1654_v50, %v1251_v47 }
 0x140   :  { %2149 = vst.msk [vmem:[%s4518_s3 + $0x228] sm:$0xff] %vm2079_vm0, %v2020_v49  ;;  %v1273_v49 = vld [vmem:[%s4515_s0 + $0x2d0] sm:$0xff] }
 0x141   :  { %2148 = vst.msk [vmem:[%s4518_s3 + $0x220] sm:$0xff] %vm2079_vm0, %v2019_v51  ;;  %v1669_v53 = vpop.permute.xlu1 %1668 }
 0x142   :  { %v2022_v55 = vmul.f32 %v1669_v53, %v1254_v52  ;;  %v1664_v34 = vpop.permute.xlu0 %1663  ;;  %v1276_v53 = vld [vmem:[%s4515_s0 + $0x2e8] sm:$0xff] }
 0x143   :  { %v2021_v11 = vmul.f32 %v1664_v34, %v1253_v54 }
 0x144   :  { %2151 = vst.msk [vmem:[%s4518_s3 + $0x238] sm:$0xff] %vm2079_vm0, %v2022_v55  ;;  %v1275_v55 = vld [vmem:[%s4515_s0 + $0x2e0] sm:$0xff] }
 0x145   :  { %2150 = vst.msk [vmem:[%s4518_s3 + $0x230] sm:$0xff] %vm2079_vm0, %v2021_v11  ;;  %v1679_v39 = vpop.permute.xlu1 %1678 }
 0x146   :  { %v2024_v59 = vmul.f32 %v1679_v39, %v1256_v56  ;;  %v1674_v61 = vpop.permute.xlu0 %1673  ;;  %v1278_v39 = vld [vmem:[%s4515_s0 + $0x2f8] sm:$0xff] }
 0x147   :  { %v2023_v62 = vmul.f32 %v1674_v61, %v1255_v57 }
 0x148   :  { %2153 = vst.msk [vmem:[%s4518_s3 + $0x248] sm:$0xff] %vm2079_vm0, %v2024_v59  ;;  %v1277_v59 = vld [vmem:[%s4515_s0 + $0x2f0] sm:$0xff] }
 0x149   :  { %2152 = vst.msk [vmem:[%s4518_s3 + $0x240] sm:$0xff] %vm2079_vm0, %v2023_v62  ;;  %v1689_v60 = vpop.permute.xlu1 %1688 }
 0x14a   :  { %v2026_v2 = vmul.f32 %v1689_v60, %v1258_v63  ;;  %v1684_v1 = vpop.permute.xlu0 %1683  ;;  %v1280_v60 = vld [vmem:[%s4515_s0 + $0x308] sm:$0xff] }
 0x14b   :  { %v2025_v4 = vmul.f32 %v1684_v1, %v1257_v58 }
 0x14c   :  { %2155 = vst.msk [vmem:[%s4518_s3 + $0x258] sm:$0xff] %vm2079_vm0, %v2026_v2  ;;  %v1279_v2 = vld [vmem:[%s4515_s0 + $0x300] sm:$0xff] }
 0x14d   :  { %2154 = vst.msk [vmem:[%s4518_s3 + $0x250] sm:$0xff] %vm2079_vm0, %v2025_v4  ;;  %v1699_v5 = vpop.permute.xlu1 %1698 }
 0x14e   :  { %v2028_v10 = vmul.f32 %v1699_v5, %v1260_v0  ;;  %v1694_v12 = vpop.permute.xlu0 %1693  ;;  %v1282_v5 = vld [vmem:[%s4515_s0 + $0x318] sm:$0xff] }
 0x14f   :  { %v2027_v13 = vmul.f32 %v1694_v12, %v1259_v7 }
 0x150   :  { %2157 = vst.msk [vmem:[%s4518_s3 + $0x268] sm:$0xff] %vm2079_vm0, %v2028_v10  ;;  %v1281_v10 = vld [vmem:[%s4515_s0 + $0x310] sm:$0xff] }
 0x151   :  { %2156 = vst.msk [vmem:[%s4518_s3 + $0x260] sm:$0xff] %vm2079_vm0, %v2027_v13  ;;  %v1709_v17 = vpop.permute.xlu1 %1708 }
 0x152   :  { %v2030_v18 = vmul.f32 %v1709_v17, %v1262_v14  ;;  %v1704_v20 = vpop.permute.xlu0 %1703  ;;  %v1284_v17 = vld [vmem:[%s4515_s0 + $0x328] sm:$0xff] }
 0x153   :  { %v2029_v21 = vmul.f32 %v1704_v20, %v1261_v15 }
 0x154   :  { %2159 = vst.msk [vmem:[%s4518_s3 + $0x278] sm:$0xff] %vm2079_vm0, %v2030_v18  ;;  %v1283_v18 = vld [vmem:[%s4515_s0 + $0x320] sm:$0xff] }
 0x155   :  { %2158 = vst.msk [vmem:[%s4518_s3 + $0x270] sm:$0xff] %vm2079_vm0, %v2029_v21  ;;  %v1719_v23 = vpop.permute.xlu1 %1718 }
 0x156   :  { %v2032_v24 = vmul.f32 %v1719_v23, %v1264_v22  ;;  %v1714_v19 = vpop.permute.xlu0 %1713  ;;  %v1286_v23 = vld [vmem:[%s4515_s0 + $0x338] sm:$0xff] }
 0x157   :  { %v2031_v3 = vmul.f32 %v1714_v19, %v1263_v16 }
 0x158   :  { %2161 = vst.msk [vmem:[%s4518_s3 + $0x288] sm:$0xff] %vm2079_vm0, %v2032_v24  ;;  %v1285_v24 = vld [vmem:[%s4515_s0 + $0x330] sm:$0xff] }
 0x159   :  { %2160 = vst.msk [vmem:[%s4518_s3 + $0x280] sm:$0xff] %vm2079_vm0, %v2031_v3  ;;  %v1729_v28 = vpop.permute.xlu1 %1728 }
 0x15a   :  { %v2034_v6 = vmul.f32 %v1729_v28, %v1266_v25  ;;  %v1724_v9 = vpop.permute.xlu0 %1723  ;;  %v1288_v28 = vld [vmem:[%s4515_s0 + $0x348] sm:$0xff] }
 0x15b   :  { %v2033_v29 = vmul.f32 %v1724_v9, %v1265_v26 }
 0x15c   :  { %2163 = vst.msk [vmem:[%s4518_s3 + $0x298] sm:$0xff] %vm2079_vm0, %v2034_v6  ;;  %v1287_v6 = vld [vmem:[%s4515_s0 + $0x340] sm:$0xff] }
 0x15d   :  { %2162 = vst.msk [vmem:[%s4518_s3 + $0x290] sm:$0xff] %vm2079_vm0, %v2033_v29  ;;  %v1739_v33 = vpop.permute.xlu1 %1738 }
 0x15e   :  { %v2036_v35 = vmul.f32 %v1739_v33, %v1268_v31  ;;  %v1734_v27 = vpop.permute.xlu0 %1733  ;;  %v1290_v33 = vld [vmem:[%s4515_s0 + $0x358] sm:$0xff] }
 0x15f   :  { %v2035_v30 = vmul.f32 %v1734_v27, %v1267_v32 }
 0x160   :  { %2165 = vst.msk [vmem:[%s4518_s3 + $0x2a8] sm:$0xff] %vm2079_vm0, %v2036_v35  ;;  %v1289_v35 = vld [vmem:[%s4515_s0 + $0x350] sm:$0xff] }
 0x161   :  { %2164 = vst.msk [vmem:[%s4518_s3 + $0x2a0] sm:$0xff] %vm2079_vm0, %v2035_v30  ;;  %v1749_v38 = vpop.permute.xlu1 %1748 }
 0x162   :  { %v2038_v40 = vmul.f32 %v1749_v38, %v1270_v36  ;;  %v1744_v41 = vpop.permute.xlu0 %1743  ;;  %v1292_v38 = vld [vmem:[%s4515_s0 + $0x368] sm:$0xff] }
 0x163   :  { %v2037_v42 = vmul.f32 %v1744_v41, %v1269_v37 }
 0x164   :  { %2167 = vst.msk [vmem:[%s4518_s3 + $0x2b8] sm:$0xff] %vm2079_vm0, %v2038_v40  ;;  %v1291_v40 = vld [vmem:[%s4515_s0 + $0x360] sm:$0xff] }
 0x165   :  { %2166 = vst.msk [vmem:[%s4518_s3 + $0x2b0] sm:$0xff] %vm2079_vm0, %v2037_v42  ;;  %v1759_v44 = vpop.permute.xlu1 %1758 }
 0x166   :  { %v2040_v45 = vmul.f32 %v1759_v44, %v1272_v43  ;;  %v1754_v46 = vpop.permute.xlu0 %1753  ;;  %v1294_v44 = vld [vmem:[%s4515_s0 + $0x378] sm:$0xff] }
 0x167   :  { %v2039_v47 = vmul.f32 %v1754_v46, %v1271_v8 }
 0x168   :  { %2169 = vst.msk [vmem:[%s4518_s3 + $0x2c8] sm:$0xff] %vm2079_vm0, %v2040_v45  ;;  %v1293_v45 = vld [vmem:[%s4515_s0 + $0x370] sm:$0xff] }
 0x169   :  { %2168 = vst.msk [vmem:[%s4518_s3 + $0x2c0] sm:$0xff] %vm2079_vm0, %v2039_v47  ;;  %v1769_v50 = vpop.permute.xlu1 %1768 }
 0x16a   :  { %v2042_v51 = vmul.f32 %v1769_v50, %v1274_v48  ;;  %v1764_v52 = vpop.permute.xlu0 %1763  ;;  %v1296_v50 = vld [vmem:[%s4515_s0 + $0x388] sm:$0xff] }
 0x16b   :  { %v2041_v54 = vmul.f32 %v1764_v52, %v1273_v49 }
 0x16c   :  { %2171 = vst.msk [vmem:[%s4518_s3 + $0x2d8] sm:$0xff] %vm2079_vm0, %v2042_v51  ;;  %v1295_v51 = vld [vmem:[%s4515_s0 + $0x380] sm:$0xff] }
 0x16d   :  { %2170 = vst.msk [vmem:[%s4518_s3 + $0x2d0] sm:$0xff] %vm2079_vm0, %v2041_v54  ;;  %v1779_v34 = vpop.permute.xlu1 %1778 }
 0x16e   :  { %v2044_v11 = vmul.f32 %v1779_v34, %v1276_v53  ;;  %v1774_v56 = vpop.permute.xlu0 %1773  ;;  %v1298_v34 = vld [vmem:[%s4515_s0 + $0x398] sm:$0xff] }
 0x16f   :  { %v2043_v57 = vmul.f32 %v1774_v56, %v1275_v55 }
 0x170   :  { %2173 = vst.msk [vmem:[%s4518_s3 + $0x2e8] sm:$0xff] %vm2079_vm0, %v2044_v11  ;;  %v1297_v11 = vld [vmem:[%s4515_s0 + $0x390] sm:$0xff] }
 0x171   :  { %2172 = vst.msk [vmem:[%s4518_s3 + $0x2e0] sm:$0xff] %vm2079_vm0, %v2043_v57  ;;  %v1789_v61 = vpop.permute.xlu1 %1788 }
 0x172   :  { %v2046_v62 = vmul.f32 %v1789_v61, %v1278_v39  ;;  %v1784_v63 = vpop.permute.xlu0 %1783  ;;  %v1300_v61 = vld [vmem:[%s4515_s0 + $0x3a8] sm:$0xff] }
 0x173   :  { %v2045_v58 = vmul.f32 %v1784_v63, %v1277_v59 }
 0x174   :  { %2175 = vst.msk [vmem:[%s4518_s3 + $0x2f8] sm:$0xff] %vm2079_vm0, %v2046_v62  ;;  %v1299_v62 = vld [vmem:[%s4515_s0 + $0x3a0] sm:$0xff] }
 0x175   :  { %2174 = vst.msk [vmem:[%s4518_s3 + $0x2f0] sm:$0xff] %vm2079_vm0, %v2045_v58  ;;  %v1799_v1 = vpop.permute.xlu1 %1798 }
 0x176   :  { %v2048_v4 = vmul.f32 %v1799_v1, %v1280_v60  ;;  %v1794_v0 = vpop.permute.xlu0 %1793  ;;  %v1302_v1 = vld [vmem:[%s4515_s0 + $0x3b8] sm:$0xff] }
 0x177   :  { %v2047_v7 = vmul.f32 %v1794_v0, %v1279_v2 }
 0x178   :  { %2177 = vst.msk [vmem:[%s4518_s3 + $0x308] sm:$0xff] %vm2079_vm0, %v2048_v4  ;;  %v1301_v4 = vld [vmem:[%s4515_s0 + $0x3b0] sm:$0xff] }
 0x179   :  { %2176 = vst.msk [vmem:[%s4518_s3 + $0x300] sm:$0xff] %vm2079_vm0, %v2047_v7  ;;  %v1809_v12 = vpop.permute.xlu1 %1808 }
 0x17a   :  { %v2050_v13 = vmul.f32 %v1809_v12, %v1282_v5  ;;  %v1804_v14 = vpop.permute.xlu0 %1803  ;;  %v1304_v12 = vld [vmem:[%s4515_s0 + $0x3c8] sm:$0xff] }
 0x17b   :  { %v2049_v15 = vmul.f32 %v1804_v14, %v1281_v10 }
 0x17c   :  { %2179 = vst.msk [vmem:[%s4518_s3 + $0x318] sm:$0xff] %vm2079_vm0, %v2050_v13  ;;  %v1303_v13 = vld [vmem:[%s4515_s0 + $0x3c0] sm:$0xff] }
 0x17d   :  { %2178 = vst.msk [vmem:[%s4518_s3 + $0x310] sm:$0xff] %vm2079_vm0, %v2049_v15  ;;  %v1819_v20 = vpop.permute.xlu1 %1818 }
 0x17e   :  { %v2052_v21 = vmul.f32 %v1819_v20, %v1284_v17  ;;  %v1814_v22 = vpop.permute.xlu0 %1813  ;;  %v1306_v20 = vld [vmem:[%s4515_s0 + $0x3d8] sm:$0xff] }
 0x17f   :  { %v2051_v16 = vmul.f32 %v1814_v22, %v1283_v18 }
 0x180   :  { %2181 = vst.msk [vmem:[%s4518_s3 + $0x328] sm:$0xff] %vm2079_vm0, %v2052_v21  ;;  %v1305_v21 = vld [vmem:[%s4515_s0 + $0x3d0] sm:$0xff] }
 0x181   :  { %2180 = vst.msk [vmem:[%s4518_s3 + $0x320] sm:$0xff] %vm2079_vm0, %v2051_v16  ;;  %v1829_v19 = vpop.permute.xlu1 %1828 }
 0x182   :  { %v2054_v3 = vmul.f32 %v1829_v19, %v1286_v23  ;;  %v1824_v25 = vpop.permute.xlu0 %1823  ;;  %v1308_v19 = vld [vmem:[%s4515_s0 + $0x3e8] sm:$0xff] }
 0x183   :  { %v2053_v26 = vmul.f32 %v1824_v25, %v1285_v24 }
 0x184   :  { %2183 = vst.msk [vmem:[%s4518_s3 + $0x338] sm:$0xff] %vm2079_vm0, %v2054_v3  ;;  %v1307_v3 = vld [vmem:[%s4515_s0 + $0x3e0] sm:$0xff] }
 0x185   :  { %2182 = vst.msk [vmem:[%s4518_s3 + $0x330] sm:$0xff] %vm2079_vm0, %v2053_v26  ;;  %v1839_v9 = vpop.permute.xlu1 %1838 }
 0x186   :  { %v2056_v29 = vmul.f32 %v1839_v9, %v1288_v28  ;;  %v1834_v31 = vpop.permute.xlu0 %1833  ;;  %v1310_v9 = vld [vmem:[%s4515_s0 + $0x3f8] sm:$0xff] }
 0x187   :  { %v2055_v32 = vmul.f32 %v1834_v31, %v1287_v6 }
 0x188   :  { %2185 = vst.msk [vmem:[%s4518_s3 + $0x348] sm:$0xff] %vm2079_vm0, %v2056_v29  ;;  %v1309_v29 = vld [vmem:[%s4515_s0 + $0x3f0] sm:$0xff] }
 0x189   :  { %2184 = vst.msk [vmem:[%s4518_s3 + $0x340] sm:$0xff] %vm2079_vm0, %v2055_v32  ;;  %v1849_v27 = vpop.permute.xlu1 %1848 }
 0x18a   :  { %v2058_v30 = vmul.f32 %v1849_v27, %v1290_v33  ;;  %v1844_v36 = vpop.permute.xlu0 %1843 }
 0x18b   :  { %v2057_v37 = vmul.f32 %v1844_v36, %v1289_v35 }
 0x18c   :  { %2187 = vst.msk [vmem:[%s4518_s3 + $0x358] sm:$0xff] %vm2079_vm0, %v2058_v30 }
 0x18d   :  { %2186 = vst.msk [vmem:[%s4518_s3 + $0x350] sm:$0xff] %vm2079_vm0, %v2057_v37  ;;  %v1859_v41 = vpop.permute.xlu1 %1858 }
 0x18e   :  { %v2060_v42 = vmul.f32 %v1859_v41, %v1292_v38  ;;  %v1854_v43 = vpop.permute.xlu0 %1853 }
 0x18f   :  { %v2059_v8 = vmul.f32 %v1854_v43, %v1291_v40 }
 0x190   :  { %2189 = vst.msk [vmem:[%s4518_s3 + $0x368] sm:$0xff] %vm2079_vm0, %v2060_v42 }
 0x191   :  { %2188 = vst.msk [vmem:[%s4518_s3 + $0x360] sm:$0xff] %vm2079_vm0, %v2059_v8  ;;  %v1869_v46 = vpop.permute.xlu1 %1868 }
 0x192   :  { %v2062_v47 = vmul.f32 %v1869_v46, %v1294_v44  ;;  %v1864_v48 = vpop.permute.xlu0 %1863 }
 0x193   :  { %v2061_v49 = vmul.f32 %v1864_v48, %v1293_v45 }
 0x194   :  { %2191 = vst.msk [vmem:[%s4518_s3 + $0x378] sm:$0xff] %vm2079_vm0, %v2062_v47 }
 0x195   :  { %2190 = vst.msk [vmem:[%s4518_s3 + $0x370] sm:$0xff] %vm2079_vm0, %v2061_v49  ;;  %v1879_v52 = vpop.permute.xlu1 %1878 }
 0x196   :  { %v2064_v54 = vmul.f32 %v1879_v52, %v1296_v50  ;;  %v1874_v53 = vpop.permute.xlu0 %1873 }
 0x197   :  { %v2063_v55 = vmul.f32 %v1874_v53, %v1295_v51 }
 0x198   :  { %2193 = vst.msk [vmem:[%s4518_s3 + $0x388] sm:$0xff] %vm2079_vm0, %v2064_v54 }
 0x199   :  { %2192 = vst.msk [vmem:[%s4518_s3 + $0x380] sm:$0xff] %vm2079_vm0, %v2063_v55  ;;  %v1889_v56 = vpop.permute.xlu1 %1888 }
 0x19a   :  { %v2066_v57 = vmul.f32 %v1889_v56, %v1298_v34  ;;  %v1884_v39 = vpop.permute.xlu0 %1883 }
 0x19b   :  { %v2065_v59 = vmul.f32 %v1884_v39, %v1297_v11 }
 0x19c   :  { %2195 = vst.msk [vmem:[%s4518_s3 + $0x398] sm:$0xff] %vm2079_vm0, %v2066_v57 }
 0x19d   :  { %2194 = vst.msk [vmem:[%s4518_s3 + $0x390] sm:$0xff] %vm2079_vm0, %v2065_v59  ;;  %v1899_v63 = vpop.permute.xlu1 %1898 }
 0x19e   :  { %v2068_v58 = vmul.f32 %v1899_v63, %v1300_v61  ;;  %v1894_v60 = vpop.permute.xlu0 %1893 }
 0x19f   :  { %v2067_v2 = vmul.f32 %v1894_v60, %v1299_v62 }
 0x1a0   :  { %2197 = vst.msk [vmem:[%s4518_s3 + $0x3a8] sm:$0xff] %vm2079_vm0, %v2068_v58 }
 0x1a1   :  { %2196 = vst.msk [vmem:[%s4518_s3 + $0x3a0] sm:$0xff] %vm2079_vm0, %v2067_v2  ;;  %v1909_v0 = vpop.permute.xlu1 %1908 }
 0x1a2   :  { %v2070_v7 = vmul.f32 %v1909_v0, %v1302_v1  ;;  %v1904_v5 = vpop.permute.xlu0 %1903 }
 0x1a3   :  { %v2069_v10 = vmul.f32 %v1904_v5, %v1301_v4 }
 0x1a4   :  { %2199 = vst.msk [vmem:[%s4518_s3 + $0x3b8] sm:$0xff] %vm2079_vm0, %v2070_v7 }
 0x1a5   :  { %2198 = vst.msk [vmem:[%s4518_s3 + $0x3b0] sm:$0xff] %vm2079_vm0, %v2069_v10  ;;  %v1919_v14 = vpop.permute.xlu1 %1918 }
 0x1a6   :  { %v2072_v15 = vmul.f32 %v1919_v14, %v1304_v12  ;;  %v1914_v17 = vpop.permute.xlu0 %1913 }
 0x1a7   :  { %v2071_v18 = vmul.f32 %v1914_v17, %v1303_v13 }
 0x1a8   :  { %2201 = vst.msk [vmem:[%s4518_s3 + $0x3c8] sm:$0xff] %vm2079_vm0, %v2072_v15 }
 0x1a9   :  { %2200 = vst.msk [vmem:[%s4518_s3 + $0x3c0] sm:$0xff] %vm2079_vm0, %v2071_v18  ;;  %v1929_v22 = vpop.permute.xlu1 %1928 }
 0x1aa   :  { %v2074_v16 = vmul.f32 %v1929_v22, %v1306_v20  ;;  %v1924_v23 = vpop.permute.xlu0 %1923 }
 0x1ab   :  { %v2073_v24 = vmul.f32 %v1924_v23, %v1305_v21 }
 0x1ac   :  { %2203 = vst.msk [vmem:[%s4518_s3 + $0x3d8] sm:$0xff] %vm2079_vm0, %v2074_v16 }
 0x1ad   :  { %2202 = vst.msk [vmem:[%s4518_s3 + $0x3d0] sm:$0xff] %vm2079_vm0, %v2073_v24  ;;  %v1939_v25 = vpop.permute.xlu1 %1938 }
 0x1ae   :  { %v2076_v26 = vmul.f32 %v1939_v25, %v1308_v19  ;;  %v1934_v28 = vpop.permute.xlu0 %1933 }
 0x1af   :  { %v2075_v6 = vmul.f32 %v1934_v28, %v1307_v3 }
 0x1b0   :  { %2205 = vst.msk [vmem:[%s4518_s3 + $0x3e8] sm:$0xff] %vm2079_vm0, %v2076_v26 }
 0x1b1   :  { %2204 = vst.msk [vmem:[%s4518_s3 + $0x3e0] sm:$0xff] %vm2079_vm0, %v2075_v6  ;;  %v1949_v31 = vpop.permute.xlu1 %1948 }
 0x1b2   :  { %v2078_v32 = vmul.f32 %v1949_v31, %v1310_v9  ;;  %v1944_v33 = vpop.permute.xlu0 %1943 }
 0x1b3   :  { %v2077_v35 = vmul.f32 %v1944_v33, %v1309_v29 }
 0x1b4   :  { %2207 = vst.msk [vmem:[%s4518_s3 + $0x3f8] sm:$0xff] %vm2079_vm0, %v2078_v32 }
 0x1b5   :  { %2206 = vst.msk [vmem:[%s4518_s3 + $0x3f0] sm:$0xff] %vm2079_vm0, %v2077_v35 }
 0x1b6   :  { %2212 = vsyncpa [#allocation3], 1 }

// kernel: attention_gate_forward.3
= control target key start
LH: loop header
LB: loop body
LE: loop exit
PB: predicated region body
PF: predicated region fallthrough
CT: control target
= control target key end

     0   :  { %s4251_s2 = inlined_call_operand.vmem [shape: bf16[128,128], index: 2, kind: input, shape index: {}]   ;;  %s4252_s3 = inlined_call_operand.vmem [shape: bf16[128,128], index: 3, kind: input, shape index: {}]   ;;  %s4253_s0 = inlined_call_operand.vmem [shape: bf16[1024,128], index: 0, kind: input, shape index: {}]   ;;  %s4254_s1 = inlined_call_operand.vmem [shape: bf16[1024,128], index: 1, kind: input, shape index: {}]   ;;  %s4255_s4 = inlined_call_operand.vmem [shape: f32[8,128], index: 4, kind: output, shape index: {}]  }
   0x1   :  { %v3634_v0 = vld [vmem:[%s4251_s2 + $0x38] sm:$0xff]   ;;  %v3636_v2 = vld [vmem:[%s4251_s2 + $0x30] sm:$0xff]   ;;  %v3638_v4 = vld [vmem:[%s4251_s2 + $0x28] sm:$0xff]  }
   0x2   :  { %v3635_v1 = vld [vmem:[%s4252_s3 + $0x38] sm:$0xff]   ;;  %3345 = vmatprep.subr.bf16.mxu0 %v3634_v0  ;;  %v3637_v3 = vld [vmem:[%s4252_s3 + $0x30] sm:$0xff]   ;;  %v3639_v5 = vld [vmem:[%s4252_s3 + $0x28] sm:$0xff]  }
   0x3   :  { %3489 = vmatprep.subr.bf16.mxu1 %v3635_v1  ;;  %3346 = vmatpush3.bf16.msra.mxu0 %v3634_v0  ;;  %v3640_v6 = vld [vmem:[%s4251_s2 + $0x20] sm:$0xff]   ;;  %v3642_v8 = vld [vmem:[%s4251_s2 + $0x18] sm:$0xff]   ;;  %v3644_v10 = vld [vmem:[%s4251_s2 + $0x10] sm:$0xff]  }
   0x4   :  { %3490 = vmatpush3.bf16.msra.mxu1 %v3635_v1  ;;  %3347 = vmatprep.subr.bf16.mxu0 %v3636_v2  ;;  %v3641_v7 = vld [vmem:[%s4252_s3 + $0x20] sm:$0xff]   ;;  %v3643_v9 = vld [vmem:[%s4252_s3 + $0x18] sm:$0xff]   ;;  %v3645_v11 = vld [vmem:[%s4252_s3 + $0x10] sm:$0xff]  }
   0x5   :  { %3491 = vmatprep.subr.bf16.mxu1 %v3637_v3  ;;  %v3650_v12 = vld [vmem:[%s4253_s0] sm:$0xff]   ;;  %v3646_v14 = vld [vmem:[%s4251_s2 + $0x8] sm:$0xff]   ;;  %v3654_v20 = vld [vmem:[%s4253_s0 + $0x10] sm:$0xff]  }
   0x6   :  { %v3651_v13 = vld [vmem:[%s4254_s1] sm:$0xff]   ;;  %3361 = vmatprep.mubr.bf16.mxu0 %v3650_v12  ;;  %v3647_v15 = vld [vmem:[%s4252_s3 + $0x8] sm:$0xff]   ;;  %v3655_v21 = vld [vmem:[%s4254_s1 + $0x10] sm:$0xff]  }
   0x7   :  { %3348 = vmatpush3.bf16.msra.mxu0 %v3636_v2  ;;  %3505 = vmatprep.mubr.bf16.mxu1 %v3651_v13  ;;  %v3648_v16 = vld [vmem:[%s4251_s2] sm:$0xff]   ;;  %v3652_v18 = vld [vmem:[%s4253_s0 + $0x8] sm:$0xff]   ;;  %v3656_v22 = vld [vmem:[%s4253_s0 + $0x18] sm:$0xff]  }
   0x8   :  { %3492 = vmatpush3.bf16.msra.mxu1 %v3637_v3  ;;  %3349 = vmatprep.subr.bf16.mxu0 %v3638_v4  ;;  %v3649_v17 = vld [vmem:[%s4252_s3] sm:$0xff]   ;;  %v3653_v19 = vld [vmem:[%s4254_s1 + $0x8] sm:$0xff]   ;;  %v3657_v23 = vld [vmem:[%s4254_s1 + $0x18] sm:$0xff]  }
   0x9   :  { %3493 = vmatprep.subr.bf16.mxu1 %v3639_v5  ;;  %v3658_v24 = vld [vmem:[%s4253_s0 + $0x20] sm:$0xff]   ;;  %v3660_v26 = vld [vmem:[%s4253_s0 + $0x28] sm:$0xff]   ;;  %v3662_v28 = vld [vmem:[%s4253_s0 + $0x30] sm:$0xff]  }
   0xa   :  { %v3659_v25 = vld [vmem:[%s4254_s1 + $0x20] sm:$0xff]   ;;  %v3661_v27 = vld [vmem:[%s4254_s1 + $0x28] sm:$0xff]   ;;  %v3663_v29 = vld [vmem:[%s4254_s1 + $0x30] sm:$0xff]  }
   0xb   :  { %3350 = vmatpush3.bf16.msra.mxu0 %v3638_v4  ;;  %v3664_v30 = vld [vmem:[%s4253_s0 + $0x38] sm:$0xff]   ;;  %v3666_v32 = vld [vmem:[%s4253_s0 + $0x40] sm:$0xff]   ;;  %v3668_v34 = vld [vmem:[%s4253_s0 + $0x48] sm:$0xff]  }
   0xc   :  { %3494 = vmatpush3.bf16.msra.mxu1 %v3639_v5  ;;  %3351 = vmatprep.subr.bf16.mxu0 %v3640_v6  ;;  %v3665_v31 = vld [vmem:[%s4254_s1 + $0x38] sm:$0xff]   ;;  %v3667_v33 = vld [vmem:[%s4254_s1 + $0x40] sm:$0xff]   ;;  %v3669_v35 = vld [vmem:[%s4254_s1 + $0x48] sm:$0xff]  }
   0xd   :  { %3495 = vmatprep.subr.bf16.mxu1 %v3641_v7  ;;  %v3670_v36 = vld [vmem:[%s4253_s0 + $0x50] sm:$0xff]   ;;  %v3672_v38 = vld [vmem:[%s4253_s0 + $0x58] sm:$0xff]   ;;  %v3674_v40 = vld [vmem:[%s4253_s0 + $0x60] sm:$0xff]  }
   0xe   :  { %v3671_v37 = vld [vmem:[%s4254_s1 + $0x50] sm:$0xff]   ;;  %v3673_v39 = vld [vmem:[%s4254_s1 + $0x58] sm:$0xff]   ;;  %v3675_v41 = vld [vmem:[%s4254_s1 + $0x60] sm:$0xff]  }
   0xf   :  { %3352 = vmatpush3.bf16.msra.mxu0 %v3640_v6  ;;  %v3676_v42 = vld [vmem:[%s4253_s0 + $0x68] sm:$0xff]   ;;  %v3678_v44 = vld [vmem:[%s4253_s0 + $0x70] sm:$0xff]   ;;  %v3680_v46 = vld [vmem:[%s4253_s0 + $0x78] sm:$0xff]  }
  0x10   :  { %3496 = vmatpush3.bf16.msra.mxu1 %v3641_v7  ;;  %3353 = vmatprep.subr.bf16.mxu0 %v3642_v8  ;;  %v3677_v43 = vld [vmem:[%s4254_s1 + $0x68] sm:$0xff]   ;;  %v3679_v45 = vld [vmem:[%s4254_s1 + $0x70] sm:$0xff]   ;;  %v3681_v47 = vld [vmem:[%s4254_s1 + $0x78] sm:$0xff]  }
  0x11   :  { %3497 = vmatprep.subr.bf16.mxu1 %v3643_v9  ;;  %v3682_v48 = vld [vmem:[%s4253_s0 + $0x80] sm:$0xff]   ;;  %v3684_v50 = vld [vmem:[%s4253_s0 + $0x88] sm:$0xff]   ;;  %v3686_v52 = vld [vmem:[%s4253_s0 + $0x90] sm:$0xff]  }
  0x12   :  { %v3683_v49 = vld [vmem:[%s4254_s1 + $0x80] sm:$0xff]   ;;  %v3685_v51 = vld [vmem:[%s4254_s1 + $0x88] sm:$0xff]   ;;  %v3687_v53 = vld [vmem:[%s4254_s1 + $0x90] sm:$0xff]  }
  0x13   :  { %3354 = vmatpush3.bf16.msra.mxu0 %v3642_v8  ;;  %v3688_v54 = vld [vmem:[%s4253_s0 + $0x98] sm:$0xff]   ;;  %v3690_v56 = vld [vmem:[%s4253_s0 + $0xa0] sm:$0xff]   ;;  %v3692_v58 = vld [vmem:[%s4253_s0 + $0xa8] sm:$0xff]  }
  0x14   :  { %3498 = vmatpush3.bf16.msra.mxu1 %v3643_v9  ;;  %3355 = vmatprep.subr.bf16.mxu0 %v3644_v10  ;;  %v3689_v55 = vld [vmem:[%s4254_s1 + $0x98] sm:$0xff]   ;;  %v3691_v57 = vld [vmem:[%s4254_s1 + $0xa0] sm:$0xff]   ;;  %v3693_v59 = vld [vmem:[%s4254_s1 + $0xa8] sm:$0xff]  }
  0x15   :  { %3499 = vmatprep.subr.bf16.mxu1 %v3645_v11  ;;  %v3694_v60 = vld [vmem:[%s4253_s0 + $0xb0] sm:$0xff]   ;;  %v3696_v62 = vld [vmem:[%s4253_s0 + $0xb8] sm:$0xff]   ;;  %v3698_v0 = vld [vmem:[%s4253_s0 + $0xc0] sm:$0xff]  }
  0x16   :  { %v3695_v61 = vld [vmem:[%s4254_s1 + $0xb0] sm:$0xff]   ;;  %v3697_v63 = vld [vmem:[%s4254_s1 + $0xb8] sm:$0xff]   ;;  %v3699_v1 = vld [vmem:[%s4254_s1 + $0xc0] sm:$0xff]  }
  0x17   :  { %3356 = vmatpush3.bf16.msra.mxu0 %v3644_v10  ;;  %v3700_v2 = vld [vmem:[%s4253_s0 + $0xc8] sm:$0xff]   ;;  %v3702_v4 = vld [vmem:[%s4253_s0 + $0xd0] sm:$0xff]   ;;  %v3704_v6 = vld [vmem:[%s4253_s0 + $0xd8] sm:$0xff]  }
  0x18   :  { %3500 = vmatpush3.bf16.msra.mxu1 %v3645_v11  ;;  %3357 = vmatprep.subr.bf16.mxu0 %v3646_v14  ;;  %v3701_v3 = vld [vmem:[%s4254_s1 + $0xc8] sm:$0xff]   ;;  %v3703_v5 = vld [vmem:[%s4254_s1 + $0xd0] sm:$0xff]   ;;  %v3705_v7 = vld [vmem:[%s4254_s1 + $0xd8] sm:$0xff]  }
  0x19   :  { %3501 = vmatprep.subr.bf16.mxu1 %v3647_v15  ;;  %v3706_v8 = vld [vmem:[%s4253_s0 + $0xe0] sm:$0xff]   ;;  %v3708_v10 = vld [vmem:[%s4253_s0 + $0xe8] sm:$0xff]   ;;  %v3710_v12 = vld [vmem:[%s4253_s0 + $0xf0] sm:$0xff]  }
  0x1a   :  { %v3707_v9 = vld [vmem:[%s4254_s1 + $0xe0] sm:$0xff]   ;;  %v3709_v11 = vld [vmem:[%s4254_s1 + $0xe8] sm:$0xff]   ;;  %v3711_v13 = vld [vmem:[%s4254_s1 + $0xf0] sm:$0xff]  }
  0x1b   :  { %3358 = vmatpush3.bf16.msra.mxu0 %v3646_v14  ;;  %v3712_v14 = vld [vmem:[%s4253_s0 + $0xf8] sm:$0xff]  }
  0x1c   :  { %3502 = vmatpush3.bf16.msra.mxu1 %v3647_v15  ;;  %3359 = vmatprep.subr.bf16.mxu0 %v3648_v16  ;;  %v3713_v15 = vld [vmem:[%s4254_s1 + $0xf8] sm:$0xff]  }
  0x1d   :  { %3503 = vmatprep.subr.bf16.mxu1 %v3649_v17 }
  0x1f   :  { %3360 = vmatpush3.bf16.msra.mxu0 %v3648_v16  ;;  %v3714_v16 = vld [vmem:[%s4253_s0 + $0x100] sm:$0xff]  }
  0x20   :  { %3504 = vmatpush3.bf16.msra.mxu1 %v3649_v17  ;;  %v3715_v17 = vld [vmem:[%s4254_s1 + $0x100] sm:$0xff]  }
  0x22   :  { %3362 = vmatmul.mubr.bf16.vlgmr.msra.gmra.mxu0 %v3652_v18  ;;  %v3716_v18 = vld [vmem:[%s4253_s0 + $0x108] sm:$0xff]  }
  0x23   :  { %3506 = vmatmul.mubr.bf16.vlgmr.msra.gmra.mxu1 %v3653_v19  ;;  %3365 = vmatprep.mubr.bf16.mxu0 %v3654_v20  ;;  %v3717_v19 = vld [vmem:[%s4254_s1 + $0x108] sm:$0xff]   ;;  %v3718_v20 = vld [vmem:[%s4253_s0 + $0x110] sm:$0xff]  }
  0x24   :  { %3509 = vmatprep.mubr.bf16.mxu1 %v3655_v21  ;;  %v3719_v21 = vld [vmem:[%s4254_s1 + $0x110] sm:$0xff]  }
  0x2a   :  { %3366 = vmatmul.mubr.bf16.gmra.mxu0 %v3656_v22  ;;  %v3720_v22 = vld [vmem:[%s4253_s0 + $0x118] sm:$0xff]  }
  0x2b   :  { %3510 = vmatmul.mubr.bf16.gmra.mxu1 %v3657_v23  ;;  %3369 = vmatprep.mubr.bf16.mxu0 %v3658_v24  ;;  %v3721_v23 = vld [vmem:[%s4254_s1 + $0x118] sm:$0xff]   ;;  %v3722_v24 = vld [vmem:[%s4253_s0 + $0x120] sm:$0xff]  }
  0x2c   :  { %3513 = vmatprep.mubr.bf16.mxu1 %v3659_v25  ;;  %v3723_v25 = vld [vmem:[%s4254_s1 + $0x120] sm:$0xff]  }
  0x32   :  { %3370 = vmatmul.mubr.bf16.gmra.mxu0 %v3660_v26  ;;  %v3724_v26 = vld [vmem:[%s4253_s0 + $0x128] sm:$0xff]  }
  0x33   :  { %3514 = vmatmul.mubr.bf16.gmra.mxu1 %v3661_v27  ;;  %3373 = vmatprep.mubr.bf16.mxu0 %v3662_v28  ;;  %v3725_v27 = vld [vmem:[%s4254_s1 + $0x128] sm:$0xff]   ;;  %v3726_v28 = vld [vmem:[%s4253_s0 + $0x130] sm:$0xff]  }
  0x34   :  { %3517 = vmatprep.mubr.bf16.mxu1 %v3663_v29  ;;  %v3727_v29 = vld [vmem:[%s4254_s1 + $0x130] sm:$0xff]  }
  0x3a   :  { %3374 = vmatmul.mubr.bf16.gmra.mxu0 %v3664_v30  ;;  %v3728_v30 = vld [vmem:[%s4253_s0 + $0x138] sm:$0xff]  }
  0x3b   :  { %3518 = vmatmul.mubr.bf16.gmra.mxu1 %v3665_v31  ;;  %3377 = vmatprep.mubr.bf16.mxu0 %v3666_v32  ;;  %v3729_v31 = vld [vmem:[%s4254_s1 + $0x138] sm:$0xff]   ;;  %v3730_v32 = vld [vmem:[%s4253_s0 + $0x140] sm:$0xff]  }
  0x3c   :  { %3521 = vmatprep.mubr.bf16.mxu1 %v3667_v33  ;;  %v3731_v33 = vld [vmem:[%s4254_s1 + $0x140] sm:$0xff]  }
  0x42   :  { %3378 = vmatmul.mubr.bf16.gmra.mxu0 %v3668_v34  ;;  %v3732_v34 = vld [vmem:[%s4253_s0 + $0x148] sm:$0xff]  }
  0x43   :  { %3522 = vmatmul.mubr.bf16.gmra.mxu1 %v3669_v35  ;;  %3381 = vmatprep.mubr.bf16.mxu0 %v3670_v36  ;;  %v3733_v35 = vld [vmem:[%s4254_s1 + $0x148] sm:$0xff]   ;;  %v3734_v36 = vld [vmem:[%s4253_s0 + $0x150] sm:$0xff]  }
  0x44   :  { %3525 = vmatprep.mubr.bf16.mxu1 %v3671_v37  ;;  %v3735_v37 = vld [vmem:[%s4254_s1 + $0x150] sm:$0xff]  }
  0x4a   :  { %3382 = vmatmul.mubr.bf16.gmra.mxu0 %v3672_v38  ;;  %v3736_v38 = vld [vmem:[%s4253_s0 + $0x158] sm:$0xff]  }
  0x4b   :  { %3526 = vmatmul.mubr.bf16.gmra.mxu1 %v3673_v39  ;;  %3385 = vmatprep.mubr.bf16.mxu0 %v3674_v40  ;;  %v3737_v39 = vld [vmem:[%s4254_s1 + $0x158] sm:$0xff]   ;;  %v3738_v40 = vld [vmem:[%s4253_s0 + $0x160] sm:$0xff]  }
  0x4c   :  { %3529 = vmatprep.mubr.bf16.mxu1 %v3675_v41  ;;  %v3739_v41 = vld [vmem:[%s4254_s1 + $0x160] sm:$0xff]  }
  0x52   :  { %3386 = vmatmul.mubr.bf16.gmra.mxu0 %v3676_v42  ;;  %v3740_v42 = vld [vmem:[%s4253_s0 + $0x168] sm:$0xff]  }
  0x53   :  { %3530 = vmatmul.mubr.bf16.gmra.mxu1 %v3677_v43  ;;  %3389 = vmatprep.mubr.bf16.mxu0 %v3678_v44  ;;  %v3741_v43 = vld [vmem:[%s4254_s1 + $0x168] sm:$0xff]   ;;  %v3742_v44 = vld [vmem:[%s4253_s0 + $0x170] sm:$0xff]  }
  0x54   :  { %3533 = vmatprep.mubr.bf16.mxu1 %v3679_v45  ;;  %v3743_v45 = vld [vmem:[%s4254_s1 + $0x170] sm:$0xff]  }
  0x5a   :  { %3390 = vmatmul.mubr.bf16.gmra.mxu0 %v3680_v46  ;;  %v3744_v46 = vld [vmem:[%s4253_s0 + $0x178] sm:$0xff]  }
  0x5b   :  { %3534 = vmatmul.mubr.bf16.gmra.mxu1 %v3681_v47  ;;  %3393 = vmatprep.mubr.bf16.mxu0 %v3682_v48  ;;  %v3745_v47 = vld [vmem:[%s4254_s1 + $0x178] sm:$0xff]   ;;  %v3746_v48 = vld [vmem:[%s4253_s0 + $0x180] sm:$0xff]  }
  0x5c   :  { %3537 = vmatprep.mubr.bf16.mxu1 %v3683_v49  ;;  %v3747_v49 = vld [vmem:[%s4254_s1 + $0x180] sm:$0xff]  }
  0x62   :  { %3394 = vmatmul.mubr.bf16.gmra.mxu0 %v3684_v50  ;;  %v3748_v50 = vld [vmem:[%s4253_s0 + $0x188] sm:$0xff]  }
  0x63   :  { %3538 = vmatmul.mubr.bf16.gmra.mxu1 %v3685_v51  ;;  %3397 = vmatprep.mubr.bf16.mxu0 %v3686_v52  ;;  %v3749_v51 = vld [vmem:[%s4254_s1 + $0x188] sm:$0xff]   ;;  %v3750_v52 = vld [vmem:[%s4253_s0 + $0x190] sm:$0xff]  }
  0x64   :  { %3541 = vmatprep.mubr.bf16.mxu1 %v3687_v53  ;;  %v3751_v53 = vld [vmem:[%s4254_s1 + $0x190] sm:$0xff]  }
  0x6a   :  { %3398 = vmatmul.mubr.bf16.gmra.mxu0 %v3688_v54 }
  0x6b   :  { %3542 = vmatmul.mubr.bf16.gmra.mxu1 %v3689_v55  ;;  %3401 = vmatprep.mubr.bf16.mxu0 %v3690_v56 }
  0x6c   :  { %3545 = vmatprep.mubr.bf16.mxu1 %v3691_v57 }
  0x72   :  { %3402 = vmatmul.mubr.bf16.gmra.mxu0 %v3692_v58 }
  0x73   :  { %3546 = vmatmul.mubr.bf16.gmra.mxu1 %v3693_v59  ;;  %3405 = vmatprep.mubr.bf16.mxu0 %v3694_v60  ;;  %v3752_v59 = vld [vmem:[%s4253_s0 + $0x198] sm:$0xff]  }
  0x74   :  { %3549 = vmatprep.mubr.bf16.mxu1 %v3695_v61  ;;  %v3753_v61 = vld [vmem:[%s4254_s1 + $0x198] sm:$0xff]  }
  0x7a   :  { %3406 = vmatmul.mubr.bf16.gmra.mxu0 %v3696_v62  ;;  %v3754_v62 = vld [vmem:[%s4253_s0 + $0x1a0] sm:$0xff]  }
  0x7b   :  { %3550 = vmatmul.mubr.bf16.gmra.mxu1 %v3697_v63  ;;  %3409 = vmatprep.mubr.bf16.mxu0 %v3698_v0  ;;  %v3755_v0 = vld [vmem:[%s4254_s1 + $0x1a0] sm:$0xff]  }
  0x7c   :  { %3553 = vmatprep.mubr.bf16.mxu1 %v3699_v1 }
  0x82   :  { %3410 = vmatmul.mubr.bf16.gmra.mxu0 %v3700_v2 }
  0x83   :  { %3554 = vmatmul.mubr.bf16.gmra.mxu1 %v3701_v3  ;;  %3413 = vmatprep.mubr.bf16.mxu0 %v3702_v4 }
  0x84   :  { %3557 = vmatprep.mubr.bf16.mxu1 %v3703_v5 }
  0x8a   :  { %3414 = vmatmul.mubr.bf16.gmra.mxu0 %v3704_v6 }
  0x8b   :  { %3558 = vmatmul.mubr.bf16.gmra.mxu1 %v3705_v7  ;;  %3417 = vmatprep.mubr.bf16.mxu0 %v3706_v8 }
  0x8c   :  { %3561 = vmatprep.mubr.bf16.mxu1 %v3707_v9 }
  0x92   :  { %3418 = vmatmul.mubr.bf16.gmra.mxu0 %v3708_v10 }
  0x93   :  { %3562 = vmatmul.mubr.bf16.gmra.mxu1 %v3709_v11  ;;  %3421 = vmatprep.mubr.bf16.mxu0 %v3710_v12 }
  0x94   :  { %3565 = vmatprep.mubr.bf16.mxu1 %v3711_v13 }
  0x9a   :  { %3422 = vmatmul.mubr.bf16.gmra.mxu0 %v3712_v14 }
  0x9b   :  { %3566 = vmatmul.mubr.bf16.gmra.mxu1 %v3713_v15  ;;  %3425 = vmatprep.mubr.bf16.mxu0 %v3714_v16 }
  0x9c   :  { %3569 = vmatprep.mubr.bf16.mxu1 %v3715_v17 }
  0xa2   :  { %3426 = vmatmul.mubr.bf16.gmra.mxu0 %v3716_v18 }
  0xa3   :  { %3570 = vmatmul.mubr.bf16.gmra.mxu1 %v3717_v19  ;;  %3429 = vmatprep.mubr.bf16.mxu0 %v3718_v20 }
  0xa4   :  { %3573 = vmatprep.mubr.bf16.mxu1 %v3719_v21 }
  0xaa   :  { %3430 = vmatmul.mubr.bf16.gmra.mxu0 %v3720_v22 }
  0xab   :  { %3574 = vmatmul.mubr.bf16.gmra.mxu1 %v3721_v23  ;;  %3433 = vmatprep.mubr.bf16.mxu0 %v3722_v24 }
  0xac   :  { %3577 = vmatprep.mubr.bf16.mxu1 %v3723_v25  ;;  %v3756_v25 = vld [vmem:[%s4253_s0 + $0x1a8] sm:$0xff]  }
  0xb2   :  { %3434 = vmatmul.mubr.bf16.gmra.mxu0 %v3724_v26 }
  0xb3   :  { %3578 = vmatmul.mubr.bf16.gmra.mxu1 %v3725_v27  ;;  %3437 = vmatprep.mubr.bf16.mxu0 %v3726_v28 }
  0xb4   :  { %3581 = vmatprep.mubr.bf16.mxu1 %v3727_v29 }
  0xba   :  { %3438 = vmatmul.mubr.bf16.gmra.mxu0 %v3728_v30  ;;  %v3757_v30 = vld [vmem:[%s4254_s1 + $0x1a8] sm:$0xff]  }
  0xbb   :  { %3582 = vmatmul.mubr.bf16.gmra.mxu1 %v3729_v31  ;;  %3441 = vmatprep.mubr.bf16.mxu0 %v3730_v32  ;;  %v3758_v31 = vld [vmem:[%s4253_s0 + $0x1b0] sm:$0xff]  }
  0xbc   :  { %3585 = vmatprep.mubr.bf16.mxu1 %v3731_v33 }
  0xc2   :  { %3442 = vmatmul.mubr.bf16.gmra.mxu0 %v3732_v34 }
  0xc3   :  { %3586 = vmatmul.mubr.bf16.gmra.mxu1 %v3733_v35  ;;  %3445 = vmatprep.mubr.bf16.mxu0 %v3734_v36  ;;  %v3759_v36 = vld [vmem:[%s4254_s1 + $0x1b0] sm:$0xff]  }
  0xc4   :  { %3589 = vmatprep.mubr.bf16.mxu1 %v3735_v37 }
  0xca   :  { %3446 = vmatmul.mubr.bf16.gmra.mxu0 %v3736_v38 }
  0xcb   :  { %3590 = vmatmul.mubr.bf16.gmra.mxu1 %v3737_v39  ;;  %3449 = vmatprep.mubr.bf16.mxu0 %v3738_v40 }
  0xcc   :  { %3593 = vmatprep.mubr.bf16.mxu1 %v3739_v41 }
  0xd2   :  { %3450 = vmatmul.mubr.bf16.gmra.mxu0 %v3740_v42 }
  0xd3   :  { %3594 = vmatmul.mubr.bf16.gmra.mxu1 %v3741_v43  ;;  %3453 = vmatprep.mubr.bf16.mxu0 %v3742_v44 }
  0xd4   :  { %3597 = vmatprep.mubr.bf16.mxu1 %v3743_v45 }
  0xda   :  { %3454 = vmatmul.mubr.bf16.gmra.mxu0 %v3744_v46 }
  0xdb   :  { %3598 = vmatmul.mubr.bf16.gmra.mxu1 %v3745_v47  ;;  %3457 = vmatprep.mubr.bf16.mxu0 %v3746_v48 }
  0xdc   :  { %3601 = vmatprep.mubr.bf16.mxu1 %v3747_v49 }
  0xe2   :  { %v3363_v54 = vpop.f32.mrf.mxu0  ;;  %3458 = vmatmul.mubr.bf16.gmra.mxu0 %v3748_v50 }
  0xe3   :  { %v3507_v55 = vpop.f32.mrf.mxu1  ;;  %3602 = vmatmul.mubr.bf16.gmra.mxu1 %v3749_v51  ;;  %3461 = vmatprep.mubr.bf16.mxu0 %v3750_v52  ;;  %v2396_v9 = vmul.f32 %v3363_v54, %v3363_v54 }
  0xe4   :  { %v628_v56 = vpop.f32.mrf.mxu0  ;;  %3605 = vmatprep.mubr.bf16.mxu1 %v3751_v53  ;;  %v2792_v13 = vmul.f32 %v3507_v55, %v3507_v55 }
  0xe5   :  { %v1749_v57 = vpop.f32.mrf.mxu1  ;;  %v2394_v1 = vmul.f32 %v628_v56, %v628_v56 }
  0xe6   :  { %v3364_v58 = vpop.f32.mrf.mxu0  ;;  %v2790_v5 = vmul.f32 %v1749_v57, %v1749_v57 }
  0xe7   :  { %v3508_v60 = vpop.f32.mrf.mxu1  ;;  %v2397_v17 = vmul.f32 %v3364_v58, %v3364_v58 }
  0xe8   :  { %v631_v63 = vpop.f32.mrf.mxu0  ;;  %v2793_v21 = vmul.f32 %v3508_v60, %v3508_v60 }
  0xe9   :  { %v2260_v2 = vadd.f32 %v631_v63, %v628_v56  ;;  %v2395_v3 = vmul.f32 %v631_v63, %v631_v63  ;;  %v1752_v4 = vpop.f32.mrf.mxu1 }
  0xea   :  { %v2656_v6 = vadd.f32 %v1752_v4, %v1749_v57  ;;  %v2791_v7 = vmul.f32 %v1752_v4, %v1752_v4  ;;  %v3367_v8 = vpop.f32.mrf.mxu0  ;;  %3462 = vmatmul.mubr.bf16.gmra.mxu0 %v3752_v59 }
  0xeb   :  { %v2261_v10 = vadd.f32 %v3363_v54, %v2260_v2  ;;  %v2522_v11 = vadd.f32 %v2395_v3, %v2394_v1  ;;  %v3511_v12 = vpop.f32.mrf.mxu1  ;;  %3606 = vmatmul.mubr.bf16.gmra.mxu1 %v3753_v61  ;;  %3465 = vmatprep.mubr.bf16.mxu0 %v3754_v62  ;;  %v2400_v45 = vmul.f32 %v3367_v8, %v3367_v8  ;;  %v3760_v61 = vld [vmem:[%s4253_s0 + $0x1b8] sm:$0xff]   ;;  %v3762_v3 = vld [vmem:[%s4253_s0 + $0x1c0] sm:$0xff]  }
  0xec   :  { %v2657_v14 = vadd.f32 %v3507_v55, %v2656_v6  ;;  %v2918_v15 = vadd.f32 %v2791_v7, %v2790_v5  ;;  %v644_v16 = vpop.f32.mrf.mxu0  ;;  %3609 = vmatprep.mubr.bf16.mxu1 %v3755_v0  ;;  %v2796_v49 = vmul.f32 %v3511_v12, %v3511_v12  ;;  %v3761_v2 = vld [vmem:[%s4254_s1 + $0x1b8] sm:$0xff]  }
  0xed   :  { %v2262_v18 = vadd.f32 %v3364_v58, %v2261_v10  ;;  %v2523_v19 = vadd.f32 %v2522_v11, %v2396_v9  ;;  %v1765_v20 = vpop.f32.mrf.mxu1  ;;  %v2398_v28 = vmul.f32 %v644_v16, %v644_v16 }
  0xee   :  { %v2658_v22 = vadd.f32 %v3508_v60, %v2657_v14  ;;  %v2919_v23 = vadd.f32 %v2918_v15, %v2792_v13  ;;  %v3368_v24 = vpop.f32.mrf.mxu0  ;;  %v2794_v34 = vmul.f32 %v1765_v20, %v1765_v20 }
  0xef   :  { %v2524_v26 = vadd.f32 %v2523_v19, %v2397_v17  ;;  %v2263_v27 = vadd.f32 %v2262_v18, %v644_v16  ;;  %v3512_v29 = vpop.f32.mrf.mxu1  ;;  %v2401_v53 = vmul.f32 %v3368_v24, %v3368_v24 }
  0xf0   :  { %v2920_v32 = vadd.f32 %v2919_v23, %v2793_v21  ;;  %v2659_v33 = vadd.f32 %v2658_v22, %v1765_v20  ;;  %v647_v35 = vpop.f32.mrf.mxu0  ;;  %v2797_v57 = vmul.f32 %v3512_v29, %v3512_v29 }
  0xf1   :  { %v2525_v37 = vadd.f32 %v2524_v26, %v2398_v28  ;;  %v2264_v38 = vadd.f32 %v2263_v27, %v647_v35  ;;  %v2399_v39 = vmul.f32 %v647_v35, %v647_v35  ;;  %v1768_v40 = vpop.f32.mrf.mxu1 }
  0xf2   :  { %v2921_v41 = vadd.f32 %v2920_v32, %v2794_v34  ;;  %v2660_v42 = vadd.f32 %v2659_v33, %v1768_v40  ;;  %v2795_v43 = vmul.f32 %v1768_v40, %v1768_v40  ;;  %v3371_v44 = vpop.f32.mrf.mxu0  ;;  %3466 = vmatmul.mubr.bf16.gmra.mxu0 %v3756_v25  ;;  %v3764_v33 = vld [vmem:[%s4253_s0 + $0x1c8] sm:$0xff]  }
  0xf3   :  { %v2265_v46 = vadd.f32 %v3367_v8, %v2264_v38  ;;  %v2526_v47 = vadd.f32 %v2525_v37, %v2399_v39  ;;  %v3515_v48 = vpop.f32.mrf.mxu1  ;;  %3610 = vmatmul.mubr.bf16.gmra.mxu1 %v3757_v30  ;;  %3469 = vmatprep.mubr.bf16.mxu0 %v3758_v31  ;;  %v3763_v8 = vld [vmem:[%s4254_s1 + $0x1c0] sm:$0xff]   ;;  %v2404_v17 = vmul.f32 %v3371_v44, %v3371_v44  ;;  %v3765_v38 = vld [vmem:[%s4254_s1 + $0x1c8] sm:$0xff]   ;;  %v3766_v39 = vld [vmem:[%s4253_s0 + $0x1d0] sm:$0xff]  }
  0xf4   :  { %v2661_v50 = vadd.f32 %v3511_v12, %v2660_v42  ;;  %v2922_v51 = vadd.f32 %v2921_v41, %v2795_v43  ;;  %v660_v52 = vpop.f32.mrf.mxu0  ;;  %3613 = vmatprep.mubr.bf16.mxu1 %v3759_v36  ;;  %v2800_v21 = vmul.f32 %v3515_v48, %v3515_v48 }
  0xf5   :  { %v2266_v54 = vadd.f32 %v3368_v24, %v2265_v46  ;;  %v2527_v55 = vadd.f32 %v2526_v47, %v2400_v45  ;;  %v1781_v56 = vpop.f32.mrf.mxu1  ;;  %v2402_v0 = vmul.f32 %v660_v52, %v660_v52 }
  0xf6   :  { %v2662_v58 = vadd.f32 %v3512_v29, %v2661_v50  ;;  %v2923_v59 = vadd.f32 %v2922_v51, %v2796_v49  ;;  %v3372_v60 = vpop.f32.mrf.mxu0  ;;  %v2798_v6 = vmul.f32 %v1781_v56, %v1781_v56 }
  0xf7   :  { %v2528_v62 = vadd.f32 %v2527_v55, %v2401_v53  ;;  %v2267_v63 = vadd.f32 %v2266_v54, %v660_v52  ;;  %v3516_v1 = vpop.f32.mrf.mxu1  ;;  %v2405_v25 = vmul.f32 %v3372_v60, %v3372_v60 }
  0xf8   :  { %v2924_v4 = vadd.f32 %v2923_v59, %v2797_v57  ;;  %v2663_v5 = vadd.f32 %v2662_v58, %v1781_v56  ;;  %v663_v7 = vpop.f32.mrf.mxu0  ;;  %v2801_v29 = vmul.f32 %v3516_v1, %v3516_v1 }
  0xf9   :  { %v2529_v9 = vadd.f32 %v2528_v62, %v2402_v0  ;;  %v2268_v10 = vadd.f32 %v2267_v63, %v663_v7  ;;  %v2403_v11 = vmul.f32 %v663_v7, %v663_v7  ;;  %v1784_v12 = vpop.f32.mrf.mxu1 }
  0xfa   :  { %v2925_v13 = vadd.f32 %v2924_v4, %v2798_v6  ;;  %v2664_v14 = vadd.f32 %v2663_v5, %v1784_v12  ;;  %v2799_v15 = vmul.f32 %v1784_v12, %v1784_v12  ;;  %v3375_v16 = vpop.f32.mrf.mxu0  ;;  %3470 = vmatmul.mubr.bf16.gmra.mxu0 %v3760_v61  ;;  %v3768_v5 = vld [vmem:[%s4253_s0 + $0x1d8] sm:$0xff]  }
  0xfb   :  { %v2269_v18 = vadd.f32 %v3371_v44, %v2268_v10  ;;  %v2530_v19 = vadd.f32 %v2529_v9, %v2403_v11  ;;  %v3519_v20 = vpop.f32.mrf.mxu1  ;;  %3614 = vmatmul.mubr.bf16.gmra.mxu1 %v3761_v2  ;;  %3473 = vmatprep.mubr.bf16.mxu0 %v3762_v3  ;;  %v3767_v44 = vld [vmem:[%s4254_s1 + $0x1d0] sm:$0xff]   ;;  %v2408_v53 = vmul.f32 %v3375_v16, %v3375_v16  ;;  %v3769_v10 = vld [vmem:[%s4254_s1 + $0x1d8] sm:$0xff]   ;;  %v3770_v11 = vld [vmem:[%s4253_s0 + $0x1e0] sm:$0xff]  }
  0xfc   :  { %v2665_v22 = vadd.f32 %v3515_v48, %v2664_v14  ;;  %v2926_v23 = vadd.f32 %v2925_v13, %v2799_v15  ;;  %v676_v24 = vpop.f32.mrf.mxu0  ;;  %3617 = vmatprep.mubr.bf16.mxu1 %v3763_v8  ;;  %v2804_v57 = vmul.f32 %v3519_v20, %v3519_v20 }
  0xfd   :  { %v2270_v26 = vadd.f32 %v3372_v60, %v2269_v18  ;;  %v2531_v27 = vadd.f32 %v2530_v19, %v2404_v17  ;;  %v1797_v28 = vpop.f32.mrf.mxu1  ;;  %v2406_v36 = vmul.f32 %v676_v24, %v676_v24 }
  0xfe   :  { %v2666_v30 = vadd.f32 %v3516_v1, %v2665_v22  ;;  %v2927_v31 = vadd.f32 %v2926_v23, %v2800_v21  ;;  %v3376_v32 = vpop.f32.mrf.mxu0  ;;  %v2802_v42 = vmul.f32 %v1797_v28, %v1797_v28 }
  0xff   :  { %v2532_v34 = vadd.f32 %v2531_v27, %v2405_v25  ;;  %v2271_v35 = vadd.f32 %v2270_v26, %v676_v24  ;;  %v3520_v37 = vpop.f32.mrf.mxu1  ;;  %v2409_v61 = vmul.f32 %v3376_v32, %v3376_v32 }
 0x100   :  { %v2928_v40 = vadd.f32 %v2927_v31, %v2801_v29  ;;  %v2667_v41 = vadd.f32 %v2666_v30, %v1797_v28  ;;  %v679_v43 = vpop.f32.mrf.mxu0  ;;  %v2805_v1 = vmul.f32 %v3520_v37, %v3520_v37 }
 0x101   :  { %v2533_v45 = vadd.f32 %v2532_v34, %v2406_v36  ;;  %v2272_v46 = vadd.f32 %v2271_v35, %v679_v43  ;;  %v2407_v47 = vmul.f32 %v679_v43, %v679_v43  ;;  %v1800_v48 = vpop.f32.mrf.mxu1 }
 0x102   :  { %v2929_v49 = vadd.f32 %v2928_v40, %v2802_v42  ;;  %v2668_v50 = vadd.f32 %v2667_v41, %v1800_v48  ;;  %v2803_v51 = vmul.f32 %v1800_v48, %v1800_v48  ;;  %v3379_v52 = vpop.f32.mrf.mxu0  ;;  %3474 = vmatmul.mubr.bf16.gmra.mxu0 %v3764_v33  ;;  %v3772_v41 = vld [vmem:[%s4253_s0 + $0x1e8] sm:$0xff]  }
 0x103   :  { %v2273_v54 = vadd.f32 %v3375_v16, %v2272_v46  ;;  %v2534_v55 = vadd.f32 %v2533_v45, %v2407_v47  ;;  %v3523_v56 = vpop.f32.mrf.mxu1  ;;  %3618 = vmatmul.mubr.bf16.gmra.mxu1 %v3765_v38  ;;  %3477 = vmatprep.mubr.bf16.mxu0 %v3766_v39  ;;  %v3771_v16 = vld [vmem:[%s4254_s1 + $0x1e0] sm:$0xff]   ;;  %v2412_v25 = vmul.f32 %v3379_v52, %v3379_v52  ;;  %v3773_v46 = vld [vmem:[%s4254_s1 + $0x1e8] sm:$0xff]   ;;  %v3774_v47 = vld [vmem:[%s4253_s0 + $0x1f0] sm:$0xff]  }
 0x104   :  { %v2669_v58 = vadd.f32 %v3519_v20, %v2668_v50  ;;  %v2930_v59 = vadd.f32 %v2929_v49, %v2803_v51  ;;  %v692_v60 = vpop.f32.mrf.mxu0  ;;  %3621 = vmatprep.mubr.bf16.mxu1 %v3767_v44  ;;  %v2808_v29 = vmul.f32 %v3523_v56, %v3523_v56 }
 0x105   :  { %v2274_v62 = vadd.f32 %v3376_v32, %v2273_v54  ;;  %v2535_v63 = vadd.f32 %v2534_v55, %v2408_v53  ;;  %v1813_v0 = vpop.f32.mrf.mxu1  ;;  %v2410_v8 = vmul.f32 %v692_v60, %v692_v60 }
 0x106   :  { %v2670_v2 = vadd.f32 %v3520_v37, %v2669_v58  ;;  %v2931_v3 = vadd.f32 %v2930_v59, %v2804_v57  ;;  %v3380_v4 = vpop.f32.mrf.mxu0  ;;  %v2806_v14 = vmul.f32 %v1813_v0, %v1813_v0 }
 0x107   :  { %v2536_v6 = vadd.f32 %v2535_v63, %v2409_v61  ;;  %v2275_v7 = vadd.f32 %v2274_v62, %v692_v60  ;;  %v3524_v9 = vpop.f32.mrf.mxu1  ;;  %v2413_v33 = vmul.f32 %v3380_v4, %v3380_v4 }
 0x108   :  { %v2932_v12 = vadd.f32 %v2931_v3, %v2805_v1  ;;  %v2671_v13 = vadd.f32 %v2670_v2, %v1813_v0  ;;  %v695_v15 = vpop.f32.mrf.mxu0  ;;  %v2809_v37 = vmul.f32 %v3524_v9, %v3524_v9 }
 0x109   :  { %v2537_v17 = vadd.f32 %v2536_v6, %v2410_v8  ;;  %v2276_v18 = vadd.f32 %v2275_v7, %v695_v15  ;;  %v2411_v19 = vmul.f32 %v695_v15, %v695_v15  ;;  %v1816_v20 = vpop.f32.mrf.mxu1 }
 0x10a   :  { %v2933_v21 = vadd.f32 %v2932_v12, %v2806_v14  ;;  %v2672_v22 = vadd.f32 %v2671_v13, %v1816_v20  ;;  %v2807_v23 = vmul.f32 %v1816_v20, %v1816_v20  ;;  %v3383_v24 = vpop.f32.mrf.mxu0  ;;  %3478 = vmatmul.mubr.bf16.gmra.mxu0 %v3768_v5  ;;  %v3776_v13 = vld [vmem:[%s4253_s0 + $0x1f8] sm:$0xff]  }
 0x10b   :  { %v2277_v26 = vadd.f32 %v3379_v52, %v2276_v18  ;;  %v2538_v27 = vadd.f32 %v2537_v17, %v2411_v19  ;;  %v3527_v28 = vpop.f32.mrf.mxu1  ;;  %3622 = vmatmul.mubr.bf16.gmra.mxu1 %v3769_v10  ;;  %3481 = vmatprep.mubr.bf16.mxu0 %v3770_v11  ;;  %v3775_v52 = vld [vmem:[%s4254_s1 + $0x1f0] sm:$0xff]   ;;  %v2416_v61 = vmul.f32 %v3383_v24, %v3383_v24  ;;  %v3777_v18 = vld [vmem:[%s4254_s1 + $0x1f8] sm:$0xff]  }
 0x10c   :  { %v2673_v30 = vadd.f32 %v3523_v56, %v2672_v22  ;;  %v2934_v31 = vadd.f32 %v2933_v21, %v2807_v23  ;;  %v708_v32 = vpop.f32.mrf.mxu0  ;;  %3625 = vmatprep.mubr.bf16.mxu1 %v3771_v16  ;;  %v2812_v1 = vmul.f32 %v3527_v28, %v3527_v28 }
 0x10d   :  { %v2278_v34 = vadd.f32 %v3380_v4, %v2277_v26  ;;  %v2539_v35 = vadd.f32 %v2538_v27, %v2412_v25  ;;  %v1829_v36 = vpop.f32.mrf.mxu1  ;;  %v2414_v44 = vmul.f32 %v708_v32, %v708_v32 }
 0x10e   :  { %v2674_v38 = vadd.f32 %v3524_v9, %v2673_v30  ;;  %v2935_v39 = vadd.f32 %v2934_v31, %v2808_v29  ;;  %v3384_v40 = vpop.f32.mrf.mxu0  ;;  %v2810_v50 = vmul.f32 %v1829_v36, %v1829_v36 }
 0x10f   :  { %v2540_v42 = vadd.f32 %v2539_v35, %v2413_v33  ;;  %v2279_v43 = vadd.f32 %v2278_v34, %v708_v32  ;;  %v3528_v45 = vpop.f32.mrf.mxu1  ;;  %v2417_v5 = vmul.f32 %v3384_v40, %v3384_v40 }
 0x110   :  { %v2936_v48 = vadd.f32 %v2935_v39, %v2809_v37  ;;  %v2675_v49 = vadd.f32 %v2674_v38, %v1829_v36  ;;  %v711_v51 = vpop.f32.mrf.mxu0  ;;  %v2813_v9 = vmul.f32 %v3528_v45, %v3528_v45 }
 0x111   :  { %v2541_v53 = vadd.f32 %v2540_v42, %v2414_v44  ;;  %v2280_v54 = vadd.f32 %v2279_v43, %v711_v51  ;;  %v2415_v55 = vmul.f32 %v711_v51, %v711_v51  ;;  %v1832_v56 = vpop.f32.mrf.mxu1 }
 0x112   :  { %v2937_v57 = vadd.f32 %v2936_v48, %v2810_v50  ;;  %v2676_v58 = vadd.f32 %v2675_v49, %v1832_v56  ;;  %v2811_v59 = vmul.f32 %v1832_v56, %v1832_v56  ;;  %v3387_v60 = vpop.f32.mrf.mxu0  ;;  %3482 = vmatmul.mubr.bf16.gmra.mxu0 %v3772_v41 }
 0x113   :  { %v2281_v62 = vadd.f32 %v3383_v24, %v2280_v54  ;;  %v2542_v63 = vadd.f32 %v2541_v53, %v2415_v55  ;;  %v3531_v0 = vpop.f32.mrf.mxu1  ;;  %3626 = vmatmul.mubr.bf16.gmra.mxu1 %v3773_v46  ;;  %3485 = vmatprep.mubr.bf16.mxu0 %v3774_v47  ;;  %v2420_v31 = vmul.f32 %v3387_v60, %v3387_v60 }
 0x114   :  { %v2677_v2 = vadd.f32 %v3527_v28, %v2676_v58  ;;  %v2938_v3 = vadd.f32 %v2937_v57, %v2811_v59  ;;  %v724_v4 = vpop.f32.mrf.mxu0  ;;  %3629 = vmatprep.mubr.bf16.mxu1 %v3775_v52  ;;  %v2816_v35 = vmul.f32 %v3531_v0, %v3531_v0 }
 0x115   :  { %v2282_v6 = vadd.f32 %v3384_v40, %v2281_v62  ;;  %v2543_v7 = vadd.f32 %v2542_v63, %v2416_v61  ;;  %v1845_v8 = vpop.f32.mrf.mxu1  ;;  %v2418_v16 = vmul.f32 %v724_v4, %v724_v4 }
 0x116   :  { %v2678_v10 = vadd.f32 %v3528_v45, %v2677_v2  ;;  %v2939_v11 = vadd.f32 %v2938_v3, %v2812_v1  ;;  %v3388_v12 = vpop.f32.mrf.mxu0  ;;  %v2814_v21 = vmul.f32 %v1845_v8, %v1845_v8 }
 0x117   :  { %v2544_v14 = vadd.f32 %v2543_v7, %v2417_v5  ;;  %v2283_v15 = vadd.f32 %v2282_v6, %v724_v4  ;;  %v3532_v17 = vpop.f32.mrf.mxu1  ;;  %v2421_v39 = vmul.f32 %v3388_v12, %v3388_v12 }
 0x118   :  { %v2940_v19 = vadd.f32 %v2939_v11, %v2813_v9  ;;  %v2679_v20 = vadd.f32 %v2678_v10, %v1845_v8  ;;  %v727_v22 = vpop.f32.mrf.mxu0  ;;  %v2817_v43 = vmul.f32 %v3532_v17, %v3532_v17 }
 0x119   :  { %v2545_v23 = vadd.f32 %v2544_v14, %v2418_v16  ;;  %v2284_v24 = vadd.f32 %v2283_v15, %v727_v22  ;;  %v2419_v25 = vmul.f32 %v727_v22, %v727_v22  ;;  %v1848_v26 = vpop.f32.mrf.mxu1 }
 0x11a   :  { %v2941_v27 = vadd.f32 %v2940_v19, %v2814_v21  ;;  %v2680_v28 = vadd.f32 %v2679_v20, %v1848_v26  ;;  %v2815_v29 = vmul.f32 %v1848_v26, %v1848_v26  ;;  %v3391_v30 = vpop.f32.mrf.mxu0  ;;  %3486 = vmatmul.mubr.bf16.gmra.mxu0 %v3776_v13 }
 0x11b   :  { %v2285_v32 = vadd.f32 %v3387_v60, %v2284_v24  ;;  %v2546_v33 = vadd.f32 %v2545_v23, %v2419_v25  ;;  %v3535_v34 = vpop.f32.mrf.mxu1  ;;  %3630 = vmatmul.mubr.bf16.gmra.mxu1 %v3777_v18  ;;  %v2424_v63 = vmul.f32 %v3391_v30, %v3391_v30 }
 0x11c   :  { %v2681_v36 = vadd.f32 %v3531_v0, %v2680_v28  ;;  %v2942_v37 = vadd.f32 %v2941_v27, %v2815_v29  ;;  %v740_v38 = vpop.f32.mrf.mxu0  ;;  %v2820_v3 = vmul.f32 %v3535_v34, %v3535_v34 }
 0x11d   :  { %v2286_v40 = vadd.f32 %v3388_v12, %v2285_v32  ;;  %v2547_v41 = vadd.f32 %v2546_v33, %v2420_v31  ;;  %v1861_v42 = vpop.f32.mrf.mxu1  ;;  %v2422_v49 = vmul.f32 %v740_v38, %v740_v38 }
 0x11e   :  { %v2682_v44 = vadd.f32 %v3532_v17, %v2681_v36  ;;  %v2943_v45 = vadd.f32 %v2942_v37, %v2816_v35  ;;  %v3392_v46 = vpop.f32.mrf.mxu0  ;;  %v2818_v53 = vmul.f32 %v1861_v42, %v1861_v42 }
 0x11f   :  { %v2548_v47 = vadd.f32 %v2547_v41, %v2421_v39  ;;  %v2287_v48 = vadd.f32 %v2286_v40, %v740_v38  ;;  %v3536_v50 = vpop.f32.mrf.mxu1  ;;  %v2425_v7 = vmul.f32 %v3392_v46, %v3392_v46 }
 0x120   :  { %v2944_v51 = vadd.f32 %v2943_v45, %v2817_v43  ;;  %v2683_v52 = vadd.f32 %v2682_v44, %v1861_v42  ;;  %v743_v54 = vpop.f32.mrf.mxu0  ;;  %v2821_v11 = vmul.f32 %v3536_v50, %v3536_v50 }
 0x121   :  { %v2549_v55 = vadd.f32 %v2548_v47, %v2422_v49  ;;  %v2288_v56 = vadd.f32 %v2287_v48, %v743_v54  ;;  %v2423_v57 = vmul.f32 %v743_v54, %v743_v54  ;;  %v1864_v58 = vpop.f32.mrf.mxu1 }
 0x122   :  { %v2945_v59 = vadd.f32 %v2944_v51, %v2818_v53  ;;  %v2684_v60 = vadd.f32 %v2683_v52, %v1864_v58  ;;  %v2819_v61 = vmul.f32 %v1864_v58, %v1864_v58  ;;  %v3395_v62 = vpop.f32.mrf.mxu0 }
 0x123   :  { %v2289_v0 = vadd.f32 %v3391_v30, %v2288_v56  ;;  %v2550_v1 = vadd.f32 %v2549_v55, %v2423_v57  ;;  %v3539_v2 = vpop.f32.mrf.mxu1  ;;  %v2428_v31 = vmul.f32 %v3395_v62, %v3395_v62 }
 0x124   :  { %v2685_v4 = vadd.f32 %v3535_v34, %v2684_v60  ;;  %v2946_v5 = vadd.f32 %v2945_v59, %v2819_v61  ;;  %v756_v6 = vpop.f32.mrf.mxu0  ;;  %v2824_v35 = vmul.f32 %v3539_v2, %v3539_v2 }
 0x125   :  { %v2290_v8 = vadd.f32 %v3392_v46, %v2289_v0  ;;  %v2551_v9 = vadd.f32 %v2550_v1, %v2424_v63  ;;  %v1877_v10 = vpop.f32.mrf.mxu1  ;;  %v2426_v17 = vmul.f32 %v756_v6, %v756_v6 }
 0x126   :  { %v2686_v12 = vadd.f32 %v3536_v50, %v2685_v4  ;;  %v2947_v13 = vadd.f32 %v2946_v5, %v2820_v3  ;;  %v3396_v14 = vpop.f32.mrf.mxu0  ;;  %v2822_v21 = vmul.f32 %v1877_v10, %v1877_v10 }
 0x127   :  { %v2552_v15 = vadd.f32 %v2551_v9, %v2425_v7  ;;  %v2291_v16 = vadd.f32 %v2290_v8, %v756_v6  ;;  %v3540_v18 = vpop.f32.mrf.mxu1  ;;  %v2429_v39 = vmul.f32 %v3396_v14, %v3396_v14 }
 0x128   :  { %v2948_v19 = vadd.f32 %v2947_v13, %v2821_v11  ;;  %v2687_v20 = vadd.f32 %v2686_v12, %v1877_v10  ;;  %v759_v22 = vpop.f32.mrf.mxu0  ;;  %v2825_v43 = vmul.f32 %v3540_v18, %v3540_v18 }
 0x129   :  { %v2553_v23 = vadd.f32 %v2552_v15, %v2426_v17  ;;  %v2292_v24 = vadd.f32 %v2291_v16, %v759_v22  ;;  %v2427_v25 = vmul.f32 %v759_v22, %v759_v22  ;;  %v1880_v26 = vpop.f32.mrf.mxu1 }
 0x12a   :  { %v2949_v27 = vadd.f32 %v2948_v19, %v2822_v21  ;;  %v2688_v28 = vadd.f32 %v2687_v20, %v1880_v26  ;;  %v2823_v29 = vmul.f32 %v1880_v26, %v1880_v26  ;;  %v3399_v30 = vpop.f32.mrf.mxu0 }
 0x12b   :  { %v2293_v32 = vadd.f32 %v3395_v62, %v2292_v24  ;;  %v2554_v33 = vadd.f32 %v2553_v23, %v2427_v25  ;;  %v3543_v34 = vpop.f32.mrf.mxu1  ;;  %v2432_v63 = vmul.f32 %v3399_v30, %v3399_v30 }
 0x12c   :  { %v2689_v36 = vadd.f32 %v3539_v2, %v2688_v28  ;;  %v2950_v37 = vadd.f32 %v2949_v27, %v2823_v29  ;;  %v772_v38 = vpop.f32.mrf.mxu0  ;;  %v2828_v3 = vmul.f32 %v3543_v34, %v3543_v34 }
 0x12d   :  { %v2294_v40 = vadd.f32 %v3396_v14, %v2293_v32  ;;  %v2555_v41 = vadd.f32 %v2554_v33, %v2428_v31  ;;  %v1893_v42 = vpop.f32.mrf.mxu1  ;;  %v2430_v49 = vmul.f32 %v772_v38, %v772_v38 }
 0x12e   :  { %v2690_v44 = vadd.f32 %v3540_v18, %v2689_v36  ;;  %v2951_v45 = vadd.f32 %v2950_v37, %v2824_v35  ;;  %v3400_v46 = vpop.f32.mrf.mxu0  ;;  %v2826_v53 = vmul.f32 %v1893_v42, %v1893_v42 }
 0x12f   :  { %v2556_v47 = vadd.f32 %v2555_v41, %v2429_v39  ;;  %v2295_v48 = vadd.f32 %v2294_v40, %v772_v38  ;;  %v3544_v50 = vpop.f32.mrf.mxu1  ;;  %v2433_v7 = vmul.f32 %v3400_v46, %v3400_v46 }
 0x130   :  { %v2952_v51 = vadd.f32 %v2951_v45, %v2825_v43  ;;  %v2691_v52 = vadd.f32 %v2690_v44, %v1893_v42  ;;  %v775_v54 = vpop.f32.mrf.mxu0  ;;  %v2829_v11 = vmul.f32 %v3544_v50, %v3544_v50 }
 0x131   :  { %v2557_v55 = vadd.f32 %v2556_v47, %v2430_v49  ;;  %v2296_v56 = vadd.f32 %v2295_v48, %v775_v54  ;;  %v2431_v57 = vmul.f32 %v775_v54, %v775_v54  ;;  %v1896_v58 = vpop.f32.mrf.mxu1 }
 0x132   :  { %v2953_v59 = vadd.f32 %v2952_v51, %v2826_v53  ;;  %v2692_v60 = vadd.f32 %v2691_v52, %v1896_v58  ;;  %v2827_v61 = vmul.f32 %v1896_v58, %v1896_v58  ;;  %v3403_v62 = vpop.f32.mrf.mxu0 }
 0x133   :  { %v2297_v0 = vadd.f32 %v3399_v30, %v2296_v56  ;;  %v2558_v1 = vadd.f32 %v2557_v55, %v2431_v57  ;;  %v3547_v2 = vpop.f32.mrf.mxu1  ;;  %v2436_v31 = vmul.f32 %v3403_v62, %v3403_v62 }
 0x134   :  { %v2693_v4 = vadd.f32 %v3543_v34, %v2692_v60  ;;  %v2954_v5 = vadd.f32 %v2953_v59, %v2827_v61  ;;  %v788_v6 = vpop.f32.mrf.mxu0  ;;  %v2832_v35 = vmul.f32 %v3547_v2, %v3547_v2 }
 0x135   :  { %v2298_v8 = vadd.f32 %v3400_v46, %v2297_v0  ;;  %v2559_v9 = vadd.f32 %v2558_v1, %v2432_v63  ;;  %v1909_v10 = vpop.f32.mrf.mxu1  ;;  %v2434_v17 = vmul.f32 %v788_v6, %v788_v6 }
 0x136   :  { %v2694_v12 = vadd.f32 %v3544_v50, %v2693_v4  ;;  %v2955_v13 = vadd.f32 %v2954_v5, %v2828_v3  ;;  %v3404_v14 = vpop.f32.mrf.mxu0  ;;  %v2830_v21 = vmul.f32 %v1909_v10, %v1909_v10 }
 0x137   :  { %v2560_v15 = vadd.f32 %v2559_v9, %v2433_v7  ;;  %v2299_v16 = vadd.f32 %v2298_v8, %v788_v6  ;;  %v3548_v18 = vpop.f32.mrf.mxu1  ;;  %v2437_v39 = vmul.f32 %v3404_v14, %v3404_v14 }
 0x138   :  { %v2956_v19 = vadd.f32 %v2955_v13, %v2829_v11  ;;  %v2695_v20 = vadd.f32 %v2694_v12, %v1909_v10  ;;  %v791_v22 = vpop.f32.mrf.mxu0  ;;  %v2833_v43 = vmul.f32 %v3548_v18, %v3548_v18 }
 0x139   :  { %v2561_v23 = vadd.f32 %v2560_v15, %v2434_v17  ;;  %v2300_v24 = vadd.f32 %v2299_v16, %v791_v22  ;;  %v2435_v25 = vmul.f32 %v791_v22, %v791_v22  ;;  %v1912_v26 = vpop.f32.mrf.mxu1 }
 0x13a   :  { %v2957_v27 = vadd.f32 %v2956_v19, %v2830_v21  ;;  %v2696_v28 = vadd.f32 %v2695_v20, %v1912_v26  ;;  %v2831_v29 = vmul.f32 %v1912_v26, %v1912_v26  ;;  %v3407_v30 = vpop.f32.mrf.mxu0 }
 0x13b   :  { %v2301_v32 = vadd.f32 %v3403_v62, %v2300_v24  ;;  %v2562_v33 = vadd.f32 %v2561_v23, %v2435_v25  ;;  %v3551_v34 = vpop.f32.mrf.mxu1  ;;  %v2440_v63 = vmul.f32 %v3407_v30, %v3407_v30 }
 0x13c   :  { %v2697_v36 = vadd.f32 %v3547_v2, %v2696_v28  ;;  %v2958_v37 = vadd.f32 %v2957_v27, %v2831_v29  ;;  %v804_v38 = vpop.f32.mrf.mxu0  ;;  %v2836_v3 = vmul.f32 %v3551_v34, %v3551_v34 }
 0x13d   :  { %v2302_v40 = vadd.f32 %v3404_v14, %v2301_v32  ;;  %v2563_v41 = vadd.f32 %v2562_v33, %v2436_v31  ;;  %v1925_v42 = vpop.f32.mrf.mxu1  ;;  %v2438_v49 = vmul.f32 %v804_v38, %v804_v38 }
 0x13e   :  { %v2698_v44 = vadd.f32 %v3548_v18, %v2697_v36  ;;  %v2959_v45 = vadd.f32 %v2958_v37, %v2832_v35  ;;  %v3408_v46 = vpop.f32.mrf.mxu0  ;;  %v2834_v53 = vmul.f32 %v1925_v42, %v1925_v42 }
 0x13f   :  { %v2564_v47 = vadd.f32 %v2563_v41, %v2437_v39  ;;  %v2303_v48 = vadd.f32 %v2302_v40, %v804_v38  ;;  %v3552_v50 = vpop.f32.mrf.mxu1  ;;  %v2441_v7 = vmul.f32 %v3408_v46, %v3408_v46 }
 0x140   :  { %v2960_v51 = vadd.f32 %v2959_v45, %v2833_v43  ;;  %v2699_v52 = vadd.f32 %v2698_v44, %v1925_v42  ;;  %v807_v54 = vpop.f32.mrf.mxu0  ;;  %v2837_v11 = vmul.f32 %v3552_v50, %v3552_v50 }
 0x141   :  { %v2565_v55 = vadd.f32 %v2564_v47, %v2438_v49  ;;  %v2304_v56 = vadd.f32 %v2303_v48, %v807_v54  ;;  %v2439_v57 = vmul.f32 %v807_v54, %v807_v54  ;;  %v1928_v58 = vpop.f32.mrf.mxu1 }
 0x142   :  { %v2961_v59 = vadd.f32 %v2960_v51, %v2834_v53  ;;  %v2700_v60 = vadd.f32 %v2699_v52, %v1928_v58  ;;  %v2835_v61 = vmul.f32 %v1928_v58, %v1928_v58  ;;  %v3411_v62 = vpop.f32.mrf.mxu0 }
 0x143   :  { %v2305_v0 = vadd.f32 %v3407_v30, %v2304_v56  ;;  %v2566_v1 = vadd.f32 %v2565_v55, %v2439_v57  ;;  %v3555_v2 = vpop.f32.mrf.mxu1  ;;  %v2444_v31 = vmul.f32 %v3411_v62, %v3411_v62 }
 0x144   :  { %v2701_v4 = vadd.f32 %v3551_v34, %v2700_v60  ;;  %v2962_v5 = vadd.f32 %v2961_v59, %v2835_v61  ;;  %v820_v6 = vpop.f32.mrf.mxu0  ;;  %v2840_v35 = vmul.f32 %v3555_v2, %v3555_v2 }
 0x145   :  { %v2306_v8 = vadd.f32 %v3408_v46, %v2305_v0  ;;  %v2567_v9 = vadd.f32 %v2566_v1, %v2440_v63  ;;  %v1941_v10 = vpop.f32.mrf.mxu1  ;;  %v2442_v17 = vmul.f32 %v820_v6, %v820_v6 }
 0x146   :  { %v2702_v12 = vadd.f32 %v3552_v50, %v2701_v4  ;;  %v2963_v13 = vadd.f32 %v2962_v5, %v2836_v3  ;;  %v3412_v14 = vpop.f32.mrf.mxu0  ;;  %v2838_v21 = vmul.f32 %v1941_v10, %v1941_v10 }
 0x147   :  { %v2568_v15 = vadd.f32 %v2567_v9, %v2441_v7  ;;  %v2307_v16 = vadd.f32 %v2306_v8, %v820_v6  ;;  %v3556_v18 = vpop.f32.mrf.mxu1  ;;  %v2445_v39 = vmul.f32 %v3412_v14, %v3412_v14 }
 0x148   :  { %v2964_v19 = vadd.f32 %v2963_v13, %v2837_v11  ;;  %v2703_v20 = vadd.f32 %v2702_v12, %v1941_v10  ;;  %v823_v22 = vpop.f32.mrf.mxu0  ;;  %v2841_v43 = vmul.f32 %v3556_v18, %v3556_v18 }
 0x149   :  { %v2569_v23 = vadd.f32 %v2568_v15, %v2442_v17  ;;  %v2308_v24 = vadd.f32 %v2307_v16, %v823_v22  ;;  %v2443_v25 = vmul.f32 %v823_v22, %v823_v22  ;;  %v1944_v26 = vpop.f32.mrf.mxu1 }
 0x14a   :  { %v2965_v27 = vadd.f32 %v2964_v19, %v2838_v21  ;;  %v2704_v28 = vadd.f32 %v2703_v20, %v1944_v26  ;;  %v2839_v29 = vmul.f32 %v1944_v26, %v1944_v26  ;;  %v3415_v30 = vpop.f32.mrf.mxu0 }
 0x14b   :  { %v2309_v32 = vadd.f32 %v3411_v62, %v2308_v24  ;;  %v2570_v33 = vadd.f32 %v2569_v23, %v2443_v25  ;;  %v3559_v34 = vpop.f32.mrf.mxu1  ;;  %v2448_v63 = vmul.f32 %v3415_v30, %v3415_v30 }
 0x14c   :  { %v2705_v36 = vadd.f32 %v3555_v2, %v2704_v28  ;;  %v2966_v37 = vadd.f32 %v2965_v27, %v2839_v29  ;;  %v836_v38 = vpop.f32.mrf.mxu0  ;;  %v2844_v3 = vmul.f32 %v3559_v34, %v3559_v34 }
 0x14d   :  { %v2310_v40 = vadd.f32 %v3412_v14, %v2309_v32  ;;  %v2571_v41 = vadd.f32 %v2570_v33, %v2444_v31  ;;  %v1957_v42 = vpop.f32.mrf.mxu1  ;;  %v2446_v49 = vmul.f32 %v836_v38, %v836_v38 }
 0x14e   :  { %v2706_v44 = vadd.f32 %v3556_v18, %v2705_v36  ;;  %v2967_v45 = vadd.f32 %v2966_v37, %v2840_v35  ;;  %v3416_v46 = vpop.f32.mrf.mxu0  ;;  %v2842_v53 = vmul.f32 %v1957_v42, %v1957_v42 }
 0x14f   :  { %v2572_v47 = vadd.f32 %v2571_v41, %v2445_v39  ;;  %v2311_v48 = vadd.f32 %v2310_v40, %v836_v38  ;;  %v3560_v50 = vpop.f32.mrf.mxu1  ;;  %v2449_v7 = vmul.f32 %v3416_v46, %v3416_v46 }
 0x150   :  { %v2968_v51 = vadd.f32 %v2967_v45, %v2841_v43  ;;  %v2707_v52 = vadd.f32 %v2706_v44, %v1957_v42  ;;  %v839_v54 = vpop.f32.mrf.mxu0  ;;  %v2845_v11 = vmul.f32 %v3560_v50, %v3560_v50 }
 0x151   :  { %v2573_v55 = vadd.f32 %v2572_v47, %v2446_v49  ;;  %v2312_v56 = vadd.f32 %v2311_v48, %v839_v54  ;;  %v2447_v57 = vmul.f32 %v839_v54, %v839_v54  ;;  %v1960_v58 = vpop.f32.mrf.mxu1 }
 0x152   :  { %v2969_v59 = vadd.f32 %v2968_v51, %v2842_v53  ;;  %v2708_v60 = vadd.f32 %v2707_v52, %v1960_v58  ;;  %v2843_v61 = vmul.f32 %v1960_v58, %v1960_v58  ;;  %v3419_v62 = vpop.f32.mrf.mxu0 }
 0x153   :  { %v2313_v0 = vadd.f32 %v3415_v30, %v2312_v56  ;;  %v2574_v1 = vadd.f32 %v2573_v55, %v2447_v57  ;;  %v3563_v2 = vpop.f32.mrf.mxu1  ;;  %v2452_v31 = vmul.f32 %v3419_v62, %v3419_v62 }
 0x154   :  { %v2709_v4 = vadd.f32 %v3559_v34, %v2708_v60  ;;  %v2970_v5 = vadd.f32 %v2969_v59, %v2843_v61  ;;  %v852_v6 = vpop.f32.mrf.mxu0  ;;  %v2848_v35 = vmul.f32 %v3563_v2, %v3563_v2 }
 0x155   :  { %v2314_v8 = vadd.f32 %v3416_v46, %v2313_v0  ;;  %v2575_v9 = vadd.f32 %v2574_v1, %v2448_v63  ;;  %v1973_v10 = vpop.f32.mrf.mxu1  ;;  %v2450_v17 = vmul.f32 %v852_v6, %v852_v6 }
 0x156   :  { %v2710_v12 = vadd.f32 %v3560_v50, %v2709_v4  ;;  %v2971_v13 = vadd.f32 %v2970_v5, %v2844_v3  ;;  %v3420_v14 = vpop.f32.mrf.mxu0  ;;  %v2846_v21 = vmul.f32 %v1973_v10, %v1973_v10 }
 0x157   :  { %v2576_v15 = vadd.f32 %v2575_v9, %v2449_v7  ;;  %v2315_v16 = vadd.f32 %v2314_v8, %v852_v6  ;;  %v3564_v18 = vpop.f32.mrf.mxu1  ;;  %v2453_v39 = vmul.f32 %v3420_v14, %v3420_v14 }
 0x158   :  { %v2972_v19 = vadd.f32 %v2971_v13, %v2845_v11  ;;  %v2711_v20 = vadd.f32 %v2710_v12, %v1973_v10  ;;  %v855_v22 = vpop.f32.mrf.mxu0  ;;  %v2849_v43 = vmul.f32 %v3564_v18, %v3564_v18 }
 0x159   :  { %v2577_v23 = vadd.f32 %v2576_v15, %v2450_v17  ;;  %v2316_v24 = vadd.f32 %v2315_v16, %v855_v22  ;;  %v2451_v25 = vmul.f32 %v855_v22, %v855_v22  ;;  %v1976_v26 = vpop.f32.mrf.mxu1 }
 0x15a   :  { %v2973_v27 = vadd.f32 %v2972_v19, %v2846_v21  ;;  %v2712_v28 = vadd.f32 %v2711_v20, %v1976_v26  ;;  %v2847_v29 = vmul.f32 %v1976_v26, %v1976_v26  ;;  %v3423_v30 = vpop.f32.mrf.mxu0 }
 0x15b   :  { %v2317_v32 = vadd.f32 %v3419_v62, %v2316_v24  ;;  %v2578_v33 = vadd.f32 %v2577_v23, %v2451_v25  ;;  %v3567_v34 = vpop.f32.mrf.mxu1  ;;  %v2456_v63 = vmul.f32 %v3423_v30, %v3423_v30 }
 0x15c   :  { %v2713_v36 = vadd.f32 %v3563_v2, %v2712_v28  ;;  %v2974_v37 = vadd.f32 %v2973_v27, %v2847_v29  ;;  %v868_v38 = vpop.f32.mrf.mxu0  ;;  %v2852_v3 = vmul.f32 %v3567_v34, %v3567_v34 }
 0x15d   :  { %v2318_v40 = vadd.f32 %v3420_v14, %v2317_v32  ;;  %v2579_v41 = vadd.f32 %v2578_v33, %v2452_v31  ;;  %v1989_v42 = vpop.f32.mrf.mxu1  ;;  %v2454_v49 = vmul.f32 %v868_v38, %v868_v38 }
 0x15e   :  { %v2714_v44 = vadd.f32 %v3564_v18, %v2713_v36  ;;  %v2975_v45 = vadd.f32 %v2974_v37, %v2848_v35  ;;  %v3424_v46 = vpop.f32.mrf.mxu0  ;;  %v2850_v53 = vmul.f32 %v1989_v42, %v1989_v42 }
 0x15f   :  { %v2580_v47 = vadd.f32 %v2579_v41, %v2453_v39  ;;  %v2319_v48 = vadd.f32 %v2318_v40, %v868_v38  ;;  %v3568_v50 = vpop.f32.mrf.mxu1  ;;  %v2457_v7 = vmul.f32 %v3424_v46, %v3424_v46 }
 0x160   :  { %v2976_v51 = vadd.f32 %v2975_v45, %v2849_v43  ;;  %v2715_v52 = vadd.f32 %v2714_v44, %v1989_v42  ;;  %v871_v54 = vpop.f32.mrf.mxu0  ;;  %v2853_v11 = vmul.f32 %v3568_v50, %v3568_v50 }
 0x161   :  { %v2581_v55 = vadd.f32 %v2580_v47, %v2454_v49  ;;  %v2320_v56 = vadd.f32 %v2319_v48, %v871_v54  ;;  %v2455_v57 = vmul.f32 %v871_v54, %v871_v54  ;;  %v1992_v58 = vpop.f32.mrf.mxu1 }
 0x162   :  { %v2977_v59 = vadd.f32 %v2976_v51, %v2850_v53  ;;  %v2716_v60 = vadd.f32 %v2715_v52, %v1992_v58  ;;  %v2851_v61 = vmul.f32 %v1992_v58, %v1992_v58  ;;  %v3427_v62 = vpop.f32.mrf.mxu0 }
 0x163   :  { %v2321_v0 = vadd.f32 %v3423_v30, %v2320_v56  ;;  %v2582_v1 = vadd.f32 %v2581_v55, %v2455_v57  ;;  %v3571_v2 = vpop.f32.mrf.mxu1  ;;  %v2460_v31 = vmul.f32 %v3427_v62, %v3427_v62 }
 0x164   :  { %v2717_v4 = vadd.f32 %v3567_v34, %v2716_v60  ;;  %v2978_v5 = vadd.f32 %v2977_v59, %v2851_v61  ;;  %v884_v6 = vpop.f32.mrf.mxu0  ;;  %v2856_v35 = vmul.f32 %v3571_v2, %v3571_v2 }
 0x165   :  { %v2322_v8 = vadd.f32 %v3424_v46, %v2321_v0  ;;  %v2583_v9 = vadd.f32 %v2582_v1, %v2456_v63  ;;  %v2005_v10 = vpop.f32.mrf.mxu1  ;;  %v2458_v17 = vmul.f32 %v884_v6, %v884_v6 }
 0x166   :  { %v2718_v12 = vadd.f32 %v3568_v50, %v2717_v4  ;;  %v2979_v13 = vadd.f32 %v2978_v5, %v2852_v3  ;;  %v3428_v14 = vpop.f32.mrf.mxu0  ;;  %v2854_v21 = vmul.f32 %v2005_v10, %v2005_v10 }
 0x167   :  { %v2584_v15 = vadd.f32 %v2583_v9, %v2457_v7  ;;  %v2323_v16 = vadd.f32 %v2322_v8, %v884_v6  ;;  %v3572_v18 = vpop.f32.mrf.mxu1  ;;  %v2461_v39 = vmul.f32 %v3428_v14, %v3428_v14 }
 0x168   :  { %v2980_v19 = vadd.f32 %v2979_v13, %v2853_v11  ;;  %v2719_v20 = vadd.f32 %v2718_v12, %v2005_v10  ;;  %v887_v22 = vpop.f32.mrf.mxu0  ;;  %v2857_v43 = vmul.f32 %v3572_v18, %v3572_v18 }
 0x169   :  { %v2585_v23 = vadd.f32 %v2584_v15, %v2458_v17  ;;  %v2324_v24 = vadd.f32 %v2323_v16, %v887_v22  ;;  %v2459_v25 = vmul.f32 %v887_v22, %v887_v22  ;;  %v2008_v26 = vpop.f32.mrf.mxu1  ;;  %v3778_v15 = vmov 0.0  }
 0x16a   :  { %v2981_v27 = vadd.f32 %v2980_v19, %v2854_v21  ;;  %v2720_v28 = vadd.f32 %v2719_v20, %v2008_v26  ;;  %v2855_v29 = vmul.f32 %v2008_v26, %v2008_v26  ;;  %v3431_v30 = vpop.f32.mrf.mxu0  ;;  %3052 = vst [vmem:[%s4255_s4 + $0x4] sm:$0xf] %v3778_v15 }
 0x16b   :  { %v2325_v32 = vadd.f32 %v3427_v62, %v2324_v24  ;;  %v2586_v33 = vadd.f32 %v2585_v23, %v2459_v25  ;;  %v3575_v34 = vpop.f32.mrf.mxu1  ;;  %v2464_v63 = vmul.f32 %v3431_v30, %v3431_v30 }
 0x16c   :  { %v2721_v36 = vadd.f32 %v3571_v2, %v2720_v28  ;;  %v2982_v37 = vadd.f32 %v2981_v27, %v2855_v29  ;;  %v900_v38 = vpop.f32.mrf.mxu0  ;;  %v2860_v3 = vmul.f32 %v3575_v34, %v3575_v34 }
 0x16d   :  { %v2587_v40 = vadd.f32 %v2586_v33, %v2460_v31  ;;  %v2326_v41 = vadd.f32 %v3428_v14, %v2325_v32  ;;  %v2021_v42 = vpop.f32.mrf.mxu1  ;;  %v2462_v48 = vmul.f32 %v900_v38, %v900_v38 }
 0x16e   :  { %v2983_v44 = vadd.f32 %v2982_v37, %v2856_v35  ;;  %v2722_v45 = vadd.f32 %v3572_v18, %v2721_v36  ;;  %v3432_v46 = vpop.f32.mrf.mxu0  ;;  %v2858_v52 = vmul.f32 %v2021_v42, %v2021_v42 }
 0x16f   :  { %v2327_v47 = vadd.f32 %v2326_v41, %v900_v38  ;;  %v2588_v49 = vadd.f32 %v2587_v40, %v2461_v39  ;;  %v3576_v50 = vpop.f32.mrf.mxu1  ;;  %v2465_v7 = vmul.f32 %v3432_v46, %v3432_v46 }
 0x170   :  { %v2723_v51 = vadd.f32 %v2722_v45, %v2021_v42  ;;  %v2984_v53 = vadd.f32 %v2983_v44, %v2857_v43  ;;  %v903_v54 = vpop.f32.mrf.mxu0  ;;  %v2861_v11 = vmul.f32 %v3576_v50, %v3576_v50 }
 0x171   :  { %v2589_v55 = vadd.f32 %v2588_v49, %v2462_v48  ;;  %v2328_v56 = vadd.f32 %v2327_v47, %v903_v54  ;;  %v2463_v57 = vmul.f32 %v903_v54, %v903_v54  ;;  %v2024_v58 = vpop.f32.mrf.mxu1 }
 0x172   :  { %v2985_v59 = vadd.f32 %v2984_v53, %v2858_v52  ;;  %v2724_v60 = vadd.f32 %v2723_v51, %v2024_v58  ;;  %v2859_v61 = vmul.f32 %v2024_v58, %v2024_v58  ;;  %v3435_v62 = vpop.f32.mrf.mxu0 }
 0x173   :  { %v2329_v0 = vadd.f32 %v3431_v30, %v2328_v56  ;;  %v2590_v1 = vadd.f32 %v2589_v55, %v2463_v57  ;;  %v3579_v2 = vpop.f32.mrf.mxu1  ;;  %v2468_v32 = vmul.f32 %v3435_v62, %v3435_v62 }
 0x174   :  { %v2725_v4 = vadd.f32 %v3575_v34, %v2724_v60  ;;  %v2986_v5 = vadd.f32 %v2985_v59, %v2859_v61  ;;  %v916_v6 = vpop.f32.mrf.mxu0  ;;  %v2864_v36 = vmul.f32 %v3579_v2, %v3579_v2 }
 0x175   :  { %v2591_v8 = vadd.f32 %v2590_v1, %v2464_v63  ;;  %v2330_v9 = vadd.f32 %v3432_v46, %v2329_v0  ;;  %v2037_v10 = vpop.f32.mrf.mxu1  ;;  %v2466_v17 = vmul.f32 %v916_v6, %v916_v6 }
 0x176   :  { %v2987_v12 = vadd.f32 %v2986_v5, %v2860_v3  ;;  %v2726_v13 = vadd.f32 %v3576_v50, %v2725_v4  ;;  %v3436_v14 = vpop.f32.mrf.mxu0  ;;  %v2862_v21 = vmul.f32 %v2037_v10, %v2037_v10 }
 0x177   :  { %v2331_v16 = vadd.f32 %v2330_v9, %v916_v6  ;;  %v2592_v18 = vadd.f32 %v2591_v8, %v2465_v7  ;;  %v3580_v19 = vpop.f32.mrf.mxu1  ;;  %v2469_v40 = vmul.f32 %v3436_v14, %v3436_v14 }
 0x178   :  { %v2727_v20 = vadd.f32 %v2726_v13, %v2037_v10  ;;  %v2988_v22 = vadd.f32 %v2987_v12, %v2861_v11  ;;  %v919_v23 = vpop.f32.mrf.mxu0  ;;  %v2865_v44 = vmul.f32 %v3580_v19, %v3580_v19 }
 0x179   :  { %v2593_v24 = vadd.f32 %v2592_v18, %v2466_v17  ;;  %v2332_v25 = vadd.f32 %v2331_v16, %v919_v23  ;;  %v2467_v26 = vmul.f32 %v919_v23, %v919_v23  ;;  %v2040_v27 = vpop.f32.mrf.mxu1 }
 0x17a   :  { %v2989_v28 = vadd.f32 %v2988_v22, %v2862_v21  ;;  %v2728_v29 = vadd.f32 %v2727_v20, %v2040_v27  ;;  %v2863_v30 = vmul.f32 %v2040_v27, %v2040_v27  ;;  %v3439_v31 = vpop.f32.mrf.mxu0 }
 0x17b   :  { %v2333_v33 = vadd.f32 %v3435_v62, %v2332_v25  ;;  %v2594_v34 = vadd.f32 %v2593_v24, %v2467_v26  ;;  %v3583_v35 = vpop.f32.mrf.mxu1  ;;  %v2472_v0 = vmul.f32 %v3439_v31, %v3439_v31 }
 0x17c   :  { %v2729_v37 = vadd.f32 %v3579_v2, %v2728_v29  ;;  %v2990_v38 = vadd.f32 %v2989_v28, %v2863_v30  ;;  %v932_v39 = vpop.f32.mrf.mxu0  ;;  %v2868_v4 = vmul.f32 %v3583_v35, %v3583_v35 }
 0x17d   :  { %v2595_v41 = vadd.f32 %v2594_v34, %v2468_v32  ;;  %v2334_v42 = vadd.f32 %v3436_v14, %v2333_v33  ;;  %v2053_v43 = vpop.f32.mrf.mxu1  ;;  %v2470_v49 = vmul.f32 %v932_v39, %v932_v39 }
 0x17e   :  { %v2991_v45 = vadd.f32 %v2990_v38, %v2864_v36  ;;  %v2730_v46 = vadd.f32 %v3580_v19, %v2729_v37  ;;  %v3440_v47 = vpop.f32.mrf.mxu0  ;;  %v2866_v53 = vmul.f32 %v2053_v43, %v2053_v43 }
 0x17f   :  { %v2335_v48 = vadd.f32 %v2334_v42, %v932_v39  ;;  %v2596_v50 = vadd.f32 %v2595_v41, %v2469_v40  ;;  %v3584_v51 = vpop.f32.mrf.mxu1  ;;  %v2473_v8 = vmul.f32 %v3440_v47, %v3440_v47 }
 0x180   :  { %v2731_v52 = vadd.f32 %v2730_v46, %v2053_v43  ;;  %v2992_v54 = vadd.f32 %v2991_v45, %v2865_v44  ;;  %v935_v55 = vpop.f32.mrf.mxu0  ;;  %v2869_v12 = vmul.f32 %v3584_v51, %v3584_v51 }
 0x181   :  { %v2597_v56 = vadd.f32 %v2596_v50, %v2470_v49  ;;  %v2336_v57 = vadd.f32 %v2335_v48, %v935_v55  ;;  %v2471_v58 = vmul.f32 %v935_v55, %v935_v55  ;;  %v2056_v59 = vpop.f32.mrf.mxu1 }
 0x182   :  { %v2993_v60 = vadd.f32 %v2992_v54, %v2866_v53  ;;  %v2732_v61 = vadd.f32 %v2731_v52, %v2056_v59  ;;  %v2867_v62 = vmul.f32 %v2056_v59, %v2056_v59  ;;  %v3443_v63 = vpop.f32.mrf.mxu0 }
 0x183   :  { %v2337_v1 = vadd.f32 %v3439_v31, %v2336_v57  ;;  %v2598_v2 = vadd.f32 %v2597_v56, %v2471_v58  ;;  %v3587_v3 = vpop.f32.mrf.mxu1  ;;  %v2476_v32 = vmul.f32 %v3443_v63, %v3443_v63 }
 0x184   :  { %v2733_v5 = vadd.f32 %v3583_v35, %v2732_v61  ;;  %v2994_v6 = vadd.f32 %v2993_v60, %v2867_v62  ;;  %v948_v7 = vpop.f32.mrf.mxu0  ;;  %v2872_v36 = vmul.f32 %v3587_v3, %v3587_v3 }
 0x185   :  { %v2599_v9 = vadd.f32 %v2598_v2, %v2472_v0  ;;  %v2338_v10 = vadd.f32 %v3440_v47, %v2337_v1  ;;  %v2069_v11 = vpop.f32.mrf.mxu1  ;;  %v2474_v17 = vmul.f32 %v948_v7, %v948_v7 }
 0x186   :  { %v2995_v13 = vadd.f32 %v2994_v6, %v2868_v4  ;;  %v2734_v14 = vadd.f32 %v3584_v51, %v2733_v5  ;;  %v3444_v15 = vpop.f32.mrf.mxu0  ;;  %v2870_v21 = vmul.f32 %v2069_v11, %v2069_v11 }
 0x187   :  { %v2339_v16 = vadd.f32 %v2338_v10, %v948_v7  ;;  %v2600_v18 = vadd.f32 %v2599_v9, %v2473_v8  ;;  %v3588_v19 = vpop.f32.mrf.mxu1  ;;  %v2477_v40 = vmul.f32 %v3444_v15, %v3444_v15 }
 0x188   :  { %v2735_v20 = vadd.f32 %v2734_v14, %v2069_v11  ;;  %v2996_v22 = vadd.f32 %v2995_v13, %v2869_v12  ;;  %v951_v23 = vpop.f32.mrf.mxu0  ;;  %v2873_v44 = vmul.f32 %v3588_v19, %v3588_v19 }
 0x189   :  { %v2601_v24 = vadd.f32 %v2600_v18, %v2474_v17  ;;  %v2340_v25 = vadd.f32 %v2339_v16, %v951_v23  ;;  %v2475_v26 = vmul.f32 %v951_v23, %v951_v23  ;;  %v2072_v27 = vpop.f32.mrf.mxu1 }
 0x18a   :  { %v2997_v28 = vadd.f32 %v2996_v22, %v2870_v21  ;;  %v2736_v29 = vadd.f32 %v2735_v20, %v2072_v27  ;;  %v2871_v30 = vmul.f32 %v2072_v27, %v2072_v27  ;;  %v3447_v31 = vpop.f32.mrf.mxu0 }
 0x18b   :  { %v2341_v33 = vadd.f32 %v3443_v63, %v2340_v25  ;;  %v2602_v34 = vadd.f32 %v2601_v24, %v2475_v26  ;;  %v3591_v35 = vpop.f32.mrf.mxu1  ;;  %v2480_v0 = vmul.f32 %v3447_v31, %v3447_v31 }
 0x18c   :  { %v2737_v37 = vadd.f32 %v3587_v3, %v2736_v29  ;;  %v2998_v38 = vadd.f32 %v2997_v28, %v2871_v30  ;;  %v964_v39 = vpop.f32.mrf.mxu0  ;;  %v2876_v4 = vmul.f32 %v3591_v35, %v3591_v35 }
 0x18d   :  { %v2603_v41 = vadd.f32 %v2602_v34, %v2476_v32  ;;  %v2342_v42 = vadd.f32 %v3444_v15, %v2341_v33  ;;  %v2085_v43 = vpop.f32.mrf.mxu1  ;;  %v2478_v49 = vmul.f32 %v964_v39, %v964_v39 }
 0x18e   :  { %v2999_v45 = vadd.f32 %v2998_v38, %v2872_v36  ;;  %v2738_v46 = vadd.f32 %v3588_v19, %v2737_v37  ;;  %v3448_v47 = vpop.f32.mrf.mxu0  ;;  %v2874_v53 = vmul.f32 %v2085_v43, %v2085_v43 }
 0x18f   :  { %v2343_v48 = vadd.f32 %v2342_v42, %v964_v39  ;;  %v2604_v50 = vadd.f32 %v2603_v41, %v2477_v40  ;;  %v3592_v51 = vpop.f32.mrf.mxu1  ;;  %v2481_v8 = vmul.f32 %v3448_v47, %v3448_v47 }
 0x190   :  { %v2739_v52 = vadd.f32 %v2738_v46, %v2085_v43  ;;  %v3000_v54 = vadd.f32 %v2999_v45, %v2873_v44  ;;  %v967_v55 = vpop.f32.mrf.mxu0  ;;  %v2877_v12 = vmul.f32 %v3592_v51, %v3592_v51 }
 0x191   :  { %v2605_v56 = vadd.f32 %v2604_v50, %v2478_v49  ;;  %v2344_v57 = vadd.f32 %v2343_v48, %v967_v55  ;;  %v2479_v58 = vmul.f32 %v967_v55, %v967_v55  ;;  %v2088_v59 = vpop.f32.mrf.mxu1 }
 0x192   :  { %v3001_v60 = vadd.f32 %v3000_v54, %v2874_v53  ;;  %v2740_v61 = vadd.f32 %v2739_v52, %v2088_v59  ;;  %v2875_v62 = vmul.f32 %v2088_v59, %v2088_v59  ;;  %v3451_v63 = vpop.f32.mrf.mxu0 }
 0x193   :  { %v2345_v1 = vadd.f32 %v3447_v31, %v2344_v57  ;;  %v2606_v2 = vadd.f32 %v2605_v56, %v2479_v58  ;;  %v3595_v3 = vpop.f32.mrf.mxu1  ;;  %v2484_v32 = vmul.f32 %v3451_v63, %v3451_v63 }
 0x194   :  { %v2741_v5 = vadd.f32 %v3591_v35, %v2740_v61  ;;  %v3002_v6 = vadd.f32 %v3001_v60, %v2875_v62  ;;  %v980_v7 = vpop.f32.mrf.mxu0  ;;  %v2880_v36 = vmul.f32 %v3595_v3, %v3595_v3 }
 0x195   :  { %v2607_v9 = vadd.f32 %v2606_v2, %v2480_v0  ;;  %v2346_v10 = vadd.f32 %v3448_v47, %v2345_v1  ;;  %v2101_v11 = vpop.f32.mrf.mxu1  ;;  %v2482_v17 = vmul.f32 %v980_v7, %v980_v7 }
 0x196   :  { %v3003_v13 = vadd.f32 %v3002_v6, %v2876_v4  ;;  %v2742_v14 = vadd.f32 %v3592_v51, %v2741_v5  ;;  %v3452_v15 = vpop.f32.mrf.mxu0  ;;  %v2878_v21 = vmul.f32 %v2101_v11, %v2101_v11 }
 0x197   :  { %v2347_v16 = vadd.f32 %v2346_v10, %v980_v7  ;;  %v2608_v18 = vadd.f32 %v2607_v9, %v2481_v8  ;;  %v3596_v19 = vpop.f32.mrf.mxu1  ;;  %v2485_v40 = vmul.f32 %v3452_v15, %v3452_v15 }
 0x198   :  { %v2743_v20 = vadd.f32 %v2742_v14, %v2101_v11  ;;  %v3004_v22 = vadd.f32 %v3003_v13, %v2877_v12  ;;  %v983_v23 = vpop.f32.mrf.mxu0  ;;  %v2881_v44 = vmul.f32 %v3596_v19, %v3596_v19 }
 0x199   :  { %v2609_v24 = vadd.f32 %v2608_v18, %v2482_v17  ;;  %v2348_v25 = vadd.f32 %v2347_v16, %v983_v23  ;;  %v2483_v26 = vmul.f32 %v983_v23, %v983_v23  ;;  %v2104_v27 = vpop.f32.mrf.mxu1 }
 0x19a   :  { %v3005_v28 = vadd.f32 %v3004_v22, %v2878_v21  ;;  %v2744_v29 = vadd.f32 %v2743_v20, %v2104_v27  ;;  %v2879_v30 = vmul.f32 %v2104_v27, %v2104_v27  ;;  %v3455_v31 = vpop.f32.mrf.mxu0 }
 0x19b   :  { %v2349_v33 = vadd.f32 %v3451_v63, %v2348_v25  ;;  %v2610_v34 = vadd.f32 %v2609_v24, %v2483_v26  ;;  %v3599_v35 = vpop.f32.mrf.mxu1  ;;  %v2488_v0 = vmul.f32 %v3455_v31, %v3455_v31 }
 0x19c   :  { %v2745_v37 = vadd.f32 %v3595_v3, %v2744_v29  ;;  %v3006_v38 = vadd.f32 %v3005_v28, %v2879_v30  ;;  %v996_v39 = vpop.f32.mrf.mxu0  ;;  %v2884_v4 = vmul.f32 %v3599_v35, %v3599_v35 }
 0x19d   :  { %v2611_v41 = vadd.f32 %v2610_v34, %v2484_v32  ;;  %v2350_v42 = vadd.f32 %v3452_v15, %v2349_v33  ;;  %v2117_v43 = vpop.f32.mrf.mxu1  ;;  %v2486_v49 = vmul.f32 %v996_v39, %v996_v39 }
 0x19e   :  { %v3007_v45 = vadd.f32 %v3006_v38, %v2880_v36  ;;  %v2746_v46 = vadd.f32 %v3596_v19, %v2745_v37  ;;  %v3456_v47 = vpop.f32.mrf.mxu0  ;;  %v2882_v53 = vmul.f32 %v2117_v43, %v2117_v43 }
 0x19f   :  { %v2351_v48 = vadd.f32 %v2350_v42, %v996_v39  ;;  %v2612_v50 = vadd.f32 %v2611_v41, %v2485_v40  ;;  %v3600_v51 = vpop.f32.mrf.mxu1  ;;  %v2489_v8 = vmul.f32 %v3456_v47, %v3456_v47 }
 0x1a0   :  { %v2747_v52 = vadd.f32 %v2746_v46, %v2117_v43  ;;  %v3008_v54 = vadd.f32 %v3007_v45, %v2881_v44  ;;  %v999_v55 = vpop.f32.mrf.mxu0  ;;  %v2885_v12 = vmul.f32 %v3600_v51, %v3600_v51 }
 0x1a1   :  { %v2613_v56 = vadd.f32 %v2612_v50, %v2486_v49  ;;  %v2352_v57 = vadd.f32 %v2351_v48, %v999_v55  ;;  %v2487_v58 = vmul.f32 %v999_v55, %v999_v55  ;;  %v2120_v59 = vpop.f32.mrf.mxu1 }
 0x1a2   :  { %v3009_v60 = vadd.f32 %v3008_v54, %v2882_v53  ;;  %v2748_v61 = vadd.f32 %v2747_v52, %v2120_v59  ;;  %v2883_v62 = vmul.f32 %v2120_v59, %v2120_v59  ;;  %v3459_v63 = vpop.f32.mrf.mxu0 }
 0x1a3   :  { %v2353_v1 = vadd.f32 %v3455_v31, %v2352_v57  ;;  %v2614_v2 = vadd.f32 %v2613_v56, %v2487_v58  ;;  %v3603_v3 = vpop.f32.mrf.mxu1  ;;  %v2492_v32 = vmul.f32 %v3459_v63, %v3459_v63 }
 0x1a4   :  { %v2749_v5 = vadd.f32 %v3599_v35, %v2748_v61  ;;  %v3010_v6 = vadd.f32 %v3009_v60, %v2883_v62  ;;  %v1012_v7 = vpop.f32.mrf.mxu0  ;;  %v2888_v36 = vmul.f32 %v3603_v3, %v3603_v3 }
 0x1a5   :  { %v2615_v9 = vadd.f32 %v2614_v2, %v2488_v0  ;;  %v2354_v10 = vadd.f32 %v3456_v47, %v2353_v1  ;;  %v2133_v11 = vpop.f32.mrf.mxu1  ;;  %v2490_v17 = vmul.f32 %v1012_v7, %v1012_v7 }
 0x1a6   :  { %v3011_v13 = vadd.f32 %v3010_v6, %v2884_v4  ;;  %v2750_v14 = vadd.f32 %v3600_v51, %v2749_v5  ;;  %v3460_v15 = vpop.f32.mrf.mxu0  ;;  %v2886_v21 = vmul.f32 %v2133_v11, %v2133_v11 }
 0x1a7   :  { %v2355_v16 = vadd.f32 %v2354_v10, %v1012_v7  ;;  %v2616_v18 = vadd.f32 %v2615_v9, %v2489_v8  ;;  %v3604_v19 = vpop.f32.mrf.mxu1  ;;  %v2493_v40 = vmul.f32 %v3460_v15, %v3460_v15 }
 0x1a8   :  { %v2751_v20 = vadd.f32 %v2750_v14, %v2133_v11  ;;  %v3012_v22 = vadd.f32 %v3011_v13, %v2885_v12  ;;  %v1015_v23 = vpop.f32.mrf.mxu0  ;;  %v2889_v44 = vmul.f32 %v3604_v19, %v3604_v19 }
 0x1a9   :  { %v2617_v24 = vadd.f32 %v2616_v18, %v2490_v17  ;;  %v2356_v25 = vadd.f32 %v2355_v16, %v1015_v23  ;;  %v2491_v26 = vmul.f32 %v1015_v23, %v1015_v23  ;;  %v2136_v27 = vpop.f32.mrf.mxu1 }
 0x1aa   :  { %v3013_v28 = vadd.f32 %v3012_v22, %v2886_v21  ;;  %v2752_v29 = vadd.f32 %v2751_v20, %v2136_v27  ;;  %v2887_v30 = vmul.f32 %v2136_v27, %v2136_v27  ;;  %v3463_v31 = vpop.f32.mrf.mxu0 }
 0x1ab   :  { %v2357_v33 = vadd.f32 %v3459_v63, %v2356_v25  ;;  %v2618_v34 = vadd.f32 %v2617_v24, %v2491_v26  ;;  %v3607_v35 = vpop.f32.mrf.mxu1  ;;  %v2496_v0 = vmul.f32 %v3463_v31, %v3463_v31 }
 0x1ac   :  { %v2753_v37 = vadd.f32 %v3603_v3, %v2752_v29  ;;  %v3014_v38 = vadd.f32 %v3013_v28, %v2887_v30  ;;  %v1028_v39 = vpop.f32.mrf.mxu0  ;;  %v2892_v4 = vmul.f32 %v3607_v35, %v3607_v35 }
 0x1ad   :  { %v2619_v41 = vadd.f32 %v2618_v34, %v2492_v32  ;;  %v2358_v42 = vadd.f32 %v3460_v15, %v2357_v33  ;;  %v2149_v43 = vpop.f32.mrf.mxu1  ;;  %v2494_v49 = vmul.f32 %v1028_v39, %v1028_v39 }
 0x1ae   :  { %v3015_v45 = vadd.f32 %v3014_v38, %v2888_v36  ;;  %v2754_v46 = vadd.f32 %v3604_v19, %v2753_v37  ;;  %v3464_v47 = vpop.f32.mrf.mxu0  ;;  %v2890_v53 = vmul.f32 %v2149_v43, %v2149_v43 }
 0x1af   :  { %v2359_v48 = vadd.f32 %v2358_v42, %v1028_v39  ;;  %v2620_v50 = vadd.f32 %v2619_v41, %v2493_v40  ;;  %v3608_v51 = vpop.f32.mrf.mxu1  ;;  %v2497_v8 = vmul.f32 %v3464_v47, %v3464_v47 }
 0x1b0   :  { %v2755_v52 = vadd.f32 %v2754_v46, %v2149_v43  ;;  %v3016_v54 = vadd.f32 %v3015_v45, %v2889_v44  ;;  %v1031_v55 = vpop.f32.mrf.mxu0  ;;  %v2893_v12 = vmul.f32 %v3608_v51, %v3608_v51 }
 0x1b1   :  { %v2621_v56 = vadd.f32 %v2620_v50, %v2494_v49  ;;  %v2360_v57 = vadd.f32 %v2359_v48, %v1031_v55  ;;  %v2495_v58 = vmul.f32 %v1031_v55, %v1031_v55  ;;  %v2152_v59 = vpop.f32.mrf.mxu1 }
 0x1b2   :  { %v3017_v60 = vadd.f32 %v3016_v54, %v2890_v53  ;;  %v2756_v61 = vadd.f32 %v2755_v52, %v2152_v59  ;;  %v2891_v62 = vmul.f32 %v2152_v59, %v2152_v59  ;;  %v3467_v63 = vpop.f32.mrf.mxu0 }
 0x1b3   :  { %v2361_v1 = vadd.f32 %v3463_v31, %v2360_v57  ;;  %v2622_v2 = vadd.f32 %v2621_v56, %v2495_v58  ;;  %v3611_v3 = vpop.f32.mrf.mxu1  ;;  %v2500_v32 = vmul.f32 %v3467_v63, %v3467_v63 }
 0x1b4   :  { %v2757_v5 = vadd.f32 %v3607_v35, %v2756_v61  ;;  %v3018_v6 = vadd.f32 %v3017_v60, %v2891_v62  ;;  %v1044_v7 = vpop.f32.mrf.mxu0  ;;  %v2896_v36 = vmul.f32 %v3611_v3, %v3611_v3 }
 0x1b5   :  { %v2623_v9 = vadd.f32 %v2622_v2, %v2496_v0  ;;  %v2362_v10 = vadd.f32 %v3464_v47, %v2361_v1  ;;  %v2165_v11 = vpop.f32.mrf.mxu1  ;;  %v2498_v17 = vmul.f32 %v1044_v7, %v1044_v7 }
 0x1b6   :  { %v3019_v13 = vadd.f32 %v3018_v6, %v2892_v4  ;;  %v2758_v14 = vadd.f32 %v3608_v51, %v2757_v5  ;;  %v3468_v15 = vpop.f32.mrf.mxu0  ;;  %v2894_v21 = vmul.f32 %v2165_v11, %v2165_v11 }
 0x1b7   :  { %v2363_v16 = vadd.f32 %v2362_v10, %v1044_v7  ;;  %v2624_v18 = vadd.f32 %v2623_v9, %v2497_v8  ;;  %v3612_v19 = vpop.f32.mrf.mxu1  ;;  %v2501_v40 = vmul.f32 %v3468_v15, %v3468_v15 }
 0x1b8   :  { %v2759_v20 = vadd.f32 %v2758_v14, %v2165_v11  ;;  %v3020_v22 = vadd.f32 %v3019_v13, %v2893_v12  ;;  %v1047_v23 = vpop.f32.mrf.mxu0  ;;  %v2897_v44 = vmul.f32 %v3612_v19, %v3612_v19 }
 0x1b9   :  { %v2625_v24 = vadd.f32 %v2624_v18, %v2498_v17  ;;  %v2364_v25 = vadd.f32 %v2363_v16, %v1047_v23  ;;  %v2499_v26 = vmul.f32 %v1047_v23, %v1047_v23  ;;  %v2168_v27 = vpop.f32.mrf.mxu1 }
 0x1ba   :  { %v3021_v28 = vadd.f32 %v3020_v22, %v2894_v21  ;;  %v2760_v29 = vadd.f32 %v2759_v20, %v2168_v27  ;;  %v2895_v30 = vmul.f32 %v2168_v27, %v2168_v27  ;;  %v3471_v31 = vpop.f32.mrf.mxu0 }
 0x1bb   :  { %v2365_v33 = vadd.f32 %v3467_v63, %v2364_v25  ;;  %v2626_v34 = vadd.f32 %v2625_v24, %v2499_v26  ;;  %v3615_v35 = vpop.f32.mrf.mxu1  ;;  %v2504_v0 = vmul.f32 %v3471_v31, %v3471_v31 }
 0x1bc   :  { %v2761_v37 = vadd.f32 %v3611_v3, %v2760_v29  ;;  %v3022_v38 = vadd.f32 %v3021_v28, %v2895_v30  ;;  %v1060_v39 = vpop.f32.mrf.mxu0  ;;  %v2900_v4 = vmul.f32 %v3615_v35, %v3615_v35 }
 0x1bd   :  { %v2627_v41 = vadd.f32 %v2626_v34, %v2500_v32  ;;  %v2366_v42 = vadd.f32 %v3468_v15, %v2365_v33  ;;  %v2181_v43 = vpop.f32.mrf.mxu1  ;;  %v2502_v49 = vmul.f32 %v1060_v39, %v1060_v39 }
 0x1be   :  { %v3023_v45 = vadd.f32 %v3022_v38, %v2896_v36  ;;  %v2762_v46 = vadd.f32 %v3612_v19, %v2761_v37  ;;  %v3472_v47 = vpop.f32.mrf.mxu0  ;;  %v2898_v53 = vmul.f32 %v2181_v43, %v2181_v43 }
 0x1bf   :  { %v2367_v48 = vadd.f32 %v2366_v42, %v1060_v39  ;;  %v2628_v50 = vadd.f32 %v2627_v41, %v2501_v40  ;;  %v3616_v51 = vpop.f32.mrf.mxu1  ;;  %v2505_v8 = vmul.f32 %v3472_v47, %v3472_v47 }
 0x1c0   :  { %v2763_v52 = vadd.f32 %v2762_v46, %v2181_v43  ;;  %v3024_v54 = vadd.f32 %v3023_v45, %v2897_v44  ;;  %v1063_v55 = vpop.f32.mrf.mxu0  ;;  %v2901_v12 = vmul.f32 %v3616_v51, %v3616_v51 }
 0x1c1   :  { %v2629_v56 = vadd.f32 %v2628_v50, %v2502_v49  ;;  %v2368_v57 = vadd.f32 %v2367_v48, %v1063_v55  ;;  %v2503_v58 = vmul.f32 %v1063_v55, %v1063_v55  ;;  %v2184_v59 = vpop.f32.mrf.mxu1 }
 0x1c2   :  { %v3025_v60 = vadd.f32 %v3024_v54, %v2898_v53  ;;  %v2764_v61 = vadd.f32 %v2763_v52, %v2184_v59  ;;  %v2899_v62 = vmul.f32 %v2184_v59, %v2184_v59  ;;  %v3475_v63 = vpop.f32.mrf.mxu0 }
 0x1c3   :  { %v2369_v1 = vadd.f32 %v3471_v31, %v2368_v57  ;;  %v2630_v2 = vadd.f32 %v2629_v56, %v2503_v58  ;;  %v3619_v3 = vpop.f32.mrf.mxu1  ;;  %v2508_v32 = vmul.f32 %v3475_v63, %v3475_v63 }
 0x1c4   :  { %v2765_v5 = vadd.f32 %v3615_v35, %v2764_v61  ;;  %v3026_v6 = vadd.f32 %v3025_v60, %v2899_v62  ;;  %v1076_v7 = vpop.f32.mrf.mxu0  ;;  %v2904_v36 = vmul.f32 %v3619_v3, %v3619_v3 }
 0x1c5   :  { %v2631_v9 = vadd.f32 %v2630_v2, %v2504_v0  ;;  %v2370_v10 = vadd.f32 %v3472_v47, %v2369_v1  ;;  %v2197_v11 = vpop.f32.mrf.mxu1  ;;  %v2506_v17 = vmul.f32 %v1076_v7, %v1076_v7 }
 0x1c6   :  { %v3027_v13 = vadd.f32 %v3026_v6, %v2900_v4  ;;  %v2766_v14 = vadd.f32 %v3616_v51, %v2765_v5  ;;  %v3476_v15 = vpop.f32.mrf.mxu0  ;;  %v2902_v21 = vmul.f32 %v2197_v11, %v2197_v11 }
 0x1c7   :  { %v2371_v16 = vadd.f32 %v2370_v10, %v1076_v7  ;;  %v2632_v18 = vadd.f32 %v2631_v9, %v2505_v8  ;;  %v3620_v19 = vpop.f32.mrf.mxu1  ;;  %v2509_v40 = vmul.f32 %v3476_v15, %v3476_v15 }
 0x1c8   :  { %v2767_v20 = vadd.f32 %v2766_v14, %v2197_v11  ;;  %v3028_v22 = vadd.f32 %v3027_v13, %v2901_v12  ;;  %v1079_v23 = vpop.f32.mrf.mxu0  ;;  %v2905_v44 = vmul.f32 %v3620_v19, %v3620_v19 }
 0x1c9   :  { %v2633_v24 = vadd.f32 %v2632_v18, %v2506_v17  ;;  %v2372_v25 = vadd.f32 %v2371_v16, %v1079_v23  ;;  %v2507_v26 = vmul.f32 %v1079_v23, %v1079_v23  ;;  %v2200_v27 = vpop.f32.mrf.mxu1 }
 0x1ca   :  { %v3029_v28 = vadd.f32 %v3028_v22, %v2902_v21  ;;  %v2768_v29 = vadd.f32 %v2767_v20, %v2200_v27  ;;  %v2903_v30 = vmul.f32 %v2200_v27, %v2200_v27  ;;  %v3479_v31 = vpop.f32.mrf.mxu0 }
 0x1cb   :  { %v2373_v33 = vadd.f32 %v3475_v63, %v2372_v25  ;;  %v2634_v34 = vadd.f32 %v2633_v24, %v2507_v26  ;;  %v3623_v35 = vpop.f32.mrf.mxu1  ;;  %v2512_v0 = vmul.f32 %v3479_v31, %v3479_v31 }
 0x1cc   :  { %v2769_v37 = vadd.f32 %v3619_v3, %v2768_v29  ;;  %v3030_v38 = vadd.f32 %v3029_v28, %v2903_v30  ;;  %v1092_v39 = vpop.f32.mrf.mxu0  ;;  %v2908_v4 = vmul.f32 %v3623_v35, %v3623_v35 }
 0x1cd   :  { %v2635_v41 = vadd.f32 %v2634_v34, %v2508_v32  ;;  %v2374_v42 = vadd.f32 %v3476_v15, %v2373_v33  ;;  %v2213_v43 = vpop.f32.mrf.mxu1  ;;  %v2510_v49 = vmul.f32 %v1092_v39, %v1092_v39 }
 0x1ce   :  { %v3031_v45 = vadd.f32 %v3030_v38, %v2904_v36  ;;  %v2770_v46 = vadd.f32 %v3620_v19, %v2769_v37  ;;  %v3480_v47 = vpop.f32.mrf.mxu0  ;;  %v2906_v53 = vmul.f32 %v2213_v43, %v2213_v43 }
 0x1cf   :  { %v2375_v48 = vadd.f32 %v2374_v42, %v1092_v39  ;;  %v2636_v50 = vadd.f32 %v2635_v41, %v2509_v40  ;;  %v3624_v51 = vpop.f32.mrf.mxu1  ;;  %v2513_v8 = vmul.f32 %v3480_v47, %v3480_v47 }
 0x1d0   :  { %v2771_v52 = vadd.f32 %v2770_v46, %v2213_v43  ;;  %v3032_v54 = vadd.f32 %v3031_v45, %v2905_v44  ;;  %v1095_v55 = vpop.f32.mrf.mxu0  ;;  %v2909_v12 = vmul.f32 %v3624_v51, %v3624_v51 }
 0x1d1   :  { %v2637_v56 = vadd.f32 %v2636_v50, %v2510_v49  ;;  %v2376_v57 = vadd.f32 %v2375_v48, %v1095_v55  ;;  %v2511_v58 = vmul.f32 %v1095_v55, %v1095_v55  ;;  %v2216_v59 = vpop.f32.mrf.mxu1 }
 0x1d2   :  { %v3033_v60 = vadd.f32 %v3032_v54, %v2906_v53  ;;  %v2772_v61 = vadd.f32 %v2771_v52, %v2216_v59  ;;  %v2907_v62 = vmul.f32 %v2216_v59, %v2216_v59  ;;  %v3483_v63 = vpop.f32.mrf.mxu0 }
 0x1d3   :  { %v2377_v1 = vadd.f32 %v3479_v31, %v2376_v57  ;;  %v2638_v2 = vadd.f32 %v2637_v56, %v2511_v58  ;;  %v3627_v3 = vpop.f32.mrf.mxu1  ;;  %v2516_v32 = vmul.f32 %v3483_v63, %v3483_v63 }
 0x1d4   :  { %v2773_v5 = vadd.f32 %v3623_v35, %v2772_v61  ;;  %v3034_v6 = vadd.f32 %v3033_v60, %v2907_v62  ;;  %v1108_v7 = vpop.f32.mrf.mxu0  ;;  %v2912_v36 = vmul.f32 %v3627_v3, %v3627_v3 }
 0x1d5   :  { %v2639_v9 = vadd.f32 %v2638_v2, %v2512_v0  ;;  %v2378_v10 = vadd.f32 %v3480_v47, %v2377_v1  ;;  %v2229_v11 = vpop.f32.mrf.mxu1  ;;  %v2514_v17 = vmul.f32 %v1108_v7, %v1108_v7 }
 0x1d6   :  { %v3035_v13 = vadd.f32 %v3034_v6, %v2908_v4  ;;  %v2774_v14 = vadd.f32 %v3624_v51, %v2773_v5  ;;  %v3484_v15 = vpop.f32.mrf.mxu0  ;;  %v2910_v21 = vmul.f32 %v2229_v11, %v2229_v11 }
 0x1d7   :  { %v2379_v16 = vadd.f32 %v2378_v10, %v1108_v7  ;;  %v2640_v18 = vadd.f32 %v2639_v9, %v2513_v8  ;;  %v3628_v19 = vpop.f32.mrf.mxu1  ;;  %v2517_v40 = vmul.f32 %v3484_v15, %v3484_v15 }
 0x1d8   :  { %v2775_v20 = vadd.f32 %v2774_v14, %v2229_v11  ;;  %v3036_v22 = vadd.f32 %v3035_v13, %v2909_v12  ;;  %v1111_v23 = vpop.f32.mrf.mxu0  ;;  %v2913_v44 = vmul.f32 %v3628_v19, %v3628_v19 }
 0x1d9   :  { %v2641_v24 = vadd.f32 %v2640_v18, %v2514_v17  ;;  %v2380_v25 = vadd.f32 %v2379_v16, %v1111_v23  ;;  %v2515_v26 = vmul.f32 %v1111_v23, %v1111_v23  ;;  %v2232_v27 = vpop.f32.mrf.mxu1 }
 0x1da   :  { %v3037_v28 = vadd.f32 %v3036_v22, %v2910_v21  ;;  %v2776_v29 = vadd.f32 %v2775_v20, %v2232_v27  ;;  %v2911_v30 = vmul.f32 %v2232_v27, %v2232_v27  ;;  %v3487_v31 = vpop.f32.mrf.mxu0 }
 0x1db   :  { %v2381_v33 = vadd.f32 %v3483_v63, %v2380_v25  ;;  %v2642_v34 = vadd.f32 %v2641_v24, %v2515_v26  ;;  %v3631_v35 = vpop.f32.mrf.mxu1  ;;  %v2520_v63 = vmul.f32 %v3487_v31, %v3487_v31 }
 0x1dc   :  { %v2777_v37 = vadd.f32 %v3627_v3, %v2776_v29  ;;  %v3038_v38 = vadd.f32 %v3037_v28, %v2911_v30  ;;  %v1124_v39 = vpop.f32.mrf.mxu0  ;;  %v2916_v2 = vmul.f32 %v3631_v35, %v3631_v35 }
 0x1dd   :  { %v2643_v41 = vadd.f32 %v2642_v34, %v2516_v32  ;;  %v2382_v42 = vadd.f32 %v3484_v15, %v2381_v33  ;;  %v2245_v43 = vpop.f32.mrf.mxu1  ;;  %v2518_v49 = vmul.f32 %v1124_v39, %v1124_v39 }
 0x1de   :  { %v3039_v45 = vadd.f32 %v3038_v38, %v2912_v36  ;;  %v2778_v46 = vadd.f32 %v3628_v19, %v2777_v37  ;;  %v3488_v47 = vpop.f32.mrf.mxu0  ;;  %v2914_v53 = vmul.f32 %v2245_v43, %v2245_v43 }
 0x1df   :  { %v2383_v48 = vadd.f32 %v2382_v42, %v1124_v39  ;;  %v2644_v50 = vadd.f32 %v2643_v41, %v2517_v40  ;;  %v3632_v51 = vpop.f32.mrf.mxu1  ;;  %v2521_v5 = vmul.f32 %v3488_v47, %v3488_v47 }
 0x1e0   :  { %v2779_v52 = vadd.f32 %v2778_v46, %v2245_v43  ;;  %v3040_v54 = vadd.f32 %v3039_v45, %v2913_v44  ;;  %v1127_v55 = vpop.f32.mrf.mxu0  ;;  %v2917_v8 = vmul.f32 %v3632_v51, %v3632_v51 }
 0x1e1   :  { %v2645_v56 = vadd.f32 %v2644_v50, %v2518_v49  ;;  %v2384_v57 = vadd.f32 %v2383_v48, %v1127_v55  ;;  %v2519_v58 = vmul.f32 %v1127_v55, %v1127_v55  ;;  %v2248_v59 = vpop.f32.mrf.mxu1 }
 0x1e2   :  { %v3041_v60 = vadd.f32 %v3040_v54, %v2914_v53  ;;  %v2780_v61 = vadd.f32 %v2779_v52, %v2248_v59  ;;  %v2915_v62 = vmul.f32 %v2248_v59, %v2248_v59 }
 0x1e3   :  { %v2385_v0 = vadd.f32 %v3487_v31, %v2384_v57  ;;  %v2646_v1 = vadd.f32 %v2645_v56, %v2519_v58 }
 0x1e4   :  { %v2781_v3 = vadd.f32 %v3631_v35, %v2780_v61  ;;  %v3042_v4 = vadd.f32 %v3041_v60, %v2915_v62 }
 0x1e5   :  { %v2386_v6 = vadd.f32 %v3488_v47, %v2385_v0  ;;  %v2647_v7 = vadd.f32 %v2646_v1, %v2520_v63 }
 0x1e6   :  { %v2782_v9 = vadd.f32 %v3632_v51, %v2781_v3  ;;  %v3043_v10 = vadd.f32 %v3042_v4, %v2916_v2 }
 0x1e7   :  { %v2387_v11 = vrot.slane %v2386_v6, 4  ;;  %v2648_v12 = vadd.f32 %v2647_v7, %v2521_v5 }
 0x1e8   :  { %v2783_v13 = vrot.slane %v2782_v9, 4  ;;  %v3044_v14 = vadd.f32 %v3043_v10, %v2917_v8 }
 0x1e9   :  { %v2388_v15 = vadd.f32 %v2387_v11, %v2386_v6  ;;  %v2649_v16 = vrot.slane %v2648_v12, 4 }
 0x1ea   :  { %v2784_v17 = vadd.f32 %v2783_v13, %v2782_v9  ;;  %v3045_v18 = vrot.slane %v3044_v14, 4 }
 0x1eb   :  { %v2389_v19 = vrot.slane %v2388_v15, 2  ;;  %v2650_v20 = vadd.f32 %v2649_v16, %v2648_v12 }
 0x1ec   :  { %v2785_v21 = vrot.slane %v2784_v17, 2  ;;  %v3046_v22 = vadd.f32 %v3045_v18, %v3044_v14 }
 0x1ed   :  { %v2390_v23 = vadd.f32 %v2389_v19, %v2388_v15  ;;  %v2651_v24 = vrot.slane %v2650_v20, 2 }
 0x1ee   :  { %v2786_v25 = vadd.f32 %v2785_v21, %v2784_v17  ;;  %v3047_v26 = vrot.slane %v3046_v22, 2 }
 0x1ef   :  { %v2391_v27 = vrot.slane %v2390_v23, 1  ;;  %v2652_v28 = vadd.f32 %v2651_v24, %v2650_v20 }
 0x1f0   :  { %v2787_v29 = vrot.slane %v2786_v25, 1  ;;  %v3048_v30 = vadd.f32 %v3047_v26, %v3046_v22 }
 0x1f1   :  { %v2392_v31 = vadd.f32 %v2391_v27, %v2390_v23  ;;  %v2653_v32 = vrot.slane %v2652_v28, 1 }
 0x1f2   :  { %v2788_v33 = vadd.f32 %v2787_v29, %v2786_v25  ;;  %v3049_v34 = vrot.slane %v3048_v30, 1 }
 0x1f3   :  { %2393 = vst [vmem:[%s4255_s4] sm:$0x1] %v2392_v31  ;;  %v2654_v35 = vadd.f32 %v2653_v32, %v2652_v28 }
 0x1f4   :  { %2789 = vst [vmem:[%s4255_s4 + $0x2] sm:$0x1] %v2788_v33  ;;  %v3050_v36 = vadd.f32 %v3049_v34, %v3048_v30 }
 0x1f5   :  { %2655 = vst [vmem:[%s4255_s4 + $0x1] sm:$0x1] %v2654_v35 }
 0x1f6   :  { %3051 = vst [vmem:[%s4255_s4 + $0x3] sm:$0x1] %v3050_v36 }

// kernel: attention_gate_forward.4
= control target key start
LH: loop header
LB: loop body
LE: loop exit
PB: predicated region body
PF: predicated region fallthrough
CT: control target
= control target key end

     0   :  { %vm3440_vm0 = vcmask 7168   ;;  %s5997_s2 = inlined_call_operand.vmem [shape: bf16[128,128], index: 2, kind: input, shape index: {}]   ;;  %s5998_s3 = inlined_call_operand.vmem [shape: bf16[128,128], index: 3, kind: input, shape index: {}]   ;;  %s5999_s0 = inlined_call_operand.vmem [shape: bf16[1024,128], index: 0, kind: input, shape index: {}]   ;;  %s6000_s1 = inlined_call_operand.vmem [shape: bf16[1024,128], index: 1, kind: input, shape index: {}]   ;;  %s6001_s4 = inlined_call_operand.vmem [shape: f32[8,128], index: 4, kind: input, shape index: {}]   ;;  %s6002_s5 = inlined_call_operand.vmem [shape: f32[1024,1], index: 5, kind: output, shape index: {}]  }
   0x1   :  { %v4154_v0 = vld [vmem:[%s5997_s2 + $0x38] sm:$0xff]   ;;  %v4156_v2 = vld [vmem:[%s5997_s2 + $0x30] sm:$0xff]   ;;  %v4158_v4 = vld [vmem:[%s5997_s2 + $0x28] sm:$0xff]  }
   0x2   :  { %v4155_v1 = vld [vmem:[%s5998_s3 + $0x38] sm:$0xff]   ;;  %3866 = vmatprep.subr.bf16.mxu0 %v4154_v0  ;;  %v4157_v3 = vld [vmem:[%s5998_s3 + $0x30] sm:$0xff]   ;;  %v4159_v5 = vld [vmem:[%s5998_s3 + $0x28] sm:$0xff]  }
   0x3   :  { %4010 = vmatprep.subr.bf16.mxu1 %v4155_v1  ;;  %3867 = vmatpush3.bf16.msra.mxu0 %v4154_v0  ;;  %v4160_v6 = vld [vmem:[%s5997_s2 + $0x20] sm:$0xff]   ;;  %v4162_v8 = vld [vmem:[%s5997_s2 + $0x18] sm:$0xff]   ;;  %v4164_v10 = vld [vmem:[%s5997_s2 + $0x10] sm:$0xff]  }
   0x4   :  { %4011 = vmatpush3.bf16.msra.mxu1 %v4155_v1  ;;  %3868 = vmatprep.subr.bf16.mxu0 %v4156_v2  ;;  %v4161_v7 = vld [vmem:[%s5998_s3 + $0x20] sm:$0xff]   ;;  %v4163_v9 = vld [vmem:[%s5998_s3 + $0x18] sm:$0xff]   ;;  %v4165_v11 = vld [vmem:[%s5998_s3 + $0x10] sm:$0xff]  }
   0x5   :  { %4012 = vmatprep.subr.bf16.mxu1 %v4157_v3  ;;  %v4170_v12 = vld [vmem:[%s5999_s0] sm:$0xff]   ;;  %v4166_v14 = vld [vmem:[%s5997_s2 + $0x8] sm:$0xff]   ;;  %v4174_v20 = vld [vmem:[%s5999_s0 + $0x10] sm:$0xff]  }
   0x6   :  { %v4171_v13 = vld [vmem:[%s6000_s1] sm:$0xff]   ;;  %3882 = vmatprep.mubr.bf16.mxu0 %v4170_v12  ;;  %v4167_v15 = vld [vmem:[%s5998_s3 + $0x8] sm:$0xff]   ;;  %v4175_v21 = vld [vmem:[%s6000_s1 + $0x10] sm:$0xff]  }
   0x7   :  { %3869 = vmatpush3.bf16.msra.mxu0 %v4156_v2  ;;  %4026 = vmatprep.mubr.bf16.mxu1 %v4171_v13  ;;  %v4168_v16 = vld [vmem:[%s5997_s2] sm:$0xff]   ;;  %v4172_v18 = vld [vmem:[%s5999_s0 + $0x8] sm:$0xff]   ;;  %v4176_v22 = vld [vmem:[%s5999_s0 + $0x18] sm:$0xff]  }
   0x8   :  { %4013 = vmatpush3.bf16.msra.mxu1 %v4157_v3  ;;  %3870 = vmatprep.subr.bf16.mxu0 %v4158_v4  ;;  %v4169_v17 = vld [vmem:[%s5998_s3] sm:$0xff]   ;;  %v4173_v19 = vld [vmem:[%s6000_s1 + $0x8] sm:$0xff]   ;;  %v4177_v23 = vld [vmem:[%s6000_s1 + $0x18] sm:$0xff]  }
   0x9   :  { %4014 = vmatprep.subr.bf16.mxu1 %v4159_v5  ;;  %v4178_v24 = vld [vmem:[%s5999_s0 + $0x20] sm:$0xff]   ;;  %v4180_v26 = vld [vmem:[%s5999_s0 + $0x28] sm:$0xff]   ;;  %v4182_v28 = vld [vmem:[%s5999_s0 + $0x30] sm:$0xff]  }
   0xa   :  { %v4179_v25 = vld [vmem:[%s6000_s1 + $0x20] sm:$0xff]   ;;  %v4181_v27 = vld [vmem:[%s6000_s1 + $0x28] sm:$0xff]   ;;  %v4183_v29 = vld [vmem:[%s6000_s1 + $0x30] sm:$0xff]  }
   0xb   :  { %3871 = vmatpush3.bf16.msra.mxu0 %v4158_v4  ;;  %v4184_v30 = vld [vmem:[%s5999_s0 + $0x38] sm:$0xff]   ;;  %v4186_v32 = vld [vmem:[%s5999_s0 + $0x40] sm:$0xff]   ;;  %v4188_v34 = vld [vmem:[%s5999_s0 + $0x48] sm:$0xff]  }
   0xc   :  { %4015 = vmatpush3.bf16.msra.mxu1 %v4159_v5  ;;  %3872 = vmatprep.subr.bf16.mxu0 %v4160_v6  ;;  %v4185_v31 = vld [vmem:[%s6000_s1 + $0x38] sm:$0xff]   ;;  %v4187_v33 = vld [vmem:[%s6000_s1 + $0x40] sm:$0xff]   ;;  %v4189_v35 = vld [vmem:[%s6000_s1 + $0x48] sm:$0xff]  }
   0xd   :  { %4016 = vmatprep.subr.bf16.mxu1 %v4161_v7  ;;  %v4190_v36 = vld [vmem:[%s5999_s0 + $0x50] sm:$0xff]   ;;  %v4192_v38 = vld [vmem:[%s5999_s0 + $0x58] sm:$0xff]   ;;  %v4194_v40 = vld [vmem:[%s5999_s0 + $0x60] sm:$0xff]  }
   0xe   :  { %v4191_v37 = vld [vmem:[%s6000_s1 + $0x50] sm:$0xff]   ;;  %v4193_v39 = vld [vmem:[%s6000_s1 + $0x58] sm:$0xff]   ;;  %v4195_v41 = vld [vmem:[%s6000_s1 + $0x60] sm:$0xff]  }
   0xf   :  { %3873 = vmatpush3.bf16.msra.mxu0 %v4160_v6  ;;  %v4196_v42 = vld [vmem:[%s5999_s0 + $0x68] sm:$0xff]   ;;  %v4198_v44 = vld [vmem:[%s5999_s0 + $0x70] sm:$0xff]   ;;  %v4200_v46 = vld [vmem:[%s5999_s0 + $0x78] sm:$0xff]  }
  0x10   :  { %4017 = vmatpush3.bf16.msra.mxu1 %v4161_v7  ;;  %3874 = vmatprep.subr.bf16.mxu0 %v4162_v8  ;;  %v4197_v43 = vld [vmem:[%s6000_s1 + $0x68] sm:$0xff]   ;;  %v4199_v45 = vld [vmem:[%s6000_s1 + $0x70] sm:$0xff]   ;;  %v4201_v47 = vld [vmem:[%s6000_s1 + $0x78] sm:$0xff]  }
  0x11   :  { %4018 = vmatprep.subr.bf16.mxu1 %v4163_v9  ;;  %v4202_v48 = vld [vmem:[%s5999_s0 + $0x80] sm:$0xff]   ;;  %v4204_v50 = vld [vmem:[%s5999_s0 + $0x88] sm:$0xff]   ;;  %v4206_v52 = vld [vmem:[%s5999_s0 + $0x90] sm:$0xff]  }
  0x12   :  { %v4203_v49 = vld [vmem:[%s6000_s1 + $0x80] sm:$0xff]   ;;  %v4205_v51 = vld [vmem:[%s6000_s1 + $0x88] sm:$0xff]   ;;  %v4207_v53 = vld [vmem:[%s6000_s1 + $0x90] sm:$0xff]  }
  0x13   :  { %3875 = vmatpush3.bf16.msra.mxu0 %v4162_v8  ;;  %v4208_v54 = vld [vmem:[%s5999_s0 + $0x98] sm:$0xff]   ;;  %v4210_v56 = vld [vmem:[%s5999_s0 + $0xa0] sm:$0xff]   ;;  %v4212_v58 = vld [vmem:[%s5999_s0 + $0xa8] sm:$0xff]  }
  0x14   :  { %4019 = vmatpush3.bf16.msra.mxu1 %v4163_v9  ;;  %3876 = vmatprep.subr.bf16.mxu0 %v4164_v10  ;;  %v4209_v55 = vld [vmem:[%s6000_s1 + $0x98] sm:$0xff]   ;;  %v4211_v57 = vld [vmem:[%s6000_s1 + $0xa0] sm:$0xff]   ;;  %v4213_v59 = vld [vmem:[%s6000_s1 + $0xa8] sm:$0xff]  }
  0x15   :  { %4020 = vmatprep.subr.bf16.mxu1 %v4165_v11  ;;  %v4214_v60 = vld [vmem:[%s5999_s0 + $0xb0] sm:$0xff]   ;;  %v4216_v62 = vld [vmem:[%s5999_s0 + $0xb8] sm:$0xff]   ;;  %v4218_v0 = vld [vmem:[%s5999_s0 + $0xc0] sm:$0xff]  }
  0x16   :  { %v4215_v61 = vld [vmem:[%s6000_s1 + $0xb0] sm:$0xff]   ;;  %v4217_v63 = vld [vmem:[%s6000_s1 + $0xb8] sm:$0xff]   ;;  %v4219_v1 = vld [vmem:[%s6000_s1 + $0xc0] sm:$0xff]  }
  0x17   :  { %3877 = vmatpush3.bf16.msra.mxu0 %v4164_v10  ;;  %v4220_v2 = vld [vmem:[%s5999_s0 + $0xc8] sm:$0xff]   ;;  %v4222_v4 = vld [vmem:[%s5999_s0 + $0xd0] sm:$0xff]   ;;  %v4224_v6 = vld [vmem:[%s5999_s0 + $0xd8] sm:$0xff]  }
  0x18   :  { %4021 = vmatpush3.bf16.msra.mxu1 %v4165_v11  ;;  %3878 = vmatprep.subr.bf16.mxu0 %v4166_v14  ;;  %v4221_v3 = vld [vmem:[%s6000_s1 + $0xc8] sm:$0xff]   ;;  %v4223_v5 = vld [vmem:[%s6000_s1 + $0xd0] sm:$0xff]   ;;  %v4225_v7 = vld [vmem:[%s6000_s1 + $0xd8] sm:$0xff]  }
  0x19   :  { %4022 = vmatprep.subr.bf16.mxu1 %v4167_v15  ;;  %v4226_v8 = vld [vmem:[%s5999_s0 + $0xe0] sm:$0xff]   ;;  %v4228_v10 = vld [vmem:[%s5999_s0 + $0xe8] sm:$0xff]   ;;  %v4230_v12 = vld [vmem:[%s5999_s0 + $0xf0] sm:$0xff]  }
  0x1a   :  { %v4227_v9 = vld [vmem:[%s6000_s1 + $0xe0] sm:$0xff]   ;;  %v4229_v11 = vld [vmem:[%s6000_s1 + $0xe8] sm:$0xff]   ;;  %v4231_v13 = vld [vmem:[%s6000_s1 + $0xf0] sm:$0xff]  }
  0x1b   :  { %3879 = vmatpush3.bf16.msra.mxu0 %v4166_v14  ;;  %v4232_v14 = vld [vmem:[%s5999_s0 + $0xf8] sm:$0xff]  }
  0x1c   :  { %4023 = vmatpush3.bf16.msra.mxu1 %v4167_v15  ;;  %3880 = vmatprep.subr.bf16.mxu0 %v4168_v16  ;;  %v4233_v15 = vld [vmem:[%s6000_s1 + $0xf8] sm:$0xff]  }
  0x1d   :  { %4024 = vmatprep.subr.bf16.mxu1 %v4169_v17 }
  0x1f   :  { %3881 = vmatpush3.bf16.msra.mxu0 %v4168_v16  ;;  %v4234_v16 = vld [vmem:[%s5999_s0 + $0x100] sm:$0xff]  }
  0x20   :  { %4025 = vmatpush3.bf16.msra.mxu1 %v4169_v17  ;;  %v4235_v17 = vld [vmem:[%s6000_s1 + $0x100] sm:$0xff]  }
  0x22   :  { %3883 = vmatmul.mubr.bf16.vlgmr.msra.gmra.mxu0 %v4172_v18  ;;  %v4236_v18 = vld [vmem:[%s5999_s0 + $0x108] sm:$0xff]  }
  0x23   :  { %4027 = vmatmul.mubr.bf16.vlgmr.msra.gmra.mxu1 %v4173_v19  ;;  %3886 = vmatprep.mubr.bf16.mxu0 %v4174_v20  ;;  %v4237_v19 = vld [vmem:[%s6000_s1 + $0x108] sm:$0xff]   ;;  %v4238_v20 = vld [vmem:[%s5999_s0 + $0x110] sm:$0xff]  }
  0x24   :  { %4030 = vmatprep.mubr.bf16.mxu1 %v4175_v21  ;;  %v4239_v21 = vld [vmem:[%s6000_s1 + $0x110] sm:$0xff]  }
  0x2a   :  { %3887 = vmatmul.mubr.bf16.gmra.mxu0 %v4176_v22  ;;  %v4240_v22 = vld [vmem:[%s5999_s0 + $0x118] sm:$0xff]  }
  0x2b   :  { %4031 = vmatmul.mubr.bf16.gmra.mxu1 %v4177_v23  ;;  %3890 = vmatprep.mubr.bf16.mxu0 %v4178_v24  ;;  %v4241_v23 = vld [vmem:[%s6000_s1 + $0x118] sm:$0xff]   ;;  %v4242_v24 = vld [vmem:[%s5999_s0 + $0x120] sm:$0xff]  }
  0x2c   :  { %4034 = vmatprep.mubr.bf16.mxu1 %v4179_v25  ;;  %v4243_v25 = vld [vmem:[%s6000_s1 + $0x120] sm:$0xff]  }
  0x32   :  { %3891 = vmatmul.mubr.bf16.gmra.mxu0 %v4180_v26  ;;  %v4244_v26 = vld [vmem:[%s5999_s0 + $0x128] sm:$0xff]  }
  0x33   :  { %4035 = vmatmul.mubr.bf16.gmra.mxu1 %v4181_v27  ;;  %3894 = vmatprep.mubr.bf16.mxu0 %v4182_v28  ;;  %v4245_v27 = vld [vmem:[%s6000_s1 + $0x128] sm:$0xff]   ;;  %v4246_v28 = vld [vmem:[%s5999_s0 + $0x130] sm:$0xff]  }
  0x34   :  { %4038 = vmatprep.mubr.bf16.mxu1 %v4183_v29  ;;  %v4247_v29 = vld [vmem:[%s6000_s1 + $0x130] sm:$0xff]  }
  0x3a   :  { %3895 = vmatmul.mubr.bf16.gmra.mxu0 %v4184_v30  ;;  %v4248_v30 = vld [vmem:[%s5999_s0 + $0x138] sm:$0xff]  }
  0x3b   :  { %4039 = vmatmul.mubr.bf16.gmra.mxu1 %v4185_v31  ;;  %3898 = vmatprep.mubr.bf16.mxu0 %v4186_v32  ;;  %v4249_v31 = vld [vmem:[%s6000_s1 + $0x138] sm:$0xff]   ;;  %v4250_v32 = vld [vmem:[%s5999_s0 + $0x140] sm:$0xff]  }
  0x3c   :  { %4042 = vmatprep.mubr.bf16.mxu1 %v4187_v33  ;;  %v4251_v33 = vld [vmem:[%s6000_s1 + $0x140] sm:$0xff]  }
  0x42   :  { %3899 = vmatmul.mubr.bf16.gmra.mxu0 %v4188_v34  ;;  %v4252_v34 = vld [vmem:[%s5999_s0 + $0x148] sm:$0xff]  }
  0x43   :  { %4043 = vmatmul.mubr.bf16.gmra.mxu1 %v4189_v35  ;;  %3902 = vmatprep.mubr.bf16.mxu0 %v4190_v36  ;;  %v4253_v35 = vld [vmem:[%s6000_s1 + $0x148] sm:$0xff]   ;;  %v4254_v36 = vld [vmem:[%s5999_s0 + $0x150] sm:$0xff]  }
  0x44   :  { %4046 = vmatprep.mubr.bf16.mxu1 %v4191_v37  ;;  %v4255_v37 = vld [vmem:[%s6000_s1 + $0x150] sm:$0xff]  }
  0x4a   :  { %3903 = vmatmul.mubr.bf16.gmra.mxu0 %v4192_v38  ;;  %v4256_v38 = vld [vmem:[%s5999_s0 + $0x158] sm:$0xff]  }
  0x4b   :  { %4047 = vmatmul.mubr.bf16.gmra.mxu1 %v4193_v39  ;;  %3906 = vmatprep.mubr.bf16.mxu0 %v4194_v40  ;;  %v4257_v39 = vld [vmem:[%s6000_s1 + $0x158] sm:$0xff]   ;;  %v4258_v40 = vld [vmem:[%s5999_s0 + $0x160] sm:$0xff]  }
  0x4c   :  { %4050 = vmatprep.mubr.bf16.mxu1 %v4195_v41  ;;  %v4259_v41 = vld [vmem:[%s6000_s1 + $0x160] sm:$0xff]  }
  0x52   :  { %3907 = vmatmul.mubr.bf16.gmra.mxu0 %v4196_v42  ;;  %v4260_v42 = vld [vmem:[%s5999_s0 + $0x168] sm:$0xff]  }
  0x53   :  { %4051 = vmatmul.mubr.bf16.gmra.mxu1 %v4197_v43  ;;  %3910 = vmatprep.mubr.bf16.mxu0 %v4198_v44  ;;  %v4261_v43 = vld [vmem:[%s6000_s1 + $0x168] sm:$0xff]   ;;  %v4262_v44 = vld [vmem:[%s5999_s0 + $0x170] sm:$0xff]  }
  0x54   :  { %4054 = vmatprep.mubr.bf16.mxu1 %v4199_v45  ;;  %v4263_v45 = vld [vmem:[%s6000_s1 + $0x170] sm:$0xff]  }
  0x5a   :  { %3911 = vmatmul.mubr.bf16.gmra.mxu0 %v4200_v46  ;;  %v4264_v46 = vld [vmem:[%s5999_s0 + $0x178] sm:$0xff]  }
  0x5b   :  { %4055 = vmatmul.mubr.bf16.gmra.mxu1 %v4201_v47  ;;  %3914 = vmatprep.mubr.bf16.mxu0 %v4202_v48  ;;  %v4265_v47 = vld [vmem:[%s6000_s1 + $0x178] sm:$0xff]   ;;  %v4266_v48 = vld [vmem:[%s5999_s0 + $0x180] sm:$0xff]  }
  0x5c   :  { %4058 = vmatprep.mubr.bf16.mxu1 %v4203_v49  ;;  %v4267_v49 = vld [vmem:[%s6000_s1 + $0x180] sm:$0xff]  }
  0x62   :  { %3915 = vmatmul.mubr.bf16.gmra.mxu0 %v4204_v50  ;;  %v4268_v50 = vld [vmem:[%s5999_s0 + $0x188] sm:$0xff]  }
  0x63   :  { %4059 = vmatmul.mubr.bf16.gmra.mxu1 %v4205_v51  ;;  %3918 = vmatprep.mubr.bf16.mxu0 %v4206_v52  ;;  %v4269_v51 = vld [vmem:[%s6000_s1 + $0x188] sm:$0xff]   ;;  %v4270_v52 = vld [vmem:[%s5999_s0 + $0x190] sm:$0xff]  }
  0x64   :  { %4062 = vmatprep.mubr.bf16.mxu1 %v4207_v53  ;;  %v4692_v53 = vld [vmem:[%s6001_s4] ss:$0 sm:$0xff] }
  0x6a   :  { %3919 = vmatmul.mubr.bf16.gmra.mxu0 %v4208_v54  ;;  %v4271_v54 = vld [vmem:[%s6000_s1 + $0x190] sm:$0xff]  }
  0x6b   :  { %4063 = vmatmul.mubr.bf16.gmra.mxu1 %v4209_v55  ;;  %3922 = vmatprep.mubr.bf16.mxu0 %v4210_v56  ;;  %v4700_v55 = vld [vmem:[%s6001_s4 + $0x2] ss:$0 sm:$0xff] }
  0x6c   :  { %4066 = vmatprep.mubr.bf16.mxu1 %v4211_v57  ;;  %v4705_v57 = vld [vmem:[%s6001_s4 + $0x1] ss:$0 sm:$0xff] }
  0x72   :  { %3923 = vmatmul.mubr.bf16.gmra.mxu0 %v4212_v58 }
  0x73   :  { %4067 = vmatmul.mubr.bf16.gmra.mxu1 %v4213_v59  ;;  %3926 = vmatprep.mubr.bf16.mxu0 %v4214_v60 }
  0x74   :  { %4070 = vmatprep.mubr.bf16.mxu1 %v4215_v61 }
  0x7a   :  { %3927 = vmatmul.mubr.bf16.gmra.mxu0 %v4216_v62 }
  0x7b   :  { %4071 = vmatmul.mubr.bf16.gmra.mxu1 %v4217_v63  ;;  %3930 = vmatprep.mubr.bf16.mxu0 %v4218_v0 }
  0x7c   :  { %4074 = vmatprep.mubr.bf16.mxu1 %v4219_v1 }
  0x82   :  { %3931 = vmatmul.mubr.bf16.gmra.mxu0 %v4220_v2  ;;  %v4272_v2 = vld [vmem:[%s5999_s0 + $0x198] sm:$0xff]  }
  0x83   :  { %4075 = vmatmul.mubr.bf16.gmra.mxu1 %v4221_v3  ;;  %3934 = vmatprep.mubr.bf16.mxu0 %v4222_v4  ;;  %v4717_v3 = vld [vmem:[%s6001_s4 + $0x3] ss:$0 sm:$0xff] }
  0x84   :  { %4078 = vmatprep.mubr.bf16.mxu1 %v4223_v5 }
  0x8a   :  { %3935 = vmatmul.mubr.bf16.gmra.mxu0 %v4224_v6 }
  0x8b   :  { %4079 = vmatmul.mubr.bf16.gmra.mxu1 %v4225_v7  ;;  %3938 = vmatprep.mubr.bf16.mxu0 %v4226_v8 }
  0x8c   :  { %4082 = vmatprep.mubr.bf16.mxu1 %v4227_v9  ;;  %v4273_v9 = vld [vmem:[%s6000_s1 + $0x198] sm:$0xff]  }
  0x92   :  { %3939 = vmatmul.mubr.bf16.gmra.mxu0 %v4228_v10  ;;  %v4274_v10 = vld [vmem:[%s5999_s0 + $0x1a0] sm:$0xff]  }
  0x93   :  { %4083 = vmatmul.mubr.bf16.gmra.mxu1 %v4229_v11  ;;  %3942 = vmatprep.mubr.bf16.mxu0 %v4230_v12 }
  0x94   :  { %4086 = vmatprep.mubr.bf16.mxu1 %v4231_v13  ;;  %v4275_v13 = vld [vmem:[%s6000_s1 + $0x1a0] sm:$0xff]  }
  0x9a   :  { %3943 = vmatmul.mubr.bf16.gmra.mxu0 %v4232_v14 }
  0x9b   :  { %4087 = vmatmul.mubr.bf16.gmra.mxu1 %v4233_v15  ;;  %3946 = vmatprep.mubr.bf16.mxu0 %v4234_v16 }
  0x9c   :  { %4090 = vmatprep.mubr.bf16.mxu1 %v4235_v17 }
  0xa2   :  { %3947 = vmatmul.mubr.bf16.gmra.mxu0 %v4236_v18 }
  0xa3   :  { %4091 = vmatmul.mubr.bf16.gmra.mxu1 %v4237_v19  ;;  %3950 = vmatprep.mubr.bf16.mxu0 %v4238_v20 }
  0xa4   :  { %4094 = vmatprep.mubr.bf16.mxu1 %v4239_v21  ;;  %v4739_v21 = vld [vmem:[%s6001_s4 + $0x4] ss:$0 sm:$0xff] }
  0xaa   :  { %3951 = vmatmul.mubr.bf16.gmra.mxu0 %v4240_v22 }
  0xab   :  { %4095 = vmatmul.mubr.bf16.gmra.mxu1 %v4241_v23  ;;  %3954 = vmatprep.mubr.bf16.mxu0 %v4242_v24 }
  0xac   :  { %4098 = vmatprep.mubr.bf16.mxu1 %v4243_v25 }
  0xb2   :  { %3955 = vmatmul.mubr.bf16.gmra.mxu0 %v4244_v26 }
  0xb3   :  { %4099 = vmatmul.mubr.bf16.gmra.mxu1 %v4245_v27  ;;  %3958 = vmatprep.mubr.bf16.mxu0 %v4246_v28 }
  0xb4   :  { %4102 = vmatprep.mubr.bf16.mxu1 %v4247_v29 }
  0xba   :  { %3959 = vmatmul.mubr.bf16.gmra.mxu0 %v4248_v30 }
  0xbb   :  { %4103 = vmatmul.mubr.bf16.gmra.mxu1 %v4249_v31  ;;  %3962 = vmatprep.mubr.bf16.mxu0 %v4250_v32 }
  0xbc   :  { %4106 = vmatprep.mubr.bf16.mxu1 %v4251_v33 }
  0xc2   :  { %3963 = vmatmul.mubr.bf16.gmra.mxu0 %v4252_v34 }
  0xc3   :  { %4107 = vmatmul.mubr.bf16.gmra.mxu1 %v4253_v35  ;;  %3966 = vmatprep.mubr.bf16.mxu0 %v4254_v36 }
  0xc4   :  { %4110 = vmatprep.mubr.bf16.mxu1 %v4255_v37 }
  0xca   :  { %3967 = vmatmul.mubr.bf16.gmra.mxu0 %v4256_v38  ;;  %v4276_v38 = vld [vmem:[%s5999_s0 + $0x1a8] sm:$0xff]  }
  0xcb   :  { %4111 = vmatmul.mubr.bf16.gmra.mxu1 %v4257_v39  ;;  %3970 = vmatprep.mubr.bf16.mxu0 %v4258_v40 }
  0xcc   :  { %4114 = vmatprep.mubr.bf16.mxu1 %v4259_v41 }
  0xd2   :  { %3971 = vmatmul.mubr.bf16.gmra.mxu0 %v4260_v42 }
  0xd3   :  { %4115 = vmatmul.mubr.bf16.gmra.mxu1 %v4261_v43  ;;  %3974 = vmatprep.mubr.bf16.mxu0 %v4262_v44  ;;  %v4277_v44 = vld [vmem:[%s6000_s1 + $0x1a8] sm:$0xff]  }
  0xd4   :  { %4118 = vmatprep.mubr.bf16.mxu1 %v4263_v45 }
  0xda   :  { %3975 = vmatmul.mubr.bf16.gmra.mxu0 %v4264_v46 }
  0xdb   :  { %4119 = vmatmul.mubr.bf16.gmra.mxu1 %v4265_v47  ;;  %3978 = vmatprep.mubr.bf16.mxu0 %v4266_v48 }
  0xdc   :  { %4122 = vmatprep.mubr.bf16.mxu1 %v4267_v49 }
  0xe2   :  { %v3884_v56 = vpop.f32.mrf.mxu0  ;;  %3979 = vmatmul.mubr.bf16.gmra.mxu0 %v4268_v50  ;;  %v4278_v50 = vld [vmem:[%s5999_s0 + $0x1b0] sm:$0xff]  }
  0xe3   :  { %v2270_v58 = vmul.f32 %v3884_v56, %v4692_v53  ;;  %v4028_v59 = vpop.f32.mrf.mxu1  ;;  %4123 = vmatmul.mubr.bf16.gmra.mxu1 %v4269_v51  ;;  %3982 = vmatprep.mubr.bf16.mxu0 %v4270_v52 }
  0xe4   :  { %v2536_v60 = vmul.f32 %v4028_v59, %v4700_v55  ;;  %v631_v61 = vpop.f32.mrf.mxu0  ;;  %4126 = vmatprep.mubr.bf16.mxu1 %v4271_v54  ;;  %v4279_v59 = vld [vmem:[%s6000_s1 + $0x1b0] sm:$0xff]  }
  0xe5   :  { %v2403_v62 = vadd.f32 %v4705_v57, %v2270_v58  ;;  %v2268_v63 = vmul.f32 %v4692_v53, %v631_v61  ;;  %v1752_v0 = vpop.f32.mrf.mxu1 }
  0xe6   :  { %v3885_v1 = vpop.f32.mrf.mxu0  ;;  %v2534_v6 = vmul.f32 %v4700_v55, %v1752_v0 }
  0xe7   :  { %v2664_v4 = vadd.f32 %v2536_v60, %v2403_v62  ;;  %v2401_v5 = vadd.f32 %v4705_v57, %v2268_v63  ;;  %v2271_v7 = vmul.f32 %v3885_v1, %v4692_v53  ;;  %v4029_v8 = vpop.f32.mrf.mxu1 }
  0xe8   :  { %v2537_v11 = vmul.f32 %v4029_v8, %v4700_v55  ;;  %v634_v12 = vpop.f32.mrf.mxu0 }
  0xe9   :  { %v2662_v14 = vadd.f32 %v2534_v6, %v2401_v5  ;;  %v2404_v15 = vadd.f32 %v4705_v57, %v2271_v7  ;;  %v2269_v16 = vmul.f32 %v4692_v53, %v634_v12  ;;  %v1755_v17 = vpop.f32.mrf.mxu1  ;;  %v2797_v18 = vadd.f32 %v4717_v3, %v2664_v4 }
  0xea   :  { %v2535_v19 = vmul.f32 %v4700_v55, %v1755_v17  ;;  %v3888_v20 = vpop.f32.mrf.mxu0  ;;  %3983 = vmatmul.mubr.bf16.gmra.mxu0 %v4272_v2  ;;  %v4280_v17 = vld [vmem:[%s5999_s0 + $0x1b8] sm:$0xff]  }
  0xeb   :  { %v2665_v22 = vadd.f32 %v2537_v11, %v2404_v15  ;;  %v2402_v23 = vadd.f32 %v4705_v57, %v2269_v16  ;;  %v2274_v24 = vmul.f32 %v3888_v20, %v4692_v53  ;;  %v4032_v25 = vpop.f32.mrf.mxu1  ;;  %4127 = vmatmul.mubr.bf16.gmra.mxu1 %v4273_v9  ;;  %v2925_v26 = vmax.f32 %v2797_v18, 0.0  ;;  %3986 = vmatprep.mubr.bf16.mxu0 %v4274_v10 }
  0xec   :  { %v2540_v27 = vmul.f32 %v4032_v25, %v4700_v55  ;;  %v647_v28 = vpop.f32.mrf.mxu0  ;;  %4130 = vmatprep.mubr.bf16.mxu1 %v4275_v13  ;;  %v2795_v29 = vadd.f32 %v4717_v3, %v2662_v14 }
  0xed   :  { %v2663_v30 = vadd.f32 %v2535_v19, %v2402_v23  ;;  %v2407_v31 = vadd.f32 %v4705_v57, %v2274_v24  ;;  %v2272_v32 = vmul.f32 %v4692_v53, %v647_v28  ;;  %v1768_v33 = vpop.f32.mrf.mxu1  ;;  %v3058_v34 = vmul.f32 %v4739_v21, %v2925_v26  ;;  %v4281_v24 = vld [vmem:[%s6000_s1 + $0x1b8] sm:$0xff]  }
  0xee   :  { %v2538_v35 = vmul.f32 %v4700_v55, %v1768_v33  ;;  %v3889_v36 = vpop.f32.mrf.mxu0  ;;  %v2923_v37 = vmax.f32 %v2795_v29, 0.0  ;;  %v2798_v39 = vadd.f32 %v4717_v3, %v2665_v22 }
  0xef   :  { %v2668_v40 = vadd.f32 %v2540_v27, %v2407_v31  ;;  %v2405_v41 = vadd.f32 %v4705_v57, %v2272_v32  ;;  %v2275_v42 = vmul.f32 %v3889_v36, %v4692_v53  ;;  %v4033_v43 = vpop.f32.mrf.mxu1  ;;  %3188 = vadd.xlane.f32.xlu1 %v3058_v34  ;;  %v2796_v45 = vadd.f32 %v4717_v3, %v2663_v30  ;;  %v4282_v30 = vld [vmem:[%s5999_s0 + $0x1c0] sm:$0xff]  }
  0xf0   :  { %v2541_v46 = vmul.f32 %v4033_v43, %v4700_v55  ;;  %v650_v47 = vpop.f32.mrf.mxu0  ;;  %v3056_v48 = vmul.f32 %v4739_v21, %v2923_v37  ;;  %v2926_v49 = vmax.f32 %v2798_v39, 0.0  ;;  %v4283_v31 = vld [vmem:[%s6000_s1 + $0x1c0] sm:$0xff]  }
  0xf1   :  { %v2666_v51 = vadd.f32 %v2538_v35, %v2405_v41  ;;  %v2408_v52 = vadd.f32 %v4705_v57, %v2275_v42  ;;  %v2273_v54 = vmul.f32 %v4692_v53, %v650_v47  ;;  %v1771_v56 = vpop.f32.mrf.mxu1  ;;  %v2924_v58 = vmax.f32 %v2796_v45, 0.0 }
  0xf2   :  { %v2539_v60 = vmul.f32 %v4700_v55, %v1771_v56  ;;  %3184 = vadd.xlane.f32.xlu0 %v3056_v48  ;;  %v3892_v61 = vpop.f32.mrf.mxu0  ;;  %3987 = vmatmul.mubr.bf16.gmra.mxu0 %v4276_v38  ;;  %v3059_v62 = vmul.f32 %v4739_v21, %v2926_v49  ;;  %v2801_v63 = vadd.f32 %v4717_v3, %v2668_v40 }
  0xf3   :  { %v2669_v0 = vadd.f32 %v2541_v46, %v2408_v52  ;;  %v2406_v1 = vadd.f32 %v4705_v57, %v2273_v54  ;;  %v2278_v2 = vmul.f32 %v3892_v61, %v4692_v53  ;;  %v4036_v4 = vpop.f32.mrf.mxu1  ;;  %4131 = vmatmul.mubr.bf16.gmra.mxu1 %v4277_v44  ;;  %v3057_v5 = vmul.f32 %v4739_v21, %v2924_v58  ;;  %v4284_v61 = vld [vmem:[%s5999_s0 + $0x1c8] sm:$0xff]  }
  0xf4   :  { %v2544_v6 = vmul.f32 %v4036_v4, %v4700_v55  ;;  %3190 = vadd.xlane.f32.xlu1 %v3059_v62  ;;  %v663_v7 = vpop.f32.mrf.mxu0  ;;  %3990 = vmatprep.mubr.bf16.mxu0 %v4278_v50  ;;  %v2929_v8 = vmax.f32 %v2801_v63, 0.0  ;;  %v2799_v9 = vadd.f32 %v4717_v3, %v2666_v51  ;;  %v4285_v4 = vld [vmem:[%s6000_s1 + $0x1c8] sm:$0xff]  }
  0xf5   :  { %v2667_v10 = vadd.f32 %v2539_v60, %v2406_v1  ;;  %v2411_v11 = vadd.f32 %v4705_v57, %v2278_v2  ;;  %v2276_v12 = vmul.f32 %v4692_v53, %v663_v7  ;;  %v1784_v13 = vpop.f32.mrf.mxu1  ;;  %4134 = vmatprep.mubr.bf16.mxu1 %v4279_v59  ;;  %v2802_v14 = vadd.f32 %v4717_v3, %v2669_v0 }
  0xf6   :  { %v2542_v15 = vmul.f32 %v4700_v55, %v1784_v13  ;;  %3186 = vadd.xlane.f32.xlu0 %v3057_v5  ;;  %v3893_v16 = vpop.f32.mrf.mxu0  ;;  %v2927_v18 = vmax.f32 %v2799_v9, 0.0  ;;  %v3062_v28 = vmul.f32 %v4739_v21, %v2929_v8 }
  0xf7   :  { %v2672_v19 = vadd.f32 %v2544_v6, %v2411_v11  ;;  %v2409_v20 = vadd.f32 %v4705_v57, %v2276_v12  ;;  %v2279_v22 = vmul.f32 %v3893_v16, %v4692_v53  ;;  %v4037_v23 = vpop.f32.mrf.mxu1  ;;  %v2930_v25 = vmax.f32 %v2802_v14, 0.0  ;;  %v4287_v11 = vld [vmem:[%s6000_s1 + $0x1d0] sm:$0xff]  }
  0xf8   :  { %v2545_v26 = vmul.f32 %v4037_v23, %v4700_v55  ;;  %v666_v27 = vpop.f32.mrf.mxu0  ;;  %v2800_v29 = vadd.f32 %v4717_v3, %v2667_v10  ;;  %v3060_v39 = vmul.f32 %v4739_v21, %v2927_v18  ;;  %v4286_v10 = vld [vmem:[%s5999_s0 + $0x1d0] sm:$0xff]  }
  0xf9   :  { %v2670_v32 = vadd.f32 %v2542_v15, %v2409_v20  ;;  %v2412_v33 = vadd.f32 %v4705_v57, %v2279_v22  ;;  %v2277_v34 = vmul.f32 %v4692_v53, %v666_v27  ;;  %v1787_v35 = vpop.f32.mrf.mxu1  ;;  %v3063_v36 = vmul.f32 %v4739_v21, %v2930_v25 }
  0xfa   :  { %v2543_v37 = vmul.f32 %v4700_v55, %v1787_v35  ;;  %3196 = vadd.xlane.f32.xlu0 %v3062_v28  ;;  %v3896_v38 = vpop.f32.mrf.mxu0  ;;  %3991 = vmatmul.mubr.bf16.gmra.mxu0 %v4280_v17  ;;  %v2928_v40 = vmax.f32 %v2800_v29, 0.0  ;;  %v2805_v41 = vadd.f32 %v4717_v3, %v2672_v19 }
  0xfb   :  { %v2673_v42 = vadd.f32 %v2545_v26, %v2412_v33  ;;  %v2410_v43 = vadd.f32 %v4705_v57, %v2277_v34  ;;  %v2282_v44 = vmul.f32 %v3896_v38, %v4692_v53  ;;  %v4040_v45 = vpop.f32.mrf.mxu1  ;;  %4135 = vmatmul.mubr.bf16.gmra.mxu1 %v4281_v24  ;;  %3198 = vadd.xlane.f32.xlu1 %v3063_v36 }
  0xfc   :  { %v2548_v46 = vmul.f32 %v4040_v45, %v4700_v55  ;;  %v679_v47 = vpop.f32.mrf.mxu0  ;;  %v3061_v48 = vmul.f32 %v4739_v21, %v2928_v40  ;;  %3994 = vmatprep.mubr.bf16.mxu0 %v4282_v30  ;;  %4138 = vmatprep.mubr.bf16.mxu1 %v4283_v31  ;;  %v2933_v49 = vmax.f32 %v2805_v41, 0.0  ;;  %v2803_v50 = vadd.f32 %v4717_v3, %v2670_v32  ;;  %v4289_v45 = vld [vmem:[%s6000_s1 + $0x1d8] sm:$0xff]  }
  0xfd   :  { %v2671_v51 = vadd.f32 %v2543_v37, %v2410_v43  ;;  %v2415_v52 = vadd.f32 %v4705_v57, %v2282_v44  ;;  %v2280_v54 = vmul.f32 %v4692_v53, %v679_v47  ;;  %v1800_v56 = vpop.f32.mrf.mxu1  ;;  %v2806_v58 = vadd.f32 %v4717_v3, %v2673_v42 }
  0xfe   :  { %v2546_v59 = vmul.f32 %v4700_v55, %v1800_v56  ;;  %3192 = vadd.xlane.f32.xlu0 %v3060_v39  ;;  %v3897_v60 = vpop.f32.mrf.mxu0  ;;  %v2931_v62 = vmax.f32 %v2803_v50, 0.0  ;;  %v3066_v8 = vmul.f32 %v4739_v21, %v2933_v49  ;;  %v4288_v39 = vld [vmem:[%s5999_s0 + $0x1d8] sm:$0xff]  }
  0xff   :  { %v2676_v63 = vadd.f32 %v2548_v46, %v2415_v52  ;;  %v2413_v0 = vadd.f32 %v4705_v57, %v2280_v54  ;;  %v2283_v1 = vmul.f32 %v3897_v60, %v4692_v53  ;;  %v4041_v2 = vpop.f32.mrf.mxu1  ;;  %3194 = vadd.xlane.f32.xlu1 %v3061_v48  ;;  %v2934_v5 = vmax.f32 %v2806_v58, 0.0  ;;  %v4291_v52 = vld [vmem:[%s6000_s1 + $0x1e0] sm:$0xff]  }
 0x100   :  { %v2549_v6 = vmul.f32 %v4041_v2, %v4700_v55  ;;  %v682_v7 = vpop.f32.mrf.mxu0  ;;  %v2804_v9 = vadd.f32 %v4717_v3, %v2671_v51  ;;  %v3064_v19 = vmul.f32 %v4739_v21, %v2931_v62  ;;  %v4290_v51 = vld [vmem:[%s5999_s0 + $0x1e0] sm:$0xff]  }
 0x101   :  { %v2674_v12 = vadd.f32 %v2546_v59, %v2413_v0  ;;  %v2416_v13 = vadd.f32 %v4705_v57, %v2283_v1  ;;  %v2281_v14 = vmul.f32 %v4692_v53, %v682_v7  ;;  %v1803_v15 = vpop.f32.mrf.mxu1  ;;  %v3067_v16 = vmul.f32 %v4739_v21, %v2934_v5 }
 0x102   :  { %v2547_v17 = vmul.f32 %v4700_v55, %v1803_v15  ;;  %3204 = vadd.xlane.f32.xlu0 %v3066_v8  ;;  %v3900_v18 = vpop.f32.mrf.mxu0  ;;  %3995 = vmatmul.mubr.bf16.gmra.mxu0 %v4284_v61  ;;  %v2932_v20 = vmax.f32 %v2804_v9, 0.0  ;;  %v2809_v22 = vadd.f32 %v4717_v3, %v2676_v63 }
 0x103   :  { %v2677_v23 = vadd.f32 %v2549_v6, %v2416_v13  ;;  %v2414_v24 = vadd.f32 %v4705_v57, %v2281_v14  ;;  %v2286_v25 = vmul.f32 %v3900_v18, %v4692_v53  ;;  %v4044_v26 = vpop.f32.mrf.mxu1  ;;  %4139 = vmatmul.mubr.bf16.gmra.mxu1 %v4285_v4  ;;  %3206 = vadd.xlane.f32.xlu1 %v3067_v16 }
 0x104   :  { %v2552_v27 = vmul.f32 %v4044_v26, %v4700_v55  ;;  %v695_v28 = vpop.f32.mrf.mxu0  ;;  %v3065_v29 = vmul.f32 %v4739_v21, %v2932_v20  ;;  %3998 = vmatprep.mubr.bf16.mxu0 %v4286_v10  ;;  %4142 = vmatprep.mubr.bf16.mxu1 %v4287_v11  ;;  %v2937_v30 = vmax.f32 %v2809_v22, 0.0  ;;  %v2807_v31 = vadd.f32 %v4717_v3, %v2674_v12  ;;  %v4293_v26 = vld [vmem:[%s6000_s1 + $0x1e8] sm:$0xff]  }
 0x105   :  { %v2675_v32 = vadd.f32 %v2547_v17, %v2414_v24  ;;  %v2419_v33 = vadd.f32 %v4705_v57, %v2286_v25  ;;  %v2284_v34 = vmul.f32 %v4692_v53, %v695_v28  ;;  %v1816_v35 = vpop.f32.mrf.mxu1  ;;  %v2810_v36 = vadd.f32 %v4717_v3, %v2677_v23 }
 0x106   :  { %v2550_v37 = vmul.f32 %v4700_v55, %v1816_v35  ;;  %3200 = vadd.xlane.f32.xlu0 %v3064_v19  ;;  %v3901_v38 = vpop.f32.mrf.mxu0  ;;  %v2935_v40 = vmax.f32 %v2807_v31, 0.0  ;;  %v3070_v49 = vmul.f32 %v4739_v21, %v2937_v30  ;;  %v4292_v19 = vld [vmem:[%s5999_s0 + $0x1e8] sm:$0xff]  }
 0x107   :  { %v2680_v41 = vadd.f32 %v2552_v27, %v2419_v33  ;;  %v2417_v42 = vadd.f32 %v4705_v57, %v2284_v34  ;;  %v2287_v43 = vmul.f32 %v3901_v38, %v4692_v53  ;;  %v4045_v44 = vpop.f32.mrf.mxu1  ;;  %3202 = vadd.xlane.f32.xlu1 %v3065_v29  ;;  %v2938_v46 = vmax.f32 %v2810_v36, 0.0  ;;  %v4295_v33 = vld [vmem:[%s6000_s1 + $0x1f0] sm:$0xff]  }
 0x108   :  { %v2553_v47 = vmul.f32 %v4045_v44, %v4700_v55  ;;  %v698_v48 = vpop.f32.mrf.mxu0  ;;  %v2808_v50 = vadd.f32 %v4717_v3, %v2675_v32  ;;  %v3068_v63 = vmul.f32 %v4739_v21, %v2935_v40  ;;  %v4294_v32 = vld [vmem:[%s5999_s0 + $0x1f0] sm:$0xff]  }
 0x109   :  { %v2678_v54 = vadd.f32 %v2550_v37, %v2417_v42  ;;  %v2420_v56 = vadd.f32 %v4705_v57, %v2287_v43  ;;  %v2285_v58 = vmul.f32 %v4692_v53, %v698_v48  ;;  %v1819_v59 = vpop.f32.mrf.mxu1  ;;  %v3071_v60 = vmul.f32 %v4739_v21, %v2938_v46 }
 0x10a   :  { %v2551_v61 = vmul.f32 %v4700_v55, %v1819_v59  ;;  %3212 = vadd.xlane.f32.xlu0 %v3070_v49  ;;  %v3904_v62 = vpop.f32.mrf.mxu0  ;;  %3999 = vmatmul.mubr.bf16.gmra.mxu0 %v4288_v39  ;;  %v2936_v0 = vmax.f32 %v2808_v50, 0.0  ;;  %v2813_v1 = vadd.f32 %v4717_v3, %v2680_v41 }
 0x10b   :  { %v2681_v2 = vadd.f32 %v2553_v47, %v2420_v56  ;;  %v2418_v4 = vadd.f32 %v4705_v57, %v2285_v58  ;;  %v2290_v5 = vmul.f32 %v3904_v62, %v4692_v53  ;;  %v4048_v6 = vpop.f32.mrf.mxu1  ;;  %4143 = vmatmul.mubr.bf16.gmra.mxu1 %v4289_v45  ;;  %3214 = vadd.xlane.f32.xlu1 %v3071_v60 }
 0x10c   :  { %v2556_v7 = vmul.f32 %v4048_v6, %v4700_v55  ;;  %v711_v8 = vpop.f32.mrf.mxu0  ;;  %v3069_v9 = vmul.f32 %v4739_v21, %v2936_v0  ;;  %4002 = vmatprep.mubr.bf16.mxu0 %v4290_v51  ;;  %4146 = vmatprep.mubr.bf16.mxu1 %v4291_v52  ;;  %v2941_v10 = vmax.f32 %v2813_v1, 0.0  ;;  %v2811_v11 = vadd.f32 %v4717_v3, %v2678_v54  ;;  %v4297_v6 = vld [vmem:[%s6000_s1 + $0x1f8] sm:$0xff]  }
 0x10d   :  { %v2679_v12 = vadd.f32 %v2551_v61, %v2418_v4  ;;  %v2423_v13 = vadd.f32 %v4705_v57, %v2290_v5  ;;  %v2288_v14 = vmul.f32 %v4692_v53, %v711_v8  ;;  %v1832_v15 = vpop.f32.mrf.mxu1  ;;  %v2814_v16 = vadd.f32 %v4717_v3, %v2681_v2 }
 0x10e   :  { %v2554_v17 = vmul.f32 %v4700_v55, %v1832_v15  ;;  %3208 = vadd.xlane.f32.xlu0 %v3068_v63  ;;  %v3905_v18 = vpop.f32.mrf.mxu0  ;;  %v2939_v20 = vmax.f32 %v2811_v11, 0.0  ;;  %v3074_v30 = vmul.f32 %v4739_v21, %v2941_v10  ;;  %v4296_v63 = vld [vmem:[%s5999_s0 + $0x1f8] sm:$0xff]  }
 0x10f   :  { %v2684_v22 = vadd.f32 %v2556_v7, %v2423_v13  ;;  %v2421_v23 = vadd.f32 %v4705_v57, %v2288_v14  ;;  %v2291_v24 = vmul.f32 %v3905_v18, %v4692_v53  ;;  %v4049_v25 = vpop.f32.mrf.mxu1  ;;  %3210 = vadd.xlane.f32.xlu1 %v3069_v9  ;;  %v2942_v27 = vmax.f32 %v2814_v16, 0.0 }
 0x110   :  { %v2557_v28 = vmul.f32 %v4049_v25, %v4700_v55  ;;  %v714_v29 = vpop.f32.mrf.mxu0  ;;  %v2812_v31 = vadd.f32 %v4717_v3, %v2679_v12  ;;  %v3072_v41 = vmul.f32 %v4739_v21, %v2939_v20 }
 0x111   :  { %v2682_v34 = vadd.f32 %v2554_v17, %v2421_v23  ;;  %v2424_v35 = vadd.f32 %v4705_v57, %v2291_v24  ;;  %v2289_v36 = vmul.f32 %v4692_v53, %v714_v29  ;;  %v1835_v37 = vpop.f32.mrf.mxu1  ;;  %v3075_v38 = vmul.f32 %v4739_v21, %v2942_v27 }
 0x112   :  { %v2555_v39 = vmul.f32 %v4700_v55, %v1835_v37  ;;  %3220 = vadd.xlane.f32.xlu0 %v3074_v30  ;;  %v3908_v40 = vpop.f32.mrf.mxu0  ;;  %4003 = vmatmul.mubr.bf16.gmra.mxu0 %v4292_v19  ;;  %v2940_v42 = vmax.f32 %v2812_v31, 0.0  ;;  %v2817_v43 = vadd.f32 %v4717_v3, %v2684_v22 }
 0x113   :  { %v2685_v44 = vadd.f32 %v2557_v28, %v2424_v35  ;;  %v2422_v45 = vadd.f32 %v4705_v57, %v2289_v36  ;;  %v2294_v46 = vmul.f32 %v3908_v40, %v4692_v53  ;;  %v4052_v47 = vpop.f32.mrf.mxu1  ;;  %4147 = vmatmul.mubr.bf16.gmra.mxu1 %v4293_v26  ;;  %3222 = vadd.xlane.f32.xlu1 %v3075_v38 }
 0x114   :  { %v2560_v48 = vmul.f32 %v4052_v47, %v4700_v55  ;;  %v727_v49 = vpop.f32.mrf.mxu0  ;;  %v3073_v50 = vmul.f32 %v4739_v21, %v2940_v42  ;;  %4006 = vmatprep.mubr.bf16.mxu0 %v4294_v32  ;;  %4150 = vmatprep.mubr.bf16.mxu1 %v4295_v33  ;;  %v2945_v51 = vmax.f32 %v2817_v43, 0.0  ;;  %v2815_v52 = vadd.f32 %v4717_v3, %v2682_v34 }
 0x115   :  { %v2683_v54 = vadd.f32 %v2555_v39, %v2422_v45  ;;  %v2427_v56 = vadd.f32 %v4705_v57, %v2294_v46  ;;  %v2292_v58 = vmul.f32 %v4692_v53, %v727_v49  ;;  %v1848_v59 = vpop.f32.mrf.mxu1  ;;  %v2818_v60 = vadd.f32 %v4717_v3, %v2685_v44 }
 0x116   :  { %v2558_v61 = vmul.f32 %v4700_v55, %v1848_v59  ;;  %3216 = vadd.xlane.f32.xlu0 %v3072_v41  ;;  %v3909_v62 = vpop.f32.mrf.mxu0  ;;  %v2943_v0 = vmax.f32 %v2815_v52, 0.0  ;;  %v3078_v10 = vmul.f32 %v4739_v21, %v2945_v51 }
 0x117   :  { %v2688_v1 = vadd.f32 %v2560_v48, %v2427_v56  ;;  %v2425_v2 = vadd.f32 %v4705_v57, %v2292_v58  ;;  %v2295_v4 = vmul.f32 %v3909_v62, %v4692_v53  ;;  %v4053_v5 = vpop.f32.mrf.mxu1  ;;  %3218 = vadd.xlane.f32.xlu1 %v3073_v50  ;;  %v2946_v7 = vmax.f32 %v2818_v60, 0.0 }
 0x118   :  { %v2561_v8 = vmul.f32 %v4053_v5, %v4700_v55  ;;  %v730_v9 = vpop.f32.mrf.mxu0  ;;  %v2816_v11 = vadd.f32 %v4717_v3, %v2683_v54  ;;  %v3076_v19 = vmul.f32 %v4739_v21, %v2943_v0 }
 0x119   :  { %v2686_v12 = vadd.f32 %v2558_v61, %v2425_v2  ;;  %v2428_v13 = vadd.f32 %v4705_v57, %v2295_v4  ;;  %v2293_v14 = vmul.f32 %v4692_v53, %v730_v9  ;;  %v1851_v15 = vpop.f32.mrf.mxu1  ;;  %v3079_v16 = vmul.f32 %v4739_v21, %v2946_v7 }
 0x11a   :  { %v2559_v17 = vmul.f32 %v4700_v55, %v1851_v15  ;;  %3228 = vadd.xlane.f32.xlu0 %v3078_v10  ;;  %v3912_v18 = vpop.f32.mrf.mxu0  ;;  %4007 = vmatmul.mubr.bf16.gmra.mxu0 %v4296_v63  ;;  %v2944_v20 = vmax.f32 %v2816_v11, 0.0  ;;  %v2821_v22 = vadd.f32 %v4717_v3, %v2688_v1 }
 0x11b   :  { %v2689_v23 = vadd.f32 %v2561_v8, %v2428_v13  ;;  %v2426_v24 = vadd.f32 %v4705_v57, %v2293_v14  ;;  %v2298_v25 = vmul.f32 %v3912_v18, %v4692_v53  ;;  %v4056_v26 = vpop.f32.mrf.mxu1  ;;  %4151 = vmatmul.mubr.bf16.gmra.mxu1 %v4297_v6  ;;  %3230 = vadd.xlane.f32.xlu1 %v3079_v16 }
 0x11c   :  { %v2564_v27 = vmul.f32 %v4056_v26, %v4700_v55  ;;  %v743_v28 = vpop.f32.mrf.mxu0  ;;  %v3077_v29 = vmul.f32 %v4739_v21, %v2944_v20  ;;  %v2949_v30 = vmax.f32 %v2821_v22, 0.0  ;;  %v2819_v31 = vadd.f32 %v4717_v3, %v2686_v12 }
 0x11d   :  { %v2687_v32 = vadd.f32 %v2559_v17, %v2426_v24  ;;  %v2431_v33 = vadd.f32 %v4705_v57, %v2298_v25  ;;  %v2296_v34 = vmul.f32 %v4692_v53, %v743_v28  ;;  %v1864_v35 = vpop.f32.mrf.mxu1  ;;  %v2822_v36 = vadd.f32 %v4717_v3, %v2689_v23 }
 0x11e   :  { %v2562_v37 = vmul.f32 %v4700_v55, %v1864_v35  ;;  %3224 = vadd.xlane.f32.xlu0 %v3076_v19  ;;  %v3913_v38 = vpop.f32.mrf.mxu0  ;;  %v3082_v46 = vmul.f32 %v4739_v21, %v2949_v30  ;;  %v2947_v47 = vmax.f32 %v2819_v31, 0.0 }
 0x11f   :  { %v2692_v39 = vadd.f32 %v2564_v27, %v2431_v33  ;;  %v2429_v40 = vadd.f32 %v4705_v57, %v2296_v34  ;;  %v2299_v41 = vmul.f32 %v3913_v38, %v4692_v53  ;;  %v4057_v42 = vpop.f32.mrf.mxu1  ;;  %3226 = vadd.xlane.f32.xlu1 %v3077_v29  ;;  %v2950_v43 = vmax.f32 %v2822_v36, 0.0 }
 0x120   :  { %v2565_v44 = vmul.f32 %v4057_v42, %v4700_v55  ;;  %v746_v45 = vpop.f32.mrf.mxu0  ;;  %v2820_v48 = vadd.f32 %v4717_v3, %v2687_v32  ;;  %v3080_v5 = vmul.f32 %v4739_v21, %v2947_v47 }
 0x121   :  { %v2690_v49 = vadd.f32 %v2562_v37, %v2429_v40  ;;  %v2432_v50 = vadd.f32 %v4705_v57, %v2299_v41  ;;  %v2297_v51 = vmul.f32 %v4692_v53, %v746_v45  ;;  %v1867_v52 = vpop.f32.mrf.mxu1  ;;  %v3083_v54 = vmul.f32 %v4739_v21, %v2950_v43 }
 0x122   :  { %v2563_v56 = vmul.f32 %v4700_v55, %v1867_v52  ;;  %3236 = vadd.xlane.f32.xlu0 %v3082_v46  ;;  %v3916_v58 = vpop.f32.mrf.mxu0  ;;  %v2948_v59 = vmax.f32 %v2820_v48, 0.0  ;;  %v2825_v60 = vadd.f32 %v4717_v3, %v2692_v39 }
 0x123   :  { %v2693_v61 = vadd.f32 %v2565_v44, %v2432_v50  ;;  %v2430_v62 = vadd.f32 %v4705_v57, %v2297_v51  ;;  %v2302_v63 = vmul.f32 %v3916_v58, %v4692_v53  ;;  %v4060_v0 = vpop.f32.mrf.mxu1  ;;  %3238 = vadd.xlane.f32.xlu1 %v3083_v54  ;;  %v2823_v1 = vadd.f32 %v4717_v3, %v2690_v49 }
 0x124   :  { %v2568_v2 = vmul.f32 %v4060_v0, %v4700_v55  ;;  %v759_v4 = vpop.f32.mrf.mxu0  ;;  %v3081_v6 = vmul.f32 %v4739_v21, %v2948_v59  ;;  %v2953_v7 = vmax.f32 %v2825_v60, 0.0 }
 0x125   :  { %v2691_v8 = vadd.f32 %v2563_v56, %v2430_v62  ;;  %v2435_v9 = vadd.f32 %v4705_v57, %v2302_v63  ;;  %v2300_v10 = vmul.f32 %v4692_v53, %v759_v4  ;;  %v1880_v11 = vpop.f32.mrf.mxu1  ;;  %v2826_v12 = vadd.f32 %v4717_v3, %v2693_v61 }
 0x126   :  { %v2566_v13 = vmul.f32 %v4700_v55, %v1880_v11  ;;  %3232 = vadd.xlane.f32.xlu0 %v3080_v5  ;;  %v3917_v14 = vpop.f32.mrf.mxu0  ;;  %v2951_v15 = vmax.f32 %v2823_v1, 0.0  ;;  %v3086_v24 = vmul.f32 %v4739_v21, %v2953_v7 }
 0x127   :  { %v2696_v16 = vadd.f32 %v2568_v2, %v2435_v9  ;;  %v2433_v17 = vadd.f32 %v4705_v57, %v2300_v10  ;;  %v2303_v18 = vmul.f32 %v3917_v14, %v4692_v53  ;;  %v4061_v19 = vpop.f32.mrf.mxu1  ;;  %3234 = vadd.xlane.f32.xlu1 %v3081_v6  ;;  %v2954_v20 = vmax.f32 %v2826_v12, 0.0 }
 0x128   :  { %v2569_v22 = vmul.f32 %v4061_v19, %v4700_v55  ;;  %v762_v23 = vpop.f32.mrf.mxu0  ;;  %v2824_v25 = vadd.f32 %v4717_v3, %v2691_v8  ;;  %v3084_v32 = vmul.f32 %v4739_v21, %v2951_v15 }
 0x129   :  { %v2694_v26 = vadd.f32 %v2566_v13, %v2433_v17  ;;  %v2436_v27 = vadd.f32 %v4705_v57, %v2303_v18  ;;  %v2301_v28 = vmul.f32 %v4692_v53, %v762_v23  ;;  %v1883_v29 = vpop.f32.mrf.mxu1  ;;  %v3087_v30 = vmul.f32 %v4739_v21, %v2954_v20 }
 0x12a   :  { %3244 = vadd.xlane.f32.xlu0 %v3086_v24  ;;  %v3920_v31 = vpop.f32.mrf.mxu0  ;;  %v2952_v33 = vmax.f32 %v2824_v25, 0.0  ;;  %v2829_v34 = vadd.f32 %v4717_v3, %v2696_v16  ;;  %v2567_v37 = vmul.f32 %v4700_v55, %v1883_v29 }
 0x12b   :  { %v2697_v35 = vadd.f32 %v2569_v22, %v2436_v27  ;;  %v2434_v36 = vadd.f32 %v4705_v57, %v2301_v28  ;;  %v2306_v38 = vmul.f32 %v3920_v31, %v4692_v53  ;;  %v4064_v39 = vpop.f32.mrf.mxu1  ;;  %3246 = vadd.xlane.f32.xlu1 %v3087_v30  ;;  %v2827_v44 = vadd.f32 %v4717_v3, %v2694_v26 }
 0x12c   :  { %v2572_v40 = vmul.f32 %v4064_v39, %v4700_v55  ;;  %v775_v41 = vpop.f32.mrf.mxu0  ;;  %v3085_v42 = vmul.f32 %v4739_v21, %v2952_v33  ;;  %v2957_v43 = vmax.f32 %v2829_v34, 0.0 }
 0x12d   :  { %v2695_v45 = vadd.f32 %v2567_v37, %v2434_v36  ;;  %v2439_v46 = vadd.f32 %v4705_v57, %v2306_v38  ;;  %v2304_v47 = vmul.f32 %v4692_v53, %v775_v41  ;;  %v1896_v48 = vpop.f32.mrf.mxu1  ;;  %v2830_v49 = vadd.f32 %v4717_v3, %v2697_v35 }
 0x12e   :  { %v2570_v50 = vmul.f32 %v4700_v55, %v1896_v48  ;;  %3240 = vadd.xlane.f32.xlu0 %v3084_v32  ;;  %v3921_v51 = vpop.f32.mrf.mxu0  ;;  %v3090_v62 = vmul.f32 %v4739_v21, %v2957_v43  ;;  %v2955_v63 = vmax.f32 %v2827_v44, 0.0 }
 0x12f   :  { %v2700_v52 = vadd.f32 %v2572_v40, %v2439_v46  ;;  %v2437_v54 = vadd.f32 %v4705_v57, %v2304_v47  ;;  %v2307_v56 = vmul.f32 %v3921_v51, %v4692_v53  ;;  %v4065_v58 = vpop.f32.mrf.mxu1  ;;  %3242 = vadd.xlane.f32.xlu1 %v3085_v42  ;;  %v2958_v59 = vmax.f32 %v2830_v49, 0.0 }
 0x130   :  { %v2573_v60 = vmul.f32 %v4065_v58, %v4700_v55  ;;  %v778_v61 = vpop.f32.mrf.mxu0  ;;  %v2828_v0 = vadd.f32 %v4717_v3, %v2695_v45  ;;  %v3088_v18 = vmul.f32 %v4739_v21, %v2955_v63 }
 0x131   :  { %v2698_v1 = vadd.f32 %v2570_v50, %v2437_v54  ;;  %v2440_v2 = vadd.f32 %v4705_v57, %v2307_v56  ;;  %v2305_v4 = vmul.f32 %v4692_v53, %v778_v61  ;;  %v1899_v5 = vpop.f32.mrf.mxu1  ;;  %v3091_v6 = vmul.f32 %v4739_v21, %v2958_v59 }
 0x132   :  { %v2571_v7 = vmul.f32 %v4700_v55, %v1899_v5  ;;  %3252 = vadd.xlane.f32.xlu0 %v3090_v62  ;;  %v3924_v8 = vpop.f32.mrf.mxu0  ;;  %v2956_v9 = vmax.f32 %v2828_v0, 0.0  ;;  %v2833_v10 = vadd.f32 %v4717_v3, %v2700_v52 }
 0x133   :  { %v2701_v11 = vadd.f32 %v2573_v60, %v2440_v2  ;;  %v2438_v12 = vadd.f32 %v4705_v57, %v2305_v4  ;;  %v2310_v13 = vmul.f32 %v3924_v8, %v4692_v53  ;;  %v4068_v14 = vpop.f32.mrf.mxu1  ;;  %3254 = vadd.xlane.f32.xlu1 %v3091_v6  ;;  %v2831_v15 = vadd.f32 %v4717_v3, %v2698_v1 }
 0x134   :  { %v2576_v16 = vmul.f32 %v4068_v14, %v4700_v55  ;;  %v791_v17 = vpop.f32.mrf.mxu0  ;;  %v3089_v19 = vmul.f32 %v4739_v21, %v2956_v9  ;;  %v2961_v20 = vmax.f32 %v2833_v10, 0.0 }
 0x135   :  { %v2699_v22 = vadd.f32 %v2571_v7, %v2438_v12  ;;  %v2443_v23 = vadd.f32 %v4705_v57, %v2310_v13  ;;  %v2308_v24 = vmul.f32 %v4692_v53, %v791_v17  ;;  %v1912_v25 = vpop.f32.mrf.mxu1  ;;  %v2834_v26 = vadd.f32 %v4717_v3, %v2701_v11  ;;  %v5024_v17 = vld [vmem:[%s6001_s4] ss:$0 sm:$0xff] }
 0x136   :  { %v2574_v27 = vmul.f32 %v4700_v55, %v1912_v25  ;;  %3248 = vadd.xlane.f32.xlu0 %v3088_v18  ;;  %v3925_v28 = vpop.f32.mrf.mxu0  ;;  %v2959_v29 = vmax.f32 %v2831_v15, 0.0  ;;  %v3094_v37 = vmul.f32 %v4739_v21, %v2961_v20  ;;  %v5038_v25 = vld [vmem:[%s6001_s4 + $0x1] ss:$0 sm:$0xff] }
 0x137   :  { %v2704_v30 = vadd.f32 %v2576_v16, %v2443_v23  ;;  %v2441_v31 = vadd.f32 %v4705_v57, %v2308_v24  ;;  %v2311_v32 = vmul.f32 %v3925_v28, %v4692_v53  ;;  %v4069_v33 = vpop.f32.mrf.mxu1  ;;  %3250 = vadd.xlane.f32.xlu1 %v3089_v19  ;;  %v2962_v34 = vmax.f32 %v2834_v26, 0.0 }
 0x138   :  { %v2577_v35 = vmul.f32 %v4069_v33, %v4700_v55  ;;  %v794_v36 = vpop.f32.mrf.mxu0  ;;  %v2832_v38 = vadd.f32 %v4717_v3, %v2699_v22  ;;  %v3092_v45 = vmul.f32 %v4739_v21, %v2959_v29 }
 0x139   :  { %v2702_v39 = vadd.f32 %v2574_v27, %v2441_v31  ;;  %v2444_v40 = vadd.f32 %v4705_v57, %v2311_v32  ;;  %v2309_v41 = vmul.f32 %v4692_v53, %v794_v36  ;;  %v1915_v42 = vpop.f32.mrf.mxu1  ;;  %v3095_v43 = vmul.f32 %v4739_v21, %v2962_v34 }
 0x13a   :  { %3260 = vadd.xlane.f32.xlu0 %v3094_v37  ;;  %v3928_v44 = vpop.f32.mrf.mxu0  ;;  %v2960_v46 = vmax.f32 %v2832_v38, 0.0  ;;  %v2837_v47 = vadd.f32 %v4717_v3, %v2704_v30  ;;  %v2575_v50 = vmul.f32 %v4700_v55, %v1915_v42 }
 0x13b   :  { %v2705_v48 = vadd.f32 %v2577_v35, %v2444_v40  ;;  %v2442_v49 = vadd.f32 %v4705_v57, %v2309_v41  ;;  %v2314_v51 = vmul.f32 %v3928_v44, %v4692_v53  ;;  %v4072_v52 = vpop.f32.mrf.mxu1  ;;  %3262 = vadd.xlane.f32.xlu1 %v3095_v43  ;;  %v2835_v60 = vadd.f32 %v4717_v3, %v2702_v39  ;;  %v5051_v39 = vld [vmem:[%s6001_s4 + $0x3] ss:$0 sm:$0xff] }
 0x13c   :  { %v2580_v54 = vmul.f32 %v4072_v52, %v4700_v55  ;;  %v807_v56 = vpop.f32.mrf.mxu0  ;;  %v3093_v58 = vmul.f32 %v4739_v21, %v2960_v46  ;;  %v2965_v59 = vmax.f32 %v2837_v47, 0.0 }
 0x13d   :  { %v2703_v61 = vadd.f32 %v2575_v50, %v2442_v49  ;;  %v2447_v62 = vadd.f32 %v4705_v57, %v2314_v51  ;;  %v2312_v63 = vmul.f32 %v4692_v53, %v807_v56  ;;  %v1928_v0 = vpop.f32.mrf.mxu1  ;;  %v2838_v1 = vadd.f32 %v4717_v3, %v2705_v48 }
 0x13e   :  { %v2578_v2 = vmul.f32 %v4700_v55, %v1928_v0  ;;  %3256 = vadd.xlane.f32.xlu0 %v3092_v45  ;;  %v3929_v4 = vpop.f32.mrf.mxu0  ;;  %v3098_v12 = vmul.f32 %v4739_v21, %v2965_v59  ;;  %v2963_v13 = vmax.f32 %v2835_v60, 0.0  ;;  %v5065_v59 = vld [vmem:[%s6001_s4 + $0x4] ss:$0 sm:$0xff] }
 0x13f   :  { %v2708_v5 = vadd.f32 %v2580_v54, %v2447_v62  ;;  %v2445_v6 = vadd.f32 %v4705_v57, %v2312_v63  ;;  %v2315_v7 = vmul.f32 %v3929_v4, %v4692_v53  ;;  %v4073_v8 = vpop.f32.mrf.mxu1  ;;  %3258 = vadd.xlane.f32.xlu1 %v3093_v58  ;;  %v2966_v9 = vmax.f32 %v2838_v1, 0.0 }
 0x140   :  { %v2581_v10 = vmul.f32 %v4073_v8, %v4700_v55  ;;  %v810_v11 = vpop.f32.mrf.mxu0  ;;  %v2836_v14 = vadd.f32 %v4717_v3, %v2703_v61  ;;  %v5031_v55 = vld [vmem:[%s6001_s4 + $0x2] ss:$0 sm:$0xff]  ;;  %v3096_v32 = vmul.f32 %v4739_v21, %v2963_v13 }
 0x141   :  { %v2706_v15 = vadd.f32 %v2578_v2, %v2445_v6  ;;  %v2448_v16 = vadd.f32 %v4705_v57, %v2315_v7  ;;  %v2313_v53 = vmul.f32 %v5024_v17, %v810_v11  ;;  %v1931_v18 = vpop.f32.mrf.mxu1  ;;  %v3099_v19 = vmul.f32 %v4739_v21, %v2966_v9 }
 0x142   :  { %v2579_v20 = vmul.f32 %v5031_v55, %v1931_v18  ;;  %3268 = vadd.xlane.f32.xlu0 %v3098_v12  ;;  %v3932_v22 = vpop.f32.mrf.mxu0  ;;  %v2964_v57 = vmax.f32 %v2836_v14, 0.0  ;;  %v2841_v23 = vadd.f32 %v4717_v3, %v2708_v5 }
 0x143   :  { %v2709_v24 = vadd.f32 %v2581_v10, %v2448_v16  ;;  %v2446_v26 = vadd.f32 %v5038_v25, %v2313_v53  ;;  %v2318_v27 = vmul.f32 %v5024_v17, %v3932_v22  ;;  %v4076_v28 = vpop.f32.mrf.mxu1  ;;  %3270 = vadd.xlane.f32.xlu1 %v3099_v19  ;;  %v2839_v29 = vadd.f32 %v4717_v3, %v2706_v15 }
 0x144   :  { %v2584_v30 = vmul.f32 %v5031_v55, %v4076_v28  ;;  %v823_v31 = vpop.f32.mrf.mxu0  ;;  %v3097_v33 = vmul.f32 %v4739_v21, %v2964_v57  ;;  %v2969_v34 = vmax.f32 %v2841_v23, 0.0 }
 0x145   :  { %v2707_v35 = vadd.f32 %v2579_v20, %v2446_v26  ;;  %v2451_v36 = vadd.f32 %v5038_v25, %v2318_v27  ;;  %v2316_v37 = vmul.f32 %v5024_v17, %v823_v31  ;;  %v1944_v38 = vpop.f32.mrf.mxu1  ;;  %v2842_v3 = vadd.f32 %v5051_v39, %v2709_v24 }
 0x146   :  { %v2582_v40 = vmul.f32 %v5031_v55, %v1944_v38  ;;  %3264 = vadd.xlane.f32.xlu0 %v3096_v32  ;;  %v3933_v41 = vpop.f32.mrf.mxu0  ;;  %v2967_v42 = vmax.f32 %v2839_v29, 0.0  ;;  %v3102_v50 = vmul.f32 %v4739_v21, %v2969_v34 }
 0x147   :  { %v2712_v43 = vadd.f32 %v2584_v30, %v2451_v36  ;;  %v2449_v44 = vadd.f32 %v5038_v25, %v2316_v37  ;;  %v2319_v45 = vmul.f32 %v5024_v17, %v3933_v41  ;;  %v4077_v46 = vpop.f32.mrf.mxu1  ;;  %3266 = vadd.xlane.f32.xlu1 %v3097_v33  ;;  %v2970_v47 = vmax.f32 %v2842_v3, 0.0 }
 0x148   :  { %v2585_v48 = vmul.f32 %v5031_v55, %v4077_v46  ;;  %v826_v49 = vpop.f32.mrf.mxu0  ;;  %v2840_v51 = vadd.f32 %v5051_v39, %v2707_v35  ;;  %v3100_v62 = vmul.f32 %v5065_v59, %v2967_v42 }
 0x149   :  { %v2710_v52 = vadd.f32 %v2582_v40, %v2449_v44  ;;  %v2452_v54 = vadd.f32 %v5038_v25, %v2319_v45  ;;  %v2317_v56 = vmul.f32 %v5024_v17, %v826_v49  ;;  %v1947_v58 = vpop.f32.mrf.mxu1  ;;  %v3103_v60 = vmul.f32 %v5065_v59, %v2970_v47 }
 0x14a   :  { %3276 = vadd.xlane.f32.xlu0 %v3102_v50  ;;  %v3936_v61 = vpop.f32.mrf.mxu0  ;;  %v2968_v21 = vmax.f32 %v2840_v51, 0.0  ;;  %v2845_v63 = vadd.f32 %v5051_v39, %v2712_v43  ;;  %v2583_v2 = vmul.f32 %v5031_v55, %v1947_v58 }
 0x14b   :  { %v2713_v0 = vadd.f32 %v2585_v48, %v2452_v54  ;;  %v2450_v1 = vadd.f32 %v5038_v25, %v2317_v56  ;;  %v2322_v4 = vmul.f32 %v5024_v17, %v3936_v61  ;;  %v4080_v5 = vpop.f32.mrf.mxu1  ;;  %3278 = vadd.xlane.f32.xlu1 %v3103_v60  ;;  %v2843_v10 = vadd.f32 %v5051_v39, %v2710_v52 }
 0x14c   :  { %v2588_v6 = vmul.f32 %v5031_v55, %v4080_v5  ;;  %v839_v7 = vpop.f32.mrf.mxu0  ;;  %v3101_v8 = vmul.f32 %v5065_v59, %v2968_v21  ;;  %v2973_v9 = vmax.f32 %v2845_v63, 0.0 }
 0x14d   :  { %v2711_v11 = vadd.f32 %v2583_v2, %v2450_v1  ;;  %v2455_v12 = vadd.f32 %v5038_v25, %v2322_v4  ;;  %v2320_v13 = vmul.f32 %v5024_v17, %v839_v7  ;;  %v1960_v14 = vpop.f32.mrf.mxu1  ;;  %v2846_v15 = vadd.f32 %v5051_v39, %v2713_v0 }
 0x14e   :  { %v2586_v16 = vmul.f32 %v5031_v55, %v1960_v14  ;;  %3272 = vadd.xlane.f32.xlu0 %v3100_v62  ;;  %v3937_v53 = vpop.f32.mrf.mxu0  ;;  %v3106_v26 = vmul.f32 %v5065_v59, %v2973_v9  ;;  %v2971_v27 = vmax.f32 %v2843_v10, 0.0 }
 0x14f   :  { %v2716_v18 = vadd.f32 %v2588_v6, %v2455_v12  ;;  %v2453_v19 = vadd.f32 %v5038_v25, %v2320_v13  ;;  %v2323_v20 = vmul.f32 %v5024_v17, %v3937_v53  ;;  %v4081_v22 = vpop.f32.mrf.mxu1  ;;  %3274 = vadd.xlane.f32.xlu1 %v3101_v8  ;;  %v2974_v57 = vmax.f32 %v2846_v15, 0.0 }
 0x150   :  { %v2589_v23 = vmul.f32 %v5031_v55, %v4081_v22  ;;  %v842_v24 = vpop.f32.mrf.mxu0  ;;  %v2844_v28 = vadd.f32 %v5051_v39, %v2711_v11  ;;  %v3104_v45 = vmul.f32 %v5065_v59, %v2971_v27 }
 0x151   :  { %v2714_v29 = vadd.f32 %v2586_v16, %v2453_v19  ;;  %v2456_v30 = vadd.f32 %v5038_v25, %v2323_v20  ;;  %v2321_v31 = vmul.f32 %v5024_v17, %v842_v24  ;;  %v1963_v32 = vpop.f32.mrf.mxu1  ;;  %v3107_v33 = vmul.f32 %v5065_v59, %v2974_v57 }
 0x152   :  { %v2587_v34 = vmul.f32 %v5031_v55, %v1963_v32  ;;  %3284 = vadd.xlane.f32.xlu0 %v3106_v26  ;;  %v3940_v35 = vpop.f32.mrf.mxu0  ;;  %v2972_v36 = vmax.f32 %v2844_v28, 0.0  ;;  %v2849_v37 = vadd.f32 %v5051_v39, %v2716_v18 }
 0x153   :  { %v2717_v38 = vadd.f32 %v2589_v23, %v2456_v30  ;;  %v2454_v3 = vadd.f32 %v5038_v25, %v2321_v31  ;;  %v2326_v40 = vmul.f32 %v5024_v17, %v3940_v35  ;;  %v4084_v41 = vpop.f32.mrf.mxu1  ;;  %3286 = vadd.xlane.f32.xlu1 %v3107_v33  ;;  %v2847_v42 = vadd.f32 %v5051_v39, %v2714_v29 }
 0x154   :  { %v2592_v43 = vmul.f32 %v5031_v55, %v4084_v41  ;;  %v855_v44 = vpop.f32.mrf.mxu0  ;;  %v3105_v46 = vmul.f32 %v5065_v59, %v2972_v36  ;;  %v2977_v47 = vmax.f32 %v2849_v37, 0.0 }
 0x155   :  { %v2715_v48 = vadd.f32 %v2587_v34, %v2454_v3  ;;  %v2459_v49 = vadd.f32 %v5038_v25, %v2326_v40  ;;  %v2324_v50 = vmul.f32 %v5024_v17, %v855_v44  ;;  %v1976_v51 = vpop.f32.mrf.mxu1  ;;  %v2850_v52 = vadd.f32 %v5051_v39, %v2717_v38 }
 0x156   :  { %v2590_v54 = vmul.f32 %v5031_v55, %v1976_v51  ;;  %3280 = vadd.xlane.f32.xlu0 %v3104_v45  ;;  %v3941_v56 = vpop.f32.mrf.mxu0  ;;  %v2975_v58 = vmax.f32 %v2847_v42, 0.0  ;;  %v3110_v2 = vmul.f32 %v5065_v59, %v2977_v47 }
 0x157   :  { %v2720_v60 = vadd.f32 %v2592_v43, %v2459_v49  ;;  %v2457_v61 = vadd.f32 %v5038_v25, %v2324_v50  ;;  %v2327_v62 = vmul.f32 %v5024_v17, %v3941_v56  ;;  %v4085_v21 = vpop.f32.mrf.mxu1  ;;  %3282 = vadd.xlane.f32.xlu1 %v3105_v46  ;;  %v2978_v63 = vmax.f32 %v2850_v52, 0.0 }
 0x158   :  { %v2593_v0 = vmul.f32 %v5031_v55, %v4085_v21  ;;  %v858_v1 = vpop.f32.mrf.mxu0  ;;  %v2848_v4 = vadd.f32 %v5051_v39, %v2715_v48  ;;  %v3108_v11 = vmul.f32 %v5065_v59, %v2975_v58 }
 0x159   :  { %v2718_v5 = vadd.f32 %v2590_v54, %v2457_v61  ;;  %v2460_v6 = vadd.f32 %v5038_v25, %v2327_v62  ;;  %v2325_v7 = vmul.f32 %v5024_v17, %v858_v1  ;;  %v1979_v8 = vpop.f32.mrf.mxu1  ;;  %v3111_v9 = vmul.f32 %v5065_v59, %v2978_v63 }
 0x15a   :  { %3292 = vadd.xlane.f32.xlu0 %v3110_v2  ;;  %v3944_v10 = vpop.f32.mrf.mxu0  ;;  %v2976_v12 = vmax.f32 %v2848_v4, 0.0  ;;  %v2853_v13 = vadd.f32 %v5051_v39, %v2720_v60  ;;  %v2591_v16 = vmul.f32 %v5031_v55, %v1979_v8 }
 0x15b   :  { %v2721_v14 = vadd.f32 %v2593_v0, %v2460_v6  ;;  %v2458_v15 = vadd.f32 %v5038_v25, %v2325_v7  ;;  %v2330_v53 = vmul.f32 %v5024_v17, %v3944_v10  ;;  %v4088_v18 = vpop.f32.mrf.mxu1  ;;  %3294 = vadd.xlane.f32.xlu1 %v3111_v9  ;;  %v2851_v23 = vadd.f32 %v5051_v39, %v2718_v5 }
 0x15c   :  { %v2596_v19 = vmul.f32 %v5031_v55, %v4088_v18  ;;  %v871_v20 = vpop.f32.mrf.mxu0  ;;  %v3109_v22 = vmul.f32 %v5065_v59, %v2976_v12  ;;  %v2981_v57 = vmax.f32 %v2853_v13, 0.0 }
 0x15d   :  { %v2719_v24 = vadd.f32 %v2591_v16, %v2458_v15  ;;  %v2463_v26 = vadd.f32 %v5038_v25, %v2330_v53  ;;  %v2328_v27 = vmul.f32 %v5024_v17, %v871_v20  ;;  %v1992_v28 = vpop.f32.mrf.mxu1  ;;  %v2854_v29 = vadd.f32 %v5051_v39, %v2721_v14 }
 0x15e   :  { %v2594_v30 = vmul.f32 %v5031_v55, %v1992_v28  ;;  %3288 = vadd.xlane.f32.xlu0 %v3108_v11  ;;  %v3945_v31 = vpop.f32.mrf.mxu0  ;;  %v3114_v3 = vmul.f32 %v5065_v59, %v2981_v57  ;;  %v2979_v40 = vmax.f32 %v2851_v23, 0.0 }
 0x15f   :  { %v2724_v32 = vadd.f32 %v2596_v19, %v2463_v26  ;;  %v2461_v33 = vadd.f32 %v5038_v25, %v2328_v27  ;;  %v2331_v34 = vmul.f32 %v5024_v17, %v3945_v31  ;;  %v4089_v35 = vpop.f32.mrf.mxu1  ;;  %3290 = vadd.xlane.f32.xlu1 %v3109_v22  ;;  %v2982_v36 = vmax.f32 %v2854_v29, 0.0 }
 0x160   :  { %v2597_v37 = vmul.f32 %v5031_v55, %v4089_v35  ;;  %v874_v38 = vpop.f32.mrf.mxu0  ;;  %v2852_v41 = vadd.f32 %v5051_v39, %v2719_v24  ;;  %v3112_v62 = vmul.f32 %v5065_v59, %v2979_v40 }
 0x161   :  { %v2722_v42 = vadd.f32 %v2594_v30, %v2461_v33  ;;  %v2464_v43 = vadd.f32 %v5038_v25, %v2331_v34  ;;  %v2329_v44 = vmul.f32 %v5024_v17, %v874_v38  ;;  %v1995_v45 = vpop.f32.mrf.mxu1  ;;  %v3115_v46 = vmul.f32 %v5065_v59, %v2982_v36 }
 0x162   :  { %v2595_v47 = vmul.f32 %v5031_v55, %v1995_v45  ;;  %3300 = vadd.xlane.f32.xlu0 %v3114_v3  ;;  %v3948_v48 = vpop.f32.mrf.mxu0  ;;  %v2980_v49 = vmax.f32 %v2852_v41, 0.0  ;;  %v2857_v50 = vadd.f32 %v5051_v39, %v2724_v32 }
 0x163   :  { %v2725_v51 = vadd.f32 %v2597_v37, %v2464_v43  ;;  %v2462_v52 = vadd.f32 %v5038_v25, %v2329_v44  ;;  %v2334_v54 = vmul.f32 %v5024_v17, %v3948_v48  ;;  %v4092_v56 = vpop.f32.mrf.mxu1  ;;  %3302 = vadd.xlane.f32.xlu1 %v3115_v46  ;;  %v2855_v58 = vadd.f32 %v5051_v39, %v2722_v42 }
 0x164   :  { %v2600_v60 = vmul.f32 %v5031_v55, %v4092_v56  ;;  %v887_v61 = vpop.f32.mrf.mxu0  ;;  %v3113_v21 = vmul.f32 %v5065_v59, %v2980_v49  ;;  %v2985_v63 = vmax.f32 %v2857_v50, 0.0 }
 0x165   :  { %v2723_v0 = vadd.f32 %v2595_v47, %v2462_v52  ;;  %v2467_v1 = vadd.f32 %v5038_v25, %v2334_v54  ;;  %v2332_v2 = vmul.f32 %v5024_v17, %v887_v61  ;;  %v2008_v4 = vpop.f32.mrf.mxu1  ;;  %v2858_v5 = vadd.f32 %v5051_v39, %v2725_v51 }
 0x166   :  { %v2598_v6 = vmul.f32 %v5031_v55, %v2008_v4  ;;  %3296 = vadd.xlane.f32.xlu0 %v3112_v62  ;;  %v3949_v7 = vpop.f32.mrf.mxu0  ;;  %v2983_v8 = vmax.f32 %v2855_v58, 0.0  ;;  %v3118_v16 = vmul.f32 %v5065_v59, %v2985_v63 }
 0x167   :  { %v2728_v9 = vadd.f32 %v2600_v60, %v2467_v1  ;;  %v2465_v10 = vadd.f32 %v5038_v25, %v2332_v2  ;;  %v2335_v11 = vmul.f32 %v5024_v17, %v3949_v7  ;;  %v4093_v12 = vpop.f32.mrf.mxu1  ;;  %3298 = vadd.xlane.f32.xlu1 %v3113_v21  ;;  %v2986_v13 = vmax.f32 %v2858_v5, 0.0 }
 0x168   :  { %v2601_v14 = vmul.f32 %v5031_v55, %v4093_v12  ;;  %v890_v15 = vpop.f32.mrf.mxu0  ;;  %v2856_v53 = vadd.f32 %v5051_v39, %v2723_v0  ;;  %v3116_v24 = vmul.f32 %v5065_v59, %v2983_v8 }
 0x169   :  { %v2726_v18 = vadd.f32 %v2598_v6, %v2465_v10  ;;  %v2468_v19 = vadd.f32 %v5038_v25, %v2335_v11  ;;  %v2333_v20 = vmul.f32 %v5024_v17, %v890_v15  ;;  %v2011_v22 = vpop.f32.mrf.mxu1  ;;  %v3119_v57 = vmul.f32 %v5065_v59, %v2986_v13 }
 0x16a   :  { %3308 = vadd.xlane.f32.xlu0 %v3118_v16  ;;  %v3952_v23 = vpop.f32.mrf.mxu0  ;;  %v2984_v26 = vmax.f32 %v2856_v53, 0.0  ;;  %v2861_v27 = vadd.f32 %v5051_v39, %v2728_v9  ;;  %v2599_v30 = vmul.f32 %v5031_v55, %v2011_v22 }
 0x16b   :  { %v2729_v28 = vadd.f32 %v2601_v14, %v2468_v19  ;;  %v2466_v29 = vadd.f32 %v5038_v25, %v2333_v20  ;;  %v2338_v31 = vmul.f32 %v5024_v17, %v3952_v23  ;;  %v4096_v32 = vpop.f32.mrf.mxu1  ;;  %3310 = vadd.xlane.f32.xlu1 %v3119_v57  ;;  %v2859_v37 = vadd.f32 %v5051_v39, %v2726_v18 }
 0x16c   :  { %v2604_v33 = vmul.f32 %v5031_v55, %v4096_v32  ;;  %v903_v34 = vpop.f32.mrf.mxu0  ;;  %v3117_v35 = vmul.f32 %v5065_v59, %v2984_v26  ;;  %v2989_v36 = vmax.f32 %v2861_v27, 0.0 }
 0x16d   :  { %v2727_v38 = vadd.f32 %v2599_v30, %v2466_v29  ;;  %v2471_v3 = vadd.f32 %v5038_v25, %v2338_v31  ;;  %v2336_v40 = vmul.f32 %v5024_v17, %v903_v34  ;;  %v2024_v41 = vpop.f32.mrf.mxu1  ;;  %v2862_v42 = vadd.f32 %v5051_v39, %v2729_v28 }
 0x16e   :  { %v2602_v43 = vmul.f32 %v5031_v55, %v2024_v41  ;;  %3304 = vadd.xlane.f32.xlu0 %v3116_v24  ;;  %v3953_v44 = vpop.f32.mrf.mxu0  ;;  %v3122_v52 = vmul.f32 %v5065_v59, %v2989_v36  ;;  %v2987_v54 = vmax.f32 %v2859_v37, 0.0 }
 0x16f   :  { %v2732_v45 = vadd.f32 %v2604_v33, %v2471_v3  ;;  %v2469_v46 = vadd.f32 %v5038_v25, %v2336_v40  ;;  %v2339_v47 = vmul.f32 %v5024_v17, %v3953_v44  ;;  %v4097_v48 = vpop.f32.mrf.mxu1  ;;  %3306 = vadd.xlane.f32.xlu1 %v3117_v35  ;;  %v2990_v49 = vmax.f32 %v2862_v42, 0.0 }
 0x170   :  { %v2605_v50 = vmul.f32 %v5031_v55, %v4097_v48  ;;  %v906_v51 = vpop.f32.mrf.mxu0  ;;  %v2860_v56 = vadd.f32 %v5051_v39, %v2727_v38  ;;  %v3120_v11 = vmul.f32 %v5065_v59, %v2987_v54 }
 0x171   :  { %v2730_v58 = vadd.f32 %v2602_v43, %v2469_v46  ;;  %v2472_v60 = vadd.f32 %v5038_v25, %v2339_v47  ;;  %v2337_v61 = vmul.f32 %v5024_v17, %v906_v51  ;;  %v2027_v62 = vpop.f32.mrf.mxu1  ;;  %v3123_v21 = vmul.f32 %v5065_v59, %v2990_v49 }
 0x172   :  { %v2603_v63 = vmul.f32 %v5031_v55, %v2027_v62  ;;  %3316 = vadd.xlane.f32.xlu0 %v3122_v52  ;;  %v3956_v0 = vpop.f32.mrf.mxu0  ;;  %v2988_v1 = vmax.f32 %v2860_v56, 0.0  ;;  %v2865_v2 = vadd.f32 %v5051_v39, %v2732_v45 }
 0x173   :  { %v2733_v4 = vadd.f32 %v2605_v50, %v2472_v60  ;;  %v2470_v5 = vadd.f32 %v5038_v25, %v2337_v61  ;;  %v2342_v6 = vmul.f32 %v5024_v17, %v3956_v0  ;;  %v4100_v7 = vpop.f32.mrf.mxu1  ;;  %3318 = vadd.xlane.f32.xlu1 %v3123_v21  ;;  %v2863_v8 = vadd.f32 %v5051_v39, %v2730_v58 }
 0x174   :  { %v2608_v9 = vmul.f32 %v5031_v55, %v4100_v7  ;;  %v919_v10 = vpop.f32.mrf.mxu0  ;;  %v3121_v12 = vmul.f32 %v5065_v59, %v2988_v1  ;;  %v2993_v13 = vmax.f32 %v2865_v2, 0.0 }
 0x175   :  { %v2731_v14 = vadd.f32 %v2603_v63, %v2470_v5  ;;  %v2475_v15 = vadd.f32 %v5038_v25, %v2342_v6  ;;  %v2340_v16 = vmul.f32 %v5024_v17, %v919_v10  ;;  %v2040_v53 = vpop.f32.mrf.mxu1  ;;  %v2866_v18 = vadd.f32 %v5051_v39, %v2733_v4 }
 0x176   :  { %v2606_v19 = vmul.f32 %v5031_v55, %v2040_v53  ;;  %3312 = vadd.xlane.f32.xlu0 %v3120_v11  ;;  %v3957_v20 = vpop.f32.mrf.mxu0  ;;  %v2991_v22 = vmax.f32 %v2863_v8, 0.0  ;;  %v3126_v31 = vmul.f32 %v5065_v59, %v2993_v13 }
 0x177   :  { %v2736_v57 = vadd.f32 %v2608_v9, %v2475_v15  ;;  %v2473_v23 = vadd.f32 %v5038_v25, %v2340_v16  ;;  %v2343_v24 = vmul.f32 %v5024_v17, %v3957_v20  ;;  %v4101_v26 = vpop.f32.mrf.mxu1  ;;  %3314 = vadd.xlane.f32.xlu1 %v3121_v12  ;;  %v2994_v27 = vmax.f32 %v2866_v18, 0.0 }
 0x178   :  { %v2609_v28 = vmul.f32 %v5031_v55, %v4101_v26  ;;  %v3189_v29 = vpop.xlane.xlu1 %3188  ;;  %v922_v30 = vpop.f32.mrf.mxu0  ;;  %v2864_v32 = vadd.f32 %v5051_v39, %v2731_v14  ;;  %v3124_v3 = vmul.f32 %v5065_v59, %v2991_v22 }
 0x179   :  { %v2734_v33 = vadd.f32 %v2606_v19, %v2473_v23  ;;  %v2476_v34 = vadd.f32 %v5038_v25, %v2343_v24  ;;  %v2043_v35 = vpop.f32.mrf.mxu1  ;;  %3443 = vst.msk [vmem:[%s6002_s5 + $0x10] sm:$0xff] %vm3440_vm0, %v3189_v29  ;;  %v2341_v36 = vmul.f32 %v5024_v17, %v922_v30  ;;  %v3127_v37 = vmul.f32 %v5065_v59, %v2994_v27 }
 0x17a   :  { %3324 = vadd.xlane.f32.xlu0 %v3126_v31  ;;  %v3960_v38 = vpop.f32.mrf.mxu0  ;;  %v2992_v40 = vmax.f32 %v2864_v32, 0.0  ;;  %v2869_v41 = vadd.f32 %v5051_v39, %v2736_v57  ;;  %v2607_v43 = vmul.f32 %v5031_v55, %v2043_v35 }
 0x17b   :  { %v2737_v42 = vadd.f32 %v2609_v28, %v2476_v34  ;;  %v2474_v44 = vadd.f32 %v5038_v25, %v2341_v36  ;;  %v4104_v45 = vpop.f32.mrf.mxu1  ;;  %v3185_v46 = vpop.xlane.xlu0 %3184  ;;  %v2346_v47 = vmul.f32 %v5024_v17, %v3960_v38  ;;  %3326 = vadd.xlane.f32.xlu1 %v3127_v37  ;;  %v2867_v52 = vadd.f32 %v5051_v39, %v2734_v33 }
 0x17c   :  { %v2612_v48 = vmul.f32 %v5031_v55, %v4104_v45  ;;  %3441 = vst.msk [vmem:[%s6002_s5] sm:$0xff] %vm3440_vm0, %v3185_v46  ;;  %v935_v49 = vpop.f32.mrf.mxu0  ;;  %v3125_v50 = vmul.f32 %v5065_v59, %v2992_v40  ;;  %v2997_v51 = vmax.f32 %v2869_v41, 0.0 }
 0x17d   :  { %v2735_v54 = vadd.f32 %v2607_v43, %v2474_v44  ;;  %v2479_v56 = vadd.f32 %v5038_v25, %v2346_v47  ;;  %v2056_v58 = vpop.f32.mrf.mxu1  ;;  %v3191_v60 = vpop.xlane.xlu1 %3190  ;;  %v2344_v61 = vmul.f32 %v5024_v17, %v935_v49  ;;  %v2870_v62 = vadd.f32 %v5051_v39, %v2737_v42 }
 0x17e   :  { %v2610_v21 = vmul.f32 %v5031_v55, %v2056_v58  ;;  %3444 = vst.msk [vmem:[%s6002_s5 + $0x18] sm:$0xff] %vm3440_vm0, %v3191_v60  ;;  %3320 = vadd.xlane.f32.xlu0 %v3124_v3  ;;  %v3961_v63 = vpop.f32.mrf.mxu0  ;;  %v3130_v9 = vmul.f32 %v5065_v59, %v2997_v51  ;;  %v2995_v10 = vmax.f32 %v2867_v52, 0.0 }
 0x17f   :  { %v2740_v0 = vadd.f32 %v2612_v48, %v2479_v56  ;;  %v2477_v1 = vadd.f32 %v5038_v25, %v2344_v61  ;;  %v4105_v2 = vpop.f32.mrf.mxu1  ;;  %v3187_v4 = vpop.xlane.xlu0 %3186  ;;  %v2347_v5 = vmul.f32 %v5024_v17, %v3961_v63  ;;  %3322 = vadd.xlane.f32.xlu1 %v3125_v50  ;;  %v2998_v6 = vmax.f32 %v2870_v62, 0.0 }
 0x180   :  { %v2613_v7 = vmul.f32 %v5031_v55, %v4105_v2  ;;  %3442 = vst.msk [vmem:[%s6002_s5 + $0x8] sm:$0xff] %vm3440_vm0, %v3187_v4  ;;  %v938_v8 = vpop.f32.mrf.mxu0  ;;  %v2868_v11 = vadd.f32 %v5051_v39, %v2735_v54  ;;  %v3128_v31 = vmul.f32 %v5065_v59, %v2995_v10 }
 0x181   :  { %v2738_v12 = vadd.f32 %v2610_v21, %v2477_v1  ;;  %v2480_v13 = vadd.f32 %v5038_v25, %v2347_v5  ;;  %v2345_v14 = vmul.f32 %v5024_v17, %v938_v8  ;;  %v2059_v15 = vpop.f32.mrf.mxu1  ;;  %v3131_v16 = vmul.f32 %v5065_v59, %v2998_v6 }
 0x182   :  { %v2611_v53 = vmul.f32 %v5031_v55, %v2059_v15  ;;  %3332 = vadd.xlane.f32.xlu0 %v3130_v9  ;;  %v3964_v18 = vpop.f32.mrf.mxu0  ;;  %v2996_v19 = vmax.f32 %v2868_v11, 0.0  ;;  %v2873_v20 = vadd.f32 %v5051_v39, %v2740_v0 }
 0x183   :  { %v2741_v22 = vadd.f32 %v2613_v7, %v2480_v13  ;;  %v2478_v57 = vadd.f32 %v5038_v25, %v2345_v14  ;;  %v4108_v23 = vpop.f32.mrf.mxu1  ;;  %v3197_v24 = vpop.xlane.xlu0 %3196  ;;  %v2350_v26 = vmul.f32 %v5024_v17, %v3964_v18  ;;  %3334 = vadd.xlane.f32.xlu1 %v3131_v16  ;;  %v2871_v27 = vadd.f32 %v5051_v39, %v2738_v12 }
 0x184   :  { %v2616_v28 = vmul.f32 %v5031_v55, %v4108_v23  ;;  %3447 = vst.msk [vmem:[%s6002_s5 + $0x30] sm:$0xff] %vm3440_vm0, %v3197_v24  ;;  %v3199_v29 = vpop.xlane.xlu1 %3198  ;;  %v951_v30 = vpop.f32.mrf.mxu0  ;;  %v3129_v32 = vmul.f32 %v5065_v59, %v2996_v19  ;;  %v3001_v33 = vmax.f32 %v2873_v20, 0.0 }
 0x185   :  { %v2739_v34 = vadd.f32 %v2611_v53, %v2478_v57  ;;  %v2483_v35 = vadd.f32 %v5038_v25, %v2350_v26  ;;  %v2072_v36 = vpop.f32.mrf.mxu1  ;;  %3448 = vst.msk [vmem:[%s6002_s5 + $0x38] sm:$0xff] %vm3440_vm0, %v3199_v29  ;;  %v2348_v37 = vmul.f32 %v5024_v17, %v951_v30  ;;  %v2874_v38 = vadd.f32 %v5051_v39, %v2741_v22 }
 0x186   :  { %v2614_v3 = vmul.f32 %v5031_v55, %v2072_v36  ;;  %3328 = vadd.xlane.f32.xlu0 %v3128_v31  ;;  %v3965_v40 = vpop.f32.mrf.mxu0  ;;  %v2999_v41 = vmax.f32 %v2871_v27, 0.0  ;;  %v3134_v51 = vmul.f32 %v5065_v59, %v3001_v33 }
 0x187   :  { %v2744_v42 = vadd.f32 %v2616_v28, %v2483_v35  ;;  %v2481_v43 = vadd.f32 %v5038_v25, %v2348_v37  ;;  %v4109_v44 = vpop.f32.mrf.mxu1  ;;  %v3193_v45 = vpop.xlane.xlu0 %3192  ;;  %v2351_v46 = vmul.f32 %v5024_v17, %v3965_v40  ;;  %3330 = vadd.xlane.f32.xlu1 %v3129_v32  ;;  %v3002_v47 = vmax.f32 %v2874_v38, 0.0 }
 0x188   :  { %v2617_v48 = vmul.f32 %v5031_v55, %v4109_v44  ;;  %3445 = vst.msk [vmem:[%s6002_s5 + $0x20] sm:$0xff] %vm3440_vm0, %v3193_v45  ;;  %v3195_v49 = vpop.xlane.xlu1 %3194  ;;  %v954_v50 = vpop.f32.mrf.mxu0  ;;  %v2872_v52 = vadd.f32 %v5051_v39, %v2739_v34  ;;  %v3132_v21 = vmul.f32 %v5065_v59, %v2999_v41 }
 0x189   :  { %v2742_v54 = vadd.f32 %v2614_v3, %v2481_v43  ;;  %v2484_v56 = vadd.f32 %v5038_v25, %v2351_v46  ;;  %v2075_v58 = vpop.f32.mrf.mxu1  ;;  %3446 = vst.msk [vmem:[%s6002_s5 + $0x28] sm:$0xff] %vm3440_vm0, %v3195_v49  ;;  %v2349_v60 = vmul.f32 %v5024_v17, %v954_v50  ;;  %v3135_v61 = vmul.f32 %v5065_v59, %v3002_v47 }
 0x18a   :  { %3340 = vadd.xlane.f32.xlu0 %v3134_v51  ;;  %v3968_v62 = vpop.f32.mrf.mxu0  ;;  %v3000_v63 = vmax.f32 %v2872_v52, 0.0  ;;  %v2877_v0 = vadd.f32 %v5051_v39, %v2744_v42  ;;  %v2615_v2 = vmul.f32 %v5031_v55, %v2075_v58 }
 0x18b   :  { %v2745_v1 = vadd.f32 %v2617_v48, %v2484_v56  ;;  %v2482_v4 = vadd.f32 %v5038_v25, %v2349_v60  ;;  %v4112_v5 = vpop.f32.mrf.mxu1  ;;  %v3205_v6 = vpop.xlane.xlu0 %3204  ;;  %v2354_v7 = vmul.f32 %v5024_v17, %v3968_v62  ;;  %3342 = vadd.xlane.f32.xlu1 %v3135_v61  ;;  %v2875_v13 = vadd.f32 %v5051_v39, %v2742_v54 }
 0x18c   :  { %v2620_v8 = vmul.f32 %v5031_v55, %v4112_v5  ;;  %3451 = vst.msk [vmem:[%s6002_s5 + $0x50] sm:$0xff] %vm3440_vm0, %v3205_v6  ;;  %v3207_v9 = vpop.xlane.xlu1 %3206  ;;  %v967_v10 = vpop.f32.mrf.mxu0  ;;  %v3133_v11 = vmul.f32 %v5065_v59, %v3000_v63  ;;  %v3005_v12 = vmax.f32 %v2877_v0, 0.0 }
 0x18d   :  { %v2743_v14 = vadd.f32 %v2615_v2, %v2482_v4  ;;  %v2487_v15 = vadd.f32 %v5038_v25, %v2354_v7  ;;  %v2088_v16 = vpop.f32.mrf.mxu1  ;;  %3452 = vst.msk [vmem:[%s6002_s5 + $0x58] sm:$0xff] %vm3440_vm0, %v3207_v9  ;;  %v2352_v53 = vmul.f32 %v5024_v17, %v967_v10  ;;  %v2878_v18 = vadd.f32 %v5051_v39, %v2745_v1 }
 0x18e   :  { %v2618_v19 = vmul.f32 %v5031_v55, %v2088_v16  ;;  %3336 = vadd.xlane.f32.xlu0 %v3132_v21  ;;  %v3969_v20 = vpop.f32.mrf.mxu0  ;;  %v3138_v31 = vmul.f32 %v5065_v59, %v3005_v12  ;;  %v3003_v32 = vmax.f32 %v2875_v13, 0.0 }
 0x18f   :  { %v2748_v22 = vadd.f32 %v2620_v8, %v2487_v15  ;;  %v2485_v57 = vadd.f32 %v5038_v25, %v2352_v53  ;;  %v4113_v23 = vpop.f32.mrf.mxu1  ;;  %v3201_v24 = vpop.xlane.xlu0 %3200  ;;  %v2355_v26 = vmul.f32 %v5024_v17, %v3969_v20  ;;  %3338 = vadd.xlane.f32.xlu1 %v3133_v11  ;;  %v3006_v27 = vmax.f32 %v2878_v18, 0.0 }
 0x190   :  { %v2621_v28 = vmul.f32 %v5031_v55, %v4113_v23  ;;  %3449 = vst.msk [vmem:[%s6002_s5 + $0x40] sm:$0xff] %vm3440_vm0, %v3201_v24  ;;  %v3203_v29 = vpop.xlane.xlu1 %3202  ;;  %v970_v30 = vpop.f32.mrf.mxu0  ;;  %v2876_v33 = vadd.f32 %v5051_v39, %v2743_v14  ;;  %v3136_v52 = vmul.f32 %v5065_v59, %v3003_v32 }
 0x191   :  { %v2746_v34 = vadd.f32 %v2618_v19, %v2485_v57  ;;  %v2488_v35 = vadd.f32 %v5038_v25, %v2355_v26  ;;  %v2091_v36 = vpop.f32.mrf.mxu1  ;;  %3450 = vst.msk [vmem:[%s6002_s5 + $0x48] sm:$0xff] %vm3440_vm0, %v3203_v29  ;;  %v2353_v37 = vmul.f32 %v5024_v17, %v970_v30  ;;  %v3139_v38 = vmul.f32 %v5065_v59, %v3006_v27 }
 0x192   :  { %v2619_v3 = vmul.f32 %v5031_v55, %v2091_v36  ;;  %3348 = vadd.xlane.f32.xlu0 %v3138_v31  ;;  %v3972_v40 = vpop.f32.mrf.mxu0  ;;  %v3004_v41 = vmax.f32 %v2876_v33, 0.0  ;;  %v2881_v42 = vadd.f32 %v5051_v39, %v2748_v22 }
 0x193   :  { %v2749_v43 = vadd.f32 %v2621_v28, %v2488_v35  ;;  %v2486_v44 = vadd.f32 %v5038_v25, %v2353_v37  ;;  %v4116_v45 = vpop.f32.mrf.mxu1  ;;  %v3213_v46 = vpop.xlane.xlu0 %3212  ;;  %v2358_v47 = vmul.f32 %v5024_v17, %v3972_v40  ;;  %3350 = vadd.xlane.f32.xlu1 %v3139_v38  ;;  %v2879_v48 = vadd.f32 %v5051_v39, %v2746_v34 }
 0x194   :  { %v2624_v49 = vmul.f32 %v5031_v55, %v4116_v45  ;;  %3455 = vst.msk [vmem:[%s6002_s5 + $0x70] sm:$0xff] %vm3440_vm0, %v3213_v46  ;;  %v3215_v50 = vpop.xlane.xlu1 %3214  ;;  %v983_v51 = vpop.f32.mrf.mxu0  ;;  %v3137_v54 = vmul.f32 %v5065_v59, %v3004_v41  ;;  %v3009_v56 = vmax.f32 %v2881_v42, 0.0 }
 0x195   :  { %v2747_v58 = vadd.f32 %v2619_v3, %v2486_v44  ;;  %v2491_v60 = vadd.f32 %v5038_v25, %v2358_v47  ;;  %v2104_v61 = vpop.f32.mrf.mxu1  ;;  %3456 = vst.msk [vmem:[%s6002_s5 + $0x78] sm:$0xff] %vm3440_vm0, %v3215_v50  ;;  %v2356_v62 = vmul.f32 %v5024_v17, %v983_v51  ;;  %v2882_v21 = vadd.f32 %v5051_v39, %v2749_v43 }
 0x196   :  { %v2622_v63 = vmul.f32 %v5031_v55, %v2104_v61  ;;  %3344 = vadd.xlane.f32.xlu0 %v3136_v52  ;;  %v3973_v0 = vpop.f32.mrf.mxu0  ;;  %v3007_v1 = vmax.f32 %v2879_v48, 0.0  ;;  %v3142_v12 = vmul.f32 %v5065_v59, %v3009_v56 }
 0x197   :  { %v2752_v2 = vadd.f32 %v2624_v49, %v2491_v60  ;;  %v2489_v4 = vadd.f32 %v5038_v25, %v2356_v62  ;;  %v4117_v5 = vpop.f32.mrf.mxu1  ;;  %v3209_v6 = vpop.xlane.xlu0 %3208  ;;  %v2359_v7 = vmul.f32 %v5024_v17, %v3973_v0  ;;  %3346 = vadd.xlane.f32.xlu1 %v3137_v54  ;;  %v3010_v8 = vmax.f32 %v2882_v21, 0.0  ;;  %v5376_v21 = vld [vmem:[%s6001_s4 + $0x2] ss:$0 sm:$0xff] }
 0x198   :  { %v2625_v9 = vmul.f32 %v5031_v55, %v4117_v5  ;;  %3453 = vst.msk [vmem:[%s6002_s5 + $0x60] sm:$0xff] %vm3440_vm0, %v3209_v6  ;;  %v3211_v10 = vpop.xlane.xlu1 %3210  ;;  %v986_v11 = vpop.f32.mrf.mxu0  ;;  %v2880_v13 = vadd.f32 %v5051_v39, %v2747_v58  ;;  %v3140_v20 = vmul.f32 %v5065_v59, %v3007_v1 }
 0x199   :  { %v2750_v14 = vadd.f32 %v2622_v63, %v2489_v4  ;;  %v2492_v15 = vadd.f32 %v5038_v25, %v2359_v7  ;;  %v2107_v16 = vpop.f32.mrf.mxu1  ;;  %3454 = vst.msk [vmem:[%s6002_s5 + $0x68] sm:$0xff] %vm3440_vm0, %v3211_v10  ;;  %v2357_v53 = vmul.f32 %v5024_v17, %v986_v11  ;;  %v3143_v18 = vmul.f32 %v5065_v59, %v3010_v8  ;;  %v5383_v4 = vld [vmem:[%s6001_s4 + $0x1] ss:$0 sm:$0xff] }
 0x19a   :  { %3356 = vadd.xlane.f32.xlu0 %v3142_v12  ;;  %v3976_v19 = vpop.f32.mrf.mxu0  ;;  %v3008_v22 = vmax.f32 %v2880_v13, 0.0  ;;  %v2885_v57 = vadd.f32 %v5051_v39, %v2752_v2  ;;  %v2623_v24 = vmul.f32 %v5031_v55, %v2107_v16 }
 0x19b   :  { %v2753_v23 = vadd.f32 %v2625_v9, %v2492_v15  ;;  %v2490_v26 = vadd.f32 %v5038_v25, %v2357_v53  ;;  %v4120_v27 = vpop.f32.mrf.mxu1  ;;  %v3221_v28 = vpop.xlane.xlu0 %3220  ;;  %v2362_v29 = vmul.f32 %v5024_v17, %v3976_v19  ;;  %3358 = vadd.xlane.f32.xlu1 %v3143_v18  ;;  %v2883_v35 = vadd.f32 %v5051_v39, %v2750_v14  ;;  %v5390_v9 = vld [vmem:[%s6001_s4 + $0x3] ss:$0 sm:$0xff] }
 0x19c   :  { %v2628_v30 = vmul.f32 %v5031_v55, %v4120_v27  ;;  %3459 = vst.msk [vmem:[%s6002_s5 + $0x90] sm:$0xff] %vm3440_vm0, %v3221_v28  ;;  %v3223_v31 = vpop.xlane.xlu1 %3222  ;;  %v999_v32 = vpop.f32.mrf.mxu0  ;;  %v3141_v33 = vmul.f32 %v5065_v59, %v3008_v22  ;;  %v3013_v34 = vmax.f32 %v2885_v57, 0.0 }
 0x19d   :  { %v2751_v36 = vadd.f32 %v2623_v24, %v2490_v26  ;;  %v2495_v37 = vadd.f32 %v5038_v25, %v2362_v29  ;;  %v2120_v38 = vpop.f32.mrf.mxu1  ;;  %3460 = vst.msk [vmem:[%s6002_s5 + $0x98] sm:$0xff] %vm3440_vm0, %v3223_v31  ;;  %v2360_v3 = vmul.f32 %v5024_v17, %v999_v32  ;;  %v2886_v40 = vadd.f32 %v5051_v39, %v2753_v23 }
 0x19e   :  { %v2626_v41 = vmul.f32 %v5031_v55, %v2120_v38  ;;  %3352 = vadd.xlane.f32.xlu0 %v3140_v20  ;;  %v3977_v42 = vpop.f32.mrf.mxu0  ;;  %v3146_v52 = vmul.f32 %v5065_v59, %v3013_v34  ;;  %v3011_v54 = vmax.f32 %v2883_v35, 0.0 }
 0x19f   :  { %v2756_v43 = vadd.f32 %v2628_v30, %v2495_v37  ;;  %v2493_v44 = vadd.f32 %v5038_v25, %v2360_v3  ;;  %v4121_v45 = vpop.f32.mrf.mxu1  ;;  %v3217_v46 = vpop.xlane.xlu0 %3216  ;;  %v2363_v47 = vmul.f32 %v5024_v17, %v3977_v42  ;;  %3354 = vadd.xlane.f32.xlu1 %v3141_v33  ;;  %v3014_v48 = vmax.f32 %v2886_v40, 0.0  ;;  %v5418_v33 = vld [vmem:[%s6001_s4 + $0x4] ss:$0 sm:$0xff] }
 0x1a0   :  { %v2629_v49 = vmul.f32 %v5031_v55, %v4121_v45  ;;  %3457 = vst.msk [vmem:[%s6002_s5 + $0x80] sm:$0xff] %vm3440_vm0, %v3217_v46  ;;  %v3219_v50 = vpop.xlane.xlu1 %3218  ;;  %v1002_v51 = vpop.f32.mrf.mxu0  ;;  %v2884_v56 = vadd.f32 %v5051_v39, %v2751_v36  ;;  %v5369_v55 = vld [vmem:[%s6001_s4] ss:$0 sm:$0xff]  ;;  %v3144_v13 = vmul.f32 %v5065_v59, %v3011_v54 }
 0x1a1   :  { %v2754_v58 = vadd.f32 %v2626_v41, %v2493_v44  ;;  %v2496_v60 = vadd.f32 %v5038_v25, %v2363_v47  ;;  %v2123_v17 = vpop.f32.mrf.mxu1  ;;  %3458 = vst.msk [vmem:[%s6002_s5 + $0x88] sm:$0xff] %vm3440_vm0, %v3219_v50  ;;  %v2361_v61 = vmul.f32 %v5369_v55, %v1002_v51  ;;  %v3147_v62 = vmul.f32 %v5065_v59, %v3014_v48 }
 0x1a2   :  { %v2627_v25 = vmul.f32 %v5376_v21, %v2123_v17  ;;  %3364 = vadd.xlane.f32.xlu0 %v3146_v52  ;;  %v3980_v63 = vpop.f32.mrf.mxu0  ;;  %v3012_v0 = vmax.f32 %v2884_v56, 0.0  ;;  %v2889_v1 = vadd.f32 %v5051_v39, %v2756_v43 }
 0x1a3   :  { %v2757_v2 = vadd.f32 %v2629_v49, %v2496_v60  ;;  %v2494_v5 = vadd.f32 %v5383_v4, %v2361_v61  ;;  %v4124_v6 = vpop.f32.mrf.mxu1  ;;  %v3229_v7 = vpop.xlane.xlu0 %3228  ;;  %v2366_v8 = vmul.f32 %v5369_v55, %v3980_v63  ;;  %3366 = vadd.xlane.f32.xlu1 %v3147_v62  ;;  %v2887_v39 = vadd.f32 %v5390_v9, %v2754_v58 }
 0x1a4   :  { %v2632_v10 = vmul.f32 %v5376_v21, %v4124_v6  ;;  %3463 = vst.msk [vmem:[%s6002_s5 + $0xb0] sm:$0xff] %vm3440_vm0, %v3229_v7  ;;  %v3231_v11 = vpop.xlane.xlu1 %3230  ;;  %v1015_v12 = vpop.f32.mrf.mxu0  ;;  %v3145_v14 = vmul.f32 %v5065_v59, %v3012_v0  ;;  %v3017_v15 = vmax.f32 %v2889_v1, 0.0 }
 0x1a5   :  { %v2755_v16 = vadd.f32 %v2627_v25, %v2494_v5  ;;  %v2499_v53 = vadd.f32 %v5383_v4, %v2366_v8  ;;  %v2136_v18 = vpop.f32.mrf.mxu1  ;;  %3464 = vst.msk [vmem:[%s6002_s5 + $0xb8] sm:$0xff] %vm3440_vm0, %v3231_v11  ;;  %v2364_v19 = vmul.f32 %v5369_v55, %v1015_v12  ;;  %v2890_v20 = vadd.f32 %v5390_v9, %v2757_v2 }
 0x1a6   :  { %v2630_v22 = vmul.f32 %v5376_v21, %v2136_v18  ;;  %3360 = vadd.xlane.f32.xlu0 %v3144_v13  ;;  %v3981_v57 = vpop.f32.mrf.mxu0  ;;  %v3015_v23 = vmax.f32 %v2887_v39, 0.0  ;;  %v3150_v34 = vmul.f32 %v5418_v33, %v3017_v15 }
 0x1a7   :  { %v2760_v59 = vadd.f32 %v2632_v10, %v2499_v53  ;;  %v2497_v24 = vadd.f32 %v5383_v4, %v2364_v19  ;;  %v4125_v26 = vpop.f32.mrf.mxu1  ;;  %v3225_v27 = vpop.xlane.xlu0 %3224  ;;  %v2367_v28 = vmul.f32 %v5369_v55, %v3981_v57  ;;  %3362 = vadd.xlane.f32.xlu1 %v3145_v14  ;;  %v3018_v29 = vmax.f32 %v2890_v20, 0.0 }
 0x1a8   :  { %v2633_v30 = vmul.f32 %v5376_v21, %v4125_v26  ;;  %3461 = vst.msk [vmem:[%s6002_s5 + $0xa0] sm:$0xff] %vm3440_vm0, %v3225_v27  ;;  %v3227_v31 = vpop.xlane.xlu1 %3226  ;;  %v1018_v32 = vpop.f32.mrf.mxu0  ;;  %v2888_v35 = vadd.f32 %v5390_v9, %v2755_v16  ;;  %v3148_v42 = vmul.f32 %v5418_v33, %v3015_v23 }
 0x1a9   :  { %v2758_v36 = vadd.f32 %v2630_v22, %v2497_v24  ;;  %v2500_v37 = vadd.f32 %v5383_v4, %v2367_v28  ;;  %v2139_v38 = vpop.f32.mrf.mxu1  ;;  %3462 = vst.msk [vmem:[%s6002_s5 + $0xa8] sm:$0xff] %vm3440_vm0, %v3227_v31  ;;  %v2365_v3 = vmul.f32 %v5369_v55, %v1018_v32  ;;  %v3151_v40 = vmul.f32 %v5418_v33, %v3018_v29 }
 0x1aa   :  { %3372 = vadd.xlane.f32.xlu0 %v3150_v34  ;;  %v3984_v41 = vpop.f32.mrf.mxu0  ;;  %v3016_v43 = vmax.f32 %v2888_v35, 0.0  ;;  %v2893_v44 = vadd.f32 %v5390_v9, %v2760_v59  ;;  %v2631_v46 = vmul.f32 %v5376_v21, %v2139_v38 }
 0x1ab   :  { %v2761_v45 = vadd.f32 %v2633_v30, %v2500_v37  ;;  %v2498_v47 = vadd.f32 %v5383_v4, %v2365_v3  ;;  %v4128_v48 = vpop.f32.mrf.mxu1  ;;  %v3237_v49 = vpop.xlane.xlu0 %3236  ;;  %v2370_v50 = vmul.f32 %v5369_v55, %v3984_v41  ;;  %3374 = vadd.xlane.f32.xlu1 %v3151_v40  ;;  %v2891_v60 = vadd.f32 %v5390_v9, %v2758_v36 }
 0x1ac   :  { %v2636_v51 = vmul.f32 %v5376_v21, %v4128_v48  ;;  %3467 = vst.msk [vmem:[%s6002_s5 + $0xd0] sm:$0xff] %vm3440_vm0, %v3237_v49  ;;  %v3239_v52 = vpop.xlane.xlu1 %3238  ;;  %v1031_v54 = vpop.f32.mrf.mxu0  ;;  %v3149_v56 = vmul.f32 %v5418_v33, %v3016_v43  ;;  %v3021_v58 = vmax.f32 %v2893_v44, 0.0 }
 0x1ad   :  { %v2759_v17 = vadd.f32 %v2631_v46, %v2498_v47  ;;  %v2503_v61 = vadd.f32 %v5383_v4, %v2370_v50  ;;  %v2152_v62 = vpop.f32.mrf.mxu1  ;;  %3468 = vst.msk [vmem:[%s6002_s5 + $0xd8] sm:$0xff] %vm3440_vm0, %v3239_v52  ;;  %v2368_v25 = vmul.f32 %v5369_v55, %v1031_v54  ;;  %v2894_v63 = vadd.f32 %v5390_v9, %v2761_v45 }
 0x1ae   :  { %v2634_v0 = vmul.f32 %v5376_v21, %v2152_v62  ;;  %3368 = vadd.xlane.f32.xlu0 %v3148_v42  ;;  %v3985_v1 = vpop.f32.mrf.mxu0  ;;  %v3154_v13 = vmul.f32 %v5418_v33, %v3021_v58  ;;  %v3019_v14 = vmax.f32 %v2891_v60, 0.0 }
 0x1af   :  { %v2764_v2 = vadd.f32 %v2636_v51, %v2503_v61  ;;  %v2501_v5 = vadd.f32 %v5383_v4, %v2368_v25  ;;  %v4129_v6 = vpop.f32.mrf.mxu1  ;;  %v3233_v7 = vpop.xlane.xlu0 %3232  ;;  %v2371_v8 = vmul.f32 %v5369_v55, %v3985_v1  ;;  %3370 = vadd.xlane.f32.xlu1 %v3149_v56  ;;  %v3022_v39 = vmax.f32 %v2894_v63, 0.0 }
 0x1b0   :  { %v2637_v10 = vmul.f32 %v5376_v21, %v4129_v6  ;;  %3465 = vst.msk [vmem:[%s6002_s5 + $0xc0] sm:$0xff] %vm3440_vm0, %v3233_v7  ;;  %v3235_v11 = vpop.xlane.xlu1 %3234  ;;  %v1034_v12 = vpop.f32.mrf.mxu0  ;;  %v2892_v15 = vadd.f32 %v5390_v9, %v2759_v17  ;;  %v3152_v35 = vmul.f32 %v5418_v33, %v3019_v14 }
 0x1b1   :  { %v2762_v16 = vadd.f32 %v2634_v0, %v2501_v5  ;;  %v2504_v53 = vadd.f32 %v5383_v4, %v2371_v8  ;;  %v2155_v18 = vpop.f32.mrf.mxu1  ;;  %3466 = vst.msk [vmem:[%s6002_s5 + $0xc8] sm:$0xff] %vm3440_vm0, %v3235_v11  ;;  %v2369_v19 = vmul.f32 %v5369_v55, %v1034_v12  ;;  %v3155_v20 = vmul.f32 %v5418_v33, %v3022_v39 }
 0x1b2   :  { %v2635_v22 = vmul.f32 %v5376_v21, %v2155_v18  ;;  %3380 = vadd.xlane.f32.xlu0 %v3154_v13  ;;  %v3988_v57 = vpop.f32.mrf.mxu0  ;;  %v3020_v23 = vmax.f32 %v2892_v15, 0.0  ;;  %v2897_v59 = vadd.f32 %v5390_v9, %v2764_v2 }
 0x1b3   :  { %v2765_v24 = vadd.f32 %v2637_v10, %v2504_v53  ;;  %v2502_v26 = vadd.f32 %v5383_v4, %v2369_v19  ;;  %v4132_v27 = vpop.f32.mrf.mxu1  ;;  %v3245_v28 = vpop.xlane.xlu0 %3244  ;;  %v2374_v29 = vmul.f32 %v5369_v55, %v3988_v57  ;;  %3382 = vadd.xlane.f32.xlu1 %v3155_v20  ;;  %v2895_v30 = vadd.f32 %v5390_v9, %v2762_v16 }
 0x1b4   :  { %v2640_v31 = vmul.f32 %v5376_v21, %v4132_v27  ;;  %3471 = vst.msk [vmem:[%s6002_s5 + $0xf0] sm:$0xff] %vm3440_vm0, %v3245_v28  ;;  %v3247_v32 = vpop.xlane.xlu1 %3246  ;;  %v1047_v34 = vpop.f32.mrf.mxu0  ;;  %v3153_v36 = vmul.f32 %v5418_v33, %v3020_v23  ;;  %v3025_v37 = vmax.f32 %v2897_v59, 0.0 }
 0x1b5   :  { %v2763_v38 = vadd.f32 %v2635_v22, %v2502_v26  ;;  %v2507_v3 = vadd.f32 %v5383_v4, %v2374_v29  ;;  %v2168_v40 = vpop.f32.mrf.mxu1  ;;  %3472 = vst.msk [vmem:[%s6002_s5 + $0xf8] sm:$0xff] %vm3440_vm0, %v3247_v32  ;;  %v2372_v41 = vmul.f32 %v5369_v55, %v1047_v34  ;;  %v2898_v42 = vadd.f32 %v5390_v9, %v2765_v24 }
 0x1b6   :  { %v2638_v43 = vmul.f32 %v5376_v21, %v2168_v40  ;;  %3376 = vadd.xlane.f32.xlu0 %v3152_v35  ;;  %v3989_v44 = vpop.f32.mrf.mxu0  ;;  %v3023_v45 = vmax.f32 %v2895_v30, 0.0  ;;  %v3158_v58 = vmul.f32 %v5418_v33, %v3025_v37 }
 0x1b7   :  { %v2768_v46 = vadd.f32 %v2640_v31, %v2507_v3  ;;  %v2505_v47 = vadd.f32 %v5383_v4, %v2372_v41  ;;  %v4133_v48 = vpop.f32.mrf.mxu1  ;;  %v3241_v49 = vpop.xlane.xlu0 %3240  ;;  %v2375_v50 = vmul.f32 %v5369_v55, %v3989_v44  ;;  %3378 = vadd.xlane.f32.xlu1 %v3153_v36  ;;  %v3026_v51 = vmax.f32 %v2898_v42, 0.0 }
 0x1b8   :  { %v2641_v52 = vmul.f32 %v5376_v21, %v4133_v48  ;;  %3469 = vst.msk [vmem:[%s6002_s5 + $0xe0] sm:$0xff] %vm3440_vm0, %v3241_v49  ;;  %v3243_v54 = vpop.xlane.xlu1 %3242  ;;  %v1050_v56 = vpop.f32.mrf.mxu0  ;;  %v2896_v60 = vadd.f32 %v5390_v9, %v2763_v38  ;;  %v3156_v1 = vmul.f32 %v5418_v33, %v3023_v45 }
 0x1b9   :  { %v2766_v17 = vadd.f32 %v2638_v43, %v2505_v47  ;;  %v2508_v61 = vadd.f32 %v5383_v4, %v2375_v50  ;;  %v2171_v62 = vpop.f32.mrf.mxu1  ;;  %3470 = vst.msk [vmem:[%s6002_s5 + $0xe8] sm:$0xff] %vm3440_vm0, %v3243_v54  ;;  %v2373_v25 = vmul.f32 %v5369_v55, %v1050_v56  ;;  %v3159_v63 = vmul.f32 %v5418_v33, %v3026_v51 }
 0x1ba   :  { %3388 = vadd.xlane.f32.xlu0 %v3158_v58  ;;  %v3992_v0 = vpop.f32.mrf.mxu0  ;;  %v3024_v2 = vmax.f32 %v2896_v60, 0.0  ;;  %v2901_v5 = vadd.f32 %v5390_v9, %v2768_v46  ;;  %v2639_v7 = vmul.f32 %v5376_v21, %v2171_v62 }
 0x1bb   :  { %v2769_v6 = vadd.f32 %v2641_v52, %v2508_v61  ;;  %v2506_v8 = vadd.f32 %v5383_v4, %v2373_v25  ;;  %v4136_v39 = vpop.f32.mrf.mxu1  ;;  %v3253_v10 = vpop.xlane.xlu0 %3252  ;;  %v2378_v11 = vmul.f32 %v5369_v55, %v3992_v0  ;;  %3390 = vadd.xlane.f32.xlu1 %v3159_v63  ;;  %v2899_v53 = vadd.f32 %v5390_v9, %v2766_v17 }
 0x1bc   :  { %v2644_v12 = vmul.f32 %v5376_v21, %v4136_v39  ;;  %3475 = vst.msk [vmem:[%s6002_s5 + $0x110] sm:$0xff] %vm3440_vm0, %v3253_v10  ;;  %v3255_v13 = vpop.xlane.xlu1 %3254  ;;  %v1063_v14 = vpop.f32.mrf.mxu0  ;;  %v3157_v15 = vmul.f32 %v5418_v33, %v3024_v2  ;;  %v3029_v16 = vmax.f32 %v2901_v5, 0.0 }
 0x1bd   :  { %v2767_v18 = vadd.f32 %v2639_v7, %v2506_v8  ;;  %v2511_v19 = vadd.f32 %v5383_v4, %v2378_v11  ;;  %v2184_v20 = vpop.f32.mrf.mxu1  ;;  %3476 = vst.msk [vmem:[%s6002_s5 + $0x118] sm:$0xff] %vm3440_vm0, %v3255_v13  ;;  %v2376_v22 = vmul.f32 %v5369_v55, %v1063_v14  ;;  %v2902_v57 = vadd.f32 %v5390_v9, %v2769_v6 }
 0x1be   :  { %v2642_v23 = vmul.f32 %v5376_v21, %v2184_v20  ;;  %3384 = vadd.xlane.f32.xlu0 %v3156_v1  ;;  %v3993_v59 = vpop.f32.mrf.mxu0  ;;  %v3162_v35 = vmul.f32 %v5418_v33, %v3029_v16  ;;  %v3027_v36 = vmax.f32 %v2899_v53, 0.0 }
 0x1bf   :  { %v2772_v24 = vadd.f32 %v2644_v12, %v2511_v19  ;;  %v2509_v26 = vadd.f32 %v5383_v4, %v2376_v22  ;;  %v4137_v27 = vpop.f32.mrf.mxu1  ;;  %v3249_v28 = vpop.xlane.xlu0 %3248  ;;  %v2379_v29 = vmul.f32 %v5369_v55, %v3993_v59  ;;  %3386 = vadd.xlane.f32.xlu1 %v3157_v15  ;;  %v3030_v30 = vmax.f32 %v2902_v57, 0.0 }
 0x1c0   :  { %v2645_v31 = vmul.f32 %v5376_v21, %v4137_v27  ;;  %3473 = vst.msk [vmem:[%s6002_s5 + $0x100] sm:$0xff] %vm3440_vm0, %v3249_v28  ;;  %v3251_v32 = vpop.xlane.xlu1 %3250  ;;  %v1066_v34 = vpop.f32.mrf.mxu0  ;;  %v2900_v37 = vadd.f32 %v5390_v9, %v2767_v18  ;;  %v3160_v60 = vmul.f32 %v5418_v33, %v3027_v36 }
 0x1c1   :  { %v2770_v38 = vadd.f32 %v2642_v23, %v2509_v26  ;;  %v2512_v3 = vadd.f32 %v5383_v4, %v2379_v29  ;;  %v2187_v40 = vpop.f32.mrf.mxu1  ;;  %3474 = vst.msk [vmem:[%s6002_s5 + $0x108] sm:$0xff] %vm3440_vm0, %v3251_v32  ;;  %v2377_v41 = vmul.f32 %v5369_v55, %v1066_v34  ;;  %v3163_v42 = vmul.f32 %v5418_v33, %v3030_v30 }
 0x1c2   :  { %v2643_v43 = vmul.f32 %v5376_v21, %v2187_v40  ;;  %3396 = vadd.xlane.f32.xlu0 %v3162_v35  ;;  %v3996_v44 = vpop.f32.mrf.mxu0  ;;  %v3028_v45 = vmax.f32 %v2900_v37, 0.0  ;;  %v2905_v46 = vadd.f32 %v5390_v9, %v2772_v24 }
 0x1c3   :  { %v2773_v47 = vadd.f32 %v2645_v31, %v2512_v3  ;;  %v2510_v48 = vadd.f32 %v5383_v4, %v2377_v41  ;;  %v4140_v49 = vpop.f32.mrf.mxu1  ;;  %v3261_v50 = vpop.xlane.xlu0 %3260  ;;  %v2382_v51 = vmul.f32 %v5369_v55, %v3996_v44  ;;  %3398 = vadd.xlane.f32.xlu1 %v3163_v42  ;;  %v2903_v52 = vadd.f32 %v5390_v9, %v2770_v38 }
 0x1c4   :  { %v2648_v54 = vmul.f32 %v5376_v21, %v4140_v49  ;;  %3479 = vst.msk [vmem:[%s6002_s5 + $0x130] sm:$0xff] %vm3440_vm0, %v3261_v50  ;;  %v3263_v56 = vpop.xlane.xlu1 %3262  ;;  %v1079_v58 = vpop.f32.mrf.mxu0  ;;  %v3161_v17 = vmul.f32 %v5418_v33, %v3028_v45  ;;  %v3033_v61 = vmax.f32 %v2905_v46, 0.0 }
 0x1c5   :  { %v2771_v62 = vadd.f32 %v2643_v43, %v2510_v48  ;;  %v2515_v25 = vadd.f32 %v5383_v4, %v2382_v51  ;;  %v2200_v63 = vpop.f32.mrf.mxu1  ;;  %3480 = vst.msk [vmem:[%s6002_s5 + $0x138] sm:$0xff] %vm3440_vm0, %v3263_v56  ;;  %v2380_v0 = vmul.f32 %v5369_v55, %v1079_v58  ;;  %v2906_v1 = vadd.f32 %v5390_v9, %v2773_v47 }
 0x1c6   :  { %v2646_v2 = vmul.f32 %v5376_v21, %v2200_v63  ;;  %3392 = vadd.xlane.f32.xlu0 %v3160_v60  ;;  %v3997_v5 = vpop.f32.mrf.mxu0  ;;  %v3031_v6 = vmax.f32 %v2903_v52, 0.0  ;;  %v3166_v16 = vmul.f32 %v5418_v33, %v3033_v61 }
 0x1c7   :  { %v2776_v7 = vadd.f32 %v2648_v54, %v2515_v25  ;;  %v2513_v8 = vadd.f32 %v5383_v4, %v2380_v0  ;;  %v4141_v39 = vpop.f32.mrf.mxu1  ;;  %v3257_v10 = vpop.xlane.xlu0 %3256  ;;  %v2383_v11 = vmul.f32 %v5369_v55, %v3997_v5  ;;  %3394 = vadd.xlane.f32.xlu1 %v3161_v17  ;;  %v3034_v12 = vmax.f32 %v2906_v1, 0.0 }
 0x1c8   :  { %v2649_v13 = vmul.f32 %v5376_v21, %v4141_v39  ;;  %3477 = vst.msk [vmem:[%s6002_s5 + $0x120] sm:$0xff] %vm3440_vm0, %v3257_v10  ;;  %v3259_v14 = vpop.xlane.xlu1 %3258  ;;  %v1082_v15 = vpop.f32.mrf.mxu0  ;;  %v2904_v53 = vadd.f32 %v5390_v9, %v2771_v62  ;;  %v3164_v59 = vmul.f32 %v5418_v33, %v3031_v6 }
 0x1c9   :  { %v2774_v18 = vadd.f32 %v2646_v2, %v2513_v8  ;;  %v2516_v19 = vadd.f32 %v5383_v4, %v2383_v11  ;;  %v2203_v20 = vpop.f32.mrf.mxu1  ;;  %3478 = vst.msk [vmem:[%s6002_s5 + $0x128] sm:$0xff] %vm3440_vm0, %v3259_v14  ;;  %v2381_v22 = vmul.f32 %v5369_v55, %v1082_v15  ;;  %v3167_v57 = vmul.f32 %v5418_v33, %v3034_v12 }
 0x1ca   :  { %3404 = vadd.xlane.f32.xlu0 %v3166_v16  ;;  %v4000_v23 = vpop.f32.mrf.mxu0  ;;  %v3032_v24 = vmax.f32 %v2904_v53, 0.0  ;;  %v2909_v26 = vadd.f32 %v5390_v9, %v2776_v7  ;;  %v2647_v28 = vmul.f32 %v5376_v21, %v2203_v20 }
 0x1cb   :  { %v2777_v27 = vadd.f32 %v2649_v13, %v2516_v19  ;;  %v2514_v29 = vadd.f32 %v5383_v4, %v2381_v22  ;;  %v4144_v30 = vpop.f32.mrf.mxu1  ;;  %v3269_v31 = vpop.xlane.xlu0 %3268  ;;  %v2386_v32 = vmul.f32 %v5369_v55, %v4000_v23  ;;  %3406 = vadd.xlane.f32.xlu1 %v3167_v57  ;;  %v2907_v3 = vadd.f32 %v5390_v9, %v2774_v18 }
 0x1cc   :  { %v2652_v34 = vmul.f32 %v5376_v21, %v4144_v30  ;;  %3483 = vst.msk [vmem:[%s6002_s5 + $0x150] sm:$0xff] %vm3440_vm0, %v3269_v31  ;;  %v3271_v35 = vpop.xlane.xlu1 %3270  ;;  %v1095_v36 = vpop.f32.mrf.mxu0  ;;  %v3165_v37 = vmul.f32 %v5418_v33, %v3032_v24  ;;  %v3037_v38 = vmax.f32 %v2909_v26, 0.0 }
 0x1cd   :  { %v2775_v40 = vadd.f32 %v2647_v28, %v2514_v29  ;;  %v2519_v41 = vadd.f32 %v5383_v4, %v2386_v32  ;;  %v2216_v42 = vpop.f32.mrf.mxu1  ;;  %3484 = vst.msk [vmem:[%s6002_s5 + $0x158] sm:$0xff] %vm3440_vm0, %v3271_v35  ;;  %v2384_v43 = vmul.f32 %v5369_v55, %v1095_v36  ;;  %v2910_v44 = vadd.f32 %v5390_v9, %v2777_v27 }
 0x1ce   :  { %v2650_v45 = vmul.f32 %v5376_v21, %v2216_v42  ;;  %3400 = vadd.xlane.f32.xlu0 %v3164_v59  ;;  %v4001_v46 = vpop.f32.mrf.mxu0  ;;  %v3170_v60 = vmul.f32 %v5418_v33, %v3037_v38  ;;  %v3035_v17 = vmax.f32 %v2907_v3, 0.0 }
 0x1cf   :  { %v2780_v47 = vadd.f32 %v2652_v34, %v2519_v41  ;;  %v2517_v48 = vadd.f32 %v5383_v4, %v2384_v43  ;;  %v4145_v49 = vpop.f32.mrf.mxu1  ;;  %v3265_v50 = vpop.xlane.xlu0 %3264  ;;  %v2387_v51 = vmul.f32 %v5369_v55, %v4001_v46  ;;  %3402 = vadd.xlane.f32.xlu1 %v3165_v37  ;;  %v3038_v52 = vmax.f32 %v2910_v44, 0.0 }
 0x1d0   :  { %v2653_v54 = vmul.f32 %v5376_v21, %v4145_v49  ;;  %3481 = vst.msk [vmem:[%s6002_s5 + $0x140] sm:$0xff] %vm3440_vm0, %v3265_v50  ;;  %v3267_v56 = vpop.xlane.xlu1 %3266  ;;  %v1098_v58 = vpop.f32.mrf.mxu0  ;;  %v2908_v61 = vadd.f32 %v5390_v9, %v2775_v40  ;;  %v3168_v53 = vmul.f32 %v5418_v33, %v3035_v17 }
 0x1d1   :  { %v2778_v62 = vadd.f32 %v2650_v45, %v2517_v48  ;;  %v2520_v25 = vadd.f32 %v5383_v4, %v2387_v51  ;;  %v2219_v63 = vpop.f32.mrf.mxu1  ;;  %3482 = vst.msk [vmem:[%s6002_s5 + $0x148] sm:$0xff] %vm3440_vm0, %v3267_v56  ;;  %v2385_v0 = vmul.f32 %v5369_v55, %v1098_v58  ;;  %v3171_v1 = vmul.f32 %v5418_v33, %v3038_v52 }
 0x1d2   :  { %v2651_v2 = vmul.f32 %v5376_v21, %v2219_v63  ;;  %3412 = vadd.xlane.f32.xlu0 %v3170_v60  ;;  %v4004_v5 = vpop.f32.mrf.mxu0  ;;  %v3036_v6 = vmax.f32 %v2908_v61, 0.0  ;;  %v2913_v7 = vadd.f32 %v5390_v9, %v2780_v47 }
 0x1d3   :  { %v2781_v8 = vadd.f32 %v2653_v54, %v2520_v25  ;;  %v2518_v39 = vadd.f32 %v5383_v4, %v2385_v0  ;;  %v4148_v10 = vpop.f32.mrf.mxu1  ;;  %v3277_v11 = vpop.xlane.xlu0 %3276  ;;  %v2390_v12 = vmul.f32 %v5369_v55, %v4004_v5  ;;  %3414 = vadd.xlane.f32.xlu1 %v3171_v1  ;;  %v2911_v13 = vadd.f32 %v5390_v9, %v2778_v62 }
 0x1d4   :  { %v2656_v14 = vmul.f32 %v5376_v21, %v4148_v10  ;;  %3487 = vst.msk [vmem:[%s6002_s5 + $0x170] sm:$0xff] %vm3440_vm0, %v3277_v11  ;;  %v3279_v15 = vpop.xlane.xlu1 %3278  ;;  %v1111_v16 = vpop.f32.mrf.mxu0  ;;  %v3169_v18 = vmul.f32 %v5418_v33, %v3036_v6  ;;  %v3041_v19 = vmax.f32 %v2913_v7, 0.0 }
 0x1d5   :  { %v2779_v20 = vadd.f32 %v2651_v2, %v2518_v39  ;;  %v2523_v22 = vadd.f32 %v5383_v4, %v2390_v12  ;;  %v2232_v57 = vpop.f32.mrf.mxu1  ;;  %3488 = vst.msk [vmem:[%s6002_s5 + $0x178] sm:$0xff] %vm3440_vm0, %v3279_v15  ;;  %v2388_v23 = vmul.f32 %v5369_v55, %v1111_v16  ;;  %v2914_v59 = vadd.f32 %v5390_v9, %v2781_v8 }
 0x1d6   :  { %v2654_v24 = vmul.f32 %v5376_v21, %v2232_v57  ;;  %3408 = vadd.xlane.f32.xlu0 %v3168_v53  ;;  %v4005_v26 = vpop.f32.mrf.mxu0  ;;  %v3039_v27 = vmax.f32 %v2911_v13, 0.0  ;;  %v3174_v38 = vmul.f32 %v5418_v33, %v3041_v19 }
 0x1d7   :  { %v2784_v28 = vadd.f32 %v2656_v14, %v2523_v22  ;;  %v2521_v29 = vadd.f32 %v5383_v4, %v2388_v23  ;;  %v4149_v30 = vpop.f32.mrf.mxu1  ;;  %v3273_v31 = vpop.xlane.xlu0 %3272  ;;  %v2391_v32 = vmul.f32 %v5369_v55, %v4005_v26  ;;  %3410 = vadd.xlane.f32.xlu1 %v3169_v18  ;;  %v3042_v34 = vmax.f32 %v2914_v59, 0.0 }
 0x1d8   :  { %v2657_v35 = vmul.f32 %v5376_v21, %v4149_v30  ;;  %3485 = vst.msk [vmem:[%s6002_s5 + $0x160] sm:$0xff] %vm3440_vm0, %v3273_v31  ;;  %v3275_v36 = vpop.xlane.xlu1 %3274  ;;  %v1114_v37 = vpop.f32.mrf.mxu0  ;;  %v2912_v3 = vadd.f32 %v5390_v9, %v2779_v20  ;;  %v3172_v46 = vmul.f32 %v5418_v33, %v3039_v27 }
 0x1d9   :  { %v2782_v40 = vadd.f32 %v2654_v24, %v2521_v29  ;;  %v2524_v41 = vadd.f32 %v5383_v4, %v2391_v32  ;;  %v2235_v42 = vpop.f32.mrf.mxu1  ;;  %3486 = vst.msk [vmem:[%s6002_s5 + $0x168] sm:$0xff] %vm3440_vm0, %v3275_v36  ;;  %v2389_v43 = vmul.f32 %v5369_v55, %v1114_v37  ;;  %v3175_v44 = vmul.f32 %v5418_v33, %v3042_v34 }
 0x1da   :  { %3420 = vadd.xlane.f32.xlu0 %v3174_v38  ;;  %v4008_v45 = vpop.f32.mrf.mxu0  ;;  %v3040_v47 = vmax.f32 %v2912_v3, 0.0  ;;  %v2917_v48 = vadd.f32 %v5390_v9, %v2784_v28  ;;  %v2655_v50 = vmul.f32 %v5376_v21, %v2235_v42 }
 0x1db   :  { %v2785_v49 = vadd.f32 %v2657_v35, %v2524_v41  ;;  %v2522_v51 = vadd.f32 %v5383_v4, %v2389_v43  ;;  %v4152_v52 = vpop.f32.mrf.mxu1  ;;  %v3285_v54 = vpop.xlane.xlu0 %3284  ;;  %v2394_v56 = vmul.f32 %v5369_v55, %v4008_v45  ;;  %3422 = vadd.xlane.f32.xlu1 %v3175_v44  ;;  %v2915_v25 = vadd.f32 %v5390_v9, %v2782_v40 }
 0x1dc   :  { %v2660_v58 = vmul.f32 %v5376_v21, %v4152_v52  ;;  %3491 = vst.msk [vmem:[%s6002_s5 + $0x190] sm:$0xff] %vm3440_vm0, %v3285_v54  ;;  %v3287_v60 = vpop.xlane.xlu1 %3286  ;;  %v1127_v17 = vpop.f32.mrf.mxu0  ;;  %v3173_v61 = vmul.f32 %v5418_v33, %v3040_v47  ;;  %v3045_v62 = vmax.f32 %v2917_v48, 0.0 }
 0x1dd   :  { %v2783_v63 = vadd.f32 %v2655_v50, %v2522_v51  ;;  %v2527_v0 = vadd.f32 %v5383_v4, %v2394_v56  ;;  %v2248_v1 = vpop.f32.mrf.mxu1  ;;  %3492 = vst.msk [vmem:[%s6002_s5 + $0x198] sm:$0xff] %vm3440_vm0, %v3287_v60  ;;  %v2392_v2 = vmul.f32 %v5369_v55, %v1127_v17  ;;  %v2918_v5 = vadd.f32 %v5390_v9, %v2785_v49 }
 0x1de   :  { %v2658_v6 = vmul.f32 %v5376_v21, %v2248_v1  ;;  %3416 = vadd.xlane.f32.xlu0 %v3172_v46  ;;  %v4009_v7 = vpop.f32.mrf.mxu0  ;;  %v3178_v12 = vmul.f32 %v5418_v33, %v3045_v62  ;;  %v3043_v18 = vmax.f32 %v2915_v25, 0.0 }
 0x1df   :  { %v2525_v8 = vadd.f32 %v5383_v4, %v2392_v2  ;;  %v4153_v39 = vpop.f32.mrf.mxu1  ;;  %v3281_v10 = vpop.xlane.xlu0 %3280  ;;  %v2395_v11 = vmul.f32 %v5369_v55, %v4009_v7  ;;  %3418 = vadd.xlane.f32.xlu1 %v3173_v61  ;;  %v3046_v13 = vmax.f32 %v2918_v5, 0.0  ;;  %v2788_v14 = vadd.f32 %v2660_v58, %v2527_v0 }
 0x1e0   :  { %v2661_v15 = vmul.f32 %v5376_v21, %v4153_v39  ;;  %3489 = vst.msk [vmem:[%s6002_s5 + $0x180] sm:$0xff] %vm3440_vm0, %v3281_v10  ;;  %v3283_v16 = vpop.xlane.xlu1 %3282  ;;  %v1130_v53 = vpop.f32.mrf.mxu0  ;;  %v2916_v19 = vadd.f32 %v5390_v9, %v2783_v63 }
 0x1e1   :  { %v2786_v20 = vadd.f32 %v2658_v6, %v2525_v8  ;;  %v2528_v22 = vadd.f32 %v5383_v4, %v2395_v11  ;;  %v2251_v57 = vpop.f32.mrf.mxu1  ;;  %3490 = vst.msk [vmem:[%s6002_s5 + $0x188] sm:$0xff] %vm3440_vm0, %v3283_v16  ;;  %v2393_v23 = vmul.f32 %v5369_v55, %v1130_v53  ;;  %v3179_v59 = vmul.f32 %v5418_v33, %v3046_v13 }
 0x1e2   :  { %3428 = vadd.xlane.f32.xlu0 %v3178_v12  ;;  %v3044_v24 = vmax.f32 %v2916_v19, 0.0  ;;  %v2659_v27 = vmul.f32 %v5376_v21, %v2251_v57  ;;  %v3176_v55 = vmul.f32 %v5418_v33, %v3043_v18  ;;  %v2921_v32 = vadd.f32 %v5390_v9, %v2788_v14 }
 0x1e3   :  { %v2789_v26 = vadd.f32 %v2661_v15, %v2528_v22  ;;  %v2526_v28 = vadd.f32 %v5383_v4, %v2393_v23  ;;  %v3293_v29 = vpop.xlane.xlu0 %3292  ;;  %3430 = vadd.xlane.f32.xlu1 %v3179_v59  ;;  %v2919_v30 = vadd.f32 %v5390_v9, %v2786_v20 }
 0x1e4   :  { %3495 = vst.msk [vmem:[%s6002_s5 + $0x1b0] sm:$0xff] %vm3440_vm0, %v3293_v29  ;;  %v3295_v31 = vpop.xlane.xlu1 %3294  ;;  %v3177_v21 = vmul.f32 %v5418_v33, %v3044_v24  ;;  %v3049_v40 = vmax.f32 %v2921_v32, 0.0 }
 0x1e5   :  { %v2787_v34 = vadd.f32 %v2659_v27, %v2526_v28  ;;  %3496 = vst.msk [vmem:[%s6002_s5 + $0x1b8] sm:$0xff] %vm3440_vm0, %v3295_v31  ;;  %v3047_v4 = vmax.f32 %v2919_v30, 0.0  ;;  %v2922_v38 = vadd.f32 %v5390_v9, %v2789_v26 }
 0x1e6   :  { %3424 = vadd.xlane.f32.xlu0 %v3176_v55  ;;  %v3182_v45 = vmul.f32 %v5418_v33, %v3049_v40 }
 0x1e7   :  { %v3289_v35 = vpop.xlane.xlu0 %3288  ;;  %3426 = vadd.xlane.f32.xlu1 %v3177_v21  ;;  %v3180_v36 = vmul.f32 %v5418_v33, %v3047_v4  ;;  %v2920_v37 = vadd.f32 %v5390_v9, %v2787_v34  ;;  %v3050_v44 = vmax.f32 %v2922_v38, 0.0 }
 0x1e8   :  { %3493 = vst.msk [vmem:[%s6002_s5 + $0x1a0] sm:$0xff] %vm3440_vm0, %v3289_v35  ;;  %v3291_v3 = vpop.xlane.xlu1 %3290 }
 0x1e9   :  { %3494 = vst.msk [vmem:[%s6002_s5 + $0x1a8] sm:$0xff] %vm3440_vm0, %v3291_v3  ;;  %v3048_v41 = vmax.f32 %v2920_v37, 0.0  ;;  %v3183_v47 = vmul.f32 %v5418_v33, %v3050_v44 }
 0x1ea   :  { %3432 = vadd.xlane.f32.xlu0 %v3180_v36 }
 0x1eb   :  { %v3301_v42 = vpop.xlane.xlu0 %3300  ;;  %v3181_v43 = vmul.f32 %v5418_v33, %v3048_v41 }
 0x1ec   :  { %3499 = vst.msk [vmem:[%s6002_s5 + $0x1d0] sm:$0xff] %vm3440_vm0, %v3301_v42  ;;  %v3303_v9 = vpop.xlane.xlu1 %3302 }
 0x1ed   :  { %3500 = vst.msk [vmem:[%s6002_s5 + $0x1d8] sm:$0xff] %vm3440_vm0, %v3303_v9  ;;  %3434 = vadd.xlane.f32.xlu1 %v3181_v43 }
 0x1ee   :  { %3436 = vadd.xlane.f32.xlu0 %v3182_v45 }
 0x1ef   :  { %v3297_v46 = vpop.xlane.xlu0 %3296 }
 0x1f0   :  { %3497 = vst.msk [vmem:[%s6002_s5 + $0x1c0] sm:$0xff] %vm3440_vm0, %v3297_v46  ;;  %v3299_v48 = vpop.xlane.xlu1 %3298 }
 0x1f1   :  { %3498 = vst.msk [vmem:[%s6002_s5 + $0x1c8] sm:$0xff] %vm3440_vm0, %v3299_v48  ;;  %3438 = vadd.xlane.f32.xlu1 %v3183_v47 }
 0x1f3   :  { %v3309_v49 = vpop.xlane.xlu0 %3308 }
 0x1f4   :  { %3503 = vst.msk [vmem:[%s6002_s5 + $0x1f0] sm:$0xff] %vm3440_vm0, %v3309_v49  ;;  %v3311_v50 = vpop.xlane.xlu1 %3310 }
 0x1f5   :  { %3504 = vst.msk [vmem:[%s6002_s5 + $0x1f8] sm:$0xff] %vm3440_vm0, %v3311_v50 }
 0x1f7   :  { %v3305_v33 = vpop.xlane.xlu0 %3304 }
 0x1f8   :  { %3501 = vst.msk [vmem:[%s6002_s5 + $0x1e0] sm:$0xff] %vm3440_vm0, %v3305_v33  ;;  %v3307_v51 = vpop.xlane.xlu1 %3306 }
 0x1f9   :  { %3502 = vst.msk [vmem:[%s6002_s5 + $0x1e8] sm:$0xff] %vm3440_vm0, %v3307_v51 }
 0x1fb   :  { %v3317_v52 = vpop.xlane.xlu0 %3316 }
 0x1fc   :  { %3507 = vst.msk [vmem:[%s6002_s5 + $0x210] sm:$0xff] %vm3440_vm0, %v3317_v52  ;;  %v3319_v54 = vpop.xlane.xlu1 %3318 }
 0x1fd   :  { %3508 = vst.msk [vmem:[%s6002_s5 + $0x218] sm:$0xff] %vm3440_vm0, %v3319_v54 }
 0x1ff   :  { %v3313_v56 = vpop.xlane.xlu0 %3312 }
 0x200   :  { %3505 = vst.msk [vmem:[%s6002_s5 + $0x200] sm:$0xff] %vm3440_vm0, %v3313_v56  ;;  %v3315_v58 = vpop.xlane.xlu1 %3314 }
 0x201   :  { %3506 = vst.msk [vmem:[%s6002_s5 + $0x208] sm:$0xff] %vm3440_vm0, %v3315_v58 }
 0x203   :  { %v3325_v60 = vpop.xlane.xlu0 %3324 }
 0x204   :  { %3511 = vst.msk [vmem:[%s6002_s5 + $0x230] sm:$0xff] %vm3440_vm0, %v3325_v60  ;;  %v3327_v17 = vpop.xlane.xlu1 %3326 }
 0x205   :  { %3512 = vst.msk [vmem:[%s6002_s5 + $0x238] sm:$0xff] %vm3440_vm0, %v3327_v17 }
 0x207   :  { %v3321_v61 = vpop.xlane.xlu0 %3320 }
 0x208   :  { %3509 = vst.msk [vmem:[%s6002_s5 + $0x220] sm:$0xff] %vm3440_vm0, %v3321_v61  ;;  %v3323_v62 = vpop.xlane.xlu1 %3322 }
 0x209   :  { %3510 = vst.msk [vmem:[%s6002_s5 + $0x228] sm:$0xff] %vm3440_vm0, %v3323_v62 }
 0x20b   :  { %v3333_v25 = vpop.xlane.xlu0 %3332 }
 0x20c   :  { %3515 = vst.msk [vmem:[%s6002_s5 + $0x250] sm:$0xff] %vm3440_vm0, %v3333_v25  ;;  %v3335_v63 = vpop.xlane.xlu1 %3334 }
 0x20d   :  { %3516 = vst.msk [vmem:[%s6002_s5 + $0x258] sm:$0xff] %vm3440_vm0, %v3335_v63 }
 0x20f   :  { %v3329_v0 = vpop.xlane.xlu0 %3328 }
 0x210   :  { %3513 = vst.msk [vmem:[%s6002_s5 + $0x240] sm:$0xff] %vm3440_vm0, %v3329_v0  ;;  %v3331_v1 = vpop.xlane.xlu1 %3330 }
 0x211   :  { %3514 = vst.msk [vmem:[%s6002_s5 + $0x248] sm:$0xff] %vm3440_vm0, %v3331_v1 }
 0x213   :  { %v3341_v2 = vpop.xlane.xlu0 %3340 }
 0x214   :  { %3519 = vst.msk [vmem:[%s6002_s5 + $0x270] sm:$0xff] %vm3440_vm0, %v3341_v2  ;;  %v3343_v5 = vpop.xlane.xlu1 %3342 }
 0x215   :  { %3520 = vst.msk [vmem:[%s6002_s5 + $0x278] sm:$0xff] %vm3440_vm0, %v3343_v5 }
 0x217   :  { %v3337_v6 = vpop.xlane.xlu0 %3336 }
 0x218   :  { %3517 = vst.msk [vmem:[%s6002_s5 + $0x260] sm:$0xff] %vm3440_vm0, %v3337_v6  ;;  %v3339_v7 = vpop.xlane.xlu1 %3338 }
 0x219   :  { %3518 = vst.msk [vmem:[%s6002_s5 + $0x268] sm:$0xff] %vm3440_vm0, %v3339_v7 }
 0x21b   :  { %v3349_v8 = vpop.xlane.xlu0 %3348 }
 0x21c   :  { %3523 = vst.msk [vmem:[%s6002_s5 + $0x290] sm:$0xff] %vm3440_vm0, %v3349_v8  ;;  %v3351_v39 = vpop.xlane.xlu1 %3350 }
 0x21d   :  { %3524 = vst.msk [vmem:[%s6002_s5 + $0x298] sm:$0xff] %vm3440_vm0, %v3351_v39 }
 0x21f   :  { %v3345_v10 = vpop.xlane.xlu0 %3344 }
 0x220   :  { %3521 = vst.msk [vmem:[%s6002_s5 + $0x280] sm:$0xff] %vm3440_vm0, %v3345_v10  ;;  %v3347_v11 = vpop.xlane.xlu1 %3346 }
 0x221   :  { %3522 = vst.msk [vmem:[%s6002_s5 + $0x288] sm:$0xff] %vm3440_vm0, %v3347_v11 }
 0x223   :  { %v3357_v12 = vpop.xlane.xlu0 %3356 }
 0x224   :  { %3527 = vst.msk [vmem:[%s6002_s5 + $0x2b0] sm:$0xff] %vm3440_vm0, %v3357_v12  ;;  %v3359_v13 = vpop.xlane.xlu1 %3358 }
 0x225   :  { %3528 = vst.msk [vmem:[%s6002_s5 + $0x2b8] sm:$0xff] %vm3440_vm0, %v3359_v13 }
 0x227   :  { %v3353_v14 = vpop.xlane.xlu0 %3352 }
 0x228   :  { %3525 = vst.msk [vmem:[%s6002_s5 + $0x2a0] sm:$0xff] %vm3440_vm0, %v3353_v14  ;;  %v3355_v15 = vpop.xlane.xlu1 %3354 }
 0x229   :  { %3526 = vst.msk [vmem:[%s6002_s5 + $0x2a8] sm:$0xff] %vm3440_vm0, %v3355_v15 }
 0x22b   :  { %v3365_v16 = vpop.xlane.xlu0 %3364 }
 0x22c   :  { %3531 = vst.msk [vmem:[%s6002_s5 + $0x2d0] sm:$0xff] %vm3440_vm0, %v3365_v16  ;;  %v3367_v53 = vpop.xlane.xlu1 %3366 }
 0x22d   :  { %3532 = vst.msk [vmem:[%s6002_s5 + $0x2d8] sm:$0xff] %vm3440_vm0, %v3367_v53 }
 0x22f   :  { %v3361_v18 = vpop.xlane.xlu0 %3360 }
 0x230   :  { %3529 = vst.msk [vmem:[%s6002_s5 + $0x2c0] sm:$0xff] %vm3440_vm0, %v3361_v18  ;;  %v3363_v19 = vpop.xlane.xlu1 %3362 }
 0x231   :  { %3530 = vst.msk [vmem:[%s6002_s5 + $0x2c8] sm:$0xff] %vm3440_vm0, %v3363_v19 }
 0x233   :  { %v3373_v20 = vpop.xlane.xlu0 %3372 }
 0x234   :  { %3535 = vst.msk [vmem:[%s6002_s5 + $0x2f0] sm:$0xff] %vm3440_vm0, %v3373_v20  ;;  %v3375_v22 = vpop.xlane.xlu1 %3374 }
 0x235   :  { %3536 = vst.msk [vmem:[%s6002_s5 + $0x2f8] sm:$0xff] %vm3440_vm0, %v3375_v22 }
 0x237   :  { %v3369_v57 = vpop.xlane.xlu0 %3368 }
 0x238   :  { %3533 = vst.msk [vmem:[%s6002_s5 + $0x2e0] sm:$0xff] %vm3440_vm0, %v3369_v57  ;;  %v3371_v23 = vpop.xlane.xlu1 %3370 }
 0x239   :  { %3534 = vst.msk [vmem:[%s6002_s5 + $0x2e8] sm:$0xff] %vm3440_vm0, %v3371_v23 }
 0x23b   :  { %v3381_v59 = vpop.xlane.xlu0 %3380 }
 0x23c   :  { %3539 = vst.msk [vmem:[%s6002_s5 + $0x310] sm:$0xff] %vm3440_vm0, %v3381_v59  ;;  %v3383_v24 = vpop.xlane.xlu1 %3382 }
 0x23d   :  { %3540 = vst.msk [vmem:[%s6002_s5 + $0x318] sm:$0xff] %vm3440_vm0, %v3383_v24 }
 0x23f   :  { %v3377_v26 = vpop.xlane.xlu0 %3376 }
 0x240   :  { %3537 = vst.msk [vmem:[%s6002_s5 + $0x300] sm:$0xff] %vm3440_vm0, %v3377_v26  ;;  %v3379_v27 = vpop.xlane.xlu1 %3378 }
 0x241   :  { %3538 = vst.msk [vmem:[%s6002_s5 + $0x308] sm:$0xff] %vm3440_vm0, %v3379_v27 }
 0x243   :  { %v3389_v28 = vpop.xlane.xlu0 %3388 }
 0x244   :  { %3543 = vst.msk [vmem:[%s6002_s5 + $0x330] sm:$0xff] %vm3440_vm0, %v3389_v28  ;;  %v3391_v29 = vpop.xlane.xlu1 %3390 }
 0x245   :  { %3544 = vst.msk [vmem:[%s6002_s5 + $0x338] sm:$0xff] %vm3440_vm0, %v3391_v29 }
 0x247   :  { %v3385_v30 = vpop.xlane.xlu0 %3384 }
 0x248   :  { %3541 = vst.msk [vmem:[%s6002_s5 + $0x320] sm:$0xff] %vm3440_vm0, %v3385_v30  ;;  %v3387_v31 = vpop.xlane.xlu1 %3386 }
 0x249   :  { %3542 = vst.msk [vmem:[%s6002_s5 + $0x328] sm:$0xff] %vm3440_vm0, %v3387_v31 }
 0x24b   :  { %v3397_v55 = vpop.xlane.xlu0 %3396 }
 0x24c   :  { %3547 = vst.msk [vmem:[%s6002_s5 + $0x350] sm:$0xff] %vm3440_vm0, %v3397_v55  ;;  %v3399_v32 = vpop.xlane.xlu1 %3398 }
 0x24d   :  { %3548 = vst.msk [vmem:[%s6002_s5 + $0x358] sm:$0xff] %vm3440_vm0, %v3399_v32 }
 0x24f   :  { %v3393_v34 = vpop.xlane.xlu0 %3392 }
 0x250   :  { %3545 = vst.msk [vmem:[%s6002_s5 + $0x340] sm:$0xff] %vm3440_vm0, %v3393_v34  ;;  %v3395_v21 = vpop.xlane.xlu1 %3394 }
 0x251   :  { %3546 = vst.msk [vmem:[%s6002_s5 + $0x348] sm:$0xff] %vm3440_vm0, %v3395_v21 }
 0x253   :  { %v3405_v4 = vpop.xlane.xlu0 %3404 }
 0x254   :  { %3551 = vst.msk [vmem:[%s6002_s5 + $0x370] sm:$0xff] %vm3440_vm0, %v3405_v4  ;;  %v3407_v35 = vpop.xlane.xlu1 %3406 }
 0x255   :  { %3552 = vst.msk [vmem:[%s6002_s5 + $0x378] sm:$0xff] %vm3440_vm0, %v3407_v35 }
 0x257   :  { %v3401_v36 = vpop.xlane.xlu0 %3400 }
 0x258   :  { %3549 = vst.msk [vmem:[%s6002_s5 + $0x360] sm:$0xff] %vm3440_vm0, %v3401_v36  ;;  %v3403_v37 = vpop.xlane.xlu1 %3402 }
 0x259   :  { %3550 = vst.msk [vmem:[%s6002_s5 + $0x368] sm:$0xff] %vm3440_vm0, %v3403_v37 }
 0x25b   :  { %v3413_v38 = vpop.xlane.xlu0 %3412 }
 0x25c   :  { %3555 = vst.msk [vmem:[%s6002_s5 + $0x390] sm:$0xff] %vm3440_vm0, %v3413_v38  ;;  %v3415_v3 = vpop.xlane.xlu1 %3414 }
 0x25d   :  { %3556 = vst.msk [vmem:[%s6002_s5 + $0x398] sm:$0xff] %vm3440_vm0, %v3415_v3 }
 0x25f   :  { %v3409_v40 = vpop.xlane.xlu0 %3408 }
 0x260   :  { %3553 = vst.msk [vmem:[%s6002_s5 + $0x380] sm:$0xff] %vm3440_vm0, %v3409_v40  ;;  %v3411_v41 = vpop.xlane.xlu1 %3410 }
 0x261   :  { %3554 = vst.msk [vmem:[%s6002_s5 + $0x388] sm:$0xff] %vm3440_vm0, %v3411_v41 }
 0x263   :  { %v3421_v42 = vpop.xlane.xlu0 %3420 }
 0x264   :  { %3559 = vst.msk [vmem:[%s6002_s5 + $0x3b0] sm:$0xff] %vm3440_vm0, %v3421_v42  ;;  %v3423_v43 = vpop.xlane.xlu1 %3422 }
 0x265   :  { %3560 = vst.msk [vmem:[%s6002_s5 + $0x3b8] sm:$0xff] %vm3440_vm0, %v3423_v43 }
 0x267   :  { %v3417_v44 = vpop.xlane.xlu0 %3416 }
 0x268   :  { %3557 = vst.msk [vmem:[%s6002_s5 + $0x3a0] sm:$0xff] %vm3440_vm0, %v3417_v44  ;;  %v3419_v9 = vpop.xlane.xlu1 %3418 }
 0x269   :  { %3558 = vst.msk [vmem:[%s6002_s5 + $0x3a8] sm:$0xff] %vm3440_vm0, %v3419_v9 }
 0x26b   :  { %v3429_v45 = vpop.xlane.xlu0 %3428 }
 0x26c   :  { %3563 = vst.msk [vmem:[%s6002_s5 + $0x3d0] sm:$0xff] %vm3440_vm0, %v3429_v45  ;;  %v3431_v46 = vpop.xlane.xlu1 %3430 }
 0x26d   :  { %3564 = vst.msk [vmem:[%s6002_s5 + $0x3d8] sm:$0xff] %vm3440_vm0, %v3431_v46 }
 0x26f   :  { %v3425_v47 = vpop.xlane.xlu0 %3424 }
 0x270   :  { %3561 = vst.msk [vmem:[%s6002_s5 + $0x3c0] sm:$0xff] %vm3440_vm0, %v3425_v47  ;;  %v3427_v48 = vpop.xlane.xlu1 %3426 }
 0x271   :  { %3562 = vst.msk [vmem:[%s6002_s5 + $0x3c8] sm:$0xff] %vm3440_vm0, %v3427_v48 }
 0x273   :  { %v3433_v49 = vpop.xlane.xlu0 %3432 }
 0x274   :  { %3565 = vst.msk [vmem:[%s6002_s5 + $0x3e0] sm:$0xff] %vm3440_vm0, %v3433_v49 }
 0x276   :  { %v3435_v50 = vpop.xlane.xlu1 %3434 }
 0x277   :  { %v3437_v33 = vpop.xlane.xlu0 %3436  ;;  %3566 = vst.msk [vmem:[%s6002_s5 + $0x3e8] sm:$0xff] %vm3440_vm0, %v3435_v50 }
 0x278   :  { %3567 = vst.msk [vmem:[%s6002_s5 + $0x3f0] sm:$0xff] %vm3440_vm0, %v3437_v33 }
 0x27a   :  { %v3439_v51 = vpop.xlane.xlu1 %3438 }
 0x27b   :  { %3568 = vst.msk [vmem:[%s6002_s5 + $0x3f8] sm:$0xff] %vm3440_vm0, %v3439_v51 }

</bundles_post_ra>
